<compile_context>
chip_gen: v7x
topology: tpu7x:2x2x1
jax: 0.10.0
libtpu: 0.0.40
codegen_flags: <defaults>
</compile_context>

<pallas_src>
import jax
import jax.numpy as jnp
from jax.experimental import pallas as pl
from jax.experimental.pallas import tpu as pltpu

MID_SIZE = 16000
H1, H2, H3, H4, OUT = 1024, 128, 64, 16, 4

# K-tile for the first (only large) matmul.  Legal lane-aligned divisors of
# 16000 are 128/640/3200/16000; 3200 => 5 grid steps (low fixed overhead) while
# the double-buffered int8 W1 tile (3.3 MB) fits every generation's VMEM.
TK = 3200
N_K = MID_SIZE // TK

# Above v5e's 16 MiB scoped default (needed for large batches), well under
# v7x's 64 MiB physical VMEM minus compiler scratch.
VMEM_LIMIT_BYTES = 40 * 1024 * 1024


# ----------------------------------------------------------------------------
# Kernel
# ----------------------------------------------------------------------------
def _fused_mlp_kernel(x_ref, w1_ref, s1_ref, b1_ref, w2_ref, b2_ref, w3_ref,
                      b3_ref, w4_ref, b4_ref, w5_ref, b5_ref, out_ref, acc_ref):
    """K-tiled layer-1 matmul (int8/bf16 W1 -> bf16 MXU, f32 acc) + fused tail."""
    k = pl.program_id(0)

    @pl.when(k == 0)
    def _():
        acc_ref[...] = jnp.zeros_like(acc_ref)

    # Layer 1 partial matmul over this K tile (the hot, HBM-bound path).
    # W1 tile is int8 (or bf16 fallback); dequant cast to bf16 is VPU filler
    # hidden entirely under the W1 DMA.  Per-column scale applied in epilogue.
    acc_ref[...] += jnp.dot(x_ref[...].astype(jnp.bfloat16),
                            w1_ref[...].astype(jnp.bfloat16),
                            preferred_element_type=jnp.float32)

    @pl.when(k == pl.num_programs(0) - 1)
    def _():
        # Layer 1 epilogue: per-column dequant scale + bias + sigmoid.
        h1 = jax.nn.sigmoid(acc_ref[...] * s1_ref[...] + b1_ref[...])
        # Tiny tail layers: bf16 operands, f32 accumulation (all resident in VMEM).
        h2 = jnp.maximum(
            jnp.dot(h1.astype(jnp.bfloat16), w2_ref[...],
                    preferred_element_type=jnp.float32) + b2_ref[...], 0.0)
        h3 = jax.nn.sigmoid(
            jnp.dot(h2.astype(jnp.bfloat16), w3_ref[...],
                    preferred_element_type=jnp.float32) + b3_ref[...])
        h4 = jnp.maximum(
            jnp.dot(h3.astype(jnp.bfloat16), w4_ref[...],
                    preferred_element_type=jnp.float32) + b4_ref[...], 0.0)
        logits = (jnp.dot(h4.astype(jnp.bfloat16), w5_ref[...],
                          preferred_element_type=jnp.float32) + b5_ref[...])
        # Softmax over the 4 output classes; divide on the EUP slot.
        m = jnp.max(logits, axis=-1, keepdims=True)
        e = jnp.exp(logits - m)
        inv = pl.reciprocal(jnp.sum(e, axis=-1, keepdims=True), approx=True)
        out_ref[...] = (e * inv).astype(out_ref.dtype)


# ----------------------------------------------------------------------------
# Wrappers
# ----------------------------------------------------------------------------
@jax.jit
def _forward_jit(x, params):
    (w1, s1, b1, w2, b2, w3, b3, w4, b4, w5, b5) = params
    B = x.shape[0]
    full = lambda shape: pl.BlockSpec(shape, lambda k: (0, 0))
    return pl.pallas_call(
        _fused_mlp_kernel,
        out_shape=jax.ShapeDtypeStruct((B, OUT), jnp.float32),
        grid_spec=pltpu.PrefetchScalarGridSpec(
            num_scalar_prefetch=0,
            grid=(N_K,),
            in_specs=[
                pl.BlockSpec((B, TK), lambda k: (0, k)),   # x tile (f32)
                pl.BlockSpec((TK, H1), lambda k: (k, 0)),  # W1 tile (int8/bf16)
                full((1, H1)),                             # s1 (dequant scale)
                full((1, H1)),                             # b1
                full((H1, H2)), full((1, H2)),             # W2 (bf16), b2
                full((H2, H3)), full((1, H3)),             # W3 (bf16), b3
                full((H3, H4)), full((1, H4)),             # W4 (bf16), b4
                full((H4, OUT)), full((1, OUT)),           # W5 (bf16), b5
            ],
            out_specs=pl.BlockSpec((B, OUT), lambda k: (0, 0)),
            scratch_shapes=[pltpu.VMEM((B, H1), jnp.float32)],
        ),
        compiler_params=pltpu.CompilerParams(
            dimension_semantics=("arbitrary",),
            vmem_limit_bytes=VMEM_LIMIT_BYTES,
        ),
    )(x, w1, s1, b1, w2, b2, w3, b3, w4, b4, w5, b5)


def main_model_forward(x, params):
    """Forward pass.  `params` must come from prepare_params() (W1 int8 or bf16)."""
    w1 = params[0]
    if not (w1.dtype == jnp.int8 or w1.dtype == jnp.bfloat16):
        raise ValueError(
            "W1 must be pre-packed via prepare_params() (int8 weight-only quant "
            f"or bf16 fallback); got dtype {w1.dtype}. Casting it inside the "
            "forward would silently add ~100 MB of HBM traffic per call.")
    return _forward_jit(x, params)


def prepare_params(params_f32, quantize_w1=True):
    """One-time parameter prep (hoisted out of the jitted forward).

    - W1: int8 weight-only quantization with per-output-column f32 scale
      (default), or bf16 fallback with unit scale.
    - W2..W5: bf16 (off the DMA critical path; saves VMEM).
    - Biases: f32.
    """
    (w1, b1, w2, b2, w3, b3, w4, b4, w5, b5) = params_f32
    if quantize_w1:
        absmax = jnp.max(jnp.abs(w1), axis=0, keepdims=True)          # (1, H1)
        s1 = jnp.where(absmax > 0, absmax / 127.0, 1.0).astype(jnp.float32)
        w1_p = jnp.clip(jnp.round(w1 / s1), -127.0, 127.0).astype(jnp.int8)
    else:
        w1_p = w1.astype(jnp.bfloat16)
        s1 = jnp.ones((1, H1), jnp.float32)
    bf = lambda w: w.astype(jnp.bfloat16)
    return (w1_p, s1, b1, bf(w2), b2, bf(w3), b3, bf(w4), b4, bf(w5), b5)


def init_params(key):
    """Deterministic init (uniform, like torch's default Linear init), f32."""
    dims = [(MID_SIZE, H1), (H1, H2), (H2, H3), (H3, H4), (H4, OUT)]
    params = []
    for fan_in, fan_out in dims:
        kw, kb, key = jax.random.split(key, 3)
        bound = 1.0 / (fan_in ** 0.5)
        w = jax.random.uniform(kw, (fan_in, fan_out), jnp.float32, -bound, bound)
        b = jax.random.uniform(kb, (1, fan_out), jnp.float32, -bound, bound)
        params += [w, b]
    return tuple(params)


# ----------------------------------------------------------------------------
# References
# ----------------------------------------------------------------------------
def reference_forward_matched(x, params):
    """Pure-JAX reference with the kernel's exact numerics (quant W1 + bf16 tail)."""
    (w1_p, s1, b1, w2, b2, w3, b3, w4, b4, w5, b5) = params
    z1 = jnp.dot(x.astype(jnp.bfloat16), w1_p.astype(jnp.bfloat16),
                 preferred_element_type=jnp.float32) * s1 + b1
    h = jax.nn.sigmoid(z1)
    h = jnp.maximum(jnp.dot(h.astype(jnp.bfloat16), w2,
                            preferred_element_type=jnp.float32) + b2, 0.0)
    h = jax.nn.sigmoid(jnp.dot(h.astype(jnp.bfloat16), w3,
                               preferred_element_type=jnp.float32) + b3)
    h = jnp.maximum(jnp.dot(h.astype(jnp.bfloat16), w4,
                            preferred_element_type=jnp.float32) + b4, 0.0)
    logits = jnp.dot(h.astype(jnp.bfloat16), w5,
                     preferred_element_type=jnp.float32) + b5
    return jax.nn.softmax(logits, axis=-1)


def reference_forward_f32(x, params_f32):
    """Full-precision torch-equivalent forward (loose accuracy check)."""
    (w1, b1, w2, b2, w3, b3, w4, b4, w5, b5) = params_f32
    h = jax.nn.sigmoid(x @ w1 + b1)
    h = jnp.maximum(h @ w2 + b2, 0.0)
    h = jax.nn.sigmoid(h @ w3 + b3)
    h = jnp.maximum(h @ w4 + b4, 0.0)
    return jax.nn.softmax(h @ w5 + b5, axis=-1)


if __name__ == "__main__":
    key = jax.random.PRNGKey(0)
    kx, kp = jax.random.split(key)
    # Small demo batch (production should batch to 256-512 to amortize the
    # fixed W1 stream; the feature dim is fixed at 16000 by the module).
    B = 8
    x = jax.random.normal(kx, (B, MID_SIZE), jnp.float32)
    params_f32 = init_params(kp)

    # --- Default path: int8 weight-only quantized W1 ---
    params_q = prepare_params(params_f32, quantize_w1=True)
    out = jax.block_until_ready(main_model_forward(x, params_q))
    assert out.shape == (B, OUT)
    # Rows are probabilities.
    assert jnp.allclose(jnp.sum(out, axis=-1), 1.0, atol=2e-3)
    # Tight check vs a JAX reference using identical (quantized/bf16) numerics.
    ref_matched = reference_forward_matched(x, params_q)
    assert jnp.allclose(out, ref_matched, atol=3e-3, rtol=3e-3), \
        "mismatch vs numerics-matched reference"
    # Loose check vs the full-f32 torch-equivalent forward (documents the
    # bounded error of int8-W1 + bf16-tail as a product decision).
    ref_f32 = reference_forward_f32(x, params_f32)
    assert jnp.allclose(out, ref_f32, atol=1e-2, rtol=1e-2), \
        "mismatch vs f32 reference"

    # --- bf16 fallback path (same kernel, unit scale) ---
    params_bf16 = prepare_params(params_f32, quantize_w1=False)
    out_bf = jax.block_until_ready(main_model_forward(x, params_bf16))
    ref_bf = reference_forward_matched(x, params_bf16)
    assert jnp.allclose(out_bf, ref_bf, atol=3e-3, rtol=3e-3), \
        "mismatch vs bf16-matched reference"

    # Guard from the perf review: un-prepared f32 W1 must be rejected, not
    # silently recast inside the jitted forward.
    try:
        main_model_forward(x, (params_f32[0], jnp.ones((1, H1), jnp.float32),
                               *params_f32[1:]))
        raise AssertionError("expected ValueError for un-prepared f32 W1")
    except ValueError:
        pass

    print("KERNEL_OK")
</pallas_src>

<mosaic_0001>
module attributes {stable_mosaic.version = 11 : i64} {
  func.func @_fused_mlp_kernel(%arg0: i32, %arg1: memref<8x3200xf32, #tpu.memory_space<vmem>>, %arg2: memref<3200x1024xi8, #tpu.memory_space<vmem>>, %arg3: memref<1x1024xf32, #tpu.memory_space<vmem>>, %arg4: memref<1x1024xf32, #tpu.memory_space<vmem>>, %arg5: memref<1024x128xbf16, #tpu.memory_space<vmem>>, %arg6: memref<1x128xf32, #tpu.memory_space<vmem>>, %arg7: memref<128x64xbf16, #tpu.memory_space<vmem>>, %arg8: memref<1x64xf32, #tpu.memory_space<vmem>>, %arg9: memref<64x16xbf16, #tpu.memory_space<vmem>>, %arg10: memref<1x16xf32, #tpu.memory_space<vmem>>, %arg11: memref<16x4xbf16, #tpu.memory_space<vmem>>, %arg12: memref<1x4xf32, #tpu.memory_space<vmem>>, %arg13: memref<8x4xf32, #tpu.memory_space<vmem>>, %arg14: memref<8x1024xf32, #tpu.memory_space<vmem>>) attributes {dimension_semantics = [#tpu.dimension_semantics<arbitrary>], iteration_bounds = array<i64: 5>, scalar_prefetch = 0 : i64, scratch_operands = 1 : i64, tpu.core_type = #tpu.core_type<tc>, window_params = [{transform_indices = @transform_0, window_bounds = array<i64: 8, 3200>}, {transform_indices = @transform_1, window_bounds = array<i64: 3200, 1024>}, {pipeline_mode = #tpu.pipeline_mode<synchronous>, transform_indices = @transform_2, window_bounds = array<i64: 1, 1024>}, {pipeline_mode = #tpu.pipeline_mode<synchronous>, transform_indices = @transform_3, window_bounds = array<i64: 1, 1024>}, {pipeline_mode = #tpu.pipeline_mode<synchronous>, transform_indices = @transform_4, window_bounds = array<i64: 1024, 128>}, {pipeline_mode = #tpu.pipeline_mode<synchronous>, transform_indices = @transform_5, window_bounds = array<i64: 1, 128>}, {pipeline_mode = #tpu.pipeline_mode<synchronous>, transform_indices = @transform_6, window_bounds = array<i64: 128, 64>}, {pipeline_mode = #tpu.pipeline_mode<synchronous>, transform_indices = @transform_7, window_bounds = array<i64: 1, 64>}, {pipeline_mode = #tpu.pipeline_mode<synchronous>, transform_indices = @transform_8, window_bounds = array<i64: 64, 16>}, {pipeline_mode = #tpu.pipeline_mode<synchronous>, transform_indices = @transform_9, window_bounds = array<i64: 1, 16>}, {pipeline_mode = #tpu.pipeline_mode<synchronous>, transform_indices = @transform_10, window_bounds = array<i64: 16, 4>}, {pipeline_mode = #tpu.pipeline_mode<synchronous>, transform_indices = @transform_11, window_bounds = array<i64: 1, 4>}, {pipeline_mode = #tpu.pipeline_mode<synchronous>, transform_indices = @transform_12, window_bounds = array<i64: 8, 4>}]} {
    %c0_i32 = arith.constant 0 : i32
    %0 = arith.cmpi eq, %arg0, %c0_i32 : i32
    %1 = arith.extui %0 : i1 to i32
    %c0_i32_0 = arith.constant 0 : i32
    %2 = arith.cmpi ne, %1, %c0_i32_0 : i32
    scf.if %2 {
      %cst_9 = arith.constant 0.000000e+00 : f32
      %14 = vector.broadcast %cst_9 : f32 to vector<8x1024xf32>
      %c0_10 = arith.constant 0 : index
      %c0_11 = arith.constant 0 : index
      %15 = vector.load %arg14[%c0_10, %c0_11] : memref<8x1024xf32, #tpu.memory_space<vmem>>, vector<8x1024xf32>
      tpu.vector_store %arg14[%c0_10, %c0_11], %14 {strides = array<i32>} : memref<8x1024xf32, #tpu.memory_space<vmem>>, vector<8x1024xf32>,
    } else {
    }
    %c0 = arith.constant 0 : index
    %c0_1 = arith.constant 0 : index
    %3 = vector.load %arg14[%c0, %c0_1] : memref<8x1024xf32, #tpu.memory_space<vmem>>, vector<8x1024xf32>
    %c0_2 = arith.constant 0 : index
    %c0_3 = arith.constant 0 : index
    %4 = vector.load %arg1[%c0_2, %c0_3] : memref<8x3200xf32, #tpu.memory_space<vmem>>, vector<8x3200xf32>
    %5 = arith.truncf %4 : vector<8x3200xf32> to vector<8x3200xbf16>
    %c0_4 = arith.constant 0 : index
    %c0_5 = arith.constant 0 : index
    %6 = vector.load %arg2[%c0_4, %c0_5] : memref<3200x1024xi8, #tpu.memory_space<vmem>>, vector<3200x1024xi8>
    %7 = arith.sitofp %6 : vector<3200x1024xi8> to vector<3200x1024xbf16>
    %cst = arith.constant dense<0.000000e+00> : vector<8x1024xf32>
    %8 = tpu.matmul %5, %7, %cst {dimension_numbers = #tpu.dot_dimension_numbers<[1], [0], [0], [1], [0, 0, 1, 1], [], []>} : vector<8x3200xbf16>, vector<3200x1024xbf16>, vector<8x1024xf32> -> vector<8x1024xf32>
    %9 = arith.addf %3, %8 : vector<8x1024xf32>
    %c0_6 = arith.constant 0 : index
    %c0_7 = arith.constant 0 : index
    %10 = vector.load %arg14[%c0_6, %c0_7] : memref<8x1024xf32, #tpu.memory_space<vmem>>, vector<8x1024xf32>
    tpu.vector_store %arg14[%c0_6, %c0_7], %9 {strides = array<i32>} : memref<8x1024xf32, #tpu.memory_space<vmem>>, vector<8x1024xf32>,
    %c4_i32 = arith.constant 4 : i32
    %11 = arith.cmpi eq, %arg0, %c4_i32 : i32
    %12 = arith.extui %11 : i1 to i32
    %c0_i32_8 = arith.constant 0 : i32
    %13 = arith.cmpi ne, %12, %c0_i32_8 : i32
    scf.if %13 {
      %c0_9 = arith.constant 0 : index
      %c0_10 = arith.constant 0 : index
      %14 = vector.load %arg14[%c0_9, %c0_10] : memref<8x1024xf32, #tpu.memory_space<vmem>>, vector<8x1024xf32>
      %c0_11 = arith.constant 0 : index
      %c0_12 = arith.constant 0 : index
      %15 = vector.load %arg3[%c0_11, %c0_12] : memref<1x1024xf32, #tpu.memory_space<vmem>>, vector<1x1024xf32>
      %16 = vector.broadcast %15 : vector<1x1024xf32> to vector<8x1024xf32>
      %17 = arith.mulf %14, %16 : vector<8x1024xf32>
      %c0_13 = arith.constant 0 : index
      %c0_14 = arith.constant 0 : index
      %18 = vector.load %arg4[%c0_13, %c0_14] : memref<1x1024xf32, #tpu.memory_space<vmem>>, vector<1x1024xf32>
      %19 = vector.broadcast %18 : vector<1x1024xf32> to vector<8x1024xf32>
      %20 = arith.addf %17, %19 : vector<8x1024xf32>
      %21 = arith.negf %20 : vector<8x1024xf32>
      %22 = math.exp %21 : vector<8x1024xf32>
      %cst_15 = arith.constant 1.000000e+00 : f32
      %23 = vector.broadcast %cst_15 : f32 to vector<8x1024xf32>
      %24 = arith.addf %23, %22 : vector<8x1024xf32>
      %25 = arith.divf %23, %24 : vector<8x1024xf32>
      %26 = arith.truncf %25 : vector<8x1024xf32> to vector<8x1024xbf16>
      %c0_16 = arith.constant 0 : index
      %c0_17 = arith.constant 0 : index
      %27 = vector.load %arg5[%c0_16, %c0_17] : memref<1024x128xbf16, #tpu.memory_space<vmem>>, vector<1024x128xbf16>
      %cst_18 = arith.constant dense<0.000000e+00> : vector<8x128xf32>
      %28 = tpu.matmul %26, %27, %cst_18 {dimension_numbers = #tpu.dot_dimension_numbers<[1], [0], [0], [1], [0, 0, 1, 1], [], []>} : vector<8x1024xbf16>, vector<1024x128xbf16>, vector<8x128xf32> -> vector<8x128xf32>
      %c0_19 = arith.constant 0 : index
      %c0_20 = arith.constant 0 : index
      %29 = vector.load %arg6[%c0_19, %c0_20] : memref<1x128xf32, #tpu.memory_space<vmem>>, vector<1x128xf32>
      %30 = vector.broadcast %29 : vector<1x128xf32> to vector<8x128xf32>
      %31 = arith.addf %28, %30 : vector<8x128xf32>
      %cst_21 = arith.constant 0.000000e+00 : f32
      %32 = vector.broadcast %cst_21 : f32 to vector<8x128xf32>
      %33 = arith.maximumf %31, %32 : vector<8x128xf32>
      %34 = arith.truncf %33 : vector<8x128xf32> to vector<8x128xbf16>
      %c0_22 = arith.constant 0 : index
      %c0_23 = arith.constant 0 : index
      %35 = vector.load %arg7[%c0_22, %c0_23] : memref<128x64xbf16, #tpu.memory_space<vmem>>, vector<128x64xbf16>
      %cst_24 = arith.constant dense<0.000000e+00> : vector<8x64xf32>
      %36 = tpu.matmul %34, %35, %cst_24 {dimension_numbers = #tpu.dot_dimension_numbers<[1], [0], [0], [1], [0, 0, 1, 1], [], []>} : vector<8x128xbf16>, vector<128x64xbf16>, vector<8x64xf32> -> vector<8x64xf32>
      %c0_25 = arith.constant 0 : index
      %c0_26 = arith.constant 0 : index
      %37 = vector.load %arg8[%c0_25, %c0_26] : memref<1x64xf32, #tpu.memory_space<vmem>>, vector<1x64xf32>
      %38 = vector.broadcast %37 : vector<1x64xf32> to vector<8x64xf32>
      %39 = arith.addf %36, %38 : vector<8x64xf32>
      %40 = arith.negf %39 : vector<8x64xf32>
      %41 = math.exp %40 : vector<8x64xf32>
      %cst_27 = arith.constant 1.000000e+00 : f32
      %42 = vector.broadcast %cst_27 : f32 to vector<8x64xf32>
      %43 = arith.addf %42, %41 : vector<8x64xf32>
      %44 = arith.divf %42, %43 : vector<8x64xf32>
      %45 = arith.truncf %44 : vector<8x64xf32> to vector<8x64xbf16>
      %c0_28 = arith.constant 0 : index
      %c0_29 = arith.constant 0 : index
      %46 = vector.load %arg9[%c0_28, %c0_29] : memref<64x16xbf16, #tpu.memory_space<vmem>>, vector<64x16xbf16>
      %cst_30 = arith.constant dense<0.000000e+00> : vector<8x16xf32>
      %47 = tpu.matmul %45, %46, %cst_30 {dimension_numbers = #tpu.dot_dimension_numbers<[1], [0], [0], [1], [0, 0, 1, 1], [], []>} : vector<8x64xbf16>, vector<64x16xbf16>, vector<8x16xf32> -> vector<8x16xf32>
      %c0_31 = arith.constant 0 : index
      %c0_32 = arith.constant 0 : index
      %48 = vector.load %arg10[%c0_31, %c0_32] : memref<1x16xf32, #tpu.memory_space<vmem>>, vector<1x16xf32>
      %49 = vector.broadcast %48 : vector<1x16xf32> to vector<8x16xf32>
      %50 = arith.addf %47, %49 : vector<8x16xf32>
      %cst_33 = arith.constant 0.000000e+00 : f32
      %51 = vector.broadcast %cst_33 : f32 to vector<8x16xf32>
      %52 = arith.maximumf %50, %51 : vector<8x16xf32>
      %53 = arith.truncf %52 : vector<8x16xf32> to vector<8x16xbf16>
      %c0_34 = arith.constant 0 : index
      %c0_35 = arith.constant 0 : index
      %54 = vector.load %arg11[%c0_34, %c0_35] : memref<16x4xbf16, #tpu.memory_space<vmem>>, vector<16x4xbf16>
      %cst_36 = arith.constant dense<0.000000e+00> : vector<8x4xf32>
      %55 = tpu.matmul %53, %54, %cst_36 {dimension_numbers = #tpu.dot_dimension_numbers<[1], [0], [0], [1], [0, 0, 1, 1], [], []>} : vector<8x16xbf16>, vector<16x4xbf16>, vector<8x4xf32> -> vector<8x4xf32>
      %c0_37 = arith.constant 0 : index
      %c0_38 = arith.constant 0 : index
      %56 = vector.load %arg12[%c0_37, %c0_38] : memref<1x4xf32, #tpu.memory_space<vmem>>, vector<1x4xf32>
      %57 = vector.broadcast %56 : vector<1x4xf32> to vector<8x4xf32>
      %58 = arith.addf %55, %57 : vector<8x4xf32>
      %cst_39 = arith.constant dense<0xFF800000> : vector<8xf32>
      %59 = vector.multi_reduction <maximumf>, %58, %cst_39 [1] : vector<8x4xf32> to vector<8xf32>
      %60 = vector.shape_cast %59 : vector<8xf32> to vector<8x1xf32>
      %61 = vector.broadcast %60 : vector<8x1xf32> to vector<8x4xf32>
      %62 = arith.subf %58, %61 : vector<8x4xf32>
      %63 = math.exp %62 : vector<8x4xf32>
      %cst_40 = arith.constant dense<0.000000e+00> : vector<8xf32>
      %64 = vector.multi_reduction <add>, %63, %cst_40 [1] : vector<8x4xf32> to vector<8xf32>
      %65 = vector.shape_cast %64 : vector<8xf32> to vector<8x1xf32>
      %66 = tpu.reciprocal %65 {approx = true} : vector<8x1xf32> -> vector<8x1xf32>
      %67 = vector.broadcast %66 : vector<8x1xf32> to vector<8x4xf32>
      %68 = arith.mulf %63, %67 : vector<8x4xf32>
      %c0_41 = arith.constant 0 : index
      %c0_42 = arith.constant 0 : index
      %69 = vector.load %arg13[%c0_41, %c0_42] : memref<8x4xf32, #tpu.memory_space<vmem>>, vector<8x4xf32>
      tpu.vector_store %arg13[%c0_41, %c0_42], %68 {strides = array<i32>} : memref<8x4xf32, #tpu.memory_space<vmem>>, vector<8x4xf32>,
    } else {
    }
    return
  }
  func.func @transform_0(%arg0: i32) -> (i32, i32) {
    %c0_i32 = arith.constant 0 : i32
    %c0_i32_0 = arith.constant 0 : i32
    return %c0_i32, %arg0 : i32, i32
  }
  func.func @transform_1(%arg0: i32) -> (i32, i32) {
    %c0_i32 = arith.constant 0 : i32
    %c0_i32_0 = arith.constant 0 : i32
    return %arg0, %c0_i32 : i32, i32
  }
  func.func @transform_2(%arg0: i32) -> (i32, i32) {
    %c0_i32 = arith.constant 0 : i32
    %c0_i32_0 = arith.constant 0 : i32
    %c0_i32_1 = arith.constant 0 : i32
    return %c0_i32, %c0_i32_0 : i32, i32
  }
  func.func @transform_3(%arg0: i32) -> (i32, i32) {
    %c0_i32 = arith.constant 0 : i32
    %c0_i32_0 = arith.constant 0 : i32
    %c0_i32_1 = arith.constant 0 : i32
    return %c0_i32, %c0_i32_0 : i32, i32
  }
  func.func @transform_4(%arg0: i32) -> (i32, i32) {
    %c0_i32 = arith.constant 0 : i32
    %c0_i32_0 = arith.constant 0 : i32
    %c0_i32_1 = arith.constant 0 : i32
    return %c0_i32, %c0_i32_0 : i32, i32
  }
  func.func @transform_5(%arg0: i32) -> (i32, i32) {
    %c0_i32 = arith.constant 0 : i32
    %c0_i32_0 = arith.constant 0 : i32
    %c0_i32_1 = arith.constant 0 : i32
    return %c0_i32, %c0_i32_0 : i32, i32
  }
  func.func @transform_6(%arg0: i32) -> (i32, i32) {
    %c0_i32 = arith.constant 0 : i32
    %c0_i32_0 = arith.constant 0 : i32
    %c0_i32_1 = arith.constant 0 : i32
    return %c0_i32, %c0_i32_0 : i32, i32
  }
  func.func @transform_7(%arg0: i32) -> (i32, i32) {
    %c0_i32 = arith.constant 0 : i32
    %c0_i32_0 = arith.constant 0 : i32
    %c0_i32_1 = arith.constant 0 : i32
    return %c0_i32, %c0_i32_0 : i32, i32
  }
  func.func @transform_8(%arg0: i32) -> (i32, i32) {
    %c0_i32 = arith.constant 0 : i32
    %c0_i32_0 = arith.constant 0 : i32
    %c0_i32_1 = arith.constant 0 : i32
    return %c0_i32, %c0_i32_0 : i32, i32
  }
  func.func @transform_9(%arg0: i32) -> (i32, i32) {
    %c0_i32 = arith.constant 0 : i32
    %c0_i32_0 = arith.constant 0 : i32
    %c0_i32_1 = arith.constant 0 : i32
    return %c0_i32, %c0_i32_0 : i32, i32
  }
  func.func @transform_10(%arg0: i32) -> (i32, i32) {
    %c0_i32 = arith.constant 0 : i32
    %c0_i32_0 = arith.constant 0 : i32
    %c0_i32_1 = arith.constant 0 : i32
    return %c0_i32, %c0_i32_0 : i32, i32
  }
  func.func @transform_11(%arg0: i32) -> (i32, i32) {
    %c0_i32 = arith.constant 0 : i32
    %c0_i32_0 = arith.constant 0 : i32
    %c0_i32_1 = arith.constant 0 : i32
    return %c0_i32, %c0_i32_0 : i32, i32
  }
  func.func @transform_12(%arg0: i32) -> (i32, i32) {
    %c0_i32 = arith.constant 0 : i32
    %c0_i32_0 = arith.constant 0 : i32
    %c0_i32_1 = arith.constant 0 : i32
    return %c0_i32, %c0_i32_0 : i32, i32
  }
}

</mosaic_0001>

<bundles_post_ra>
// kernel: _forward_jit.1
= control target key start
LH: loop header
LB: loop body
LE: loop exit
PB: predicated region body
PF: predicated region fallthrough
CT: control target
= control target key end

     0   :  { %s8892_s0 = inlined_call_operand.hbm [shape: f32[8,16000], index: 0, kind: input, shape index: {}]   ;;  %s8893_s1 = inlined_call_operand.hbm [shape: s8[16000,1024], index: 1, kind: input, shape index: {}]   ;;  %s8894_s2 = inlined_call_operand.hbm [shape: f32[1,1024], index: 2, kind: input, shape index: {}]   ;;  %s8895_s3 = inlined_call_operand.hbm [shape: f32[1,1024], index: 3, kind: input, shape index: {}]   ;;  %s8896_s4 = inlined_call_operand.hbm [shape: bf16[1024,128], index: 4, kind: input, shape index: {}]   ;;  %s8897_s5 = inlined_call_operand.hbm [shape: f32[1,128], index: 5, kind: input, shape index: {}]   ;;  %s8898_s6 = inlined_call_operand.vmem [shape: bf16[128,64], index: 6, kind: input, shape index: {}]   ;;  %s8899_s7 = inlined_call_operand.hbm [shape: f32[1,64], index: 7, kind: input, shape index: {}]   ;;  %s8900_s8 = inlined_call_operand.vmem [shape: bf16[64,16], index: 8, kind: input, shape index: {}]   ;;  %s8901_s9 = inlined_call_operand.hbm [shape: f32[1,16], index: 9, kind: input, shape index: {}]   ;;  %s8902_s10 = inlined_call_operand.vmem [shape: bf16[16,4], index: 10, kind: input, shape index: {}]   ;;  %s8903_s11 = inlined_call_operand.hbm [shape: f32[1,4], index: 11, kind: input, shape index: {}]   ;;  %s8904_s12 = inlined_call_operand.vmem [shape: f32[8,4], index: 12, kind: output, shape index: {}]  }
   0x1   :  { %8908 = sst [smem:[#allocation23_spill]] %s8894_s2 }
   0x2   :  { %8909 = sst [smem:[#allocation24_spill]] %s8895_s3 }
   0x3   :  { %8910 = sst [smem:[#allocation25_spill]] %s8897_s5 }
   0x4   :  { %8911 = sst [smem:[#allocation26_spill]] %s8900_s8 }
   0x5   :  { %8912 = sst [smem:[#allocation27_spill]] %s8902_s10 }
   0x6   :  { %8913 = sst [smem:[#allocation28_spill]] %s8904_s12 }
   0x7   :  { %17 = vsyncpa [#allocation4], 0 }
   0x8   :  { %19 = vsyncpa [#allocation4 + $0x1], 0 }
   0x9   :  { %20 = vsyncpa [#allocation6], 0 }
   0xa   :  { %22 = vsyncpa [#allocation6 + $0x1], 0 }
   0xb   :  { %23 = vsyncpa [#allocation9], 0 }
   0xc   :  { %24 = vsyncpa [#allocation12], 0 }
   0xd   :  { %25 = vsyncpa [#allocation15], 0  ;;  %s7319_s21 = smov 0   ;;  %s7321_s22 = smov 0  }
   0xe   :  { %s7323_s23 = smov 0   ;;  %s7325_s24 = smov 0  }
   0xf LB: > { %s7238_s25 = smov [#allocation7]   ;;  %s7340_s27 = sadd.s32 4294967295, %s7236_s24   ;;  %s7236_s24 = sphi %s7325_s24, %s8939_s24   ;;  %s7232_s23 = sphi %s7323_s23, %s8938_s23   ;;  %s7228_s22 = sphi %s7321_s22, %s8937_s22   ;;  %s7224_s21 = sphi %s7319_s21, %s8936_s21  }
  0x10   : > { %s332_s26 = sshll.u32 %s7238_s25, 4  ;;  %p6421_p0 = scmp.ge.s32.totalorder %s7236_s24, 1  ;;  %s7346_s26 = int_to_ptr.vmem [resolvable:$true] %s332_s26 }
  0x11   : > { %p8906_p1 = scmp.eq.s32.totalorder %s7340_s27, 0  ;;  %p319_p2 = scmp.lt.s32.totalorder %s7236_s24, 6 }
  0x12   : > { %s7239_s29 = smov [#allocation8]   ;;  %s7240_s13 = smov [#allocation11]  }
  0x13   : > { %p7348_p4 = pnand %p6421_p0, %p319_p2  ;;  %s343_s30 = sshll.u32 %s7239_s29, 4  ;;  %s7354_s30 = int_to_ptr.vmem [resolvable:$true] %s343_s30 }
  0x14   : > { %s367_s14 = sshll.u32 %s7240_s13, 4  ;;  %s7241_s16 = smov [#allocation14]   ;;  %s7362_s14 = int_to_ptr.vmem [resolvable:$true] %s367_s14 }
  0x15   : > { %s8914_s28 = scalar_select %p7348_p4, 1, 0 }
  0x16   : > { %p6719_p5 = pneg %p7348_p4  ;;  %s7364_s17 = sshll.u32 %s7241_s16, 4  ;;  %s396_s17 = int_to_ptr.vmem [resolvable:$true] %s7364_s17 }
  0x17   : > { %s8916_s2 = sld [smem:[#allocation23_spill]] }
  0x18   : > { %p7358_p6 = pnand %p6719_p5, %p8906_p1 }
  0x1a   : > { %p7374_p8 = pneg %p7358_p6 }
  0x1d   : > { %s6926_s20 = scalar_lea.hbm %s8916_s2, 128 }
  0x1e   : > { %p6927_p7 = scmp.ne.s32.totalorder %s8916_s2, %s6926_s20  ;;  %p6933_p11 = scmp.lt.u32.totalorder %s6926_s20, %s8916_s2 }
  0x20   : > { %p6929_p9 = pnand %p7374_p8, %p6927_p7 }
  0x22   : > { %p6930_p10 = pneg %p6929_p9 }
  0x24   : > { %p6935_p12 = pnand %p6933_p11, %p6930_p10 }
  0x26   : > { %6938 = shalt.err (!%p6935_p12)
}
  0x27   : > { %s6939_s18 = scalar_lea.vmem %s7346_s26, 128  ;;  %p6947_p5 = scmp.lt.s32.totalorder %s7346_s26, %s7346_s26 }
  0x28   : > { %p6940_p13 = scmp.ne.s32.totalorder %s7346_s26, %s6939_s18  ;;  %p6948_p3 = scmp.lt.s32.totalorder %s6939_s18, %s6939_s18 }
  0x2a   : > { %p6942_p0 = pnand %p6940_p13, %p7374_p8  ;;  %p6949_p7 = por %p6948_p3, %p6947_p5 }
  0x2c   : > { %p6943_p2 = pneg %p6942_p0 }
  0x2e   : > { %p6950_p9 = pnand %p6949_p7, %p6943_p2 }
  0x30   : > { %6953 = shalt.err (!%p6950_p9)
}
  0x31   : > { %6722 = dma.hbm_to_vmem [thread:$0]  (!%p7358_p6), %s8916_s2, 128, %s7346_s26, [#allocation6]  }
  0x32   : > { %s8918_s3 = sld [smem:[#allocation24_spill]] }
  0x38   : > { %s6954_s29 = scalar_lea.hbm %s8918_s3, 128 }
  0x39   : > { %p6955_p10 = scmp.ne.s32.totalorder %s8918_s3, %s6954_s29  ;;  %p6961_p12 = scmp.lt.u32.totalorder %s6954_s29, %s8918_s3 }
  0x3b   : > { %p6957_p3 = pnand %p6955_p10, %p7374_p8 }
  0x3d   : > { %p6958_p11 = pneg %p6957_p3 }
  0x3f   : > { %p6963_p13 = pnand %p6961_p12, %p6958_p11 }
  0x41   : > { %6966 = shalt.err (!%p6963_p13)
}
  0x42   : > { %s6967_s26 = scalar_lea.vmem %s7354_s30, 128  ;;  %p6975_p7 = scmp.lt.s32.totalorder %s7354_s30, %s7354_s30 }
  0x43   : > { %p6968_p0 = scmp.ne.s32.totalorder %s7354_s30, %s6967_s26  ;;  %p6976_p9 = scmp.lt.s32.totalorder %s6967_s26, %s6967_s26 }
  0x45   : > { %p6970_p2 = pnand %p6968_p0, %p7374_p8  ;;  %p6977_p10 = por %p6976_p9, %p6975_p7 }
  0x47   : > { %p6971_p5 = pneg %p6970_p2 }
  0x49   : > { %p6978_p3 = pnand %p6977_p10, %p6971_p5 }
  0x4b   : > { %6981 = shalt.err (!%p6978_p3)
}
  0x4c   : > { %6725 = dma.hbm_to_vmem [thread:$0]  (!%p7358_p6), %s8918_s3, 128, %s7354_s30, [#allocation9]  }
  0x4d   : > { %s8919_s5 = sld [smem:[#allocation25_spill]] }
  0x53   : > { %s6982_s20 = scalar_lea.hbm %s8919_s5, 16 }
  0x54   : > { %p6983_p11 = scmp.ne.s32.totalorder %s8919_s5, %s6982_s20  ;;  %p6989_p0 = scmp.lt.u32.totalorder %s6982_s20, %s8919_s5 }
  0x56   : > { %p6985_p12 = pnand %p6983_p11, %p7374_p8 }
  0x58   : > { %p6986_p13 = pneg %p6985_p12 }
  0x5a   : > { %p6991_p2 = pnand %p6989_p0, %p6986_p13 }
  0x5c   : > { %6994 = shalt.err (!%p6991_p2)
}
  0x5d   : > { %s6995_s30 = scalar_lea.vmem %s7362_s14, 16  ;;  %s7002_s26 = scalar_lea.vmem %s7362_s14, 32 }
  0x5e   : > { %p6996_p5 = scmp.ne.s32.totalorder %s7362_s14, %s6995_s30  ;;  %p7003_p10 = scmp.lt.s32.totalorder %s7362_s14, %s7362_s14 }
  0x5f   : > { %p7004_p3 = scmp.lt.s32.totalorder %s7002_s26, %s6995_s30 }
  0x60   : > { %p6998_p7 = pnand %p6996_p5, %p7374_p8 }
  0x61   : > { %p7005_p11 = por %p7004_p3, %p7003_p10 }
  0x62   : > { %p6999_p9 = pneg %p6998_p7 }
  0x64   : > { %p7006_p12 = pnand %p7005_p11, %p6999_p9 }
  0x66   : > { %7009 = shalt.err (!%p7006_p12)
}
  0x67   : > { %6731 = dma.hbm_to_vmem [thread:$0]  (!%p7358_p6), %s8919_s5, 16, %s7362_s14, [#allocation12]  }
  0x68   : > { %s7242_s12 = smov [#allocation10]   ;;  %s7010_s29 = scalar_lea.hbm %s8901_s9, 16 }
  0x69   : > { %s353_s19 = sshll.u32 %s7242_s12, 4  ;;  %p7011_p13 = scmp.ne.s32.totalorder %s8901_s9, %s7010_s29  ;;  %s354_s19 = int_to_ptr.vmem [resolvable:$true] %s353_s19 }
  0x6a   : > { %p7017_p5 = scmp.lt.u32.totalorder %s7010_s29, %s8901_s9 }
  0x6b   : > { %p7013_p0 = pnand %p7011_p13, %p7374_p8 }
  0x6d   : > { %p7014_p2 = pneg %p7013_p0 }
  0x6f   : > { %p7019_p7 = pnand %p7017_p5, %p7014_p2 }
  0x71   : > { %7022 = shalt.err (!%p7019_p7)
}
  0x72   : > { %s7023_s14 = scalar_lea.vmem %s396_s17, 16  ;;  %s7030_s8 = scalar_lea.vmem %s396_s17, 32 }
  0x73   : > { %p7024_p9 = scmp.ne.s32.totalorder %s396_s17, %s7023_s14  ;;  %p7031_p11 = scmp.lt.s32.totalorder %s396_s17, %s396_s17 }
  0x74   : > { %p7032_p12 = scmp.lt.s32.totalorder %s7030_s8, %s7023_s14 }
  0x75   : > { %p7026_p10 = pnand %p7024_p9, %p7374_p8 }
  0x76   : > { %p7033_p1 = por %p7032_p12, %p7031_p11 }
  0x77   : > { %p7027_p3 = pneg %p7026_p10 }
  0x79   : > { %p7034_p4 = pnand %p7033_p1, %p7027_p3 }
  0x7b   : > { %7037 = shalt.err (!%p7034_p4)
}
  0x7c   : > { %6737 = dma.hbm_to_vmem [thread:$0]  (!%p7358_p6), %s8901_s9, 16, %s396_s17, [#allocation15]  }
  0x7d   : > { %s7038_s29 = scalar_lea.hbm %s8896_s4, 8192 }
  0x7e   : > { %p7039_p13 = scmp.ne.s32.totalorder %s8896_s4, %s7038_s29  ;;  %p7045_p4 = scmp.lt.u32.totalorder %s7038_s29, %s8896_s4 }
  0x80   : > { %p7041_p0 = pnand %p7039_p13, %p7374_p8 }
  0x82   : > { %p7042_p1 = pneg %p7041_p0 }
  0x84   : > { %p7047_p2 = pnand %p7045_p4, %p7042_p1 }
  0x86   : > { %7050 = shalt.err (!%p7047_p2)
}
  0x87   : > { %s7051_s14 = scalar_lea.vmem %s354_s19, 8192  ;;  %p7059_p10 = scmp.lt.s32.totalorder %s354_s19, %s354_s19 }
  0x88   : > { %p7052_p5 = scmp.ne.s32.totalorder %s354_s19, %s7051_s14  ;;  %p7060_p3 = scmp.lt.s32.totalorder %s7051_s14, %s7051_s14 }
  0x8a   : > { %p7054_p7 = pnand %p7052_p5, %p7374_p8  ;;  %p7061_p11 = por %p7060_p3, %p7059_p10 }
  0x8c   : > { %p7055_p9 = pneg %p7054_p7 }
  0x8e   : > { %p7062_p12 = pnand %p7061_p11, %p7055_p9 }
  0x90   : > { %7065 = shalt.err (!%p7062_p12)
}
  0x91   : > { %s7243_s17 = smov 64   ;;  %s7244_s8 = smov 4  }
  0x92   : > { %6728 = dma.hbm_to_vmem [thread:$0]  (!%p7358_p6), %s8896_s4, 8192, %s354_s19, [#allocation9], %s7243_s17, %s7243_s17, %s7244_s8  }
  0x93   : > { %s7245_s20 = smov [#allocation13]   ;;  %s7246_s29 = smov [#allocation16]  }
  0x94   : > { %s381_s25 = sshll.u32 %s7245_s20, 4  ;;  %s409_s16 = sshll.u32 %s7246_s29, 4  ;;  %s382_s25 = int_to_ptr.vmem [resolvable:$true] %s381_s25  ;;  %s410_s16 = int_to_ptr.vmem [resolvable:$true] %s409_s16 }
  0x95   : > { %s7066_s26 = scalar_lea.hbm %s8899_s7, 16 }
  0x96   : > { %p7067_p13 = scmp.ne.s32.totalorder %s8899_s7, %s7066_s26  ;;  %p7073_p4 = scmp.lt.u32.totalorder %s7066_s26, %s8899_s7 }
  0x98   : > { %p7069_p0 = pnand %p7067_p13, %p7374_p8 }
  0x9a   : > { %p7070_p1 = pneg %p7069_p0 }
  0x9c   : > { %p7075_p2 = pnand %p7073_p4, %p7070_p1 }
  0x9e   : > { %7078 = shalt.err (!%p7075_p2)
}
  0x9f   : > { %s7079_s19 = scalar_lea.vmem %s382_s25, 16  ;;  %s7086_s8 = scalar_lea.vmem %s382_s25, 32 }
  0xa0   : > { %p7080_p5 = scmp.ne.s32.totalorder %s382_s25, %s7079_s19  ;;  %p7087_p10 = scmp.lt.s32.totalorder %s382_s25, %s382_s25 }
  0xa1   : > { %p7088_p3 = scmp.lt.s32.totalorder %s7086_s8, %s7079_s19 }
  0xa2   : > { %p7082_p7 = pnand %p7080_p5, %p7374_p8 }
  0xa3   : > { %p7089_p11 = por %p7088_p3, %p7087_p10 }
  0xa4   : > { %p7083_p9 = pneg %p7082_p7 }
  0xa6   : > { %p7090_p12 = pnand %p7089_p11, %p7083_p9 }
  0xa8   : > { %7093 = shalt.err (!%p7090_p12)
}
  0xa9   : > { %6734 = dma.hbm_to_vmem [thread:$0]  (!%p7358_p6), %s8899_s7, 16, %s382_s25, [#allocation12]  }
  0xaa   : > { %s7094_s12 = scalar_lea.hbm %s8903_s11, 16 }
  0xab   : > { %p7095_p13 = scmp.ne.s32.totalorder %s8903_s11, %s7094_s12  ;;  %p7101_p4 = scmp.lt.u32.totalorder %s7094_s12, %s8903_s11 }
  0xad   : > { %p7097_p0 = pnand %p7095_p13, %p7374_p8 }
  0xaf   : > { %p7098_p1 = pneg %p7097_p0 }
  0xb1   : > { %p7103_p2 = pnand %p7101_p4, %p7098_p1 }
  0xb3   : > { %7106 = shalt.err (!%p7103_p2)
}
  0xb4   : > { %s7107_s26 = scalar_lea.vmem %s410_s16, 16  ;;  %s7114_s25 = scalar_lea.vmem %s410_s16, 32 }
  0xb5   : > { %p7108_p5 = scmp.ne.s32.totalorder %s410_s16, %s7107_s26  ;;  %p7115_p10 = scmp.lt.s32.totalorder %s410_s16, %s410_s16 }
  0xb6   : > { %p7116_p3 = scmp.lt.s32.totalorder %s7114_s25, %s7107_s26 }
  0xb7   : > { %p7110_p7 = pnand %p7108_p5, %p7374_p8 }
  0xb8   : > { %p7117_p11 = por %p7116_p3, %p7115_p10 }
  0xb9   : > { %p7111_p9 = pneg %p7110_p7 }
  0xbb   : > { %p7118_p12 = pnand %p7117_p11, %p7111_p9 }
  0xbd   : > { %7121 = shalt.err (!%p7118_p12)
}
  0xbe   : > { %6740 = dma.hbm_to_vmem [thread:$0]  (!%p7358_p6), %s8903_s11, 16, %s410_s16, [#allocation15]  }
  0xbf   : > { %s7518_s13 = sadd.s32 1, %s7236_s24   ;;  %s38_s8 = sadd.s32 1, %s7232_s23 }
  0xc0   : > { %s35_s15 = ssub.s32 %s7236_s24, %s7518_s13  ;;  %p45_p13 = scmp.ne.s32.totalorder %s7232_s23, %s7228_s22 }
  0xc1   : > { %p36_p8 = scmp.eq.s32.totalorder %s35_s15, 0  ;;  %p46_p0 = scmp.eq.s32.totalorder %s7236_s24, 0 }
  0xc2   : > { %p51_p1 = scmp.ne.s32.totalorder %s7228_s22, %s7224_s21  ;;  %p8920_p2 = scmp.eq.s32.totalorder %s7340_s27, 0 }
  0xc3   : > { %s7529_s2 = scalar_select %p36_p8, %s7232_s23, %s38_s8  }
  0xc4   : > { %p47_p4 = por %p46_p0, %p45_p13  ;;  %p7533_p5 = por %p8920_p2, %p51_p1 }
  0xc5   : > { %p6755_p7 = scmp.lt.s32.totalorder %s7236_s24, 5  ;;  %s7539_s3 = sand.u32 1, %s7232_s23  }
  0xc6   : > { %s6683_s16 = smul.u32 200, %s7539_s3  ;;  %s421_s25 = scalar_lea.sflag [#allocation4], %s7539_s3 }
  0xc7   : > { %s6537_s5 = smul.u32 3200, %s7236_s24  ;;  %p7543_p6 = pnand %p6755_p7, %p47_p4 }
  0xc8   : > { %s6684_s21 = smul.u32 6400, %s7539_s3  ;;  %s424_s30 = scalar_lea.vmem [#allocation3], %s6683_s16 }
  0xc9   : > { %s7551_s18 = scalar_lea.hbm %s8892_s0, %s6537_s5  ;;  %s432_s26 = sshll.u32 %s424_s30, 4  ;;  %s7553_s26 = int_to_ptr.vmem [resolvable:$true] %s432_s26 }
  0xca   : > { %s7122_s14 = scalar_lea.hbm %s7551_s18, 3200  ;;  %p7124_p10 = pneg %p7543_p6 }
  0xcb   : > { %p7123_p9 = scmp.ne.s32.totalorder %s7551_s18, %s7122_s14  ;;  %s7127_s8 = scalar_lea.hbm %s8892_s0, 16000 }
  0xcc   : > { %p7128_p12 = scmp.lt.u32.totalorder %s7551_s18, %s8892_s0  ;;  %p7129_p8 = scmp.lt.u32.totalorder %s7127_s8, %s7122_s14 }
  0xcd   : > { %p7125_p3 = pnand %p7124_p10, %p7123_p9  ;;  %p7131_p0 = scmp.lt.u32.totalorder %s7122_s14, %s7551_s18 }
  0xce   : > { %p7130_p13 = por %p7129_p8, %p7128_p12 }
  0xcf   : > { %p7126_p11 = pneg %p7125_p3 }
  0xd0   : > { %p7132_p1 = por %p7131_p0, %p7130_p13 }
  0xd2   : > { %p7133_p4 = pnand %p7132_p1, %p7126_p11 }
  0xd4   : > { %7136 = shalt.err (!%p7133_p4)
}
  0xd5   : > { %s7137_s16 = scalar_lea.vmem %s7553_s26, 3200  ;;  %s7247_s29 = smov [#allocation3]  }
  0xd6   : > { %p7138_p2 = scmp.ne.s32.totalorder %s7553_s26, %s7137_s16  ;;  %s7142_s30 = sshll.u32 %s7247_s29, 4  ;;  %s7143_s30 = int_to_ptr.vmem [resolvable:$false] %s7142_s30 }
  0xd7   : > { %s7144_s19 = scalar_lea.vmem %s7143_s30, 6400  ;;  %p7145_p3 = scmp.lt.s32.totalorder %s7553_s26, %s7143_s30 }
  0xd8   : > { %p7140_p7 = pnand %p7138_p2, %p7124_p10  ;;  %p7146_p12 = scmp.lt.s32.totalorder %s7144_s19, %s7137_s16 }
  0xda   : > { %p7141_p9 = pneg %p7140_p7  ;;  %p7147_p8 = por %p7146_p12, %p7145_p3 }
  0xdc   : > { %p7148_p13 = pnand %p7147_p8, %p7141_p9 }
  0xde   : > { %7151 = shalt.err (!%p7148_p13)
}
  0xdf   : > { %6744 = dma.hbm_to_vmem [thread:$0]  (!%p7543_p6), %s7551_s18, 3200, %s7553_s26, %s421_s25  }
  0xe0   : > { %s439_s14 = sand.u32 1, %s7236_s24   ;;  %s443_s15 = scalar_lea.vmem [#allocation5], %s6684_s21 }
  0xe1   : > { %s451_s8 = sshll.u32 %s443_s15, 4  ;;  %s6540_s5 = smul.u32 102400, %s7236_s24  ;;  %s7584_s8 = int_to_ptr.vmem [resolvable:$true] %s451_s8 }
  0xe2   : > { %s7592_s30 = scalar_lea.sflag [#allocation6], %s439_s14  ;;  %s7157_s24 = scalar_lea.hbm %s8893_s1, 512000 }
  0xe3   : > { %s7590_s29 = scalar_lea.hbm %s8893_s1, %s6540_s5 }
  0xe4   : > { %s7152_s19 = scalar_lea.hbm %s7590_s29, 102400  ;;  %p7158_p4 = scmp.lt.u32.totalorder %s7590_s29, %s8893_s1 }
  0xe5   : > { %p7153_p11 = scmp.ne.s32.totalorder %s7590_s29, %s7152_s19  ;;  %p7159_p2 = scmp.lt.u32.totalorder %s7157_s24, %s7152_s19 }
  0xe6   : > { %p7161_p9 = scmp.lt.u32.totalorder %s7152_s19, %s7590_s29 }
  0xe7   : > { %p7155_p0 = pnand %p7153_p11, %p7124_p10  ;;  %p7160_p7 = por %p7159_p2, %p7158_p4 }
  0xe9   : > { %p7156_p1 = pneg %p7155_p0  ;;  %p7162_p3 = por %p7161_p9, %p7160_p7 }
  0xeb   : > { %p7163_p12 = pnand %p7162_p3, %p7156_p1 }
  0xed   : > { %7166 = shalt.err (!%p7163_p12)
}
  0xee   : > { %s7167_s25 = scalar_lea.vmem %s7584_s8, 102400  ;;  %s7248_s14 = smov [#allocation5]  }
  0xef   : > { %p7168_p8 = scmp.ne.s32.totalorder %s7584_s8, %s7167_s25  ;;  %s7172_s15 = sshll.u32 %s7248_s14, 4  ;;  %s7173_s15 = int_to_ptr.vmem [resolvable:$false] %s7172_s15 }
  0xf0   : > { %s7174_s5 = scalar_lea.vmem %s7173_s15, 204800  ;;  %p7175_p0 = scmp.lt.s32.totalorder %s7584_s8, %s7173_s15 }
  0xf1   : > { %p7170_p13 = pnand %p7168_p8, %p7124_p10  ;;  %p7176_p4 = scmp.lt.s32.totalorder %s7174_s5, %s7167_s25 }
  0xf3   : > { %p7171_p11 = pneg %p7170_p13  ;;  %p7177_p2 = por %p7176_p4, %p7175_p0 }
  0xf5   : > { %p7178_p7 = pnand %p7177_p2, %p7171_p11 }
  0xf7   : > { %7181 = shalt.err (!%p7178_p7)
}
  0xf8   : > { %s7249_s20 = smov 1024   ;;  %p8923_p10 = scmp.ne.s32.totalorder %s8914_s28, 0 }
  0xf9   : > { %6747 = dma.hbm_to_vmem [thread:$0]  (!%p7543_p6), %s7590_s29, 102400, %s7584_s8, %s7592_s30, %s7249_s20, %s7249_s20, %s7243_s17  }
  0xfa   : > { %463 = sbr.rel (%p8923_p10) target bundleno = 3380 (0xd34), region = 68  ;;  %s465_s16 = sand.u32 (!%p8923_p10), 1, %s7228_s22  }
  0xfb   : > { %s6685_s19 = smul.u32 (!%p8923_p10), 200, %s465_s16  ;;  %s466_s3 = scalar_lea.sflag (!%p8923_p10), [#allocation4], %s465_s16 }
  0xfd   : > { %s7622_s21 = scalar_lea.vmem (!%p8923_p10), [#allocation3], %s6685_s19 }
 0x101   : > { %7199 = dma.done.wait (%p7533_p5), %s466_s3, 3200  }
 0x102   : > { %7201 = vsyncadd (%p7533_p5), %s466_s3, 4294964096  ;;  %s474_s12 = sand.u32 1, %s7340_s27   ;;  %s6686_s24 = smul.u32 6400, %s465_s16 }
 0x103   : > { %s475_s17 = scalar_lea.sflag [#allocation6], %s474_s12 }
 0x104   : > { %s7629_s8 = scalar_lea.vmem [#allocation5], %s6686_s24 }
 0x105   : > { %7203 = dma.done.wait (%p7533_p5), %s475_s17, 102400  }
 0x106   : > { %7205 = vsyncadd (%p7533_p5), %s475_s17, 4294864896  ;;  %p8924_p6 = scmp.eq.s32.totalorder %s7340_s27, 0 }
 0x108   : > { %7207 = dma.done.wait (%p8924_p6), [#allocation6], 128   ;;  %p8925_p1 = pmov %p8924_p6 }
 0x10a   : > { %7209 = vsyncadd (%p8925_p1), [#allocation6], 4294967168  ;;  %p8926_p9 = pmov %p8925_p1 }
 0x10b   : > { %p8927_p3 = pmov %p8925_p1 }
 0x10c   : > { %7211 = dma.done.wait (%p8926_p9), [#allocation9], 8320  }
 0x10d   : > { %7213 = vsyncadd (%p8927_p3), [#allocation9], 4294958976  ;;  %p8928_p12 = pmov %p8925_p1 }
 0x10e   : > { %p8929_p8 = pmov %p8925_p1 }
 0x10f   : > { %7215 = dma.done.wait (%p8928_p12), [#allocation12], 32  }
 0x110   : > { %7217 = vsyncadd (%p8929_p8), [#allocation12], 4294967264  ;;  %p8930_p5 = pmov %p8925_p1 }
 0x111   : > { %p8931_p13 = pmov %p8925_p1 }
 0x112   : > { %7219 = dma.done.wait (%p8930_p5), [#allocation15], 32  }
 0x113   : > { %7221 = vsyncadd (%p8931_p13), [#allocation15], 4294967264  ;;  %p8932_p11 = scmp.ne.s32.totalorder %s7340_s27, 0 }
 0x114   : > { %v7250_v0 = vmov (!%p8932_p11), 0.0  }
 0x115   : > { %553 = sbr.rel (%p8932_p11) target bundleno = 284 (0x11c), region = 108  ;;  %554 = vst [vmem:[#allocation2] sm:$0xff] (!%p8932_p11), %v7250_v0  ;;  %555 = vst [vmem:[#allocation2 + $0x8] sm:$0xff] (!%p8932_p11), %v7250_v0 }
 0x116   : > { %556 = vst [vmem:[#allocation2 + $0x10] sm:$0xff] (!%p8932_p11), %v7250_v0  ;;  %557 = vst [vmem:[#allocation2 + $0x18] sm:$0xff] (!%p8932_p11), %v7250_v0 }
 0x117   : > { %558 = vst [vmem:[#allocation2 + $0x20] sm:$0xff] (!%p8932_p11), %v7250_v0  ;;  %559 = vst [vmem:[#allocation2 + $0x28] sm:$0xff] (!%p8932_p11), %v7250_v0 }
 0x118   : > { %560 = vst [vmem:[#allocation2 + $0x30] sm:$0xff] (!%p8932_p11), %v7250_v0  ;;  %561 = vst [vmem:[#allocation2 + $0x38] sm:$0xff] (!%p8932_p11), %v7250_v0 }
 0x11c PF: > { %v621_v1 = vld [vmem:[%s7629_s8 + $0x8] sm:$0xff]  ;;  %v620_v3 = vld [vmem:[%s7629_s8] sm:$0xff]  ;;  %p6442_p0 = scmp.ne.s32.totalorder %s7340_s27, 4 }
 0x11d   : > { %v685_v2 = vld [vmem:[%s7629_s8 + $0x208] sm:$0xff]  ;;  %v1421_v4 = vunpack.c.l.s8.bf16 %v621_v1  ;;  %v1429_v5 = vunpack.c.h.s8.bf16 %v621_v1  ;;  %v684_v8 = vld [vmem:[%s7629_s8 + $0x200] sm:$0xff]  ;;  %v1420_v9 = vunpack.c.l.s8.bf16 %v620_v3  ;;  %v1428_v13 = vunpack.c.h.s8.bf16 %v620_v3  ;;  %s8933_s17 = sld [smem:[#allocation26_spill]] (!%p6442_p0)  ;;  %s8934_s25 = sld [smem:[#allocation27_spill]] (!%p6442_p0) }
 0x11e   : > { %v1549_v6 = vunpack.c.l.s8.bf16 %v685_v2  ;;  %v1557_v7 = vunpack.c.h.s8.bf16 %v685_v2  ;;  %v1548_v10 = vunpack.c.l.s8.bf16 %v684_v8  ;;  %v629_v11 = vld [vmem:[%s7629_s8 + $0x48] sm:$0xff]  ;;  %v1556_v14 = vunpack.c.h.s8.bf16 %v684_v8  ;;  %v628_v17 = vld [vmem:[%s7629_s8 + $0x40] sm:$0xff]  ;;  %s8935_s5 = sld [smem:[#allocation28_spill]] (!%p6442_p0) }
 0x11f   : > { %v693_v12 = vld [vmem:[%s7629_s8 + $0x248] sm:$0xff]  ;;  %3020 = vmatprep.subr.bf16.mxu0 %v1421_v4  ;;  %v1437_v15 = vunpack.c.l.s8.bf16 %v629_v11  ;;  %v692_v18 = vld [vmem:[%s7629_s8 + $0x240] sm:$0xff]  ;;  %v1436_v19 = vunpack.c.l.s8.bf16 %v628_v17  ;;  %v1445_v21 = vunpack.c.h.s8.bf16 %v629_v11  ;;  %v1444_v25 = vunpack.c.h.s8.bf16 %v628_v17 }
 0x120   : > { %3061 = vmatprep.subr.bf16.mxu1 %v1549_v6  ;;  %3021 = vmatpush1.bf16.msra.mxu0 %v1420_v9  ;;  %v1565_v16 = vunpack.c.l.s8.bf16 %v693_v12  ;;  %v1564_v20 = vunpack.c.l.s8.bf16 %v692_v18  ;;  %v1573_v22 = vunpack.c.h.s8.bf16 %v693_v12  ;;  %v637_v23 = vld [vmem:[%s7629_s8 + $0x88] sm:$0xff]  ;;  %v1572_v26 = vunpack.c.h.s8.bf16 %v692_v18  ;;  %v636_v29 = vld [vmem:[%s7629_s8 + $0x80] sm:$0xff] }
 0x121   : > { %3062 = vmatpush1.bf16.msra.mxu1 %v1548_v10  ;;  %3022 = vmatprep.subr.bf16.mxu0 %v1429_v5  ;;  %v701_v24 = vld [vmem:[%s7629_s8 + $0x288] sm:$0xff]  ;;  %v1453_v27 = vunpack.c.l.s8.bf16 %v637_v23  ;;  %v700_v30 = vld [vmem:[%s7629_s8 + $0x280] sm:$0xff]  ;;  %v1452_v33 = vunpack.c.l.s8.bf16 %v636_v29  ;;  %v1461_v35 = vunpack.c.h.s8.bf16 %v637_v23  ;;  %v1460_v41 = vunpack.c.h.s8.bf16 %v636_v29 }
 0x122   : > { %3063 = vmatprep.subr.bf16.mxu1 %v1557_v7  ;;  %v1581_v28 = vunpack.c.l.s8.bf16 %v701_v24  ;;  %v571_v31 = vld [vmem:[%s7622_s21 + $0x8] sm:$0xff]  ;;  %v573_v32 = vld [vmem:[%s7622_s21 + $0x18] sm:$0xff]  ;;  %v1580_v34 = vunpack.c.l.s8.bf16 %v700_v30  ;;  %v1589_v36 = vunpack.c.h.s8.bf16 %v701_v24  ;;  %v1588_v42 = vunpack.c.h.s8.bf16 %v700_v30 }
 0x123   : > { %v7667_v37 = vpack.c.bf16 %v571_v31, %v571_v31  ;;  %v7669_v38 = vpack.c.bf16 %v573_v32, %v573_v32  ;;  %v645_v39 = vld [vmem:[%s7629_s8 + $0xc8] sm:$0xff]  ;;  %v644_v45 = vld [vmem:[%s7629_s8 + $0xc0] sm:$0xff]  ;;  %vm7253_vm0 = vmmov (!%p6442_p0), 0   ;;  %vm6174_vm1 = vcmask (!%p6442_p0), 523264  }
 0x124   : > { %3023 = vmatpush1.bf16.msra.mxu0 %v1428_v13  ;;  %v709_v40 = vld [vmem:[%s7629_s8 + $0x2c8] sm:$0xff]  ;;  %v1469_v43 = vunpack.c.l.s8.bf16 %v645_v39  ;;  %v708_v46 = vld [vmem:[%s7629_s8 + $0x2c0] sm:$0xff]  ;;  %v1468_v47 = vunpack.c.l.s8.bf16 %v644_v45  ;;  %v1477_v49 = vunpack.c.h.s8.bf16 %v645_v39  ;;  %v1476_v53 = vunpack.c.h.s8.bf16 %v644_v45 }
 0x125   : > { %3064 = vmatpush1.bf16.msra.mxu1 %v1556_v14  ;;  %3024 = vmatprep.subr.bf16.mxu0 %v1437_v15  ;;  %v1597_v44 = vunpack.c.l.s8.bf16 %v709_v40  ;;  %v1596_v48 = vunpack.c.l.s8.bf16 %v708_v46  ;;  %v1605_v50 = vunpack.c.h.s8.bf16 %v709_v40  ;;  %v653_v51 = vld [vmem:[%s7629_s8 + $0x108] sm:$0xff]  ;;  %v1604_v54 = vunpack.c.h.s8.bf16 %v708_v46  ;;  %v652_v57 = vld [vmem:[%s7629_s8 + $0x100] sm:$0xff] }
 0x126   : > { %3065 = vmatprep.subr.bf16.mxu1 %v1565_v16  ;;  %3052 = vmatprep.mubr.bf16.mxu0 %v7667_v37  ;;  %v717_v52 = vld [vmem:[%s7629_s8 + $0x308] sm:$0xff]  ;;  %v1485_v55 = vunpack.c.l.s8.bf16 %v653_v51  ;;  %v716_v58 = vld [vmem:[%s7629_s8 + $0x300] sm:$0xff]  ;;  %v1484_v59 = vunpack.c.l.s8.bf16 %v652_v57  ;;  %v1493_v61 = vunpack.c.h.s8.bf16 %v653_v51  ;;  %v1492_v1 = vunpack.c.h.s8.bf16 %v652_v57 }
 0x127   : > { %3093 = vmatprep.mubr.bf16.mxu1 %v7669_v38  ;;  %v1613_v56 = vunpack.c.l.s8.bf16 %v717_v52  ;;  %v1612_v60 = vunpack.c.l.s8.bf16 %v716_v58  ;;  %v1621_v62 = vunpack.c.h.s8.bf16 %v717_v52  ;;  %v661_v63 = vld [vmem:[%s7629_s8 + $0x148] sm:$0xff]  ;;  %v1620_v2 = vunpack.c.h.s8.bf16 %v716_v58  ;;  %v660_v5 = vld [vmem:[%s7629_s8 + $0x140] sm:$0xff] }
 0x128   : > { %3025 = vmatpush1.bf16.msra.mxu0 %v1436_v19  ;;  %v725_v0 = vld [vmem:[%s7629_s8 + $0x348] sm:$0xff]  ;;  %v1501_v3 = vunpack.c.l.s8.bf16 %v661_v63  ;;  %v724_v6 = vld [vmem:[%s7629_s8 + $0x340] sm:$0xff]  ;;  %v1500_v7 = vunpack.c.l.s8.bf16 %v660_v5  ;;  %v1509_v9 = vunpack.c.h.s8.bf16 %v661_v63  ;;  %v1508_v13 = vunpack.c.h.s8.bf16 %v660_v5 }
 0x129   : > { %3066 = vmatpush1.bf16.msra.mxu1 %v1564_v20  ;;  %3026 = vmatprep.subr.bf16.mxu0 %v1445_v21  ;;  %v1629_v4 = vunpack.c.l.s8.bf16 %v725_v0  ;;  %v1628_v8 = vunpack.c.l.s8.bf16 %v724_v6  ;;  %v1637_v10 = vunpack.c.h.s8.bf16 %v725_v0  ;;  %v669_v11 = vld [vmem:[%s7629_s8 + $0x188] sm:$0xff]  ;;  %v1636_v14 = vunpack.c.h.s8.bf16 %v724_v6  ;;  %v668_v17 = vld [vmem:[%s7629_s8 + $0x180] sm:$0xff] }
 0x12a   : > { %3067 = vmatprep.subr.bf16.mxu1 %v1573_v22  ;;  %v733_v12 = vld [vmem:[%s7629_s8 + $0x388] sm:$0xff]  ;;  %v1517_v15 = vunpack.c.l.s8.bf16 %v669_v11  ;;  %v732_v18 = vld [vmem:[%s7629_s8 + $0x380] sm:$0xff]  ;;  %v1516_v19 = vunpack.c.l.s8.bf16 %v668_v17  ;;  %v1525_v21 = vunpack.c.h.s8.bf16 %v669_v11  ;;  %vm6235_vm2 = vcmask (!%p6442_p0), 130048  }
 0x12b   : > { %v1645_v16 = vunpack.c.l.s8.bf16 %v733_v12  ;;  %v1644_v20 = vunpack.c.l.s8.bf16 %v732_v18  ;;  %v1653_v22 = vunpack.c.h.s8.bf16 %v733_v12  ;;  %v677_v23 = vld [vmem:[%s7629_s8 + $0x1c8] sm:$0xff]  ;;  %v676_v29 = vld [vmem:[%s7629_s8 + $0x1c0] sm:$0xff]  ;;  %vm6279_vm3 = vcmask (!%p6442_p0), 31744  }
 0x12c   : > { %3027 = vmatpush1.bf16.msra.mxu0 %v1444_v25  ;;  %v741_v24 = vld [vmem:[%s7629_s8 + $0x3c8] sm:$0xff]  ;;  %v1524_v25 = vunpack.c.h.s8.bf16 %v668_v17  ;;  %v740_v30 = vld [vmem:[%s7629_s8 + $0x3c0] sm:$0xff]  ;;  %v1532_v31 = vunpack.c.l.s8.bf16 %v676_v29  ;;  %v1540_v39 = vunpack.c.h.s8.bf16 %v676_v29 }
 0x12d   : > { %3068 = vmatpush1.bf16.msra.mxu1 %v1572_v26  ;;  %3028 = vmatprep.subr.bf16.mxu0 %v1453_v27  ;;  %v1652_v26 = vunpack.c.h.s8.bf16 %v732_v18  ;;  %v1533_v27 = vunpack.c.l.s8.bf16 %v677_v23  ;;  %v1660_v32 = vunpack.c.l.s8.bf16 %v740_v30  ;;  %v1668_v40 = vunpack.c.h.s8.bf16 %v740_v30  ;;  %v748_v45 = vld [vmem:[%s7629_s8 + $0x400] sm:$0xff]  ;;  %v765_v5 = vld [vmem:[%s7629_s8 + $0x488] sm:$0xff] }
 0x12e   : > { %3069 = vmatprep.subr.bf16.mxu1 %v1581_v28  ;;  %v1661_v28 = vunpack.c.l.s8.bf16 %v741_v24  ;;  %v812_v46 = vld [vmem:[%s7629_s8 + $0x600] sm:$0xff]  ;;  %v1676_v51 = vunpack.c.l.s8.bf16 %v748_v45  ;;  %v829_v6 = vld [vmem:[%s7629_s8 + $0x688] sm:$0xff] }
 0x12f   : > { %v1804_v52 = vunpack.c.l.s8.bf16 %v812_v46  ;;  %v756_v63 = vld [vmem:[%s7629_s8 + $0x440] sm:$0xff]  ;;  %v773_v17 = vld [vmem:[%s7629_s8 + $0x4c8] sm:$0xff] }
 0x130   : > { %3029 = vmatpush1.bf16.msra.mxu0 %v1452_v33  ;;  %v1541_v33 = vunpack.c.h.s8.bf16 %v677_v23  ;;  %v820_v0 = vld [vmem:[%s7629_s8 + $0x640] sm:$0xff]  ;;  %v837_v18 = vld [vmem:[%s7629_s8 + $0x6c8] sm:$0xff] }
 0x131   : > { %3070 = vmatpush1.bf16.msra.mxu1 %v1580_v34  ;;  %3030 = vmatprep.subr.bf16.mxu0 %v1461_v35  ;;  %v1669_v34 = vunpack.c.h.s8.bf16 %v741_v24  ;;  %v749_v35 = vld [vmem:[%s7629_s8 + $0x408] sm:$0xff]  ;;  %v764_v11 = vld [vmem:[%s7629_s8 + $0x480] sm:$0xff] }
 0x132   : > { %3071 = vmatprep.subr.bf16.mxu1 %v1589_v36  ;;  %v813_v36 = vld [vmem:[%s7629_s8 + $0x608] sm:$0xff]  ;;  %v828_v12 = vld [vmem:[%s7629_s8 + $0x680] sm:$0xff] }
 0x133   : > { %v772_v23 = vld [vmem:[%s7629_s8 + $0x4c0] sm:$0xff]  ;;  %v781_v29 = vld [vmem:[%s7629_s8 + $0x508] sm:$0xff] }
 0x134   : > { %3031 = vmatpush1.bf16.msra.mxu0 %v1460_v41  ;;  %v570_v41 = vld [vmem:[%s7622_s21] sm:$0xff]  ;;  %v836_v24 = vld [vmem:[%s7629_s8 + $0x6c0] sm:$0xff]  ;;  %v845_v30 = vld [vmem:[%s7629_s8 + $0x708] sm:$0xff] }
 0x135   : > { %3072 = vmatpush1.bf16.msra.mxu1 %v1588_v42  ;;  %3032 = vmatprep.subr.bf16.mxu0 %v1469_v43  ;;  %v572_v42 = vld [vmem:[%s7622_s21 + $0x10] sm:$0xff]  ;;  %v1677_v43 = vunpack.c.l.s8.bf16 %v749_v35 }
 0x136   : > { %3073 = vmatprep.subr.bf16.mxu1 %v1597_v44  ;;  %v1805_v44 = vunpack.c.l.s8.bf16 %v813_v36 }
 0x138   : > { %3033 = vmatpush1.bf16.msra.mxu0 %v1468_v47  ;;  %v7699_v47 = vpack.c.bf16 %v570_v41, %v570_v41  ;;  %v1749_v41 = vunpack.c.h.s8.bf16 %v781_v29 }
 0x139   : > { %3074 = vmatpush1.bf16.msra.mxu1 %v1596_v48  ;;  %3034 = vmatprep.subr.bf16.mxu0 %v1477_v49  ;;  %v7701_v48 = vpack.c.bf16 %v572_v42, %v572_v42  ;;  %v575_v49 = vld [vmem:[%s7622_s21 + $0x28] sm:$0xff]  ;;  %v1877_v42 = vunpack.c.h.s8.bf16 %v845_v30 }
 0x13a   : > { %3075 = vmatprep.subr.bf16.mxu1 %v1605_v50  ;;  %v577_v50 = vld [vmem:[%s7622_s21 + $0x38] sm:$0xff]  ;;  %v7707_v57 = vpack.c.bf16 %v575_v49, %v575_v49 }
 0x13b   : > { %v7709_v58 = vpack.c.bf16 %v577_v50, %v577_v50 }
 0x13c   : > { %3035 = vmatpush1.bf16.msra.mxu0 %v1476_v53  ;;  %v1685_v53 = vunpack.c.h.s8.bf16 %v749_v35  ;;  %v780_v35 = vld [vmem:[%s7629_s8 + $0x500] sm:$0xff] }
 0x13d   : > { %3076 = vmatpush1.bf16.msra.mxu1 %v1604_v54  ;;  %3036 = vmatprep.subr.bf16.mxu0 %v1485_v55  ;;  %v1813_v54 = vunpack.c.h.s8.bf16 %v813_v36  ;;  %v757_v55 = vld [vmem:[%s7629_s8 + $0x448] sm:$0xff]  ;;  %v844_v36 = vld [vmem:[%s7629_s8 + $0x700] sm:$0xff] }
 0x13e   : > { %3077 = vmatprep.subr.bf16.mxu1 %v1613_v56  ;;  %v821_v56 = vld [vmem:[%s7629_s8 + $0x648] sm:$0xff] }
 0x140   : > { %3037 = vmatpush1.bf16.msra.mxu0 %v1484_v59  ;;  %v1684_v59 = vunpack.c.h.s8.bf16 %v748_v45  ;;  %v1748_v45 = vunpack.c.h.s8.bf16 %v780_v35 }
 0x141   : > { %3078 = vmatpush1.bf16.msra.mxu1 %v1612_v60  ;;  %3038 = vmatprep.subr.bf16.mxu0 %v1493_v61  ;;  %v1812_v60 = vunpack.c.h.s8.bf16 %v812_v46  ;;  %v1693_v61 = vunpack.c.l.s8.bf16 %v757_v55  ;;  %v1876_v46 = vunpack.c.h.s8.bf16 %v844_v36 }
 0x142   : > { %3079 = vmatprep.subr.bf16.mxu1 %v1621_v62  ;;  %v1821_v62 = vunpack.c.l.s8.bf16 %v821_v56 }
 0x144   : > { %3039 = vmatpush1.bf16.msra.mxu0 %v1492_v1  ;;  %v1692_v1 = vunpack.c.l.s8.bf16 %v756_v63 }
 0x145   : > { %3080 = vmatpush1.bf16.msra.mxu1 %v1620_v2  ;;  %3040 = vmatprep.subr.bf16.mxu0 %v1501_v3  ;;  %v1820_v2 = vunpack.c.l.s8.bf16 %v820_v0  ;;  %v1701_v3 = vunpack.c.h.s8.bf16 %v757_v55 }
 0x146   : > { %3081 = vmatprep.subr.bf16.mxu1 %v1629_v4  ;;  %v1829_v4 = vunpack.c.h.s8.bf16 %v821_v56 }
 0x148   : > { %3041 = vmatpush1.bf16.msra.mxu0 %v1500_v7  ;;  %v1700_v7 = vunpack.c.h.s8.bf16 %v756_v63 }
 0x149   : > { %3082 = vmatpush1.bf16.msra.mxu1 %v1628_v8  ;;  %3042 = vmatprep.subr.bf16.mxu0 %v1509_v9  ;;  %v1828_v8 = vunpack.c.h.s8.bf16 %v820_v0  ;;  %v1709_v9 = vunpack.c.l.s8.bf16 %v765_v5 }
 0x14a   : > { %3083 = vmatprep.subr.bf16.mxu1 %v1637_v10  ;;  %v1837_v10 = vunpack.c.l.s8.bf16 %v829_v6 }
 0x14c   : > { %3043 = vmatpush1.bf16.msra.mxu0 %v1508_v13  ;;  %v1708_v13 = vunpack.c.l.s8.bf16 %v764_v11 }
 0x14d   : > { %3084 = vmatpush1.bf16.msra.mxu1 %v1636_v14  ;;  %3044 = vmatprep.subr.bf16.mxu0 %v1517_v15  ;;  %v1836_v14 = vunpack.c.l.s8.bf16 %v828_v12  ;;  %v1717_v15 = vunpack.c.h.s8.bf16 %v765_v5 }
 0x14e   : > { %3085 = vmatprep.subr.bf16.mxu1 %v1645_v16  ;;  %v1845_v16 = vunpack.c.h.s8.bf16 %v829_v6 }
 0x150   : > { %3045 = vmatpush1.bf16.msra.mxu0 %v1516_v19  ;;  %v1716_v19 = vunpack.c.h.s8.bf16 %v764_v11 }
 0x151   : > { %3086 = vmatpush1.bf16.msra.mxu1 %v1644_v20  ;;  %3046 = vmatprep.subr.bf16.mxu0 %v1525_v21  ;;  %v1844_v20 = vunpack.c.h.s8.bf16 %v828_v12  ;;  %v1725_v21 = vunpack.c.l.s8.bf16 %v773_v17 }
 0x152   : > { %3087 = vmatprep.subr.bf16.mxu1 %v1653_v22  ;;  %v1853_v22 = vunpack.c.l.s8.bf16 %v837_v18 }
 0x154   : > { %3047 = vmatpush1.bf16.msra.mxu0 %v1524_v25  ;;  %v1724_v25 = vunpack.c.l.s8.bf16 %v772_v23 }
 0x155   : > { %3088 = vmatpush1.bf16.msra.mxu1 %v1652_v26  ;;  %3048 = vmatprep.subr.bf16.mxu0 %v1533_v27  ;;  %v1852_v26 = vunpack.c.l.s8.bf16 %v836_v24  ;;  %v1733_v27 = vunpack.c.h.s8.bf16 %v773_v17 }
 0x156   : > { %3089 = vmatprep.subr.bf16.mxu1 %v1661_v28  ;;  %v1861_v28 = vunpack.c.h.s8.bf16 %v837_v18 }
 0x158   : > { %3049 = vmatpush1.bf16.msra.mxu0 %v1532_v31  ;;  %v1732_v31 = vunpack.c.h.s8.bf16 %v772_v23  ;;  %v574_v23 = vld [vmem:[%s7622_s21 + $0x20] sm:$0xff] }
 0x159   : > { %3090 = vmatpush1.bf16.msra.mxu1 %v1660_v32  ;;  %3050 = vmatprep.subr.bf16.mxu0 %v1541_v33  ;;  %v1860_v32 = vunpack.c.h.s8.bf16 %v836_v24  ;;  %v1741_v33 = vunpack.c.l.s8.bf16 %v781_v29  ;;  %v576_v24 = vld [vmem:[%s7622_s21 + $0x30] sm:$0xff]  ;;  %v7747_v29 = vpack.c.bf16 %v574_v23, %v574_v23 }
 0x15a   : > { %3091 = vmatprep.subr.bf16.mxu1 %v1669_v34  ;;  %v1869_v34 = vunpack.c.l.s8.bf16 %v845_v30  ;;  %v7749_v30 = vpack.c.bf16 %v576_v24, %v576_v24  ;;  %v908_v23 = vld [vmem:[%s7629_s8 + $0x900] sm:$0xff] }
 0x15b   : > { %v972_v24 = vld [vmem:[%s7629_s8 + $0xb00] sm:$0xff] }
 0x15c   : > { %3051 = vmatpush1.bf16.msra.mxu0 %v1540_v39  ;;  %v1740_v39 = vunpack.c.l.s8.bf16 %v780_v35 }
 0x15d   : > { %3092 = vmatpush1.bf16.msra.mxu1 %v1668_v40  ;;  %3102 = vmatprep.subr.bf16.mxu0 %v1677_v43  ;;  %v1868_v40 = vunpack.c.l.s8.bf16 %v844_v36  ;;  %v789_v43 = vld [vmem:[%s7629_s8 + $0x548] sm:$0xff] }
 0x15e   : > { %3143 = vmatprep.subr.bf16.mxu1 %v1805_v44  ;;  %v853_v44 = vld [vmem:[%s7629_s8 + $0x748] sm:$0xff]  ;;  %v1757_v49 = vunpack.c.l.s8.bf16 %v789_v43  ;;  %v1765_v55 = vunpack.c.h.s8.bf16 %v789_v43 }
 0x15f   : > { %3053 = vmatmul.mubr.bf16.vlgmr.msra.gmra.mrb[0].mxu0 %v7699_v47  ;;  %v1885_v50 = vunpack.c.l.s8.bf16 %v853_v44  ;;  %v1893_v56 = vunpack.c.h.s8.bf16 %v853_v44 }
 0x160   : > { %3094 = vmatmul.mubr.bf16.vlgmr.msra.gmra.mrb[0].mxu1 %v7701_v48  ;;  %3103 = vmatpush1.bf16.msra.mxu0 %v1676_v51  ;;  %v788_v51 = vld [vmem:[%s7629_s8 + $0x540] sm:$0xff] }
 0x161   : > { %3144 = vmatpush1.bf16.msra.mxu1 %v1804_v52  ;;  %3104 = vmatprep.subr.bf16.mxu0 %v1685_v53  ;;  %v852_v52 = vld [vmem:[%s7629_s8 + $0x740] sm:$0xff]  ;;  %v1756_v53 = vunpack.c.l.s8.bf16 %v788_v51 }
 0x162   : > { %3145 = vmatprep.subr.bf16.mxu1 %v1813_v54  ;;  %3134 = vmatprep.mubr.bf16.mxu0 %v7707_v57  ;;  %v1884_v54 = vunpack.c.l.s8.bf16 %v852_v52 }
 0x163   : > { %3175 = vmatprep.mubr.bf16.mxu1 %v7709_v58 }
 0x164   : > { %3105 = vmatpush1.bf16.msra.mxu0 %v1684_v59  ;;  %v797_v59 = vld [vmem:[%s7629_s8 + $0x588] sm:$0xff] }
 0x165   : > { %3146 = vmatpush1.bf16.msra.mxu1 %v1812_v60  ;;  %3106 = vmatprep.subr.bf16.mxu0 %v1693_v61  ;;  %v861_v60 = vld [vmem:[%s7629_s8 + $0x788] sm:$0xff]  ;;  %v1764_v61 = vunpack.c.h.s8.bf16 %v788_v51  ;;  %v1773_v63 = vunpack.c.l.s8.bf16 %v797_v59  ;;  %v1781_v5 = vunpack.c.h.s8.bf16 %v797_v59 }
 0x166   : > { %3147 = vmatprep.subr.bf16.mxu1 %v1821_v62  ;;  %v1892_v62 = vunpack.c.h.s8.bf16 %v852_v52  ;;  %v1901_v0 = vunpack.c.l.s8.bf16 %v861_v60  ;;  %v1909_v6 = vunpack.c.h.s8.bf16 %v861_v60 }
 0x168   : > { %3107 = vmatpush1.bf16.msra.mxu0 %v1692_v1  ;;  %v796_v1 = vld [vmem:[%s7629_s8 + $0x580] sm:$0xff] }
 0x169   : > { %3148 = vmatpush1.bf16.msra.mxu1 %v1820_v2  ;;  %3108 = vmatprep.subr.bf16.mxu0 %v1701_v3  ;;  %v860_v2 = vld [vmem:[%s7629_s8 + $0x780] sm:$0xff]  ;;  %v1772_v3 = vunpack.c.l.s8.bf16 %v796_v1 }
 0x16a   : > { %3149 = vmatprep.subr.bf16.mxu1 %v1829_v4  ;;  %v1900_v4 = vunpack.c.l.s8.bf16 %v860_v2 }
 0x16c   : > { %3109 = vmatpush1.bf16.msra.mxu0 %v1700_v7  ;;  %v805_v7 = vld [vmem:[%s7629_s8 + $0x5c8] sm:$0xff] }
 0x16d   : > { %3150 = vmatpush1.bf16.msra.mxu1 %v1828_v8  ;;  %3110 = vmatprep.subr.bf16.mxu0 %v1709_v9  ;;  %v869_v8 = vld [vmem:[%s7629_s8 + $0x7c8] sm:$0xff]  ;;  %v1780_v9 = vunpack.c.h.s8.bf16 %v796_v1  ;;  %v1789_v11 = vunpack.c.l.s8.bf16 %v805_v7  ;;  %v1797_v17 = vunpack.c.h.s8.bf16 %v805_v7 }
 0x16e   : > { %3151 = vmatprep.subr.bf16.mxu1 %v1837_v10  ;;  %v1908_v10 = vunpack.c.h.s8.bf16 %v860_v2  ;;  %v1917_v12 = vunpack.c.l.s8.bf16 %v869_v8  ;;  %v1925_v18 = vunpack.c.h.s8.bf16 %v869_v8 }
 0x170   : > { %3111 = vmatpush1.bf16.msra.mxu0 %v1708_v13  ;;  %v804_v13 = vld [vmem:[%s7629_s8 + $0x5c0] sm:$0xff] }
 0x171   : > { %3152 = vmatpush1.bf16.msra.mxu1 %v1836_v14  ;;  %3112 = vmatprep.subr.bf16.mxu0 %v1717_v15  ;;  %v868_v14 = vld [vmem:[%s7629_s8 + $0x7c0] sm:$0xff]  ;;  %v1788_v15 = vunpack.c.l.s8.bf16 %v804_v13 }
 0x172   : > { %3153 = vmatprep.subr.bf16.mxu1 %v1845_v16  ;;  %v1916_v16 = vunpack.c.l.s8.bf16 %v868_v14 }
 0x174   : > { %3113 = vmatpush1.bf16.msra.mxu0 %v1716_v19  ;;  %v877_v19 = vld [vmem:[%s7629_s8 + $0x808] sm:$0xff] }
 0x175   : > { %3154 = vmatpush1.bf16.msra.mxu1 %v1844_v20  ;;  %3114 = vmatprep.subr.bf16.mxu0 %v1725_v21  ;;  %v941_v20 = vld [vmem:[%s7629_s8 + $0xa08] sm:$0xff]  ;;  %v1796_v21 = vunpack.c.h.s8.bf16 %v804_v13  ;;  %v1941_v35 = vunpack.c.h.s8.bf16 %v877_v19 }
 0x176   : > { %3155 = vmatprep.subr.bf16.mxu1 %v1853_v22  ;;  %v1924_v22 = vunpack.c.h.s8.bf16 %v868_v14  ;;  %v2069_v36 = vunpack.c.h.s8.bf16 %v941_v20 }
 0x178   : > { %3115 = vmatpush1.bf16.msra.mxu0 %v1724_v25  ;;  %v1933_v25 = vunpack.c.l.s8.bf16 %v877_v19 }
 0x179   : > { %3156 = vmatpush1.bf16.msra.mxu1 %v1852_v26  ;;  %3116 = vmatprep.subr.bf16.mxu0 %v1733_v27  ;;  %v2061_v26 = vunpack.c.l.s8.bf16 %v941_v20  ;;  %v876_v27 = vld [vmem:[%s7629_s8 + $0x800] sm:$0xff] }
 0x17a   : > { %3157 = vmatprep.subr.bf16.mxu1 %v1861_v28  ;;  %v940_v28 = vld [vmem:[%s7629_s8 + $0xa00] sm:$0xff]  ;;  %v1940_v43 = vunpack.c.h.s8.bf16 %v876_v27 }
 0x17b   : > { %v2068_v44 = vunpack.c.h.s8.bf16 %v940_v28 }
 0x17c   : > { %3117 = vmatpush1.bf16.msra.mxu0 %v1732_v31  ;;  %v579_v31 = vld [vmem:[%s7622_s21 + $0x48] sm:$0xff] }
 0x17d   : > { %3158 = vmatpush1.bf16.msra.mxu1 %v1860_v32  ;;  %3118 = vmatprep.subr.bf16.mxu0 %v1741_v33  ;;  %v581_v32 = vld [vmem:[%s7622_s21 + $0x58] sm:$0xff]  ;;  %v1932_v33 = vunpack.c.l.s8.bf16 %v876_v27 }
 0x17e   : > { %3159 = vmatprep.subr.bf16.mxu1 %v1869_v34  ;;  %v2060_v34 = vunpack.c.l.s8.bf16 %v940_v28 }
 0x180   : > { %3119 = vmatpush1.bf16.msra.mxu0 %v1740_v39  ;;  %v885_v39 = vld [vmem:[%s7629_s8 + $0x848] sm:$0xff] }
 0x181   : > { %3160 = vmatpush1.bf16.msra.mxu1 %v1868_v40  ;;  %3120 = vmatprep.subr.bf16.mxu0 %v1749_v41  ;;  %v949_v40 = vld [vmem:[%s7629_s8 + $0xa48] sm:$0xff]  ;;  %v7755_v41 = vpack.c.bf16 %v579_v31, %v579_v31 }
 0x182   : > { %3161 = vmatprep.subr.bf16.mxu1 %v1877_v42  ;;  %v7757_v42 = vpack.c.bf16 %v581_v32, %v581_v32  ;;  %v917_v31 = vld [vmem:[%s7629_s8 + $0x948] sm:$0xff] }
 0x183   : > { %v981_v32 = vld [vmem:[%s7629_s8 + $0xb48] sm:$0xff] }
 0x184   : > { %3121 = vmatpush1.bf16.msra.mxu0 %v1748_v45  ;;  %v1949_v45 = vunpack.c.l.s8.bf16 %v885_v39 }
 0x185   : > { %3162 = vmatpush1.bf16.msra.mxu1 %v1876_v46  ;;  %3122 = vmatprep.subr.bf16.mxu0 %v1757_v49  ;;  %v2077_v46 = vunpack.c.l.s8.bf16 %v949_v40  ;;  %v884_v49 = vld [vmem:[%s7629_s8 + $0x840] sm:$0xff] }
 0x186   : > { %3163 = vmatprep.subr.bf16.mxu1 %v1885_v50  ;;  %v948_v50 = vld [vmem:[%s7629_s8 + $0xa40] sm:$0xff]  ;;  %v1948_v51 = vunpack.c.l.s8.bf16 %v884_v49  ;;  %v1956_v59 = vunpack.c.h.s8.bf16 %v884_v49  ;;  %v925_v49 = vld [vmem:[%s7629_s8 + $0x988] sm:$0xff] }
 0x187   : > { %v2076_v52 = vunpack.c.l.s8.bf16 %v948_v50  ;;  %v2084_v60 = vunpack.c.h.s8.bf16 %v948_v50  ;;  %v989_v50 = vld [vmem:[%s7629_s8 + $0xb88] sm:$0xff] }
 0x188   : > { %3123 = vmatpush1.bf16.msra.mxu0 %v1756_v53  ;;  %v1957_v53 = vunpack.c.h.s8.bf16 %v885_v39  ;;  %v916_v39 = vld [vmem:[%s7629_s8 + $0x940] sm:$0xff] }
 0x189   : > { %3164 = vmatpush1.bf16.msra.mxu1 %v1884_v54  ;;  %3124 = vmatprep.subr.bf16.mxu0 %v1765_v55  ;;  %v2085_v54 = vunpack.c.h.s8.bf16 %v949_v40  ;;  %v893_v55 = vld [vmem:[%s7629_s8 + $0x888] sm:$0xff]  ;;  %v980_v40 = vld [vmem:[%s7629_s8 + $0xb40] sm:$0xff] }
 0x18a   : > { %3165 = vmatprep.subr.bf16.mxu1 %v1893_v56  ;;  %v957_v56 = vld [vmem:[%s7629_s8 + $0xa88] sm:$0xff] }
 0x18c   : > { %3125 = vmatpush1.bf16.msra.mxu0 %v1764_v61  ;;  %v1965_v61 = vunpack.c.l.s8.bf16 %v893_v55 }
 0x18d   : > { %3166 = vmatpush1.bf16.msra.mxu1 %v1892_v62  ;;  %3126 = vmatprep.subr.bf16.mxu0 %v1773_v63  ;;  %v2093_v62 = vunpack.c.l.s8.bf16 %v957_v56  ;;  %v892_v63 = vld [vmem:[%s7629_s8 + $0x880] sm:$0xff] }
 0x18e   : > { %3167 = vmatprep.subr.bf16.mxu1 %v1901_v0  ;;  %v956_v0 = vld [vmem:[%s7629_s8 + $0xa80] sm:$0xff]  ;;  %v1964_v1 = vunpack.c.l.s8.bf16 %v892_v63  ;;  %v1972_v7 = vunpack.c.h.s8.bf16 %v892_v63  ;;  %v933_v63 = vld [vmem:[%s7629_s8 + $0x9c8] sm:$0xff] }
 0x18f   : > { %v2092_v2 = vunpack.c.l.s8.bf16 %v956_v0  ;;  %v2100_v8 = vunpack.c.h.s8.bf16 %v956_v0  ;;  %v997_v0 = vld [vmem:[%s7629_s8 + $0xbc8] sm:$0xff] }
 0x190   : > { %3127 = vmatpush1.bf16.msra.mxu0 %v1772_v3  ;;  %v1973_v3 = vunpack.c.h.s8.bf16 %v893_v55  ;;  %v924_v55 = vld [vmem:[%s7629_s8 + $0x980] sm:$0xff] }
 0x191   : > { %3168 = vmatpush1.bf16.msra.mxu1 %v1900_v4  ;;  %3128 = vmatprep.subr.bf16.mxu0 %v1781_v5  ;;  %v2101_v4 = vunpack.c.h.s8.bf16 %v957_v56  ;;  %v901_v5 = vld [vmem:[%s7629_s8 + $0x8c8] sm:$0xff]  ;;  %v988_v56 = vld [vmem:[%s7629_s8 + $0xb80] sm:$0xff] }
 0x192   : > { %3169 = vmatprep.subr.bf16.mxu1 %v1909_v6  ;;  %v965_v6 = vld [vmem:[%s7629_s8 + $0xac8] sm:$0xff] }
 0x194   : > { %3129 = vmatpush1.bf16.msra.mxu0 %v1780_v9  ;;  %v1981_v9 = vunpack.c.l.s8.bf16 %v901_v5 }
 0x195   : > { %3170 = vmatpush1.bf16.msra.mxu1 %v1908_v10  ;;  %3130 = vmatprep.subr.bf16.mxu0 %v1789_v11  ;;  %v2109_v10 = vunpack.c.l.s8.bf16 %v965_v6  ;;  %v900_v11 = vld [vmem:[%s7629_s8 + $0x8c0] sm:$0xff] }
 0x196   : > { %3171 = vmatprep.subr.bf16.mxu1 %v1917_v12  ;;  %v964_v12 = vld [vmem:[%s7629_s8 + $0xac0] sm:$0xff]  ;;  %v1980_v13 = vunpack.c.l.s8.bf16 %v900_v11  ;;  %v1988_v19 = vunpack.c.h.s8.bf16 %v900_v11  ;;  %v1005_v11 = vld [vmem:[%s7629_s8 + $0xc08] sm:$0xff] }
 0x197   : > { %v2108_v14 = vunpack.c.l.s8.bf16 %v964_v12  ;;  %v2116_v20 = vunpack.c.h.s8.bf16 %v964_v12  ;;  %v1069_v12 = vld [vmem:[%s7629_s8 + $0xe08] sm:$0xff] }
 0x198   : > { %3131 = vmatpush1.bf16.msra.mxu0 %v1788_v15  ;;  %v1989_v15 = vunpack.c.h.s8.bf16 %v901_v5  ;;  %v932_v5 = vld [vmem:[%s7629_s8 + $0x9c0] sm:$0xff] }
 0x199   : > { %3172 = vmatpush1.bf16.msra.mxu1 %v1916_v16  ;;  %3132 = vmatprep.subr.bf16.mxu0 %v1797_v17  ;;  %v2117_v16 = vunpack.c.h.s8.bf16 %v965_v6  ;;  %v909_v17 = vld [vmem:[%s7629_s8 + $0x908] sm:$0xff]  ;;  %v996_v6 = vld [vmem:[%s7629_s8 + $0xbc0] sm:$0xff] }
 0x19a   : > { %3173 = vmatprep.subr.bf16.mxu1 %v1925_v18  ;;  %v973_v18 = vld [vmem:[%s7629_s8 + $0xb08] sm:$0xff]  ;;  %v2005_v27 = vunpack.c.h.s8.bf16 %v909_v17 }
 0x19b   : > { %v2133_v28 = vunpack.c.h.s8.bf16 %v973_v18 }
 0x19c   : > { %3133 = vmatpush1.bf16.msra.mxu0 %v1796_v21  ;;  %v1997_v21 = vunpack.c.l.s8.bf16 %v909_v17  ;;  %v2189_v17 = vunpack.c.l.s8.bf16 %v1005_v11 }
 0x19d   : > { %3174 = vmatpush1.bf16.msra.mxu1 %v1924_v22  ;;  %3184 = vmatprep.subr.bf16.mxu0 %v1933_v25  ;;  %v2125_v22 = vunpack.c.l.s8.bf16 %v973_v18  ;;  %v1996_v25 = vunpack.c.l.s8.bf16 %v908_v23  ;;  %v2317_v18 = vunpack.c.l.s8.bf16 %v1069_v12 }
 0x19e   : > { %3225 = vmatprep.subr.bf16.mxu1 %v2061_v26  ;;  %v2124_v26 = vunpack.c.l.s8.bf16 %v972_v24 }
 0x19f   : > { %3135 = vmatmul.mubr.bf16.vlgmr.msra.gmra.mrb[4].mxu0 %v7747_v29 }
 0x1a0   : > { %3176 = vmatmul.mubr.bf16.vlgmr.msra.gmra.mrb[4].mxu1 %v7749_v30  ;;  %3185 = vmatpush1.bf16.msra.mxu0 %v1932_v33  ;;  %v2004_v33 = vunpack.c.h.s8.bf16 %v908_v23  ;;  %v583_v23 = vld [vmem:[%s7622_s21 + $0x68] sm:$0xff] }
 0x1a1   : > { %3226 = vmatpush1.bf16.msra.mxu1 %v2060_v34  ;;  %3186 = vmatprep.subr.bf16.mxu0 %v1941_v35  ;;  %v2132_v34 = vunpack.c.h.s8.bf16 %v972_v24  ;;  %v2013_v35 = vunpack.c.l.s8.bf16 %v917_v31  ;;  %v585_v24 = vld [vmem:[%s7622_s21 + $0x78] sm:$0xff] }
 0x1a2   : > { %3227 = vmatprep.subr.bf16.mxu1 %v2069_v36  ;;  %3216 = vmatprep.mubr.bf16.mxu0 %v7755_v41  ;;  %v2141_v36 = vunpack.c.l.s8.bf16 %v981_v32 }
 0x1a3   : > { %3257 = vmatprep.mubr.bf16.mxu1 %v7757_v42 }
 0x1a4   : > { %3187 = vmatpush1.bf16.msra.mxu0 %v1940_v43  ;;  %v2012_v43 = vunpack.c.l.s8.bf16 %v916_v39 }
 0x1a5   : > { %3228 = vmatpush1.bf16.msra.mxu1 %v2068_v44  ;;  %3188 = vmatprep.subr.bf16.mxu0 %v1949_v45  ;;  %v2140_v44 = vunpack.c.l.s8.bf16 %v980_v40  ;;  %v2021_v45 = vunpack.c.h.s8.bf16 %v917_v31  ;;  %v1013_v31 = vld [vmem:[%s7629_s8 + $0xc48] sm:$0xff] }
 0x1a6   : > { %3229 = vmatprep.subr.bf16.mxu1 %v2077_v46  ;;  %v2149_v46 = vunpack.c.h.s8.bf16 %v981_v32  ;;  %v1077_v32 = vld [vmem:[%s7629_s8 + $0xe48] sm:$0xff] }
 0x1a8   : > { %3189 = vmatpush1.bf16.msra.mxu0 %v1948_v51  ;;  %v2020_v51 = vunpack.c.h.s8.bf16 %v916_v39  ;;  %v2205_v39 = vunpack.c.l.s8.bf16 %v1013_v31 }
 0x1a9   : > { %3230 = vmatpush1.bf16.msra.mxu1 %v2076_v52  ;;  %3190 = vmatprep.subr.bf16.mxu0 %v1957_v53  ;;  %v2148_v52 = vunpack.c.h.s8.bf16 %v980_v40  ;;  %v2029_v53 = vunpack.c.l.s8.bf16 %v925_v49  ;;  %v2333_v40 = vunpack.c.l.s8.bf16 %v1077_v32 }
 0x1aa   : > { %3231 = vmatprep.subr.bf16.mxu1 %v2085_v54  ;;  %v2157_v54 = vunpack.c.l.s8.bf16 %v989_v50 }
 0x1ac   : > { %3191 = vmatpush1.bf16.msra.mxu0 %v1956_v59  ;;  %v2028_v59 = vunpack.c.l.s8.bf16 %v924_v55 }
 0x1ad   : > { %3232 = vmatpush1.bf16.msra.mxu1 %v2084_v60  ;;  %3192 = vmatprep.subr.bf16.mxu0 %v1965_v61  ;;  %v2156_v60 = vunpack.c.l.s8.bf16 %v988_v56  ;;  %v2037_v61 = vunpack.c.h.s8.bf16 %v925_v49  ;;  %v2213_v49 = vunpack.c.h.s8.bf16 %v1013_v31 }
 0x1ae   : > { %3233 = vmatprep.subr.bf16.mxu1 %v2093_v62  ;;  %v2165_v62 = vunpack.c.h.s8.bf16 %v989_v50  ;;  %v2341_v50 = vunpack.c.h.s8.bf16 %v1077_v32 }
 0x1b0   : > { %3193 = vmatpush1.bf16.msra.mxu0 %v1964_v1  ;;  %v2036_v1 = vunpack.c.h.s8.bf16 %v924_v55 }
 0x1b1   : > { %3234 = vmatpush1.bf16.msra.mxu1 %v2092_v2  ;;  %3194 = vmatprep.subr.bf16.mxu0 %v1973_v3  ;;  %v2164_v2 = vunpack.c.h.s8.bf16 %v988_v56  ;;  %v2045_v3 = vunpack.c.l.s8.bf16 %v933_v63 }
 0x1b2   : > { %3235 = vmatprep.subr.bf16.mxu1 %v2101_v4  ;;  %v2173_v4 = vunpack.c.l.s8.bf16 %v997_v0 }
 0x1b4   : > { %3195 = vmatpush1.bf16.msra.mxu0 %v1972_v7  ;;  %v2044_v7 = vunpack.c.l.s8.bf16 %v932_v5 }
 0x1b5   : > { %3236 = vmatpush1.bf16.msra.mxu1 %v2100_v8  ;;  %3196 = vmatprep.subr.bf16.mxu0 %v1981_v9  ;;  %v2172_v8 = vunpack.c.l.s8.bf16 %v996_v6  ;;  %v2053_v9 = vunpack.c.h.s8.bf16 %v933_v63 }
 0x1b6   : > { %3237 = vmatprep.subr.bf16.mxu1 %v2109_v10  ;;  %v2181_v10 = vunpack.c.h.s8.bf16 %v997_v0 }
 0x1b8   : > { %3197 = vmatpush1.bf16.msra.mxu0 %v1980_v13  ;;  %v2052_v13 = vunpack.c.h.s8.bf16 %v932_v5 }
 0x1b9   : > { %3238 = vmatpush1.bf16.msra.mxu1 %v2108_v14  ;;  %3198 = vmatprep.subr.bf16.mxu0 %v1989_v15  ;;  %v2180_v14 = vunpack.c.h.s8.bf16 %v996_v6  ;;  %v578_v15 = vld [vmem:[%s7622_s21 + $0x40] sm:$0xff] }
 0x1ba   : > { %3239 = vmatprep.subr.bf16.mxu1 %v2117_v16  ;;  %v580_v16 = vld [vmem:[%s7622_s21 + $0x50] sm:$0xff] }
 0x1bc   : > { %3199 = vmatpush1.bf16.msra.mxu0 %v1988_v19  ;;  %v1004_v19 = vld [vmem:[%s7629_s8 + $0xc00] sm:$0xff] }
 0x1bd   : > { %3240 = vmatpush1.bf16.msra.mxu1 %v2116_v20  ;;  %3200 = vmatprep.subr.bf16.mxu0 %v1997_v21  ;;  %v1068_v20 = vld [vmem:[%s7629_s8 + $0xe00] sm:$0xff]  ;;  %v7795_v21 = vpack.c.bf16 %v578_v15, %v578_v15 }
 0x1be   : > { %3241 = vmatprep.subr.bf16.mxu1 %v2125_v22  ;;  %v7797_v22 = vpack.c.bf16 %v580_v16, %v580_v16 }
 0x1c0   : > { %3201 = vmatpush1.bf16.msra.mxu0 %v1996_v25  ;;  %v2188_v25 = vunpack.c.l.s8.bf16 %v1004_v19 }
 0x1c1   : > { %3242 = vmatpush1.bf16.msra.mxu1 %v2124_v26  ;;  %3202 = vmatprep.subr.bf16.mxu0 %v2005_v27  ;;  %v2316_v26 = vunpack.c.l.s8.bf16 %v1068_v20  ;;  %v2197_v27 = vunpack.c.h.s8.bf16 %v1005_v11 }
 0x1c2   : > { %3243 = vmatprep.subr.bf16.mxu1 %v2133_v28  ;;  %v2325_v28 = vunpack.c.h.s8.bf16 %v1069_v12 }
 0x1c4   : > { %3203 = vmatpush1.bf16.msra.mxu0 %v2004_v33  ;;  %v7803_v33 = vpack.c.bf16 %v583_v23, %v583_v23 }
 0x1c5   : > { %3244 = vmatpush1.bf16.msra.mxu1 %v2132_v34  ;;  %3204 = vmatprep.subr.bf16.mxu0 %v2013_v35  ;;  %v7805_v34 = vpack.c.bf16 %v585_v24, %v585_v24  ;;  %v2196_v35 = vunpack.c.h.s8.bf16 %v1004_v19  ;;  %v1036_v19 = vld [vmem:[%s7629_s8 + $0xd00] sm:$0xff] }
 0x1c6   : > { %3245 = vmatprep.subr.bf16.mxu1 %v2141_v36  ;;  %v2324_v36 = vunpack.c.h.s8.bf16 %v1068_v20  ;;  %v1100_v20 = vld [vmem:[%s7629_s8 + $0xf00] sm:$0xff]  ;;  %v2252_v23 = vunpack.c.l.s8.bf16 %v1036_v19  ;;  %v2260_v31 = vunpack.c.h.s8.bf16 %v1036_v19 }
 0x1c7   : > { %v2380_v24 = vunpack.c.l.s8.bf16 %v1100_v20  ;;  %v2388_v32 = vunpack.c.h.s8.bf16 %v1100_v20  ;;  %v1132_v19 = vld [vmem:[%s7629_s8 + $0x1000] sm:$0xff] }
 0x1c8   : > { %3205 = vmatpush1.bf16.msra.mxu0 %v2012_v43  ;;  %v1012_v43 = vld [vmem:[%s7629_s8 + $0xc40] sm:$0xff] }
 0x1c9   : > { %3246 = vmatpush1.bf16.msra.mxu1 %v2140_v44  ;;  %3206 = vmatprep.subr.bf16.mxu0 %v2021_v45  ;;  %v1076_v44 = vld [vmem:[%s7629_s8 + $0xe40] sm:$0xff]  ;;  %v2204_v45 = vunpack.c.l.s8.bf16 %v1012_v43 }
 0x1ca   : > { %3247 = vmatprep.subr.bf16.mxu1 %v2149_v46  ;;  %v2332_v46 = vunpack.c.l.s8.bf16 %v1076_v44  ;;  %v1196_v20 = vld [vmem:[%s7629_s8 + $0x1200] sm:$0xff] }
 0x1cc   : > { %3207 = vmatpush1.bf16.msra.mxu0 %v2020_v51  ;;  %v1021_v51 = vld [vmem:[%s7629_s8 + $0xc88] sm:$0xff] }
 0x1cd   : > { %3248 = vmatpush1.bf16.msra.mxu1 %v2148_v52  ;;  %3208 = vmatprep.subr.bf16.mxu0 %v2029_v53  ;;  %v1085_v52 = vld [vmem:[%s7629_s8 + $0xe88] sm:$0xff]  ;;  %v2212_v53 = vunpack.c.h.s8.bf16 %v1012_v43  ;;  %v2221_v55 = vunpack.c.l.s8.bf16 %v1021_v51  ;;  %v2229_v63 = vunpack.c.h.s8.bf16 %v1021_v51 }
 0x1ce   : > { %3249 = vmatprep.subr.bf16.mxu1 %v2157_v54  ;;  %v2340_v54 = vunpack.c.h.s8.bf16 %v1076_v44  ;;  %v2349_v56 = vunpack.c.l.s8.bf16 %v1085_v52  ;;  %v2357_v0 = vunpack.c.h.s8.bf16 %v1085_v52 }
 0x1d0   : > { %3209 = vmatpush1.bf16.msra.mxu0 %v2028_v59  ;;  %v1020_v59 = vld [vmem:[%s7629_s8 + $0xc80] sm:$0xff] }
 0x1d1   : > { %3250 = vmatpush1.bf16.msra.mxu1 %v2156_v60  ;;  %3210 = vmatprep.subr.bf16.mxu0 %v2037_v61  ;;  %v1084_v60 = vld [vmem:[%s7629_s8 + $0xe80] sm:$0xff]  ;;  %v2220_v61 = vunpack.c.l.s8.bf16 %v1020_v59 }
 0x1d2   : > { %3251 = vmatprep.subr.bf16.mxu1 %v2165_v62  ;;  %v2348_v62 = vunpack.c.l.s8.bf16 %v1084_v60 }
 0x1d4   : > { %3211 = vmatpush1.bf16.msra.mxu0 %v2036_v1  ;;  %v1029_v1 = vld [vmem:[%s7629_s8 + $0xcc8] sm:$0xff] }
 0x1d5   : > { %3252 = vmatpush1.bf16.msra.mxu1 %v2164_v2  ;;  %3212 = vmatprep.subr.bf16.mxu0 %v2045_v3  ;;  %v1093_v2 = vld [vmem:[%s7629_s8 + $0xec8] sm:$0xff]  ;;  %v2228_v3 = vunpack.c.h.s8.bf16 %v1020_v59  ;;  %v2237_v5 = vunpack.c.l.s8.bf16 %v1029_v1  ;;  %v2245_v11 = vunpack.c.h.s8.bf16 %v1029_v1 }
 0x1d6   : > { %3253 = vmatprep.subr.bf16.mxu1 %v2173_v4  ;;  %v2356_v4 = vunpack.c.h.s8.bf16 %v1084_v60  ;;  %v2365_v6 = vunpack.c.l.s8.bf16 %v1093_v2  ;;  %v2373_v12 = vunpack.c.h.s8.bf16 %v1093_v2 }
 0x1d8   : > { %3213 = vmatpush1.bf16.msra.mxu0 %v2044_v7  ;;  %v1028_v7 = vld [vmem:[%s7629_s8 + $0xcc0] sm:$0xff] }
 0x1d9   : > { %3254 = vmatpush1.bf16.msra.mxu1 %v2172_v8  ;;  %3214 = vmatprep.subr.bf16.mxu0 %v2053_v9  ;;  %v1092_v8 = vld [vmem:[%s7629_s8 + $0xec0] sm:$0xff]  ;;  %v2236_v9 = vunpack.c.l.s8.bf16 %v1028_v7  ;;  %v2244_v15 = vunpack.c.h.s8.bf16 %v1028_v7 }
 0x1da   : > { %3255 = vmatprep.subr.bf16.mxu1 %v2181_v10  ;;  %v2364_v10 = vunpack.c.l.s8.bf16 %v1092_v8  ;;  %v2372_v16 = vunpack.c.h.s8.bf16 %v1092_v8 }
 0x1dc   : > { %3215 = vmatpush1.bf16.msra.mxu0 %v2052_v13  ;;  %v1037_v13 = vld [vmem:[%s7629_s8 + $0xd08] sm:$0xff] }
 0x1dd   : > { %3256 = vmatpush1.bf16.msra.mxu1 %v2180_v14  ;;  %3266 = vmatprep.subr.bf16.mxu0 %v2189_v17  ;;  %v1101_v14 = vld [vmem:[%s7629_s8 + $0xf08] sm:$0xff]  ;;  %v2253_v17 = vunpack.c.l.s8.bf16 %v1037_v13 }
 0x1de   : > { %3307 = vmatprep.subr.bf16.mxu1 %v2317_v18  ;;  %v2381_v18 = vunpack.c.l.s8.bf16 %v1101_v14 }
 0x1df   : > { %3217 = vmatmul.mubr.bf16.vlgmr.msra.gmra.mrb[8].mxu0 %v7795_v21 }
 0x1e0   : > { %3258 = vmatmul.mubr.bf16.vlgmr.msra.gmra.mrb[8].mxu1 %v7797_v22  ;;  %3267 = vmatpush1.bf16.msra.mxu0 %v2188_v25  ;;  %v2261_v25 = vunpack.c.h.s8.bf16 %v1037_v13 }
 0x1e1   : > { %3308 = vmatpush1.bf16.msra.mxu1 %v2316_v26  ;;  %3268 = vmatprep.subr.bf16.mxu0 %v2197_v27  ;;  %v2389_v26 = vunpack.c.h.s8.bf16 %v1101_v14  ;;  %v1045_v27 = vld [vmem:[%s7629_s8 + $0xd48] sm:$0xff] }
 0x1e2   : > { %3309 = vmatprep.subr.bf16.mxu1 %v2325_v28  ;;  %3298 = vmatprep.mubr.bf16.mxu0 %v7803_v33  ;;  %v1109_v28 = vld [vmem:[%s7629_s8 + $0xf48] sm:$0xff] }
 0x1e3   : > { %3339 = vmatprep.mubr.bf16.mxu1 %v7805_v34 }
 0x1e4   : > { %3269 = vmatpush1.bf16.msra.mxu0 %v2196_v35  ;;  %v2269_v35 = vunpack.c.l.s8.bf16 %v1045_v27 }
 0x1e5   : > { %3310 = vmatpush1.bf16.msra.mxu1 %v2324_v36  ;;  %3270 = vmatprep.subr.bf16.mxu0 %v2205_v39  ;;  %v2397_v36 = vunpack.c.l.s8.bf16 %v1109_v28  ;;  %v1044_v39 = vld [vmem:[%s7629_s8 + $0xd40] sm:$0xff] }
 0x1e6   : > { %3311 = vmatprep.subr.bf16.mxu1 %v2333_v40  ;;  %v1108_v40 = vld [vmem:[%s7629_s8 + $0xf40] sm:$0xff]  ;;  %v2268_v43 = vunpack.c.l.s8.bf16 %v1044_v39  ;;  %v2276_v51 = vunpack.c.h.s8.bf16 %v1044_v39 }
 0x1e7   : > { %v2396_v44 = vunpack.c.l.s8.bf16 %v1108_v40  ;;  %v2404_v52 = vunpack.c.h.s8.bf16 %v1108_v40 }
 0x1e8   : > { %3271 = vmatpush1.bf16.msra.mxu0 %v2204_v45  ;;  %v2277_v45 = vunpack.c.h.s8.bf16 %v1045_v27  ;;  %v2444_v27 = vunpack.c.l.s8.bf16 %v1132_v19 }
 0x1e9   : > { %3312 = vmatpush1.bf16.msra.mxu1 %v2332_v46  ;;  %3272 = vmatprep.subr.bf16.mxu0 %v2213_v49  ;;  %v2405_v46 = vunpack.c.h.s8.bf16 %v1109_v28  ;;  %v1053_v49 = vld [vmem:[%s7629_s8 + $0xd88] sm:$0xff]  ;;  %v2572_v28 = vunpack.c.l.s8.bf16 %v1196_v20 }
 0x1ea   : > { %3313 = vmatprep.subr.bf16.mxu1 %v2341_v50  ;;  %v1117_v50 = vld [vmem:[%s7629_s8 + $0xf88] sm:$0xff] }
 0x1ec   : > { %3273 = vmatpush1.bf16.msra.mxu0 %v2212_v53  ;;  %v2285_v53 = vunpack.c.l.s8.bf16 %v1053_v49 }
 0x1ed   : > { %3314 = vmatpush1.bf16.msra.mxu1 %v2340_v54  ;;  %3274 = vmatprep.subr.bf16.mxu0 %v2221_v55  ;;  %v2413_v54 = vunpack.c.l.s8.bf16 %v1117_v50  ;;  %v1052_v55 = vld [vmem:[%s7629_s8 + $0xd80] sm:$0xff] }
 0x1ee   : > { %3315 = vmatprep.subr.bf16.mxu1 %v2349_v56  ;;  %v1116_v56 = vld [vmem:[%s7629_s8 + $0xf80] sm:$0xff]  ;;  %v2284_v59 = vunpack.c.l.s8.bf16 %v1052_v55  ;;  %v2292_v1 = vunpack.c.h.s8.bf16 %v1052_v55  ;;  %v1149_v55 = vld [vmem:[%s7629_s8 + $0x1088] sm:$0xff] }
 0x1ef   : > { %v2412_v60 = vunpack.c.l.s8.bf16 %v1116_v56  ;;  %v2420_v2 = vunpack.c.h.s8.bf16 %v1116_v56  ;;  %v1213_v56 = vld [vmem:[%s7629_s8 + $0x1288] sm:$0xff] }
 0x1f0   : > { %3275 = vmatpush1.bf16.msra.mxu0 %v2220_v61  ;;  %v2293_v61 = vunpack.c.h.s8.bf16 %v1053_v49  ;;  %v1140_v49 = vld [vmem:[%s7629_s8 + $0x1040] sm:$0xff] }
 0x1f1   : > { %3316 = vmatpush1.bf16.msra.mxu1 %v2348_v62  ;;  %3276 = vmatprep.subr.bf16.mxu0 %v2229_v63  ;;  %v2421_v62 = vunpack.c.h.s8.bf16 %v1117_v50  ;;  %v1061_v63 = vld [vmem:[%s7629_s8 + $0xdc8] sm:$0xff]  ;;  %v1204_v50 = vld [vmem:[%s7629_s8 + $0x1240] sm:$0xff] }
 0x1f2   : > { %3317 = vmatprep.subr.bf16.mxu1 %v2357_v0  ;;  %v1125_v0 = vld [vmem:[%s7629_s8 + $0xfc8] sm:$0xff] }
 0x1f4   : > { %3277 = vmatpush1.bf16.msra.mxu0 %v2228_v3  ;;  %v2301_v3 = vunpack.c.l.s8.bf16 %v1061_v63 }
 0x1f5   : > { %3318 = vmatpush1.bf16.msra.mxu1 %v2356_v4  ;;  %3278 = vmatprep.subr.bf16.mxu0 %v2237_v5  ;;  %v2429_v4 = vunpack.c.l.s8.bf16 %v1125_v0  ;;  %v1060_v5 = vld [vmem:[%s7629_s8 + $0xdc0] sm:$0xff] }
 0x1f6   : > { %3319 = vmatprep.subr.bf16.mxu1 %v2365_v6  ;;  %v1124_v6 = vld [vmem:[%s7629_s8 + $0xfc0] sm:$0xff]  ;;  %v2300_v7 = vunpack.c.l.s8.bf16 %v1060_v5  ;;  %v2308_v13 = vunpack.c.h.s8.bf16 %v1060_v5  ;;  %v1157_v5 = vld [vmem:[%s7629_s8 + $0x10c8] sm:$0xff] }
 0x1f7   : > { %v2428_v8 = vunpack.c.l.s8.bf16 %v1124_v6  ;;  %v2436_v14 = vunpack.c.h.s8.bf16 %v1124_v6  ;;  %v1221_v6 = vld [vmem:[%s7629_s8 + $0x12c8] sm:$0xff] }
 0x1f8   : > { %3279 = vmatpush1.bf16.msra.mxu0 %v2236_v9  ;;  %v2309_v9 = vunpack.c.h.s8.bf16 %v1061_v63  ;;  %v1148_v63 = vld [vmem:[%s7629_s8 + $0x1080] sm:$0xff] }
 0x1f9   : > { %3320 = vmatpush1.bf16.msra.mxu1 %v2364_v10  ;;  %3280 = vmatprep.subr.bf16.mxu0 %v2245_v11  ;;  %v2437_v10 = vunpack.c.h.s8.bf16 %v1125_v0  ;;  %v1133_v11 = vld [vmem:[%s7629_s8 + $0x1008] sm:$0xff]  ;;  %v1212_v0 = vld [vmem:[%s7629_s8 + $0x1280] sm:$0xff] }
 0x1fa   : > { %3321 = vmatprep.subr.bf16.mxu1 %v2373_v12  ;;  %v1197_v12 = vld [vmem:[%s7629_s8 + $0x1208] sm:$0xff] }
 0x1fc   : > { %3281 = vmatpush1.bf16.msra.mxu0 %v2244_v15  ;;  %v582_v15 = vld [vmem:[%s7622_s21 + $0x60] sm:$0xff] }
 0x1fd   : > { %3322 = vmatpush1.bf16.msra.mxu1 %v2372_v16  ;;  %3282 = vmatprep.subr.bf16.mxu0 %v2253_v17  ;;  %v584_v16 = vld [vmem:[%s7622_s21 + $0x70] sm:$0xff]  ;;  %v2445_v17 = vunpack.c.l.s8.bf16 %v1133_v11 }
 0x1fe   : > { %3323 = vmatprep.subr.bf16.mxu1 %v2381_v18  ;;  %v2573_v18 = vunpack.c.l.s8.bf16 %v1197_v12 }
 0x200   : > { %3283 = vmatpush1.bf16.msra.mxu0 %v2252_v23  ;;  %v7843_v23 = vpack.c.bf16 %v582_v15, %v582_v15 }
 0x201   : > { %3324 = vmatpush1.bf16.msra.mxu1 %v2380_v24  ;;  %3284 = vmatprep.subr.bf16.mxu0 %v2261_v25  ;;  %v7845_v24 = vpack.c.bf16 %v584_v16, %v584_v16  ;;  %v587_v25 = vld [vmem:[%s7622_s21 + $0x88] sm:$0xff] }
 0x202   : > { %3325 = vmatprep.subr.bf16.mxu1 %v2389_v26  ;;  %v589_v26 = vld [vmem:[%s7622_s21 + $0x98] sm:$0xff]  ;;  %v7851_v39 = vpack.c.bf16 %v587_v25, %v587_v25 }
 0x203   : > { %v7853_v40 = vpack.c.bf16 %v589_v26, %v589_v26 }
 0x204   : > { %3285 = vmatpush1.bf16.msra.mxu0 %v2260_v31  ;;  %v2453_v31 = vunpack.c.h.s8.bf16 %v1133_v11  ;;  %v1156_v11 = vld [vmem:[%s7629_s8 + $0x10c0] sm:$0xff] }
 0x205   : > { %3326 = vmatpush1.bf16.msra.mxu1 %v2388_v32  ;;  %3286 = vmatprep.subr.bf16.mxu0 %v2269_v35  ;;  %v2581_v32 = vunpack.c.h.s8.bf16 %v1197_v12  ;;  %v1141_v35 = vld [vmem:[%s7629_s8 + $0x1048] sm:$0xff]  ;;  %v1220_v12 = vld [vmem:[%s7629_s8 + $0x12c0] sm:$0xff]  ;;  %v2492_v25 = vunpack.c.l.s8.bf16 %v1156_v11 }
 0x206   : > { %3327 = vmatprep.subr.bf16.mxu1 %v2397_v36  ;;  %v1205_v36 = vld [vmem:[%s7629_s8 + $0x1248] sm:$0xff]  ;;  %v2620_v26 = vunpack.c.l.s8.bf16 %v1220_v12 }
 0x208   : > { %3287 = vmatpush1.bf16.msra.mxu0 %v2268_v43  ;;  %v2452_v43 = vunpack.c.h.s8.bf16 %v1132_v19 }
 0x209   : > { %3328 = vmatpush1.bf16.msra.mxu1 %v2396_v44  ;;  %3288 = vmatprep.subr.bf16.mxu0 %v2277_v45  ;;  %v2580_v44 = vunpack.c.h.s8.bf16 %v1196_v20  ;;  %v2461_v45 = vunpack.c.l.s8.bf16 %v1141_v35 }
 0x20a   : > { %3329 = vmatprep.subr.bf16.mxu1 %v2405_v46  ;;  %v2589_v46 = vunpack.c.l.s8.bf16 %v1205_v36 }
 0x20c   : > { %3289 = vmatpush1.bf16.msra.mxu0 %v2276_v51  ;;  %v2460_v51 = vunpack.c.l.s8.bf16 %v1140_v49 }
 0x20d   : > { %3330 = vmatpush1.bf16.msra.mxu1 %v2404_v52  ;;  %3290 = vmatprep.subr.bf16.mxu0 %v2285_v53  ;;  %v2588_v52 = vunpack.c.l.s8.bf16 %v1204_v50  ;;  %v2469_v53 = vunpack.c.h.s8.bf16 %v1141_v35  ;;  %v1165_v35 = vld [vmem:[%s7629_s8 + $0x1108] sm:$0xff] }
 0x20e   : > { %3331 = vmatprep.subr.bf16.mxu1 %v2413_v54  ;;  %v2597_v54 = vunpack.c.h.s8.bf16 %v1205_v36  ;;  %v1229_v36 = vld [vmem:[%s7629_s8 + $0x1308] sm:$0xff] }
 0x210   : > { %3291 = vmatpush1.bf16.msra.mxu0 %v2284_v59  ;;  %v2468_v59 = vunpack.c.h.s8.bf16 %v1140_v49  ;;  %v1164_v49 = vld [vmem:[%s7629_s8 + $0x1100] sm:$0xff] }
 0x211   : > { %3332 = vmatpush1.bf16.msra.mxu1 %v2412_v60  ;;  %3292 = vmatprep.subr.bf16.mxu0 %v2293_v61  ;;  %v2596_v60 = vunpack.c.h.s8.bf16 %v1204_v50  ;;  %v2477_v61 = vunpack.c.l.s8.bf16 %v1149_v55  ;;  %v1228_v50 = vld [vmem:[%s7629_s8 + $0x1300] sm:$0xff] }
 0x212   : > { %3333 = vmatprep.subr.bf16.mxu1 %v2421_v62  ;;  %v2605_v62 = vunpack.c.l.s8.bf16 %v1213_v56 }
 0x214   : > { %3293 = vmatpush1.bf16.msra.mxu0 %v2292_v1  ;;  %v2476_v1 = vunpack.c.l.s8.bf16 %v1148_v63 }
 0x215   : > { %3334 = vmatpush1.bf16.msra.mxu1 %v2420_v2  ;;  %3294 = vmatprep.subr.bf16.mxu0 %v2301_v3  ;;  %v2604_v2 = vunpack.c.l.s8.bf16 %v1212_v0  ;;  %v2485_v3 = vunpack.c.h.s8.bf16 %v1149_v55  ;;  %v1173_v55 = vld [vmem:[%s7629_s8 + $0x1148] sm:$0xff] }
 0x216   : > { %3335 = vmatprep.subr.bf16.mxu1 %v2429_v4  ;;  %v2613_v4 = vunpack.c.h.s8.bf16 %v1213_v56  ;;  %v1237_v56 = vld [vmem:[%s7629_s8 + $0x1348] sm:$0xff] }
 0x218   : > { %3295 = vmatpush1.bf16.msra.mxu0 %v2300_v7  ;;  %v2484_v7 = vunpack.c.h.s8.bf16 %v1148_v63  ;;  %v1172_v63 = vld [vmem:[%s7629_s8 + $0x1140] sm:$0xff] }
 0x219   : > { %3336 = vmatpush1.bf16.msra.mxu1 %v2428_v8  ;;  %3296 = vmatprep.subr.bf16.mxu0 %v2309_v9  ;;  %v2612_v8 = vunpack.c.h.s8.bf16 %v1212_v0  ;;  %v2493_v9 = vunpack.c.l.s8.bf16 %v1157_v5  ;;  %v1236_v0 = vld [vmem:[%s7629_s8 + $0x1340] sm:$0xff] }
 0x21a   : > { %3337 = vmatprep.subr.bf16.mxu1 %v2437_v10  ;;  %v2621_v10 = vunpack.c.l.s8.bf16 %v1221_v6 }
 0x21c   : > { %3297 = vmatpush1.bf16.msra.mxu0 %v2308_v13 }
 0x21d   : > { %3338 = vmatpush1.bf16.msra.mxu1 %v2436_v14  ;;  %3348 = vmatprep.subr.bf16.mxu0 %v2445_v17 }
 0x21e   : > { %3389 = vmatprep.subr.bf16.mxu1 %v2573_v18 }
 0x21f   : > { %3299 = vmatmul.mubr.bf16.vlgmr.msra.gmra.mrb[12].mxu0 %v7843_v23 }
 0x220   : > { %3340 = vmatmul.mubr.bf16.vlgmr.msra.gmra.mrb[12].mxu1 %v7845_v24  ;;  %3349 = vmatpush1.bf16.msra.mxu0 %v2444_v27 }
 0x221   : > { %3390 = vmatpush1.bf16.msra.mxu1 %v2572_v28  ;;  %3350 = vmatprep.subr.bf16.mxu0 %v2453_v31  ;;  %v2501_v31 = vunpack.c.h.s8.bf16 %v1157_v5  ;;  %v1181_v5 = vld [vmem:[%s7629_s8 + $0x1188] sm:$0xff] }
 0x222   : > { %3391 = vmatprep.subr.bf16.mxu1 %v2581_v32  ;;  %3380 = vmatprep.mubr.bf16.mxu0 %v7851_v39  ;;  %v2629_v32 = vunpack.c.h.s8.bf16 %v1221_v6  ;;  %v1245_v6 = vld [vmem:[%s7629_s8 + $0x1388] sm:$0xff] }
 0x223   : > { %3421 = vmatprep.mubr.bf16.mxu1 %v7853_v40 }
 0x224   : > { %3351 = vmatpush1.bf16.msra.mxu0 %v2452_v43  ;;  %v2500_v43 = vunpack.c.h.s8.bf16 %v1156_v11  ;;  %v1180_v11 = vld [vmem:[%s7629_s8 + $0x1180] sm:$0xff] }
 0x225   : > { %3392 = vmatpush1.bf16.msra.mxu1 %v2580_v44  ;;  %3352 = vmatprep.subr.bf16.mxu0 %v2461_v45  ;;  %v2628_v44 = vunpack.c.h.s8.bf16 %v1220_v12  ;;  %v2509_v45 = vunpack.c.l.s8.bf16 %v1165_v35  ;;  %v1244_v12 = vld [vmem:[%s7629_s8 + $0x1380] sm:$0xff] }
 0x226   : > { %3393 = vmatprep.subr.bf16.mxu1 %v2589_v46  ;;  %v2637_v46 = vunpack.c.l.s8.bf16 %v1229_v36 }
 0x228   : > { %3353 = vmatpush1.bf16.msra.mxu0 %v2460_v51  ;;  %v2508_v51 = vunpack.c.l.s8.bf16 %v1164_v49 }
 0x229   : > { %3394 = vmatpush1.bf16.msra.mxu1 %v2588_v52  ;;  %3354 = vmatprep.subr.bf16.mxu0 %v2469_v53  ;;  %v2636_v52 = vunpack.c.l.s8.bf16 %v1228_v50  ;;  %v2517_v53 = vunpack.c.h.s8.bf16 %v1165_v35 }
 0x22a   : > { %3395 = vmatprep.subr.bf16.mxu1 %v2597_v54  ;;  %v2645_v54 = vunpack.c.h.s8.bf16 %v1229_v36 }
 0x22c   : > { %3355 = vmatpush1.bf16.msra.mxu0 %v2468_v59  ;;  %v2516_v59 = vunpack.c.h.s8.bf16 %v1164_v49 }
 0x22d   : > { %3396 = vmatpush1.bf16.msra.mxu1 %v2596_v60  ;;  %3356 = vmatprep.subr.bf16.mxu0 %v2477_v61  ;;  %v2644_v60 = vunpack.c.h.s8.bf16 %v1228_v50  ;;  %v2525_v61 = vunpack.c.l.s8.bf16 %v1173_v55 }
 0x22e   : > { %3397 = vmatprep.subr.bf16.mxu1 %v2605_v62  ;;  %v2653_v62 = vunpack.c.l.s8.bf16 %v1237_v56 }
 0x230   : > { %3357 = vmatpush1.bf16.msra.mxu0 %v2476_v1  ;;  %v2524_v1 = vunpack.c.l.s8.bf16 %v1172_v63 }
 0x231   : > { %3398 = vmatpush1.bf16.msra.mxu1 %v2604_v2  ;;  %3358 = vmatprep.subr.bf16.mxu0 %v2485_v3  ;;  %v2652_v2 = vunpack.c.l.s8.bf16 %v1236_v0  ;;  %v2533_v3 = vunpack.c.h.s8.bf16 %v1173_v55  ;;  %v1260_v55 = vld [vmem:[%s7629_s8 + $0x1400] sm:$0xff] }
 0x232   : > { %3399 = vmatprep.subr.bf16.mxu1 %v2613_v4  ;;  %v3054_v13 = vpop.f32.mrb[0].mxu0  ;;  %v2661_v4 = vunpack.c.h.s8.bf16 %v1237_v56  ;;  %v1324_v56 = vld [vmem:[%s7629_s8 + $0x1600] sm:$0xff] }
 0x233   : > { %v3095_v14 = vpop.f32.mrb[0].mxu1  ;;  %v3056_v16 = vpop.f32.mrb[1].mxu0 }
 0x234   : > { %v7869_v15 = vadd.f32 %v3095_v14, %v3054_v13  ;;  %v3097_v17 = vpop.f32.mrb[1].mxu1  ;;  %v3058_v19 = vpop.f32.mrb[2].mxu0  ;;  %3359 = vmatpush1.bf16.msra.mxu0 %v2484_v7  ;;  %v2532_v7 = vunpack.c.h.s8.bf16 %v1172_v63  ;;  %v2540_v13 = vunpack.c.l.s8.bf16 %v1180_v11  ;;  %v2668_v14 = vunpack.c.l.s8.bf16 %v1244_v12 }
 0x235   : > { %v7871_v18 = vadd.f32 %v3097_v17, %v3056_v16  ;;  %v3099_v20 = vpop.f32.mrb[2].mxu1  ;;  %3400 = vmatpush1.bf16.msra.mxu1 %v2612_v8  ;;  %v3059_v27 = vpop.f32.mrb[3].mxu0  ;;  %3360 = vmatprep.subr.bf16.mxu0 %v2493_v9  ;;  %v2660_v8 = vunpack.c.h.s8.bf16 %v1236_v0  ;;  %v2541_v9 = vunpack.c.l.s8.bf16 %v1181_v5  ;;  %v2549_v16 = vunpack.c.h.s8.bf16 %v1181_v5  ;;  %v1189_v19 = vld [vmem:[%s7629_s8 + $0x11c8] sm:$0xff] }
 0x236   : > { %v3100_v28 = vpop.f32.mrb[3].mxu1  ;;  %3401 = vmatprep.subr.bf16.mxu1 %v2621_v10  ;;  %v2669_v10 = vunpack.c.l.s8.bf16 %v1245_v6  ;;  %v2677_v17 = vunpack.c.h.s8.bf16 %v1245_v6  ;;  %v1253_v20 = vld [vmem:[%s7629_s8 + $0x13c8] sm:$0xff]  ;;  %v2557_v27 = vunpack.c.l.s8.bf16 %v1189_v19  ;;  %v2700_v63 = vunpack.c.l.s8.bf16 %v1260_v55 }
 0x237   : > { %v2685_v28 = vunpack.c.l.s8.bf16 %v1253_v20  ;;  %v2828_v0 = vunpack.c.l.s8.bf16 %v1324_v56 }
 0x238   : > { %3361 = vmatpush1.bf16.msra.mxu0 %v2492_v25  ;;  %v2548_v25 = vunpack.c.h.s8.bf16 %v1180_v11  ;;  %v1268_v11 = vld [vmem:[%s7629_s8 + $0x1440] sm:$0xff] }
 0x239   : > { %3402 = vmatpush1.bf16.msra.mxu1 %v2620_v26  ;;  %3362 = vmatprep.subr.bf16.mxu0 %v2501_v31  ;;  %v2676_v26 = vunpack.c.h.s8.bf16 %v1244_v12  ;;  %v1188_v31 = vld [vmem:[%s7629_s8 + $0x11c0] sm:$0xff] }
 0x23a   : > { %3403 = vmatprep.subr.bf16.mxu1 %v2629_v32  ;;  %v1252_v32 = vld [vmem:[%s7629_s8 + $0x13c0] sm:$0xff]  ;;  %v2556_v35 = vunpack.c.l.s8.bf16 %v1188_v31  ;;  %v2564_v49 = vunpack.c.h.s8.bf16 %v1188_v31 }
 0x23b   : > { %v2684_v36 = vunpack.c.l.s8.bf16 %v1252_v32  ;;  %v2692_v50 = vunpack.c.h.s8.bf16 %v1252_v32  ;;  %v1332_v12 = vld [vmem:[%s7629_s8 + $0x1640] sm:$0xff] }
 0x23c   : > { %3363 = vmatpush1.bf16.msra.mxu0 %v2500_v43  ;;  %v2565_v43 = vunpack.c.h.s8.bf16 %v1189_v19  ;;  %v1277_v19 = vld [vmem:[%s7629_s8 + $0x1488] sm:$0xff]  ;;  %v1276_v31 = vld [vmem:[%s7629_s8 + $0x1480] sm:$0xff] }
 0x23d   : > { %3404 = vmatpush1.bf16.msra.mxu1 %v2628_v44  ;;  %3364 = vmatprep.subr.bf16.mxu0 %v2509_v45  ;;  %v2693_v44 = vunpack.c.h.s8.bf16 %v1253_v20  ;;  %v1261_v45 = vld [vmem:[%s7629_s8 + $0x1408] sm:$0xff]  ;;  %v1340_v32 = vld [vmem:[%s7629_s8 + $0x1680] sm:$0xff] }
 0x23e   : > { %3405 = vmatprep.subr.bf16.mxu1 %v2637_v46  ;;  %v1325_v46 = vld [vmem:[%s7629_s8 + $0x1608] sm:$0xff] }
 0x23f   : > { %v1341_v20 = vld [vmem:[%s7629_s8 + $0x1688] sm:$0xff] }
 0x240   : > { %3365 = vmatpush1.bf16.msra.mxu0 %v2508_v51  ;;  %v586_v51 = vld [vmem:[%s7622_s21 + $0x80] sm:$0xff] }
 0x241   : > { %3406 = vmatpush1.bf16.msra.mxu1 %v2636_v52  ;;  %3366 = vmatprep.subr.bf16.mxu0 %v2517_v53  ;;  %v588_v52 = vld [vmem:[%s7622_s21 + $0x90] sm:$0xff]  ;;  %v2701_v53 = vunpack.c.l.s8.bf16 %v1261_v45 }
 0x242   : > { %3407 = vmatprep.subr.bf16.mxu1 %v2645_v54  ;;  %v2829_v54 = vunpack.c.l.s8.bf16 %v1325_v46 }
 0x244   : > { %3367 = vmatpush1.bf16.msra.mxu0 %v2516_v59  ;;  %v7895_v59 = vpack.c.bf16 %v586_v51, %v586_v51 }
 0x245   : > { %3408 = vmatpush1.bf16.msra.mxu1 %v2644_v60  ;;  %3368 = vmatprep.subr.bf16.mxu0 %v2525_v61  ;;  %v7897_v60 = vpack.c.bf16 %v588_v52, %v588_v52  ;;  %v591_v61 = vld [vmem:[%s7622_s21 + $0xa8] sm:$0xff] }
 0x246   : > { %3409 = vmatprep.subr.bf16.mxu1 %v2653_v62  ;;  %v593_v62 = vld [vmem:[%s7622_s21 + $0xb8] sm:$0xff]  ;;  %v7903_v5 = vpack.c.bf16 %v591_v61, %v591_v61 }
 0x247   : > { %v7905_v6 = vpack.c.bf16 %v593_v62, %v593_v62 }
 0x248   : > { %3369 = vmatpush1.bf16.msra.mxu0 %v2524_v1  ;;  %v2709_v1 = vunpack.c.h.s8.bf16 %v1261_v45  ;;  %v1285_v45 = vld [vmem:[%s7629_s8 + $0x14c8] sm:$0xff] }
 0x249   : > { %3410 = vmatpush1.bf16.msra.mxu1 %v2652_v2  ;;  %3370 = vmatprep.subr.bf16.mxu0 %v2533_v3  ;;  %v2837_v2 = vunpack.c.h.s8.bf16 %v1325_v46  ;;  %v1269_v3 = vld [vmem:[%s7629_s8 + $0x1448] sm:$0xff]  ;;  %v2749_v51 = vunpack.c.l.s8.bf16 %v1285_v45 }
 0x24a   : > { %3411 = vmatprep.subr.bf16.mxu1 %v2661_v4  ;;  %v1333_v4 = vld [vmem:[%s7629_s8 + $0x1648] sm:$0xff] }
 0x24b   : > { %v1349_v46 = vld [vmem:[%s7629_s8 + $0x16c8] sm:$0xff] }
 0x24c   : > { %3371 = vmatpush1.bf16.msra.mxu0 %v2532_v7  ;;  %v2708_v7 = vunpack.c.h.s8.bf16 %v1260_v55  ;;  %v2877_v52 = vunpack.c.l.s8.bf16 %v1349_v46 }
 0x24d   : > { %3412 = vmatpush1.bf16.msra.mxu1 %v2660_v8  ;;  %3372 = vmatprep.subr.bf16.mxu0 %v2541_v9  ;;  %v2836_v8 = vunpack.c.h.s8.bf16 %v1324_v56  ;;  %v2717_v9 = vunpack.c.l.s8.bf16 %v1269_v3 }
 0x24e   : > { %3413 = vmatprep.subr.bf16.mxu1 %v2669_v10  ;;  %v2845_v10 = vunpack.c.l.s8.bf16 %v1333_v4 }
 0x250   : > { %3373 = vmatpush1.bf16.msra.mxu0 %v2540_v13  ;;  %v2716_v13 = vunpack.c.l.s8.bf16 %v1268_v11 }
 0x251   : > { %3414 = vmatpush1.bf16.msra.mxu1 %v2668_v14  ;;  %3374 = vmatprep.subr.bf16.mxu0 %v2549_v16  ;;  %v2844_v14 = vunpack.c.l.s8.bf16 %v1332_v12  ;;  %v2725_v16 = vunpack.c.h.s8.bf16 %v1269_v3 }
 0x252   : > { %3415 = vmatprep.subr.bf16.mxu1 %v2677_v17  ;;  %v2853_v17 = vunpack.c.h.s8.bf16 %v1333_v4 }
 0x254   : > { %3375 = vmatpush1.bf16.msra.mxu0 %v2548_v25  ;;  %v2724_v25 = vunpack.c.h.s8.bf16 %v1268_v11 }
 0x255   : > { %3416 = vmatpush1.bf16.msra.mxu1 %v2676_v26  ;;  %3376 = vmatprep.subr.bf16.mxu0 %v2557_v27  ;;  %v2852_v26 = vunpack.c.h.s8.bf16 %v1332_v12  ;;  %v2733_v27 = vunpack.c.l.s8.bf16 %v1277_v19  ;;  %v1357_v12 = vld [vmem:[%s7629_s8 + $0x1708] sm:$0xff] }
 0x256   : > { %3417 = vmatprep.subr.bf16.mxu1 %v2685_v28  ;;  %v2861_v28 = vunpack.c.l.s8.bf16 %v1341_v20 }
 0x258   : > { %3377 = vmatpush1.bf16.msra.mxu0 %v2556_v35  ;;  %v2732_v35 = vunpack.c.l.s8.bf16 %v1276_v31 }
 0x259   : > { %3418 = vmatpush1.bf16.msra.mxu1 %v2684_v36  ;;  %3378 = vmatprep.subr.bf16.mxu0 %v2565_v43  ;;  %v2860_v36 = vunpack.c.l.s8.bf16 %v1340_v32  ;;  %v2741_v43 = vunpack.c.h.s8.bf16 %v1277_v19  ;;  %v1292_v19 = vld [vmem:[%s7629_s8 + $0x1500] sm:$0xff] }
 0x25a   : > { %3419 = vmatprep.subr.bf16.mxu1 %v2693_v44  ;;  %v2869_v44 = vunpack.c.h.s8.bf16 %v1341_v20  ;;  %v1356_v20 = vld [vmem:[%s7629_s8 + $0x1700] sm:$0xff] }
 0x25c   : > { %3379 = vmatpush1.bf16.msra.mxu0 %v2564_v49  ;;  %v2740_v49 = vunpack.c.h.s8.bf16 %v1276_v31  ;;  %v1301_v31 = vld [vmem:[%s7629_s8 + $0x1548] sm:$0xff] }
 0x25d   : > { %3420 = vmatpush1.bf16.msra.mxu1 %v2692_v50  ;;  %3430 = vmatprep.subr.bf16.mxu0 %v2701_v53  ;;  %v2868_v50 = vunpack.c.h.s8.bf16 %v1340_v32  ;;  %v1284_v53 = vld [vmem:[%s7629_s8 + $0x14c0] sm:$0xff]  ;;  %v1365_v32 = vld [vmem:[%s7629_s8 + $0x1748] sm:$0xff] }
 0x25e   : > { %3471 = vmatprep.subr.bf16.mxu1 %v2829_v54  ;;  %v1348_v54 = vld [vmem:[%s7629_s8 + $0x16c0] sm:$0xff]  ;;  %v2748_v3 = vunpack.c.l.s8.bf16 %v1284_v53 }
 0x25f   : > { %3381 = vmatmul.mubr.bf16.vlgmr.msra.gmra.mrb[16].mxu0 %v7895_v59  ;;  %v2876_v4 = vunpack.c.l.s8.bf16 %v1348_v54 }
 0x260   : > { %3422 = vmatmul.mubr.bf16.vlgmr.msra.gmra.mrb[16].mxu1 %v7897_v60  ;;  %3431 = vmatpush1.bf16.msra.mxu0 %v2700_v63 }
 0x261   : > { %3472 = vmatpush1.bf16.msra.mxu1 %v2828_v0  ;;  %3432 = vmatprep.subr.bf16.mxu0 %v2709_v1 }
 0x262   : > { %3473 = vmatprep.subr.bf16.mxu1 %v2837_v2  ;;  %3462 = vmatprep.mubr.bf16.mxu0 %v7903_v5 }
 0x263   : > { %3503 = vmatprep.mubr.bf16.mxu1 %v7905_v6 }
 0x264   : > { %3433 = vmatpush1.bf16.msra.mxu0 %v2708_v7 }
 0x265   : > { %3474 = vmatpush1.bf16.msra.mxu1 %v2836_v8  ;;  %3434 = vmatprep.subr.bf16.mxu0 %v2717_v9 }
 0x266   : > { %3475 = vmatprep.subr.bf16.mxu1 %v2845_v10  ;;  %v2885_v10 = vunpack.c.h.s8.bf16 %v1349_v46  ;;  %v1364_v46 = vld [vmem:[%s7629_s8 + $0x1740] sm:$0xff] }
 0x268   : > { %3435 = vmatpush1.bf16.msra.mxu0 %v2716_v13  ;;  %v2756_v13 = vunpack.c.h.s8.bf16 %v1284_v53  ;;  %v1309_v53 = vld [vmem:[%s7629_s8 + $0x1588] sm:$0xff] }
 0x269   : > { %3476 = vmatpush1.bf16.msra.mxu1 %v2844_v14  ;;  %3436 = vmatprep.subr.bf16.mxu0 %v2725_v16  ;;  %v2884_v14 = vunpack.c.h.s8.bf16 %v1348_v54  ;;  %v1373_v54 = vld [vmem:[%s7629_s8 + $0x1788] sm:$0xff] }
 0x26a   : > { %3477 = vmatprep.subr.bf16.mxu1 %v2853_v17  ;;  %v2893_v17 = vunpack.c.l.s8.bf16 %v1357_v12 }
 0x26c   : > { %3437 = vmatpush1.bf16.msra.mxu0 %v2724_v25  ;;  %v2764_v25 = vunpack.c.l.s8.bf16 %v1292_v19 }
 0x26d   : > { %3478 = vmatpush1.bf16.msra.mxu1 %v2852_v26  ;;  %3438 = vmatprep.subr.bf16.mxu0 %v2733_v27  ;;  %v2892_v26 = vunpack.c.l.s8.bf16 %v1356_v20 }
 0x26e   : > { %3479 = vmatprep.subr.bf16.mxu1 %v2861_v28  ;;  %v2901_v28 = vunpack.c.h.s8.bf16 %v1357_v12 }
 0x270   : > { %3439 = vmatpush1.bf16.msra.mxu0 %v2732_v35  ;;  %v2772_v35 = vunpack.c.h.s8.bf16 %v1292_v19 }
 0x271   : > { %3480 = vmatpush1.bf16.msra.mxu1 %v2860_v36  ;;  %3440 = vmatprep.subr.bf16.mxu0 %v2741_v43  ;;  %v2900_v36 = vunpack.c.h.s8.bf16 %v1356_v20  ;;  %v2781_v43 = vunpack.c.l.s8.bf16 %v1301_v31 }
 0x272   : > { %3481 = vmatprep.subr.bf16.mxu1 %v2869_v44  ;;  %v3136_v55 = vpop.f32.mrb[4].mxu0  ;;  %v2909_v44 = vunpack.c.l.s8.bf16 %v1365_v32 }
 0x273   : > { %v3177_v56 = vpop.f32.mrb[4].mxu1  ;;  %v3137_v61 = vadd.f32 %v3136_v55, %v7869_v15  ;;  %v3138_v62 = vpop.f32.mrb[5].mxu0  ;;  %v2757_v15 = vunpack.c.h.s8.bf16 %v1285_v45  ;;  %v1300_v45 = vld [vmem:[%s7629_s8 + $0x1540] sm:$0xff] }
 0x274   : > { %v3179_v63 = vpop.f32.mrb[5].mxu1  ;;  %v3139_v0 = vadd.f32 %v3138_v62, %v7871_v18  ;;  %v3140_v1 = vpop.f32.mrb[6].mxu0  ;;  %3441 = vmatpush1.bf16.msra.mxu0 %v2740_v49  ;;  %v1293_v18 = vld [vmem:[%s7629_s8 + $0x1508] sm:$0xff]  ;;  %v2780_v49 = vunpack.c.l.s8.bf16 %v1300_v45  ;;  %v2788_v55 = vunpack.c.h.s8.bf16 %v1300_v45  ;;  %v2925_v62 = vunpack.c.l.s8.bf16 %v1373_v54 }
 0x275   : > { %v3181_v2 = vpop.f32.mrb[6].mxu1  ;;  %3482 = vmatpush1.bf16.msra.mxu1 %v2868_v50  ;;  %v7923_v7 = vadd.f32 %v3177_v56, %v3137_v61  ;;  %v3141_v8 = vpop.f32.mrb[7].mxu0  ;;  %3442 = vmatprep.subr.bf16.mxu0 %v2749_v51  ;;  %v2765_v16 = vunpack.c.l.s8.bf16 %v1293_v18  ;;  %v2773_v27 = vunpack.c.h.s8.bf16 %v1293_v18  ;;  %v2908_v50 = vunpack.c.l.s8.bf16 %v1364_v46 }
 0x276   : > { %v3182_v9 = vpop.f32.mrb[7].mxu1  ;;  %3483 = vmatprep.subr.bf16.mxu1 %v2877_v52  ;;  %v7925_v11 = vadd.f32 %v3179_v63, %v3139_v0  ;;  %v2789_v51 = vunpack.c.h.s8.bf16 %v1301_v31  ;;  %v2917_v52 = vunpack.c.h.s8.bf16 %v1365_v32  ;;  %v2916_v56 = vunpack.c.h.s8.bf16 %v1364_v46  ;;  %v1308_v63 = vld [vmem:[%s7629_s8 + $0x1580] sm:$0xff]  ;;  %v1317_v8 = vld [vmem:[%s7629_s8 + $0x15c8] sm:$0xff]  ;;  %v590_v31 = vld [vmem:[%s7622_s21 + $0xa0] sm:$0xff] }
 0x277   : > { %v2797_v61 = vunpack.c.l.s8.bf16 %v1309_v53  ;;  %v1372_v0 = vld [vmem:[%s7629_s8 + $0x1780] sm:$0xff]  ;;  %v2796_v1 = vunpack.c.l.s8.bf16 %v1308_v63  ;;  %v1381_v9 = vld [vmem:[%s7629_s8 + $0x17c8] sm:$0xff]  ;;  %v2813_v18 = vunpack.c.l.s8.bf16 %v1317_v8  ;;  %v2821_v19 = vunpack.c.h.s8.bf16 %v1317_v8 }
 0x278   : > { %3443 = vmatpush1.bf16.msra.mxu0 %v2748_v3  ;;  %v2924_v2 = vunpack.c.l.s8.bf16 %v1372_v0  ;;  %v2805_v3 = vunpack.c.h.s8.bf16 %v1309_v53  ;;  %v2941_v12 = vunpack.c.l.s8.bf16 %v1381_v9  ;;  %v2949_v20 = vunpack.c.h.s8.bf16 %v1381_v9  ;;  %v592_v32 = vld [vmem:[%s7622_s21 + $0xb0] sm:$0xff] }
 0x279   : > { %3484 = vmatpush1.bf16.msra.mxu1 %v2876_v4  ;;  %3444 = vmatprep.subr.bf16.mxu0 %v2757_v15  ;;  %v2933_v4 = vunpack.c.h.s8.bf16 %v1373_v54  ;;  %v2804_v15 = vunpack.c.h.s8.bf16 %v1308_v63  ;;  %v7949_v45 = vpack.c.bf16 %v590_v31, %v590_v31  ;;  %v7951_v46 = vpack.c.bf16 %v592_v32, %v592_v32  ;;  %v1397_v53 = vld [vmem:[%s7629_s8 + $0x1848] sm:$0xff]  ;;  %v631_v54 = vld [vmem:[%s7629_s8 + $0x58] sm:$0xff]  ;;  %v1396_v63 = vld [vmem:[%s7629_s8 + $0x1840] sm:$0xff] }
 0x27a   : > { %3485 = vmatprep.subr.bf16.mxu1 %v2885_v10  ;;  %v2932_v10 = vunpack.c.h.s8.bf16 %v1372_v0  ;;  %v630_v0 = vld [vmem:[%s7629_s8 + $0x50] sm:$0xff]  ;;  %v1447_v8 = vunpack.c.h.s8.bf16 %v631_v54  ;;  %v1405_v9 = vld [vmem:[%s7629_s8 + $0x1888] sm:$0xff] }
 0x27c   : > { %3445 = vmatpush1.bf16.msra.mxu0 %v2756_v13  ;;  %v1316_v13 = vld [vmem:[%s7629_s8 + $0x15c0] sm:$0xff] }
 0x27d   : > { %3486 = vmatpush1.bf16.msra.mxu1 %v2884_v14  ;;  %3446 = vmatprep.subr.bf16.mxu0 %v2765_v16  ;;  %v1380_v14 = vld [vmem:[%s7629_s8 + $0x17c0] sm:$0xff]  ;;  %v2812_v16 = vunpack.c.l.s8.bf16 %v1316_v13 }
 0x27e   : > { %3487 = vmatprep.subr.bf16.mxu1 %v2893_v17  ;;  %v2940_v17 = vunpack.c.l.s8.bf16 %v1380_v14 }
 0x280   : > { %3447 = vmatpush1.bf16.msra.mxu0 %v2764_v25  ;;  %v1389_v25 = vld [vmem:[%s7629_s8 + $0x1808] sm:$0xff] }
 0x281   : > { %3488 = vmatpush1.bf16.msra.mxu1 %v2892_v26  ;;  %3448 = vmatprep.subr.bf16.mxu0 %v2773_v27  ;;  %v623_v26 = vld [vmem:[%s7629_s8 + $0x18] sm:$0xff]  ;;  %v2820_v27 = vunpack.c.h.s8.bf16 %v1316_v13 }
 0x282   : > { %3489 = vmatprep.subr.bf16.mxu1 %v2901_v28  ;;  %v2948_v28 = vunpack.c.h.s8.bf16 %v1380_v14  ;;  %v1404_v14 = vld [vmem:[%s7629_s8 + $0x1880] sm:$0xff] }
 0x284   : > { %3449 = vmatpush1.bf16.msra.mxu0 %v2772_v35  ;;  %v2957_v35 = vunpack.c.l.s8.bf16 %v1389_v25 }
 0x285   : > { %3490 = vmatpush1.bf16.msra.mxu1 %v2900_v36  ;;  %3450 = vmatprep.subr.bf16.mxu0 %v2781_v43  ;;  %v1423_v36 = vunpack.c.l.s8.bf16 %v623_v26  ;;  %v1388_v43 = vld [vmem:[%s7629_s8 + $0x1800] sm:$0xff] }
 0x286   : > { %3491 = vmatprep.subr.bf16.mxu1 %v2909_v44  ;;  %v622_v44 = vld [vmem:[%s7629_s8 + $0x10] sm:$0xff] }
 0x288   : > { %3451 = vmatpush1.bf16.msra.mxu0 %v2780_v49  ;;  %v2956_v49 = vunpack.c.l.s8.bf16 %v1388_v43 }
 0x289   : > { %3492 = vmatpush1.bf16.msra.mxu1 %v2908_v50  ;;  %3452 = vmatprep.subr.bf16.mxu0 %v2789_v51  ;;  %v1422_v50 = vunpack.c.l.s8.bf16 %v622_v44  ;;  %v2965_v51 = vunpack.c.h.s8.bf16 %v1389_v25 }
 0x28a   : > { %3493 = vmatprep.subr.bf16.mxu1 %v2917_v52  ;;  %v1431_v52 = vunpack.c.h.s8.bf16 %v623_v26  ;;  %v1413_v26 = vld [vmem:[%s7629_s8 + $0x18c8] sm:$0xff] }
 0x28b   : > { %v3005_v32 = vunpack.c.l.s8.bf16 %v1413_v26 }
 0x28c   : > { %3453 = vmatpush1.bf16.msra.mxu0 %v2788_v55  ;;  %v2964_v55 = vunpack.c.h.s8.bf16 %v1388_v43  ;;  %v646_v43 = vld [vmem:[%s7629_s8 + $0xd0] sm:$0xff] }
 0x28d   : > { %3494 = vmatpush1.bf16.msra.mxu1 %v2916_v56  ;;  %3454 = vmatprep.subr.bf16.mxu0 %v2797_v61  ;;  %v1430_v56 = vunpack.c.h.s8.bf16 %v622_v44  ;;  %v2973_v61 = vunpack.c.l.s8.bf16 %v1397_v53 }
 0x28e   : > { %3495 = vmatprep.subr.bf16.mxu1 %v2925_v62  ;;  %v1439_v62 = vunpack.c.l.s8.bf16 %v631_v54 }
 0x290   : > { %3455 = vmatpush1.bf16.msra.mxu0 %v2796_v1  ;;  %v7251_v1 = vmov 0  }
 0x291   : > { %3496 = vmatpush1.bf16.msra.mxu1 %v2924_v2  ;;  %3456 = vmatprep.subr.bf16.mxu0 %v2805_v3  ;;  %v2972_v2 = vunpack.c.l.s8.bf16 %v1396_v63  ;;  %v1438_v3 = vunpack.c.l.s8.bf16 %v630_v0 }
 0x292   : > { %3497 = vmatprep.subr.bf16.mxu1 %v2933_v4  ;;  %v2981_v4 = vunpack.c.h.s8.bf16 %v1397_v53 }
 0x294   : > { %3457 = vmatpush1.bf16.msra.mxu0 %v2804_v15  ;;  %v639_v15 = vld [vmem:[%s7629_s8 + $0x98] sm:$0xff] }
 0x295   : > { %3498 = vmatpush1.bf16.msra.mxu1 %v2932_v10  ;;  %3458 = vmatprep.subr.bf16.mxu0 %v2813_v18  ;;  %v2980_v10 = vunpack.c.h.s8.bf16 %v1396_v63  ;;  %v1446_v18 = vunpack.c.h.s8.bf16 %v630_v0  ;;  %v1455_v13 = vunpack.c.l.s8.bf16 %v639_v15  ;;  %v1463_v25 = vunpack.c.h.s8.bf16 %v639_v15  ;;  %v594_v15 = vld [vmem:[%s7622_s21 + $0xc0] sm:$0xff] }
 0x296   : > { %3499 = vmatprep.subr.bf16.mxu1 %v2941_v12  ;;  %v2989_v12 = vunpack.c.l.s8.bf16 %v1405_v9 }
 0x298   : > { %3459 = vmatpush1.bf16.msra.mxu0 %v2812_v16  ;;  %v638_v16 = vld [vmem:[%s7629_s8 + $0x90] sm:$0xff] }
 0x299   : > { %3500 = vmatpush1.bf16.msra.mxu1 %v2940_v17  ;;  %3460 = vmatprep.subr.bf16.mxu0 %v2821_v19  ;;  %v2988_v17 = vunpack.c.l.s8.bf16 %v1404_v14  ;;  %v1454_v19 = vunpack.c.l.s8.bf16 %v638_v16  ;;  %v1462_v31 = vunpack.c.h.s8.bf16 %v638_v16 }
 0x29a   : > { %3501 = vmatprep.subr.bf16.mxu1 %v2949_v20  ;;  %v2997_v20 = vunpack.c.h.s8.bf16 %v1405_v9  ;;  %v1478_v9 = vunpack.c.h.s8.bf16 %v646_v43 }
 0x29c   : > { %3461 = vmatpush1.bf16.msra.mxu0 %v2820_v27  ;;  %v647_v27 = vld [vmem:[%s7629_s8 + $0xd8] sm:$0xff] }
 0x29d   : > { %3502 = vmatpush1.bf16.msra.mxu1 %v2948_v28  ;;  %3512 = vmatprep.subr.bf16.mxu0 %v2957_v35  ;;  %v2996_v28 = vunpack.c.h.s8.bf16 %v1404_v14  ;;  %v1471_v35 = vunpack.c.l.s8.bf16 %v647_v27  ;;  %v7980_v14 = vpack.c.bf16 %v594_v15, %v594_v15 }
 0x29e   : > { %3553 = vmatprep.subr.bf16.mxu1 %v1423_v36  ;;  %v1412_v36 = vld [vmem:[%s7629_s8 + $0x18c0] sm:$0xff] }
 0x29f   : > { %3463 = vmatmul.mubr.bf16.vlgmr.msra.gmra.mrb[20].mxu0 %v7949_v45 }
 0x2a0   : > { %3504 = vmatmul.mubr.bf16.vlgmr.msra.gmra.mrb[20].mxu1 %v7951_v46  ;;  %3513 = vmatpush1.bf16.msra.mxu0 %v2956_v49 }
 0x2a1   : > { %3554 = vmatpush1.bf16.msra.mxu1 %v1422_v50  ;;  %3514 = vmatprep.subr.bf16.mxu0 %v2965_v51 }
 0x2a2   : > { %3555 = vmatprep.subr.bf16.mxu1 %v1431_v52  ;;  %3544 = vmatprep.mubr.bf16.mxu0 %v7251_v1 }
 0x2a3   : > { %3585 = vmatprep.mubr.bf16.mxu1 %v7667_v37 }
 0x2a4   : > { %3515 = vmatpush1.bf16.msra.mxu0 %v2964_v55 }
 0x2a5   : > { %3556 = vmatpush1.bf16.msra.mxu1 %v1430_v56  ;;  %3516 = vmatprep.subr.bf16.mxu0 %v2973_v61  ;;  %v3004_v56 = vunpack.c.l.s8.bf16 %v1412_v36  ;;  %v1470_v61 = vunpack.c.l.s8.bf16 %v646_v43 }
 0x2a6   : > { %3557 = vmatprep.subr.bf16.mxu1 %v1439_v62 }
 0x2a8   : > { %3517 = vmatpush1.bf16.msra.mxu0 %v2972_v2  ;;  %v1479_v2 = vunpack.c.h.s8.bf16 %v647_v27 }
 0x2a9   : > { %3558 = vmatpush1.bf16.msra.mxu1 %v1438_v3  ;;  %3518 = vmatprep.subr.bf16.mxu0 %v2981_v4  ;;  %v687_v4 = vld [vmem:[%s7629_s8 + $0x218] sm:$0xff] }
 0x2aa   : > { %3559 = vmatprep.subr.bf16.mxu1 %v1447_v8  ;;  %v3012_v8 = vunpack.c.h.s8.bf16 %v1412_v36  ;;  %v694_v36 = vld [vmem:[%s7629_s8 + $0x250] sm:$0xff] }
 0x2ac   : > { %3519 = vmatpush1.bf16.msra.mxu0 %v2980_v10 }
 0x2ad   : > { %3560 = vmatpush1.bf16.msra.mxu1 %v1446_v18  ;;  %3520 = vmatprep.subr.bf16.mxu0 %v2989_v12  ;;  %v1551_v18 = vunpack.c.l.s8.bf16 %v687_v4  ;;  %v654_v12 = vld [vmem:[%s7629_s8 + $0x110] sm:$0xff] }
 0x2ae   : > { %3561 = vmatprep.subr.bf16.mxu1 %v1455_v13  ;;  %v686_v13 = vld [vmem:[%s7629_s8 + $0x210] sm:$0xff]  ;;  %v1486_v16 = vunpack.c.l.s8.bf16 %v654_v12  ;;  %v1494_v27 = vunpack.c.h.s8.bf16 %v654_v12 }
 0x2af   : > { %v678_v12 = vld [vmem:[%s7629_s8 + $0x1d0] sm:$0xff] }
 0x2b0   : > { %3521 = vmatpush1.bf16.msra.mxu0 %v2988_v17  ;;  %v1550_v17 = vunpack.c.l.s8.bf16 %v686_v13 }
 0x2b1   : > { %3562 = vmatpush1.bf16.msra.mxu1 %v1454_v19  ;;  %3522 = vmatprep.subr.bf16.mxu0 %v2997_v20  ;;  %v1559_v20 = vunpack.c.h.s8.bf16 %v687_v4  ;;  %v679_v4 = vld [vmem:[%s7629_s8 + $0x1d8] sm:$0xff] }
 0x2b2   : > { %3563 = vmatprep.subr.bf16.mxu1 %v1463_v25  ;;  %v3218_v44 = vpop.f32.mrb[8].mxu0  ;;  %v663_v25 = vld [vmem:[%s7629_s8 + $0x158] sm:$0xff] }
 0x2b3   : > { %v3259_v49 = vpop.f32.mrb[8].mxu1  ;;  %v3219_v50 = vadd.f32 %v3218_v44, %v7923_v7  ;;  %v3220_v51 = vpop.f32.mrb[9].mxu0  ;;  %v3013_v7 = vunpack.c.h.s8.bf16 %v1413_v26  ;;  %v695_v26 = vld [vmem:[%s7629_s8 + $0x258] sm:$0xff]  ;;  %v1566_v44 = vunpack.c.l.s8.bf16 %v694_v36 }
 0x2b4   : > { %v3261_v52 = vpop.f32.mrb[9].mxu1  ;;  %v3221_v53 = vadd.f32 %v3220_v51, %v7925_v11  ;;  %v3222_v54 = vpop.f32.mrb[10].mxu0  ;;  %3523 = vmatpush1.bf16.msra.mxu0 %v2996_v28  ;;  %v655_v11 = vld [vmem:[%s7629_s8 + $0x118] sm:$0xff]  ;;  %v1558_v28 = vunpack.c.h.s8.bf16 %v686_v13  ;;  %v710_v13 = vld [vmem:[%s7629_s8 + $0x2d0] sm:$0xff] }
 0x2b5   : > { %v3263_v55 = vpop.f32.mrb[10].mxu1  ;;  %3564 = vmatpush1.bf16.msra.mxu1 %v1462_v31  ;;  %v7971_v62 = vadd.f32 %v3259_v49, %v3219_v50  ;;  %v3223_v63 = vpop.f32.mrb[11].mxu0  ;;  %3524 = vmatprep.subr.bf16.mxu0 %v3005_v32  ;;  %v1487_v10 = vunpack.c.l.s8.bf16 %v655_v11  ;;  %v1495_v19 = vunpack.c.h.s8.bf16 %v655_v11  ;;  %v1503_v31 = vunpack.c.l.s8.bf16 %v663_v25  ;;  %v671_v51 = vld [vmem:[%s7629_s8 + $0x198] sm:$0xff] }
 0x2b6   : > { %v3264_v0 = vpop.f32.mrb[11].mxu1  ;;  %3565 = vmatprep.subr.bf16.mxu1 %v1471_v35  ;;  %v7973_v3 = vadd.f32 %v3261_v52, %v3221_v53  ;;  %v1567_v32 = vunpack.c.l.s8.bf16 %v695_v26  ;;  %v662_v35 = vld [vmem:[%s7629_s8 + $0x150] sm:$0xff]  ;;  %v1511_v49 = vunpack.c.h.s8.bf16 %v663_v25  ;;  %v1575_v50 = vunpack.c.h.s8.bf16 %v695_v26  ;;  %v703_v52 = vld [vmem:[%s7629_s8 + $0x298] sm:$0xff] }
 0x2b7   : > { %v1502_v43 = vunpack.c.l.s8.bf16 %v662_v35  ;;  %v1510_v53 = vunpack.c.h.s8.bf16 %v662_v35  ;;  %v1574_v54 = vunpack.c.h.s8.bf16 %v694_v36  ;;  %v1519_v55 = vunpack.c.l.s8.bf16 %v671_v51  ;;  %v702_v63 = vld [vmem:[%s7629_s8 + $0x290] sm:$0xff]  ;;  %v719_v25 = vld [vmem:[%s7629_s8 + $0x318] sm:$0xff] }
 0x2b8   : > { %3525 = vmatpush1.bf16.msra.mxu0 %v3004_v56  ;;  %v1583_v56 = vunpack.c.l.s8.bf16 %v703_v52  ;;  %v1591_v11 = vunpack.c.h.s8.bf16 %v703_v52  ;;  %v1590_v15 = vunpack.c.h.s8.bf16 %v702_v63  ;;  %v751_v26 = vld [vmem:[%s7629_s8 + $0x418] sm:$0xff]  ;;  %v718_v35 = vld [vmem:[%s7629_s8 + $0x310] sm:$0xff] }
 0x2b9   : > { %3566 = vmatpush1.bf16.msra.mxu1 %v1470_v61  ;;  %3526 = vmatprep.subr.bf16.mxu0 %v3013_v7  ;;  %v670_v61 = vld [vmem:[%s7629_s8 + $0x190] sm:$0xff]  ;;  %v1582_v7 = vunpack.c.l.s8.bf16 %v702_v63  ;;  %v759_v52 = vld [vmem:[%s7629_s8 + $0x458] sm:$0xff] }
 0x2ba   : > { %3567 = vmatprep.subr.bf16.mxu1 %v1479_v2  ;;  %v1518_v0 = vunpack.c.l.s8.bf16 %v670_v61  ;;  %v1527_v2 = vunpack.c.h.s8.bf16 %v671_v51  ;;  %v750_v36 = vld [vmem:[%s7629_s8 + $0x410] sm:$0xff]  ;;  %v727_v51 = vld [vmem:[%s7629_s8 + $0x358] sm:$0xff] }
 0x2bb   : > { %v758_v63 = vld [vmem:[%s7629_s8 + $0x450] sm:$0xff] }
 0x2bc   : > { %3527 = vmatpush1.bf16.msra.mxu0 %v3012_v8  ;;  %v711_v8 = vld [vmem:[%s7629_s8 + $0x2d8] sm:$0xff] }
 0x2bd   : > { %3568 = vmatpush1.bf16.msra.mxu1 %v1478_v9  ;;  %3594 = vmatprep.subr.bf16.mxu0 %v1551_v18  ;;  %v1526_v9 = vunpack.c.h.s8.bf16 %v670_v61  ;;  %v1599_v18 = vunpack.c.l.s8.bf16 %v711_v8  ;;  %v726_v61 = vld [vmem:[%s7629_s8 + $0x350] sm:$0xff] }
 0x2be   : > { %3569 = vmatprep.subr.bf16.mxu1 %v1487_v10  ;;  %v1535_v10 = vunpack.c.l.s8.bf16 %v679_v4 }
 0x2bf   : > { %3545 = vmatmul.mubr.bf16.vlgmr.msra.gmra.mrb[24].mxu0 %v7980_v14 }
 0x2c0   : > { %3595 = vmatpush1.bf16.msra.mxu0 %v1550_v17  ;;  %3626 = vmatprep.mubr.bf16.mxu0 %v7669_v38  ;;  %v1598_v17 = vunpack.c.l.s8.bf16 %v710_v13 }
 0x2c1   : > { %3570 = vmatpush1.bf16.msra.mxu1 %v1486_v16  ;;  %3596 = vmatprep.subr.bf16.mxu0 %v1559_v20  ;;  %v1534_v16 = vunpack.c.l.s8.bf16 %v678_v12  ;;  %v1607_v20 = vunpack.c.h.s8.bf16 %v711_v8  ;;  %v767_v8 = vld [vmem:[%s7629_s8 + $0x498] sm:$0xff] }
 0x2c2   : > { %3571 = vmatprep.subr.bf16.mxu1 %v1495_v19  ;;  %v1543_v19 = vunpack.c.h.s8.bf16 %v679_v4  ;;  %v735_v4 = vld [vmem:[%s7629_s8 + $0x398] sm:$0xff] }
 0x2c4   : > { %3597 = vmatpush1.bf16.msra.mxu0 %v1558_v28  ;;  %v1606_v28 = vunpack.c.h.s8.bf16 %v710_v13  ;;  %v766_v13 = vld [vmem:[%s7629_s8 + $0x490] sm:$0xff] }
 0x2c5   : > { %3572 = vmatpush1.bf16.msra.mxu1 %v1494_v27  ;;  %3598 = vmatprep.subr.bf16.mxu0 %v1567_v32  ;;  %v1542_v27 = vunpack.c.h.s8.bf16 %v678_v12  ;;  %v1679_v32 = vunpack.c.l.s8.bf16 %v751_v26  ;;  %v734_v12 = vld [vmem:[%s7629_s8 + $0x390] sm:$0xff] }
 0x2c6   : > { %3573 = vmatprep.subr.bf16.mxu1 %v1503_v31  ;;  %v1615_v31 = vunpack.c.l.s8.bf16 %v719_v25 }
 0x2c8   : > { %3599 = vmatpush1.bf16.msra.mxu0 %v1566_v44  ;;  %v1678_v44 = vunpack.c.l.s8.bf16 %v750_v36 }
 0x2c9   : > { %3574 = vmatpush1.bf16.msra.mxu1 %v1502_v43  ;;  %3600 = vmatprep.subr.bf16.mxu0 %v1575_v50  ;;  %v1614_v43 = vunpack.c.l.s8.bf16 %v718_v35  ;;  %v1687_v50 = vunpack.c.h.s8.bf16 %v751_v26  ;;  %v775_v26 = vld [vmem:[%s7629_s8 + $0x4d8] sm:$0xff] }
 0x2ca   : > { %3575 = vmatprep.subr.bf16.mxu1 %v1511_v49  ;;  %v1623_v49 = vunpack.c.h.s8.bf16 %v719_v25  ;;  %v743_v25 = vld [vmem:[%s7629_s8 + $0x3d8] sm:$0xff] }
 0x2cc   : > { %3601 = vmatpush1.bf16.msra.mxu0 %v1574_v54  ;;  %v1686_v54 = vunpack.c.h.s8.bf16 %v750_v36  ;;  %v774_v36 = vld [vmem:[%s7629_s8 + $0x4d0] sm:$0xff] }
 0x2cd   : > { %3576 = vmatpush1.bf16.msra.mxu1 %v1510_v53  ;;  %3602 = vmatprep.subr.bf16.mxu0 %v1583_v56  ;;  %v1622_v53 = vunpack.c.h.s8.bf16 %v718_v35  ;;  %v1695_v56 = vunpack.c.l.s8.bf16 %v759_v52  ;;  %v742_v35 = vld [vmem:[%s7629_s8 + $0x3d0] sm:$0xff] }
 0x2ce   : > { %3577 = vmatprep.subr.bf16.mxu1 %v1519_v55  ;;  %v1631_v55 = vunpack.c.l.s8.bf16 %v727_v51 }
 0x2d0   : > { %3603 = vmatpush1.bf16.msra.mxu0 %v1582_v7  ;;  %v1694_v7 = vunpack.c.l.s8.bf16 %v758_v63 }
 0x2d1   : > { %3578 = vmatpush1.bf16.msra.mxu1 %v1518_v0  ;;  %3604 = vmatprep.subr.bf16.mxu0 %v1591_v11  ;;  %v1630_v0 = vunpack.c.l.s8.bf16 %v726_v61  ;;  %v1703_v11 = vunpack.c.h.s8.bf16 %v759_v52 }
 0x2d2   : > { %3579 = vmatprep.subr.bf16.mxu1 %v1527_v2  ;;  %v1639_v2 = vunpack.c.h.s8.bf16 %v727_v51 }
 0x2d4   : > { %3605 = vmatpush1.bf16.msra.mxu0 %v1590_v15  ;;  %v1702_v15 = vunpack.c.h.s8.bf16 %v758_v63 }
 0x2d5   : > { %3580 = vmatpush1.bf16.msra.mxu1 %v1526_v9  ;;  %3606 = vmatprep.subr.bf16.mxu0 %v1599_v18  ;;  %v1638_v9 = vunpack.c.h.s8.bf16 %v726_v61  ;;  %v1711_v18 = vunpack.c.l.s8.bf16 %v767_v8 }
 0x2d6   : > { %3581 = vmatprep.subr.bf16.mxu1 %v1535_v10  ;;  %v1647_v10 = vunpack.c.l.s8.bf16 %v735_v4 }
 0x2d8   : > { %3607 = vmatpush1.bf16.msra.mxu0 %v1598_v17  ;;  %v1710_v17 = vunpack.c.l.s8.bf16 %v766_v13 }
 0x2d9   : > { %3582 = vmatpush1.bf16.msra.mxu1 %v1534_v16  ;;  %3608 = vmatprep.subr.bf16.mxu0 %v1607_v20  ;;  %v1646_v16 = vunpack.c.l.s8.bf16 %v734_v12  ;;  %v1719_v20 = vunpack.c.h.s8.bf16 %v767_v8  ;;  %v1734_v8 = vunpack.c.h.s8.bf16 %v774_v36 }
 0x2da   : > { %3583 = vmatprep.subr.bf16.mxu1 %v1543_v19  ;;  %v1655_v19 = vunpack.c.h.s8.bf16 %v735_v4  ;;  %v1670_v4 = vunpack.c.h.s8.bf16 %v742_v35 }
 0x2dc   : > { %3609 = vmatpush1.bf16.msra.mxu0 %v1606_v28  ;;  %v1718_v28 = vunpack.c.h.s8.bf16 %v766_v13 }
 0x2dd   : > { %3584 = vmatpush1.bf16.msra.mxu1 %v1542_v27  ;;  %3610 = vmatprep.subr.bf16.mxu0 %v1615_v31  ;;  %v1654_v27 = vunpack.c.h.s8.bf16 %v734_v12  ;;  %v1663_v31 = vunpack.c.l.s8.bf16 %v743_v25 }
 0x2de   : > { %3635 = vmatprep.subr.bf16.mxu1 %v1679_v32  ;;  %v1727_v32 = vunpack.c.l.s8.bf16 %v775_v26 }
 0x2e0   : > { %3586 = vmatmul.mubr.bf16.vlgmr.msra.gmra.mrb[24].mxu1 %v7699_v47  ;;  %3611 = vmatpush1.bf16.msra.mxu0 %v1614_v43 }
 0x2e1   : > { %3636 = vmatpush1.bf16.msra.mxu1 %v1678_v44  ;;  %3612 = vmatprep.subr.bf16.mxu0 %v1623_v49 }
 0x2e2   : > { %3637 = vmatprep.subr.bf16.mxu1 %v1687_v50  ;;  %3667 = vmatprep.mubr.bf16.mxu1 %v7707_v57 }
 0x2e4   : > { %3613 = vmatpush1.bf16.msra.mxu0 %v1622_v53 }
 0x2e5   : > { %3638 = vmatpush1.bf16.msra.mxu1 %v1686_v54  ;;  %3614 = vmatprep.subr.bf16.mxu0 %v1631_v55  ;;  %v1662_v55 = vunpack.c.l.s8.bf16 %v742_v35 }
 0x2e6   : > { %3639 = vmatprep.subr.bf16.mxu1 %v1695_v56  ;;  %v1726_v56 = vunpack.c.l.s8.bf16 %v774_v36 }
 0x2e8   : > { %3615 = vmatpush1.bf16.msra.mxu0 %v1630_v0 }
 0x2e9   : > { %3640 = vmatpush1.bf16.msra.mxu1 %v1694_v7  ;;  %3616 = vmatprep.subr.bf16.mxu0 %v1639_v2  ;;  %v1735_v7 = vunpack.c.h.s8.bf16 %v775_v26 }
 0x2ea   : > { %3641 = vmatprep.subr.bf16.mxu1 %v1703_v11  ;;  %v815_v11 = vld [vmem:[%s7629_s8 + $0x618] sm:$0xff] }
 0x2ec   : > { %3617 = vmatpush1.bf16.msra.mxu0 %v1638_v9 }
 0x2ed   : > { %3642 = vmatpush1.bf16.msra.mxu1 %v1702_v15  ;;  %3618 = vmatprep.subr.bf16.mxu0 %v1647_v10  ;;  %v1807_v15 = vunpack.c.l.s8.bf16 %v815_v11  ;;  %v782_v10 = vld [vmem:[%s7629_s8 + $0x510] sm:$0xff] }
 0x2ee   : > { %3643 = vmatprep.subr.bf16.mxu1 %v1711_v18  ;;  %v814_v18 = vld [vmem:[%s7629_s8 + $0x610] sm:$0xff]  ;;  %v1742_v12 = vunpack.c.l.s8.bf16 %v782_v10 }
 0x2ef   : > { %v1806_v13 = vunpack.c.l.s8.bf16 %v814_v18  ;;  %v1814_v26 = vunpack.c.h.s8.bf16 %v814_v18  ;;  %v838_v18 = vld [vmem:[%s7629_s8 + $0x6d0] sm:$0xff] }
 0x2f0   : > { %3619 = vmatpush1.bf16.msra.mxu0 %v1646_v16 }
 0x2f1   : > { %3644 = vmatpush1.bf16.msra.mxu1 %v1710_v17  ;;  %3620 = vmatprep.subr.bf16.mxu0 %v1655_v19  ;;  %v1815_v17 = vunpack.c.h.s8.bf16 %v815_v11  ;;  %v791_v19 = vld [vmem:[%s7629_s8 + $0x558] sm:$0xff] }
 0x2f2   : > { %3645 = vmatprep.subr.bf16.mxu1 %v1719_v20  ;;  %v3300_v43 = vpop.f32.mrb[12].mxu0  ;;  %v823_v20 = vld [vmem:[%s7629_s8 + $0x658] sm:$0xff] }
 0x2f3   : > { %v3341_v44 = vpop.f32.mrb[12].mxu1  ;;  %v3301_v49 = vadd.f32 %v3300_v43, %v7971_v62  ;;  %v3302_v50 = vpop.f32.mrb[13].mxu0  ;;  %v1671_v62 = vunpack.c.h.s8.bf16 %v743_v25  ;;  %v1750_v25 = vunpack.c.h.s8.bf16 %v782_v10  ;;  %v1767_v43 = vunpack.c.h.s8.bf16 %v791_v19  ;;  %v839_v11 = vld [vmem:[%s7629_s8 + $0x6d8] sm:$0xff]  ;;  %v806_v10 = vld [vmem:[%s7629_s8 + $0x5d0] sm:$0xff] }
 0x2f4   : > { %v3343_v51 = vpop.f32.mrb[13].mxu1  ;;  %v3303_v52 = vadd.f32 %v3302_v50, %v7973_v3  ;;  %v3304_v53 = vpop.f32.mrb[14].mxu0  ;;  %3621 = vmatpush1.bf16.msra.mxu0 %v1654_v27  ;;  %v783_v3 = vld [vmem:[%s7629_s8 + $0x518] sm:$0xff]  ;;  %v1759_v27 = vunpack.c.l.s8.bf16 %v791_v19 }
 0x2f5   : > { %v3345_v54 = vpop.f32.mrb[14].mxu1  ;;  %3646 = vmatpush1.bf16.msra.mxu1 %v1718_v28  ;;  %v8016_v61 = vadd.f32 %v3341_v44, %v3301_v49  ;;  %v3305_v63 = vpop.f32.mrb[15].mxu0  ;;  %3622 = vmatprep.subr.bf16.mxu0 %v1663_v31  ;;  %v1743_v9 = vunpack.c.l.s8.bf16 %v783_v3  ;;  %v1751_v16 = vunpack.c.h.s8.bf16 %v783_v3  ;;  %v1823_v28 = vunpack.c.l.s8.bf16 %v823_v20  ;;  %v790_v31 = vld [vmem:[%s7629_s8 + $0x550] sm:$0xff]  ;;  %v799_v49 = vld [vmem:[%s7629_s8 + $0x598] sm:$0xff] }
 0x2f6   : > { %v3346_v0 = vpop.f32.mrb[15].mxu1  ;;  %3647 = vmatprep.subr.bf16.mxu1 %v1727_v32  ;;  %v8018_v2 = vadd.f32 %v3343_v51, %v3303_v52  ;;  %v822_v32 = vld [vmem:[%s7629_s8 + $0x650] sm:$0xff]  ;;  %v1758_v35 = vunpack.c.l.s8.bf16 %v790_v31  ;;  %v1831_v44 = vunpack.c.h.s8.bf16 %v823_v20  ;;  %v831_v50 = vld [vmem:[%s7629_s8 + $0x698] sm:$0xff]  ;;  %v1766_v51 = vunpack.c.h.s8.bf16 %v790_v31 }
 0x2f7   : > { %v1822_v36 = vunpack.c.l.s8.bf16 %v822_v32  ;;  %v1830_v52 = vunpack.c.h.s8.bf16 %v822_v32  ;;  %v1775_v53 = vunpack.c.l.s8.bf16 %v799_v49  ;;  %v1839_v54 = vunpack.c.l.s8.bf16 %v831_v50  ;;  %v807_v3 = vld [vmem:[%s7629_s8 + $0x5d8] sm:$0xff]  ;;  %v846_v31 = vld [vmem:[%s7629_s8 + $0x710] sm:$0xff] }
 0x2f8   : > { %3623 = vmatpush1.bf16.msra.mxu0 %v1662_v55  ;;  %v798_v55 = vld [vmem:[%s7629_s8 + $0x590] sm:$0xff]  ;;  %v847_v19 = vld [vmem:[%s7629_s8 + $0x718] sm:$0xff] }
 0x2f9   : > { %3648 = vmatpush1.bf16.msra.mxu1 %v1726_v56  ;;  %3624 = vmatprep.subr.bf16.mxu0 %v1671_v62  ;;  %v830_v56 = vld [vmem:[%s7629_s8 + $0x690] sm:$0xff]  ;;  %v1774_v63 = vunpack.c.l.s8.bf16 %v798_v55  ;;  %v1783_v62 = vunpack.c.h.s8.bf16 %v799_v49  ;;  %v879_v20 = vld [vmem:[%s7629_s8 + $0x818] sm:$0xff] }
 0x2fa   : > { %3649 = vmatprep.subr.bf16.mxu1 %v1735_v7  ;;  %v1838_v0 = vunpack.c.l.s8.bf16 %v830_v56  ;;  %v1847_v7 = vunpack.c.h.s8.bf16 %v831_v50  ;;  %v878_v32 = vld [vmem:[%s7629_s8 + $0x810] sm:$0xff]  ;;  %v855_v49 = vld [vmem:[%s7629_s8 + $0x758] sm:$0xff] }
 0x2fb   : > { %v887_v50 = vld [vmem:[%s7629_s8 + $0x858] sm:$0xff] }
 0x2fc   : > { %3625 = vmatpush1.bf16.msra.mxu0 %v1670_v4  ;;  %v1782_v4 = vunpack.c.h.s8.bf16 %v798_v55  ;;  %v854_v55 = vld [vmem:[%s7629_s8 + $0x750] sm:$0xff] }
 0x2fd   : > { %3650 = vmatpush1.bf16.msra.mxu1 %v1734_v8  ;;  %3676 = vmatprep.subr.bf16.mxu0 %v1807_v15  ;;  %v1846_v8 = vunpack.c.h.s8.bf16 %v830_v56  ;;  %v1855_v15 = vunpack.c.l.s8.bf16 %v839_v11  ;;  %v886_v56 = vld [vmem:[%s7629_s8 + $0x850] sm:$0xff] }
 0x2fe   : > { %3651 = vmatprep.subr.bf16.mxu1 %v1743_v9  ;;  %v1791_v9 = vunpack.c.l.s8.bf16 %v807_v3 }
 0x2ff   : > { %3627 = vmatmul.mubr.bf16.vlgmr.msra.gmra.mrb[28].mxu0 %v7701_v48 }
 0x300   : > { %3677 = vmatpush1.bf16.msra.mxu0 %v1806_v13  ;;  %3708 = vmatprep.mubr.bf16.mxu0 %v7709_v58  ;;  %v1854_v13 = vunpack.c.l.s8.bf16 %v838_v18 }
 0x301   : > { %3652 = vmatpush1.bf16.msra.mxu1 %v1742_v12  ;;  %3678 = vmatprep.subr.bf16.mxu0 %v1815_v17  ;;  %v1790_v12 = vunpack.c.l.s8.bf16 %v806_v10  ;;  %v1863_v17 = vunpack.c.h.s8.bf16 %v839_v11  ;;  %v895_v11 = vld [vmem:[%s7629_s8 + $0x898] sm:$0xff] }
 0x302   : > { %3653 = vmatprep.subr.bf16.mxu1 %v1751_v16  ;;  %v1799_v16 = vunpack.c.h.s8.bf16 %v807_v3  ;;  %v863_v3 = vld [vmem:[%s7629_s8 + $0x798] sm:$0xff] }
 0x304   : > { %3679 = vmatpush1.bf16.msra.mxu0 %v1814_v26  ;;  %v1862_v26 = vunpack.c.h.s8.bf16 %v838_v18  ;;  %v894_v18 = vld [vmem:[%s7629_s8 + $0x890] sm:$0xff] }
 0x305   : > { %3654 = vmatpush1.bf16.msra.mxu1 %v1750_v25  ;;  %3680 = vmatprep.subr.bf16.mxu0 %v1823_v28  ;;  %v1798_v25 = vunpack.c.h.s8.bf16 %v806_v10  ;;  %v1935_v28 = vunpack.c.l.s8.bf16 %v879_v20  ;;  %v862_v10 = vld [vmem:[%s7629_s8 + $0x790] sm:$0xff] }
 0x306   : > { %3655 = vmatprep.subr.bf16.mxu1 %v1759_v27  ;;  %v1871_v27 = vunpack.c.l.s8.bf16 %v847_v19 }
 0x308   : > { %3681 = vmatpush1.bf16.msra.mxu0 %v1822_v36  ;;  %v1934_v36 = vunpack.c.l.s8.bf16 %v878_v32 }
 0x309   : > { %3656 = vmatpush1.bf16.msra.mxu1 %v1758_v35  ;;  %3682 = vmatprep.subr.bf16.mxu0 %v1831_v44  ;;  %v1870_v35 = vunpack.c.l.s8.bf16 %v846_v31  ;;  %v1943_v44 = vunpack.c.h.s8.bf16 %v879_v20  ;;  %v903_v20 = vld [vmem:[%s7629_s8 + $0x8d8] sm:$0xff] }
 0x30a   : > { %3657 = vmatprep.subr.bf16.mxu1 %v1767_v43  ;;  %v1879_v43 = vunpack.c.h.s8.bf16 %v847_v19  ;;  %v871_v19 = vld [vmem:[%s7629_s8 + $0x7d8] sm:$0xff] }
 0x30c   : > { %3683 = vmatpush1.bf16.msra.mxu0 %v1830_v52  ;;  %v1942_v52 = vunpack.c.h.s8.bf16 %v878_v32  ;;  %v902_v32 = vld [vmem:[%s7629_s8 + $0x8d0] sm:$0xff] }
 0x30d   : > { %3658 = vmatpush1.bf16.msra.mxu1 %v1766_v51  ;;  %3684 = vmatprep.subr.bf16.mxu0 %v1839_v54  ;;  %v1878_v51 = vunpack.c.h.s8.bf16 %v846_v31  ;;  %v1951_v54 = vunpack.c.l.s8.bf16 %v887_v50  ;;  %v870_v31 = vld [vmem:[%s7629_s8 + $0x7d0] sm:$0xff] }
 0x30e   : > { %3659 = vmatprep.subr.bf16.mxu1 %v1775_v53  ;;  %v1887_v53 = vunpack.c.l.s8.bf16 %v855_v49 }
 0x310   : > { %3685 = vmatpush1.bf16.msra.mxu0 %v1838_v0  ;;  %v1950_v0 = vunpack.c.l.s8.bf16 %v886_v56 }
 0x311   : > { %3660 = vmatpush1.bf16.msra.mxu1 %v1774_v63  ;;  %3686 = vmatprep.subr.bf16.mxu0 %v1847_v7  ;;  %v1886_v63 = vunpack.c.l.s8.bf16 %v854_v55  ;;  %v1959_v7 = vunpack.c.h.s8.bf16 %v887_v50 }
 0x312   : > { %3661 = vmatprep.subr.bf16.mxu1 %v1783_v62  ;;  %v1895_v62 = vunpack.c.h.s8.bf16 %v855_v49 }
 0x314   : > { %3687 = vmatpush1.bf16.msra.mxu0 %v1846_v8  ;;  %v1958_v8 = vunpack.c.h.s8.bf16 %v886_v56 }
 0x315   : > { %3662 = vmatpush1.bf16.msra.mxu1 %v1782_v4  ;;  %3688 = vmatprep.subr.bf16.mxu0 %v1855_v15  ;;  %v1894_v4 = vunpack.c.h.s8.bf16 %v854_v55  ;;  %v1967_v15 = vunpack.c.l.s8.bf16 %v895_v11 }
 0x316   : > { %3663 = vmatprep.subr.bf16.mxu1 %v1791_v9  ;;  %v1903_v9 = vunpack.c.l.s8.bf16 %v863_v3 }
 0x318   : > { %3689 = vmatpush1.bf16.msra.mxu0 %v1854_v13  ;;  %v1966_v13 = vunpack.c.l.s8.bf16 %v894_v18 }
 0x319   : > { %3664 = vmatpush1.bf16.msra.mxu1 %v1790_v12  ;;  %3690 = vmatprep.subr.bf16.mxu0 %v1863_v17  ;;  %v1902_v12 = vunpack.c.l.s8.bf16 %v862_v10  ;;  %v1975_v17 = vunpack.c.h.s8.bf16 %v895_v11  ;;  %v1990_v11 = vunpack.c.h.s8.bf16 %v902_v32 }
 0x31a   : > { %3665 = vmatprep.subr.bf16.mxu1 %v1799_v16  ;;  %v1911_v16 = vunpack.c.h.s8.bf16 %v863_v3  ;;  %v1926_v3 = vunpack.c.h.s8.bf16 %v870_v31 }
 0x31c   : > { %3691 = vmatpush1.bf16.msra.mxu0 %v1862_v26  ;;  %v1974_v26 = vunpack.c.h.s8.bf16 %v894_v18 }
 0x31d   : > { %3666 = vmatpush1.bf16.msra.mxu1 %v1798_v25  ;;  %3692 = vmatprep.subr.bf16.mxu0 %v1871_v27  ;;  %v1910_v25 = vunpack.c.h.s8.bf16 %v862_v10  ;;  %v1919_v27 = vunpack.c.l.s8.bf16 %v871_v19 }
 0x31e   : > { %3717 = vmatprep.subr.bf16.mxu1 %v1935_v28  ;;  %v1983_v28 = vunpack.c.l.s8.bf16 %v903_v20 }
 0x320   : > { %3668 = vmatmul.mubr.bf16.vlgmr.msra.gmra.mrb[28].mxu1 %v7747_v29  ;;  %3693 = vmatpush1.bf16.msra.mxu0 %v1870_v35 }
 0x321   : > { %3718 = vmatpush1.bf16.msra.mxu1 %v1934_v36  ;;  %3694 = vmatprep.subr.bf16.mxu0 %v1879_v43 }
 0x322   : > { %3719 = vmatprep.subr.bf16.mxu1 %v1943_v44  ;;  %3749 = vmatprep.mubr.bf16.mxu1 %v7755_v41 }
 0x324   : > { %3695 = vmatpush1.bf16.msra.mxu0 %v1878_v51 }
 0x325   : > { %3720 = vmatpush1.bf16.msra.mxu1 %v1942_v52  ;;  %3696 = vmatprep.subr.bf16.mxu0 %v1887_v53  ;;  %v1918_v53 = vunpack.c.l.s8.bf16 %v870_v31 }
 0x326   : > { %3721 = vmatprep.subr.bf16.mxu1 %v1951_v54  ;;  %v1982_v54 = vunpack.c.l.s8.bf16 %v902_v32 }
 0x328   : > { %3697 = vmatpush1.bf16.msra.mxu0 %v1886_v63 }
 0x329   : > { %3722 = vmatpush1.bf16.msra.mxu1 %v1950_v0  ;;  %3698 = vmatprep.subr.bf16.mxu0 %v1895_v62  ;;  %v1991_v0 = vunpack.c.h.s8.bf16 %v903_v20 }
 0x32a   : > { %3723 = vmatprep.subr.bf16.mxu1 %v1959_v7  ;;  %v943_v7 = vld [vmem:[%s7629_s8 + $0xa18] sm:$0xff] }
 0x32c   : > { %3699 = vmatpush1.bf16.msra.mxu0 %v1894_v4 }
 0x32d   : > { %3724 = vmatpush1.bf16.msra.mxu1 %v1958_v8  ;;  %3700 = vmatprep.subr.bf16.mxu0 %v1903_v9  ;;  %v2063_v8 = vunpack.c.l.s8.bf16 %v943_v7  ;;  %v910_v9 = vld [vmem:[%s7629_s8 + $0x910] sm:$0xff] }
 0x32e   : > { %3725 = vmatprep.subr.bf16.mxu1 %v1967_v15  ;;  %v942_v15 = vld [vmem:[%s7629_s8 + $0xa10] sm:$0xff]  ;;  %v1998_v10 = vunpack.c.l.s8.bf16 %v910_v9 }
 0x32f   : > { %v2062_v18 = vunpack.c.l.s8.bf16 %v942_v15  ;;  %v2070_v20 = vunpack.c.h.s8.bf16 %v942_v15  ;;  %v966_v15 = vld [vmem:[%s7629_s8 + $0xad0] sm:$0xff] }
 0x330   : > { %3701 = vmatpush1.bf16.msra.mxu0 %v1902_v12 }
 0x331   : > { %3726 = vmatpush1.bf16.msra.mxu1 %v1966_v13  ;;  %3702 = vmatprep.subr.bf16.mxu0 %v1911_v16  ;;  %v2071_v13 = vunpack.c.h.s8.bf16 %v943_v7  ;;  %v919_v16 = vld [vmem:[%s7629_s8 + $0x958] sm:$0xff] }
 0x332   : > { %3727 = vmatprep.subr.bf16.mxu1 %v1975_v17  ;;  %v3382_v35 = vpop.f32.mrb[16].mxu0  ;;  %v951_v17 = vld [vmem:[%s7629_s8 + $0xa58] sm:$0xff] }
 0x333   : > { %v3423_v36 = vpop.f32.mrb[16].mxu1  ;;  %v3383_v43 = vadd.f32 %v3382_v35, %v8016_v61  ;;  %v3384_v44 = vpop.f32.mrb[17].mxu0  ;;  %v1927_v61 = vunpack.c.h.s8.bf16 %v871_v19  ;;  %v2006_v19 = vunpack.c.h.s8.bf16 %v910_v9  ;;  %v2023_v35 = vunpack.c.h.s8.bf16 %v919_v16  ;;  %v967_v7 = vld [vmem:[%s7629_s8 + $0xad8] sm:$0xff]  ;;  %v934_v9 = vld [vmem:[%s7629_s8 + $0x9d0] sm:$0xff] }
 0x334   : > { %v3425_v49 = vpop.f32.mrb[17].mxu1  ;;  %v3385_v50 = vadd.f32 %v3384_v44, %v8018_v2  ;;  %v3386_v51 = vpop.f32.mrb[18].mxu0  ;;  %3703 = vmatpush1.bf16.msra.mxu0 %v1910_v25  ;;  %v911_v2 = vld [vmem:[%s7629_s8 + $0x918] sm:$0xff]  ;;  %v2015_v25 = vunpack.c.l.s8.bf16 %v919_v16 }
 0x335   : > { %v3427_v52 = vpop.f32.mrb[18].mxu1  ;;  %3728 = vmatpush1.bf16.msra.mxu1 %v1974_v26  ;;  %v8058_v55 = vadd.f32 %v3423_v36, %v3383_v43  ;;  %v3387_v56 = vpop.f32.mrb[19].mxu0  ;;  %3704 = vmatprep.subr.bf16.mxu0 %v1919_v27  ;;  %v1999_v4 = vunpack.c.l.s8.bf16 %v911_v2  ;;  %v2007_v12 = vunpack.c.h.s8.bf16 %v911_v2  ;;  %v2079_v26 = vunpack.c.l.s8.bf16 %v951_v17  ;;  %v918_v27 = vld [vmem:[%s7629_s8 + $0x950] sm:$0xff]  ;;  %v927_v43 = vld [vmem:[%s7629_s8 + $0x998] sm:$0xff] }
 0x336   : > { %v3428_v63 = vpop.f32.mrb[19].mxu1  ;;  %3729 = vmatprep.subr.bf16.mxu1 %v1983_v28  ;;  %v8060_v62 = vadd.f32 %v3425_v49, %v3385_v50  ;;  %v950_v28 = vld [vmem:[%s7629_s8 + $0xa50] sm:$0xff]  ;;  %v2014_v31 = vunpack.c.l.s8.bf16 %v918_v27  ;;  %v2087_v36 = vunpack.c.h.s8.bf16 %v951_v17  ;;  %v959_v44 = vld [vmem:[%s7629_s8 + $0xa98] sm:$0xff]  ;;  %v2022_v49 = vunpack.c.h.s8.bf16 %v918_v27 }
 0x337   : > { %v2078_v32 = vunpack.c.l.s8.bf16 %v950_v28  ;;  %v2086_v50 = vunpack.c.h.s8.bf16 %v950_v28  ;;  %v2031_v51 = vunpack.c.l.s8.bf16 %v927_v43  ;;  %v2095_v52 = vunpack.c.l.s8.bf16 %v959_v44  ;;  %v935_v2 = vld [vmem:[%s7629_s8 + $0x9d8] sm:$0xff]  ;;  %v974_v27 = vld [vmem:[%s7629_s8 + $0xb10] sm:$0xff] }
 0x338   : > { %3705 = vmatpush1.bf16.msra.mxu0 %v1918_v53  ;;  %v926_v53 = vld [vmem:[%s7629_s8 + $0x990] sm:$0xff]  ;;  %v975_v16 = vld [vmem:[%s7629_s8 + $0xb18] sm:$0xff] }
 0x339   : > { %3730 = vmatpush1.bf16.msra.mxu1 %v1982_v54  ;;  %3706 = vmatprep.subr.bf16.mxu0 %v1927_v61  ;;  %v958_v54 = vld [vmem:[%s7629_s8 + $0xa90] sm:$0xff]  ;;  %v2030_v56 = vunpack.c.l.s8.bf16 %v926_v53  ;;  %v2039_v61 = vunpack.c.h.s8.bf16 %v927_v43  ;;  %v1007_v17 = vld [vmem:[%s7629_s8 + $0xc18] sm:$0xff] }
 0x33a   : > { %3731 = vmatprep.subr.bf16.mxu1 %v1991_v0  ;;  %v2094_v63 = vunpack.c.l.s8.bf16 %v958_v54  ;;  %v2103_v0 = vunpack.c.h.s8.bf16 %v959_v44  ;;  %v1006_v28 = vld [vmem:[%s7629_s8 + $0xc10] sm:$0xff]  ;;  %v983_v43 = vld [vmem:[%s7629_s8 + $0xb58] sm:$0xff] }
 0x33b   : > { %v1015_v44 = vld [vmem:[%s7629_s8 + $0xc58] sm:$0xff] }
 0x33c   : > { %3707 = vmatpush1.bf16.msra.mxu0 %v1926_v3  ;;  %v2038_v3 = vunpack.c.h.s8.bf16 %v926_v53  ;;  %v982_v53 = vld [vmem:[%s7629_s8 + $0xb50] sm:$0xff] }
 0x33d   : > { %3732 = vmatpush1.bf16.msra.mxu1 %v1990_v11  ;;  %3758 = vmatprep.subr.bf16.mxu0 %v2063_v8  ;;  %v2102_v11 = vunpack.c.h.s8.bf16 %v958_v54  ;;  %v2111_v8 = vunpack.c.l.s8.bf16 %v967_v7  ;;  %v1014_v54 = vld [vmem:[%s7629_s8 + $0xc50] sm:$0xff] }
 0x33e   : > { %3733 = vmatprep.subr.bf16.mxu1 %v1999_v4  ;;  %v2047_v4 = vunpack.c.l.s8.bf16 %v935_v2 }
 0x33f   : > { %3709 = vmatmul.mubr.bf16.vlgmr.msra.gmra.mrb[32].mxu0 %v7749_v30 }
 0x340   : > { %3759 = vmatpush1.bf16.msra.mxu0 %v2062_v18  ;;  %3790 = vmatprep.mubr.bf16.mxu0 %v7757_v42  ;;  %v2110_v18 = vunpack.c.l.s8.bf16 %v966_v15 }
 0x341   : > { %3734 = vmatpush1.bf16.msra.mxu1 %v1998_v10  ;;  %3760 = vmatprep.subr.bf16.mxu0 %v2071_v13  ;;  %v2046_v10 = vunpack.c.l.s8.bf16 %v934_v9  ;;  %v2119_v13 = vunpack.c.h.s8.bf16 %v967_v7  ;;  %v1023_v7 = vld [vmem:[%s7629_s8 + $0xc98] sm:$0xff] }
 0x342   : > { %3735 = vmatprep.subr.bf16.mxu1 %v2007_v12  ;;  %v2055_v12 = vunpack.c.h.s8.bf16 %v935_v2  ;;  %v991_v2 = vld [vmem:[%s7629_s8 + $0xb98] sm:$0xff] }
 0x344   : > { %3761 = vmatpush1.bf16.msra.mxu0 %v2070_v20  ;;  %v2118_v20 = vunpack.c.h.s8.bf16 %v966_v15  ;;  %v1022_v15 = vld [vmem:[%s7629_s8 + $0xc90] sm:$0xff] }
 0x345   : > { %3736 = vmatpush1.bf16.msra.mxu1 %v2006_v19  ;;  %3762 = vmatprep.subr.bf16.mxu0 %v2079_v26  ;;  %v2054_v19 = vunpack.c.h.s8.bf16 %v934_v9  ;;  %v2191_v26 = vunpack.c.l.s8.bf16 %v1007_v17  ;;  %v990_v9 = vld [vmem:[%s7629_s8 + $0xb90] sm:$0xff] }
 0x346   : > { %3737 = vmatprep.subr.bf16.mxu1 %v2015_v25  ;;  %v2127_v25 = vunpack.c.l.s8.bf16 %v975_v16 }
 0x348   : > { %3763 = vmatpush1.bf16.msra.mxu0 %v2078_v32  ;;  %v2190_v32 = vunpack.c.l.s8.bf16 %v1006_v28 }
 0x349   : > { %3738 = vmatpush1.bf16.msra.mxu1 %v2014_v31  ;;  %3764 = vmatprep.subr.bf16.mxu0 %v2087_v36  ;;  %v2126_v31 = vunpack.c.l.s8.bf16 %v974_v27  ;;  %v2199_v36 = vunpack.c.h.s8.bf16 %v1007_v17  ;;  %v1031_v17 = vld [vmem:[%s7629_s8 + $0xcd8] sm:$0xff] }
 0x34a   : > { %3739 = vmatprep.subr.bf16.mxu1 %v2023_v35  ;;  %v2135_v35 = vunpack.c.h.s8.bf16 %v975_v16  ;;  %v999_v16 = vld [vmem:[%s7629_s8 + $0xbd8] sm:$0xff] }
 0x34c   : > { %3765 = vmatpush1.bf16.msra.mxu0 %v2086_v50  ;;  %v2198_v50 = vunpack.c.h.s8.bf16 %v1006_v28  ;;  %v1030_v28 = vld [vmem:[%s7629_s8 + $0xcd0] sm:$0xff] }
 0x34d   : > { %3740 = vmatpush1.bf16.msra.mxu1 %v2022_v49  ;;  %3766 = vmatprep.subr.bf16.mxu0 %v2095_v52  ;;  %v2134_v49 = vunpack.c.h.s8.bf16 %v974_v27  ;;  %v2207_v52 = vunpack.c.l.s8.bf16 %v1015_v44  ;;  %v998_v27 = vld [vmem:[%s7629_s8 + $0xbd0] sm:$0xff] }
 0x34e   : > { %3741 = vmatprep.subr.bf16.mxu1 %v2031_v51  ;;  %v2143_v51 = vunpack.c.l.s8.bf16 %v983_v43 }
 0x350   : > { %3767 = vmatpush1.bf16.msra.mxu0 %v2094_v63  ;;  %v2206_v63 = vunpack.c.l.s8.bf16 %v1014_v54 }
 0x351   : > { %3742 = vmatpush1.bf16.msra.mxu1 %v2030_v56  ;;  %3768 = vmatprep.subr.bf16.mxu0 %v2103_v0  ;;  %v2142_v56 = vunpack.c.l.s8.bf16 %v982_v53  ;;  %v2215_v0 = vunpack.c.h.s8.bf16 %v1015_v44 }
 0x352   : > { %3743 = vmatprep.subr.bf16.mxu1 %v2039_v61  ;;  %v2151_v61 = vunpack.c.h.s8.bf16 %v983_v43 }
 0x354   : > { %3769 = vmatpush1.bf16.msra.mxu0 %v2102_v11  ;;  %v2214_v11 = vunpack.c.h.s8.bf16 %v1014_v54 }
 0x355   : > { %3744 = vmatpush1.bf16.msra.mxu1 %v2038_v3  ;;  %3770 = vmatprep.subr.bf16.mxu0 %v2111_v8  ;;  %v2150_v3 = vunpack.c.h.s8.bf16 %v982_v53  ;;  %v2223_v8 = vunpack.c.l.s8.bf16 %v1023_v7 }
 0x356   : > { %3745 = vmatprep.subr.bf16.mxu1 %v2047_v4  ;;  %v2159_v4 = vunpack.c.l.s8.bf16 %v991_v2 }
 0x358   : > { %3771 = vmatpush1.bf16.msra.mxu0 %v2110_v18  ;;  %v2222_v18 = vunpack.c.l.s8.bf16 %v1022_v15 }
 0x359   : > { %3746 = vmatpush1.bf16.msra.mxu1 %v2046_v10  ;;  %3772 = vmatprep.subr.bf16.mxu0 %v2119_v13  ;;  %v2158_v10 = vunpack.c.l.s8.bf16 %v990_v9  ;;  %v2231_v13 = vunpack.c.h.s8.bf16 %v1023_v7  ;;  %v2246_v7 = vunpack.c.h.s8.bf16 %v1030_v28 }
 0x35a   : > { %3747 = vmatprep.subr.bf16.mxu1 %v2055_v12  ;;  %v2167_v12 = vunpack.c.h.s8.bf16 %v991_v2  ;;  %v2182_v2 = vunpack.c.h.s8.bf16 %v998_v27 }
 0x35c   : > { %3773 = vmatpush1.bf16.msra.mxu0 %v2118_v20  ;;  %v2230_v20 = vunpack.c.h.s8.bf16 %v1022_v15 }
 0x35d   : > { %3748 = vmatpush1.bf16.msra.mxu1 %v2054_v19  ;;  %3774 = vmatprep.subr.bf16.mxu0 %v2127_v25  ;;  %v2166_v19 = vunpack.c.h.s8.bf16 %v990_v9  ;;  %v2175_v25 = vunpack.c.l.s8.bf16 %v999_v16 }
 0x35e   : > { %3799 = vmatprep.subr.bf16.mxu1 %v2191_v26  ;;  %v2239_v26 = vunpack.c.l.s8.bf16 %v1031_v17 }
 0x360   : > { %3750 = vmatmul.mubr.bf16.vlgmr.msra.gmra.mrb[32].mxu1 %v7795_v21  ;;  %3775 = vmatpush1.bf16.msra.mxu0 %v2126_v31 }
 0x361   : > { %3800 = vmatpush1.bf16.msra.mxu1 %v2190_v32  ;;  %3776 = vmatprep.subr.bf16.mxu0 %v2135_v35 }
 0x362   : > { %3801 = vmatprep.subr.bf16.mxu1 %v2199_v36  ;;  %3831 = vmatprep.mubr.bf16.mxu1 %v7803_v33 }
 0x364   : > { %3777 = vmatpush1.bf16.msra.mxu0 %v2134_v49 }
 0x365   : > { %3802 = vmatpush1.bf16.msra.mxu1 %v2198_v50  ;;  %3778 = vmatprep.subr.bf16.mxu0 %v2143_v51  ;;  %v2174_v51 = vunpack.c.l.s8.bf16 %v998_v27 }
 0x366   : > { %3803 = vmatprep.subr.bf16.mxu1 %v2207_v52  ;;  %v2238_v52 = vunpack.c.l.s8.bf16 %v1030_v28 }
 0x368   : > { %3779 = vmatpush1.bf16.msra.mxu0 %v2142_v56 }
 0x369   : > { %3804 = vmatpush1.bf16.msra.mxu1 %v2206_v63  ;;  %3780 = vmatprep.subr.bf16.mxu0 %v2151_v61  ;;  %v2247_v63 = vunpack.c.h.s8.bf16 %v1031_v17 }
 0x36a   : > { %3805 = vmatprep.subr.bf16.mxu1 %v2215_v0  ;;  %v1071_v0 = vld [vmem:[%s7629_s8 + $0xe18] sm:$0xff] }
 0x36c   : > { %3781 = vmatpush1.bf16.msra.mxu0 %v2150_v3 }
 0x36d   : > { %3806 = vmatpush1.bf16.msra.mxu1 %v2214_v11  ;;  %3782 = vmatprep.subr.bf16.mxu0 %v2159_v4  ;;  %v2319_v11 = vunpack.c.l.s8.bf16 %v1071_v0  ;;  %v1038_v4 = vld [vmem:[%s7629_s8 + $0xd10] sm:$0xff] }
 0x36e   : > { %3807 = vmatprep.subr.bf16.mxu1 %v2223_v8  ;;  %v1070_v8 = vld [vmem:[%s7629_s8 + $0xe10] sm:$0xff]  ;;  %v2254_v9 = vunpack.c.l.s8.bf16 %v1038_v4 }
 0x36f   : > { %v2318_v15 = vunpack.c.l.s8.bf16 %v1070_v8  ;;  %v2326_v17 = vunpack.c.h.s8.bf16 %v1070_v8  ;;  %v1094_v8 = vld [vmem:[%s7629_s8 + $0xed0] sm:$0xff] }
 0x370   : > { %3783 = vmatpush1.bf16.msra.mxu0 %v2158_v10 }
 0x371   : > { %3808 = vmatpush1.bf16.msra.mxu1 %v2222_v18  ;;  %3784 = vmatprep.subr.bf16.mxu0 %v2167_v12  ;;  %v2327_v18 = vunpack.c.h.s8.bf16 %v1071_v0  ;;  %v1047_v12 = vld [vmem:[%s7629_s8 + $0xd58] sm:$0xff] }
 0x372   : > { %3809 = vmatprep.subr.bf16.mxu1 %v2231_v13  ;;  %v3464_v31 = vpop.f32.mrb[20].mxu0  ;;  %v1079_v13 = vld [vmem:[%s7629_s8 + $0xe58] sm:$0xff] }
 0x373   : > { %v3505_v32 = vpop.f32.mrb[20].mxu1  ;;  %v3465_v35 = vadd.f32 %v3464_v31, %v8058_v55  ;;  %v3466_v36 = vpop.f32.mrb[21].mxu0  ;;  %v2183_v55 = vunpack.c.h.s8.bf16 %v999_v16  ;;  %v2262_v16 = vunpack.c.h.s8.bf16 %v1038_v4  ;;  %v2279_v31 = vunpack.c.h.s8.bf16 %v1047_v12  ;;  %v1095_v0 = vld [vmem:[%s7629_s8 + $0xed8] sm:$0xff]  ;;  %v1062_v4 = vld [vmem:[%s7629_s8 + $0xdd0] sm:$0xff] }
 0x374   : > { %v3507_v43 = vpop.f32.mrb[21].mxu1  ;;  %v3467_v44 = vadd.f32 %v3466_v36, %v8060_v62  ;;  %v3468_v49 = vpop.f32.mrb[22].mxu0  ;;  %3785 = vmatpush1.bf16.msra.mxu0 %v2166_v19  ;;  %v1039_v62 = vld [vmem:[%s7629_s8 + $0xd18] sm:$0xff]  ;;  %v2271_v19 = vunpack.c.l.s8.bf16 %v1047_v12 }
 0x375   : > { %v3509_v50 = vpop.f32.mrb[22].mxu1  ;;  %3810 = vmatpush1.bf16.msra.mxu1 %v2230_v20  ;;  %v8100_v53 = vadd.f32 %v3505_v32, %v3465_v35  ;;  %v3469_v54 = vpop.f32.mrb[23].mxu0  ;;  %3786 = vmatprep.subr.bf16.mxu0 %v2175_v25  ;;  %v2255_v3 = vunpack.c.l.s8.bf16 %v1039_v62  ;;  %v2263_v10 = vunpack.c.h.s8.bf16 %v1039_v62  ;;  %v2335_v20 = vunpack.c.l.s8.bf16 %v1079_v13  ;;  %v1046_v25 = vld [vmem:[%s7629_s8 + $0xd50] sm:$0xff]  ;;  %v1055_v35 = vld [vmem:[%s7629_s8 + $0xd98] sm:$0xff] }
 0x376   : > { %v3510_v56 = vpop.f32.mrb[23].mxu1  ;;  %3811 = vmatprep.subr.bf16.mxu1 %v2239_v26  ;;  %v8102_v61 = vadd.f32 %v3507_v43, %v3467_v44  ;;  %v1078_v26 = vld [vmem:[%s7629_s8 + $0xe50] sm:$0xff]  ;;  %v2270_v27 = vunpack.c.l.s8.bf16 %v1046_v25  ;;  %v2343_v32 = vunpack.c.h.s8.bf16 %v1079_v13  ;;  %v1087_v36 = vld [vmem:[%s7629_s8 + $0xe98] sm:$0xff]  ;;  %v2278_v43 = vunpack.c.h.s8.bf16 %v1046_v25 }
 0x377   : > { %v2334_v28 = vunpack.c.l.s8.bf16 %v1078_v26  ;;  %v2342_v44 = vunpack.c.h.s8.bf16 %v1078_v26  ;;  %v2287_v49 = vunpack.c.l.s8.bf16 %v1055_v35  ;;  %v2351_v50 = vunpack.c.l.s8.bf16 %v1087_v36  ;;  %v1063_v62 = vld [vmem:[%s7629_s8 + $0xdd8] sm:$0xff] }
 0x378   : > { %3787 = vmatpush1.bf16.msra.mxu0 %v2174_v51  ;;  %v1054_v51 = vld [vmem:[%s7629_s8 + $0xd90] sm:$0xff]  ;;  %v2311_v26 = vunpack.c.h.s8.bf16 %v1063_v62 }
 0x379   : > { %3812 = vmatpush1.bf16.msra.mxu1 %v2238_v52  ;;  %3788 = vmatprep.subr.bf16.mxu0 %v2183_v55  ;;  %v1086_v52 = vld [vmem:[%s7629_s8 + $0xe90] sm:$0xff]  ;;  %v2286_v54 = vunpack.c.l.s8.bf16 %v1054_v51  ;;  %v2295_v55 = vunpack.c.h.s8.bf16 %v1055_v35 }
 0x37a   : > { %3813 = vmatprep.subr.bf16.mxu1 %v2247_v63  ;;  %v2350_v56 = vunpack.c.l.s8.bf16 %v1086_v52  ;;  %v2359_v63 = vunpack.c.h.s8.bf16 %v1087_v36 }
 0x37c   : > { %3789 = vmatpush1.bf16.msra.mxu0 %v2182_v2  ;;  %v2294_v2 = vunpack.c.h.s8.bf16 %v1054_v51 }
 0x37d   : > { %3814 = vmatpush1.bf16.msra.mxu1 %v2246_v7  ;;  %3840 = vmatprep.subr.bf16.mxu0 %v2319_v11  ;;  %v2358_v7 = vunpack.c.h.s8.bf16 %v1086_v52  ;;  %v2367_v11 = vunpack.c.l.s8.bf16 %v1095_v0 }
 0x37e   : > { %3815 = vmatprep.subr.bf16.mxu1 %v2255_v3  ;;  %v2303_v3 = vunpack.c.l.s8.bf16 %v1063_v62 }
 0x37f   : > { %3791 = vmatmul.mubr.bf16.vlgmr.msra.gmra.mrb[36].mxu0 %v7797_v22 }
 0x380   : > { %3841 = vmatpush1.bf16.msra.mxu0 %v2318_v15  ;;  %3872 = vmatprep.mubr.bf16.mxu0 %v7805_v34 }
 0x381   : > { %3816 = vmatpush1.bf16.msra.mxu1 %v2254_v9  ;;  %3842 = vmatprep.subr.bf16.mxu0 %v2327_v18  ;;  %v562_v9 = vld [vmem:[#allocation2] sm:$0xff]  ;;  %v563_v18 = vld [vmem:[#allocation2 + $0x8] sm:$0xff] }
 0x382   : > { %3817 = vmatprep.subr.bf16.mxu1 %v2263_v10 }
 0x384   : > { %3843 = vmatpush1.bf16.msra.mxu0 %v2326_v17  ;;  %v2302_v17 = vunpack.c.l.s8.bf16 %v1062_v4 }
 0x385   : > { %3818 = vmatpush1.bf16.msra.mxu1 %v2262_v16  ;;  %3844 = vmatprep.subr.bf16.mxu0 %v2335_v20 }
 0x386   : > { %3819 = vmatprep.subr.bf16.mxu1 %v2271_v19  ;;  %v2366_v19 = vunpack.c.l.s8.bf16 %v1094_v8 }
 0x388   : > { %3845 = vmatpush1.bf16.msra.mxu0 %v2334_v28  ;;  %v1103_v28 = vld [vmem:[%s7629_s8 + $0xf18] sm:$0xff] }
 0x389   : > { %3820 = vmatpush1.bf16.msra.mxu1 %v2270_v27  ;;  %3846 = vmatprep.subr.bf16.mxu0 %v2343_v32  ;;  %v2375_v27 = vunpack.c.h.s8.bf16 %v1095_v0  ;;  %v2374_v32 = vunpack.c.h.s8.bf16 %v1094_v8  ;;  %v2383_v35 = vunpack.c.l.s8.bf16 %v1103_v28  ;;  %v2391_v51 = vunpack.c.h.s8.bf16 %v1103_v28 }
 0x38a   : > { %3821 = vmatprep.subr.bf16.mxu1 %v2279_v31  ;;  %v1135_v31 = vld [vmem:[%s7629_s8 + $0x1018] sm:$0xff] }
 0x38b   : > { %v2447_v36 = vunpack.c.l.s8.bf16 %v1135_v31  ;;  %v2455_v52 = vunpack.c.h.s8.bf16 %v1135_v31 }
 0x38c   : > { %3847 = vmatpush1.bf16.msra.mxu0 %v2342_v44  ;;  %v1134_v44 = vld [vmem:[%s7629_s8 + $0x1010] sm:$0xff] }
 0x38d   : > { %3822 = vmatpush1.bf16.msra.mxu1 %v2278_v43  ;;  %3848 = vmatprep.subr.bf16.mxu0 %v2351_v50  ;;  %v1102_v43 = vld [vmem:[%s7629_s8 + $0xf10] sm:$0xff]  ;;  %v2446_v50 = vunpack.c.l.s8.bf16 %v1134_v44 }
 0x38e   : > { %3823 = vmatprep.subr.bf16.mxu1 %v2287_v49  ;;  %v2382_v49 = vunpack.c.l.s8.bf16 %v1102_v43 }
 0x390   : > { %3849 = vmatpush1.bf16.msra.mxu0 %v2350_v56  ;;  %v1143_v56 = vld [vmem:[%s7629_s8 + $0x1058] sm:$0xff] }
 0x391   : > { %3824 = vmatpush1.bf16.msra.mxu1 %v2286_v54  ;;  %3850 = vmatprep.subr.bf16.mxu0 %v2359_v63  ;;  %v1111_v54 = vld [vmem:[%s7629_s8 + $0xf58] sm:$0xff]  ;;  %v2454_v63 = vunpack.c.h.s8.bf16 %v1134_v44  ;;  %v2463_v0 = vunpack.c.l.s8.bf16 %v1143_v56  ;;  %v2471_v8 = vunpack.c.h.s8.bf16 %v1143_v56 }
 0x392   : > { %3825 = vmatprep.subr.bf16.mxu1 %v2295_v55  ;;  %v3546_v15 = vpop.f32.mrb[24].mxu0  ;;  %v2390_v55 = vunpack.c.h.s8.bf16 %v1102_v43  ;;  %v2399_v62 = vunpack.c.l.s8.bf16 %v1111_v54 }
 0x393   : > { %v3547_v10 = vadd.f32 %v3546_v15, %v8100_v53  ;;  %v3548_v12 = vpop.f32.mrb[25].mxu0  ;;  %v1151_v15 = vld [vmem:[%s7629_s8 + $0x1098] sm:$0xff] }
 0x394   : > { %v3549_v13 = vadd.f32 %v3548_v12, %v8102_v61  ;;  %v3550_v16 = vpop.f32.mrb[26].mxu0  ;;  %3851 = vmatpush1.bf16.msra.mxu0 %v2358_v7  ;;  %v2310_v61 = vunpack.c.h.s8.bf16 %v1062_v4  ;;  %v1142_v7 = vld [vmem:[%s7629_s8 + $0x1050] sm:$0xff]  ;;  %v2407_v4 = vunpack.c.h.s8.bf16 %v1111_v54 }
 0x395   : > { %3826 = vmatpush1.bf16.msra.mxu1 %v2294_v2  ;;  %v5152_v20 = vadd.f32 %v3547_v10, %v562_v9  ;;  %v3551_v25 = vpop.f32.mrb[27].mxu0  ;;  %3852 = vmatprep.subr.bf16.mxu0 %v2367_v11  ;;  %v1110_v2 = vld [vmem:[%s7629_s8 + $0xf50] sm:$0xff]  ;;  %v2462_v11 = vunpack.c.l.s8.bf16 %v1142_v7  ;;  %v1119_v9 = vld [vmem:[%s7629_s8 + $0xf98] sm:$0xff] }
 0x396   : > { %3827 = vmatprep.subr.bf16.mxu1 %v2303_v3  ;;  %v5153_v53 = vadd.f32 %v3549_v13, %v563_v18  ;;  %v2398_v3 = vunpack.c.l.s8.bf16 %v1110_v2  ;;  %v2406_v10 = vunpack.c.h.s8.bf16 %v1110_v2  ;;  %v2470_v18 = vunpack.c.h.s8.bf16 %v1142_v7  ;;  %v1118_v16 = vld [vmem:[%s7629_s8 + $0xf90] sm:$0xff] }
 0x397   : > { %5160 = vst [vmem:[#allocation2] sm:$0xff] %v5152_v20  ;;  %v2415_v12 = vunpack.c.l.s8.bf16 %v1119_v9  ;;  %v2479_v13 = vunpack.c.l.s8.bf16 %v1151_v15  ;;  %v2423_v25 = vunpack.c.h.s8.bf16 %v1119_v9  ;;  %v2422_v28 = vunpack.c.h.s8.bf16 %v1118_v16 }
 0x398   : > { %5161 = vst [vmem:[#allocation2 + $0x8] sm:$0xff] %v5153_v53  ;;  %3853 = vmatpush1.bf16.msra.mxu0 %v2366_v19  ;;  %v2414_v19 = vunpack.c.l.s8.bf16 %v1118_v16  ;;  %v1159_v53 = vld [vmem:[%s7629_s8 + $0x10d8] sm:$0xff] }
 0x399   : > { %3828 = vmatpush1.bf16.msra.mxu1 %v2302_v17  ;;  %3854 = vmatprep.subr.bf16.mxu0 %v2375_v27  ;;  %v1150_v17 = vld [vmem:[%s7629_s8 + $0x1090] sm:$0xff]  ;;  %v1127_v27 = vld [vmem:[%s7629_s8 + $0xfd8] sm:$0xff]  ;;  %v2503_v56 = vunpack.c.h.s8.bf16 %v1159_v53 }
 0x39a   : > { %3829 = vmatprep.subr.bf16.mxu1 %v2311_v26  ;;  %v2478_v20 = vunpack.c.l.s8.bf16 %v1150_v17  ;;  %v2487_v26 = vunpack.c.h.s8.bf16 %v1151_v15  ;;  %v2486_v31 = vunpack.c.h.s8.bf16 %v1150_v17  ;;  %v2439_v54 = vunpack.c.h.s8.bf16 %v1127_v27 }
 0x39c   : > { %3855 = vmatpush1.bf16.msra.mxu0 %v2374_v32  ;;  %v2495_v32 = vunpack.c.l.s8.bf16 %v1159_v53 }
 0x39d   : > { %3830 = vmatpush1.bf16.msra.mxu1 %v2310_v61  ;;  %3856 = vmatprep.subr.bf16.mxu0 %v2383_v35  ;;  %v2431_v61 = vunpack.c.l.s8.bf16 %v1127_v27  ;;  %v1126_v35 = vld [vmem:[%s7629_s8 + $0xfd0] sm:$0xff] }
 0x39e   : > { %3881 = vmatprep.subr.bf16.mxu1 %v2447_v36  ;;  %v1158_v36 = vld [vmem:[%s7629_s8 + $0x10d0] sm:$0xff] }
 0x3a0   : > { %3832 = vmatmul.mubr.bf16.vlgmr.msra.gmra.mrb[36].mxu1 %v7843_v23  ;;  %3857 = vmatpush1.bf16.msra.mxu0 %v2382_v49 }
 0x3a1   : > { %3882 = vmatpush1.bf16.msra.mxu1 %v2446_v50  ;;  %3858 = vmatprep.subr.bf16.mxu0 %v2391_v51  ;;  %v2430_v50 = vunpack.c.l.s8.bf16 %v1126_v35  ;;  %v2494_v51 = vunpack.c.l.s8.bf16 %v1158_v36 }
 0x3a2   : > { %3883 = vmatprep.subr.bf16.mxu1 %v2455_v52  ;;  %3913 = vmatprep.mubr.bf16.mxu1 %v7851_v39 }
 0x3a4   : > { %3859 = vmatpush1.bf16.msra.mxu0 %v2390_v55  ;;  %v1167_v55 = vld [vmem:[%s7629_s8 + $0x1118] sm:$0xff] }
 0x3a5   : > { %3884 = vmatpush1.bf16.msra.mxu1 %v2454_v63  ;;  %3860 = vmatprep.subr.bf16.mxu0 %v2399_v62  ;;  %v1199_v63 = vld [vmem:[%s7629_s8 + $0x1218] sm:$0xff]  ;;  %v2438_v62 = vunpack.c.h.s8.bf16 %v1126_v35  ;;  %v2511_v2 = vunpack.c.l.s8.bf16 %v1167_v55  ;;  %v2519_v9 = vunpack.c.h.s8.bf16 %v1167_v55 }
 0x3a6   : > { %3885 = vmatprep.subr.bf16.mxu1 %v2463_v0  ;;  %v2502_v0 = vunpack.c.h.s8.bf16 %v1158_v36  ;;  %v2575_v7 = vunpack.c.l.s8.bf16 %v1199_v63  ;;  %v2583_v15 = vunpack.c.h.s8.bf16 %v1199_v63  ;;  %v1191_v55 = vld [vmem:[%s7629_s8 + $0x11d8] sm:$0xff] }
 0x3a7   : > { %v1223_v63 = vld [vmem:[%s7629_s8 + $0x12d8] sm:$0xff] }
 0x3a8   : > { %3861 = vmatpush1.bf16.msra.mxu0 %v2398_v3  ;;  %v1166_v3 = vld [vmem:[%s7629_s8 + $0x1110] sm:$0xff] }
 0x3a9   : > { %3886 = vmatpush1.bf16.msra.mxu1 %v2462_v11  ;;  %3862 = vmatprep.subr.bf16.mxu0 %v2407_v4  ;;  %v1198_v11 = vld [vmem:[%s7629_s8 + $0x1210] sm:$0xff]  ;;  %v2510_v4 = vunpack.c.l.s8.bf16 %v1166_v3 }
 0x3aa   : > { %3887 = vmatprep.subr.bf16.mxu1 %v2471_v8  ;;  %v2574_v8 = vunpack.c.l.s8.bf16 %v1198_v11 }
 0x3ac   : > { %3863 = vmatpush1.bf16.msra.mxu0 %v2406_v10  ;;  %v1175_v10 = vld [vmem:[%s7629_s8 + $0x1158] sm:$0xff] }
 0x3ad   : > { %3888 = vmatpush1.bf16.msra.mxu1 %v2470_v18  ;;  %3864 = vmatprep.subr.bf16.mxu0 %v2415_v12  ;;  %v1207_v18 = vld [vmem:[%s7629_s8 + $0x1258] sm:$0xff]  ;;  %v2518_v12 = vunpack.c.h.s8.bf16 %v1166_v3  ;;  %v2527_v16 = vunpack.c.l.s8.bf16 %v1175_v10  ;;  %v2535_v27 = vunpack.c.h.s8.bf16 %v1175_v10  ;;  %v1190_v3 = vld [vmem:[%s7629_s8 + $0x11d0] sm:$0xff] }
 0x3ae   : > { %3889 = vmatprep.subr.bf16.mxu1 %v2479_v13  ;;  %v2582_v13 = vunpack.c.h.s8.bf16 %v1198_v11  ;;  %v2591_v17 = vunpack.c.l.s8.bf16 %v1207_v18  ;;  %v2599_v53 = vunpack.c.h.s8.bf16 %v1207_v18  ;;  %v1222_v11 = vld [vmem:[%s7629_s8 + $0x12d0] sm:$0xff]  ;;  %v2558_v18 = vunpack.c.l.s8.bf16 %v1190_v3 }
 0x3b0   : > { %3865 = vmatpush1.bf16.msra.mxu0 %v2414_v19  ;;  %v1174_v19 = vld [vmem:[%s7629_s8 + $0x1150] sm:$0xff] }
 0x3b1   : > { %3890 = vmatpush1.bf16.msra.mxu1 %v2478_v20  ;;  %3866 = vmatprep.subr.bf16.mxu0 %v2423_v25  ;;  %v1206_v20 = vld [vmem:[%s7629_s8 + $0x1250] sm:$0xff]  ;;  %v2526_v25 = vunpack.c.l.s8.bf16 %v1174_v19 }
 0x3b2   : > { %3891 = vmatprep.subr.bf16.mxu1 %v2487_v26  ;;  %v2590_v26 = vunpack.c.l.s8.bf16 %v1206_v20 }
 0x3b3   : > { %v8142_v43 = vpop.f32.mrb[24].mxu1 }
 0x3b4   : > { %v8144_v44 = vpop.f32.mrb[25].mxu1  ;;  %3867 = vmatpush1.bf16.msra.mxu0 %v2422_v28  ;;  %v1183_v28 = vld [vmem:[%s7629_s8 + $0x1198] sm:$0xff] }
 0x3b5   : > { %v3591_v49 = vpop.f32.mrb[26].mxu1  ;;  %3892 = vmatpush1.bf16.msra.mxu1 %v2486_v31  ;;  %3868 = vmatprep.subr.bf16.mxu0 %v2431_v61  ;;  %v1215_v31 = vld [vmem:[%s7629_s8 + $0x1298] sm:$0xff]  ;;  %v2534_v61 = vunpack.c.h.s8.bf16 %v1174_v19  ;;  %v2543_v35 = vunpack.c.l.s8.bf16 %v1183_v28 }
 0x3b6   : > { %v3592_v52 = vpop.f32.mrb[27].mxu1  ;;  %3893 = vmatprep.subr.bf16.mxu1 %v2495_v32  ;;  %v2598_v32 = vunpack.c.h.s8.bf16 %v1206_v20  ;;  %v2607_v36 = vunpack.c.l.s8.bf16 %v1215_v31  ;;  %v1182_v49 = vld [vmem:[%s7629_s8 + $0x1190] sm:$0xff]  ;;  %v1231_v19 = vld [vmem:[%s7629_s8 + $0x1318] sm:$0xff] }
 0x3b7   : > { %v1263_v20 = vld [vmem:[%s7629_s8 + $0x1418] sm:$0xff] }
 0x3b8   : > { %3869 = vmatpush1.bf16.msra.mxu0 %v2430_v50  ;;  %v1214_v50 = vld [vmem:[%s7629_s8 + $0x1290] sm:$0xff] }
 0x3b9   : > { %3894 = vmatpush1.bf16.msra.mxu1 %v2494_v51  ;;  %3870 = vmatprep.subr.bf16.mxu0 %v2439_v54  ;;  %v2542_v51 = vunpack.c.l.s8.bf16 %v1182_v49  ;;  %v2606_v52 = vunpack.c.l.s8.bf16 %v1214_v50  ;;  %v2551_v54 = vunpack.c.h.s8.bf16 %v1183_v28 }
 0x3ba   : > { %3895 = vmatprep.subr.bf16.mxu1 %v2503_v56  ;;  %v2615_v56 = vunpack.c.h.s8.bf16 %v1215_v31 }
 0x3bc   : > { %3871 = vmatpush1.bf16.msra.mxu0 %v2438_v62  ;;  %v2550_v62 = vunpack.c.h.s8.bf16 %v1182_v49 }
 0x3bd   : > { %3896 = vmatpush1.bf16.msra.mxu1 %v2502_v0  ;;  %3922 = vmatprep.subr.bf16.mxu0 %v2575_v7  ;;  %v2614_v0 = vunpack.c.h.s8.bf16 %v1214_v50  ;;  %v2623_v7 = vunpack.c.l.s8.bf16 %v1223_v63 }
 0x3be   : > { %3897 = vmatprep.subr.bf16.mxu1 %v2511_v2  ;;  %v2559_v2 = vunpack.c.l.s8.bf16 %v1191_v55 }
 0x3bf   : > { %3873 = vmatmul.mubr.bf16.vlgmr.msra.gmra.mrb[40].mxu0 %v7845_v24 }
 0x3c0   : > { %3923 = vmatpush1.bf16.msra.mxu0 %v2574_v8  ;;  %3954 = vmatprep.mubr.bf16.mxu0 %v7853_v40 }
 0x3c1   : > { %3898 = vmatpush1.bf16.msra.mxu1 %v2510_v4  ;;  %3924 = vmatprep.subr.bf16.mxu0 %v2583_v15 }
 0x3c2   : > { %3899 = vmatprep.subr.bf16.mxu1 %v2519_v9 }
 0x3c4   : > { %3925 = vmatpush1.bf16.msra.mxu0 %v2582_v13 }
 0x3c5   : > { %3900 = vmatpush1.bf16.msra.mxu1 %v2518_v12  ;;  %3926 = vmatprep.subr.bf16.mxu0 %v2591_v17  ;;  %v2622_v12 = vunpack.c.l.s8.bf16 %v1222_v11  ;;  %v2631_v17 = vunpack.c.h.s8.bf16 %v1223_v63 }
 0x3c6   : > { %3901 = vmatprep.subr.bf16.mxu1 %v2527_v16  ;;  %v2567_v16 = vunpack.c.h.s8.bf16 %v1191_v55 }
 0x3c8   : > { %3927 = vmatpush1.bf16.msra.mxu0 %v2590_v26  ;;  %v2703_v26 = vunpack.c.l.s8.bf16 %v1263_v20 }
 0x3c9   : > { %3902 = vmatpush1.bf16.msra.mxu1 %v2526_v25  ;;  %3928 = vmatprep.subr.bf16.mxu0 %v2599_v53  ;;  %v2639_v25 = vunpack.c.l.s8.bf16 %v1231_v19  ;;  %v1262_v53 = vld [vmem:[%s7629_s8 + $0x1410] sm:$0xff] }
 0x3ca   : > { %3903 = vmatprep.subr.bf16.mxu1 %v2535_v27  ;;  %v1230_v27 = vld [vmem:[%s7629_s8 + $0x1310] sm:$0xff]  ;;  %v2702_v31 = vunpack.c.l.s8.bf16 %v1262_v53  ;;  %v2710_v50 = vunpack.c.h.s8.bf16 %v1262_v53 }
 0x3cb   : > { %v2638_v28 = vunpack.c.l.s8.bf16 %v1230_v27  ;;  %v2646_v49 = vunpack.c.h.s8.bf16 %v1230_v27  ;;  %v1254_v27 = vld [vmem:[%s7629_s8 + $0x13d0] sm:$0xff] }
 0x3cc   : > { %3929 = vmatpush1.bf16.msra.mxu0 %v2598_v32  ;;  %v2711_v32 = vunpack.c.h.s8.bf16 %v1263_v20  ;;  %v1287_v20 = vld [vmem:[%s7629_s8 + $0x14d8] sm:$0xff]  ;;  %v1286_v53 = vld [vmem:[%s7629_s8 + $0x14d0] sm:$0xff] }
 0x3cd   : > { %3904 = vmatpush1.bf16.msra.mxu1 %v2534_v61  ;;  %3930 = vmatprep.subr.bf16.mxu0 %v2607_v36  ;;  %v2647_v61 = vunpack.c.h.s8.bf16 %v1231_v19  ;;  %v1271_v36 = vld [vmem:[%s7629_s8 + $0x1458] sm:$0xff] }
 0x3ce   : > { %3905 = vmatprep.subr.bf16.mxu1 %v2543_v35  ;;  %v1239_v35 = vld [vmem:[%s7629_s8 + $0x1358] sm:$0xff] }
 0x3cf   : > { %v1255_v19 = vld [vmem:[%s7629_s8 + $0x13d8] sm:$0xff] }
 0x3d0   : > { %3931 = vmatpush1.bf16.msra.mxu0 %v2606_v52  ;;  %v2719_v52 = vunpack.c.l.s8.bf16 %v1271_v36 }
 0x3d1   : > { %3906 = vmatpush1.bf16.msra.mxu1 %v2542_v51  ;;  %3932 = vmatprep.subr.bf16.mxu0 %v2615_v56  ;;  %v2655_v51 = vunpack.c.l.s8.bf16 %v1239_v35  ;;  %v1270_v56 = vld [vmem:[%s7629_s8 + $0x1450] sm:$0xff] }
 0x3d2   : > { %3907 = vmatprep.subr.bf16.mxu1 %v2551_v54  ;;  %v3628_v4 = vpop.f32.mrb[28].mxu0  ;;  %v1238_v54 = vld [vmem:[%s7629_s8 + $0x1350] sm:$0xff]  ;;  %v2718_v63 = vunpack.c.l.s8.bf16 %v1270_v56 }
 0x3d3   : > { %v8165_v8 = vadd.f32 %v3628_v4, %v8142_v43  ;;  %v3630_v9 = vpop.f32.mrb[29].mxu0  ;;  %v2566_v43 = vunpack.c.h.s8.bf16 %v1190_v3  ;;  %v2654_v55 = vunpack.c.l.s8.bf16 %v1238_v54  ;;  %v2662_v3 = vunpack.c.h.s8.bf16 %v1238_v54  ;;  %v1295_v54 = vld [vmem:[%s7629_s8 + $0x1518] sm:$0xff] }
 0x3d4   : > { %v8168_v15 = vadd.f32 %v3630_v9, %v8144_v44  ;;  %v3632_v10 = vpop.f32.mrb[30].mxu0  ;;  %3933 = vmatpush1.bf16.msra.mxu0 %v2614_v0  ;;  %v2630_v44 = vunpack.c.h.s8.bf16 %v1222_v11  ;;  %v2727_v0 = vunpack.c.h.s8.bf16 %v1271_v36  ;;  %v2726_v11 = vunpack.c.h.s8.bf16 %v1270_v56  ;;  %v1327_v56 = vld [vmem:[%s7629_s8 + $0x1618] sm:$0xff] }
 0x3d5   : > { %3908 = vmatpush1.bf16.msra.mxu1 %v2550_v62  ;;  %v3633_v13 = vpop.f32.mrb[31].mxu0  ;;  %3934 = vmatprep.subr.bf16.mxu0 %v2623_v7  ;;  %v2663_v62 = vunpack.c.h.s8.bf16 %v1239_v35  ;;  %v1279_v7 = vld [vmem:[%s7629_s8 + $0x1498] sm:$0xff]  ;;  %v1246_v10 = vld [vmem:[%s7629_s8 + $0x1390] sm:$0xff]  ;;  %v2686_v36 = vunpack.c.l.s8.bf16 %v1254_v27 }
 0x3d6   : > { %3909 = vmatprep.subr.bf16.mxu1 %v2559_v2  ;;  %v1247_v2 = vld [vmem:[%s7629_s8 + $0x1398] sm:$0xff]  ;;  %v2735_v9 = vunpack.c.l.s8.bf16 %v1279_v7 }
 0x3d7   : > { %v2671_v4 = vunpack.c.l.s8.bf16 %v1247_v2 }
 0x3d8   : > { %3935 = vmatpush1.bf16.msra.mxu0 %v2622_v12  ;;  %v2670_v12 = vunpack.c.l.s8.bf16 %v1246_v10 }
 0x3d9   : > { %3910 = vmatpush1.bf16.msra.mxu1 %v2558_v18  ;;  %3936 = vmatprep.subr.bf16.mxu0 %v2631_v17  ;;  %v1278_v18 = vld [vmem:[%s7629_s8 + $0x1490] sm:$0xff]  ;;  %v2743_v17 = vunpack.c.h.s8.bf16 %v1279_v7 }
 0x3da   : > { %3911 = vmatprep.subr.bf16.mxu1 %v2567_v16  ;;  %v2734_v13 = vunpack.c.l.s8.bf16 %v1278_v18  ;;  %v2679_v16 = vunpack.c.h.s8.bf16 %v1247_v2 }
 0x3dc   : > { %3937 = vmatpush1.bf16.msra.mxu0 %v2630_v44  ;;  %v2742_v44 = vunpack.c.h.s8.bf16 %v1278_v18 }
 0x3dd   : > { %3912 = vmatpush1.bf16.msra.mxu1 %v2566_v43  ;;  %3938 = vmatprep.subr.bf16.mxu0 %v2639_v25  ;;  %v2678_v43 = vunpack.c.h.s8.bf16 %v1246_v10  ;;  %v2687_v25 = vunpack.c.l.s8.bf16 %v1255_v19 }
 0x3de   : > { %3963 = vmatprep.subr.bf16.mxu1 %v2703_v26  ;;  %v2751_v26 = vunpack.c.l.s8.bf16 %v1287_v20 }
 0x3e0   : > { %3914 = vmatmul.mubr.bf16.vlgmr.msra.gmra.mrb[40].mxu1 %v7895_v59  ;;  %3939 = vmatpush1.bf16.msra.mxu0 %v2638_v28 }
 0x3e1   : > { %3964 = vmatpush1.bf16.msra.mxu1 %v2702_v31  ;;  %3940 = vmatprep.subr.bf16.mxu0 %v2647_v61 }
 0x3e2   : > { %3965 = vmatprep.subr.bf16.mxu1 %v2711_v32  ;;  %3995 = vmatprep.mubr.bf16.mxu1 %v7903_v5 }
 0x3e4   : > { %3941 = vmatpush1.bf16.msra.mxu0 %v2646_v49  ;;  %v2750_v49 = vunpack.c.l.s8.bf16 %v1286_v53 }
 0x3e5   : > { %3966 = vmatpush1.bf16.msra.mxu1 %v2710_v50  ;;  %3942 = vmatprep.subr.bf16.mxu0 %v2655_v51  ;;  %v2695_v51 = vunpack.c.h.s8.bf16 %v1255_v19 }
 0x3e6   : > { %3967 = vmatprep.subr.bf16.mxu1 %v2719_v52  ;;  %v2759_v52 = vunpack.c.h.s8.bf16 %v1287_v20 }
 0x3e8   : > { %3943 = vmatpush1.bf16.msra.mxu0 %v2654_v55  ;;  %v2767_v55 = vunpack.c.l.s8.bf16 %v1295_v54 }
 0x3e9   : > { %3968 = vmatpush1.bf16.msra.mxu1 %v2718_v63  ;;  %3944 = vmatprep.subr.bf16.mxu0 %v2663_v62  ;;  %v2831_v63 = vunpack.c.l.s8.bf16 %v1327_v56  ;;  %v1294_v62 = vld [vmem:[%s7629_s8 + $0x1510] sm:$0xff] }
 0x3ea   : > { %3969 = vmatprep.subr.bf16.mxu1 %v2727_v0  ;;  %v1326_v0 = vld [vmem:[%s7629_s8 + $0x1610] sm:$0xff]  ;;  %v2766_v2 = vunpack.c.l.s8.bf16 %v1294_v62  ;;  %v2774_v10 = vunpack.c.h.s8.bf16 %v1294_v62 }
 0x3eb   : > { %v2830_v7 = vunpack.c.l.s8.bf16 %v1326_v0  ;;  %v2838_v18 = vunpack.c.h.s8.bf16 %v1326_v0  ;;  %v1318_v62 = vld [vmem:[%s7629_s8 + $0x15d0] sm:$0xff] }
 0x3ec   : > { %3945 = vmatpush1.bf16.msra.mxu0 %v2662_v3  ;;  %v2775_v3 = vunpack.c.h.s8.bf16 %v1295_v54  ;;  %v1319_v54 = vld [vmem:[%s7629_s8 + $0x15d8] sm:$0xff]  ;;  %v1350_v0 = vld [vmem:[%s7629_s8 + $0x16d0] sm:$0xff] }
 0x3ed   : > { %3970 = vmatpush1.bf16.msra.mxu1 %v2726_v11  ;;  %3946 = vmatprep.subr.bf16.mxu0 %v2671_v4  ;;  %v2839_v11 = vunpack.c.h.s8.bf16 %v1327_v56  ;;  %v1303_v4 = vld [vmem:[%s7629_s8 + $0x1558] sm:$0xff] }
 0x3ee   : > { %3971 = vmatprep.subr.bf16.mxu1 %v2735_v9  ;;  %v1335_v9 = vld [vmem:[%s7629_s8 + $0x1658] sm:$0xff] }
 0x3ef   : > { %v1351_v56 = vld [vmem:[%s7629_s8 + $0x16d8] sm:$0xff] }
 0x3f0   : > { %3947 = vmatpush1.bf16.msra.mxu0 %v2670_v12  ;;  %v2783_v12 = vunpack.c.l.s8.bf16 %v1303_v4 }
 0x3f1   : > { %3972 = vmatpush1.bf16.msra.mxu1 %v2734_v13  ;;  %3948 = vmatprep.subr.bf16.mxu0 %v2679_v16  ;;  %v2847_v13 = vunpack.c.l.s8.bf16 %v1335_v9  ;;  %v1302_v16 = vld [vmem:[%s7629_s8 + $0x1550] sm:$0xff] }
 0x3f2   : > { %3973 = vmatprep.subr.bf16.mxu1 %v2743_v17  ;;  %v1334_v17 = vld [vmem:[%s7629_s8 + $0x1650] sm:$0xff]  ;;  %v2782_v19 = vunpack.c.l.s8.bf16 %v1302_v16 }
 0x3f3   : > { %v3669_v28 = vpop.f32.mrb[28].mxu1  ;;  %v2846_v20 = vunpack.c.l.s8.bf16 %v1334_v17 }
 0x3f4   : > { %v8189_v31 = vadd.f32 %v3669_v28, %v8165_v8  ;;  %v3671_v61 = vpop.f32.mrb[29].mxu1  ;;  %3949 = vmatpush1.bf16.msra.mxu0 %v2678_v43  ;;  %v2694_v8 = vunpack.c.h.s8.bf16 %v1254_v27  ;;  %v2791_v43 = vunpack.c.h.s8.bf16 %v1303_v4  ;;  %v2790_v27 = vunpack.c.h.s8.bf16 %v1302_v16  ;;  %v1359_v16 = vld [vmem:[%s7629_s8 + $0x1718] sm:$0xff] }
 0x3f5   : > { %v8192_v32 = vadd.f32 %v3671_v61, %v8168_v15  ;;  %v3673_v35 = vpop.f32.mrb[30].mxu1  ;;  %3974 = vmatpush1.bf16.msra.mxu1 %v2742_v44  ;;  %3950 = vmatprep.subr.bf16.mxu0 %v2687_v25  ;;  %v2758_v15 = vunpack.c.h.s8.bf16 %v1286_v53  ;;  %v2855_v44 = vunpack.c.h.s8.bf16 %v1335_v9  ;;  %v1311_v25 = vld [vmem:[%s7629_s8 + $0x1598] sm:$0xff]  ;;  %v2854_v53 = vunpack.c.h.s8.bf16 %v1334_v17 }
 0x3f6   : > { %v3674_v50 = vpop.f32.mrb[31].mxu1  ;;  %3975 = vmatprep.subr.bf16.mxu1 %v2751_v26  ;;  %v1343_v26 = vld [vmem:[%s7629_s8 + $0x1698] sm:$0xff]  ;;  %v2799_v28 = vunpack.c.l.s8.bf16 %v1311_v25  ;;  %v1310_v35 = vld [vmem:[%s7629_s8 + $0x1590] sm:$0xff]  ;;  %v2814_v9 = vunpack.c.l.s8.bf16 %v1318_v62 }
 0x3f7   : > { %v2863_v61 = vunpack.c.l.s8.bf16 %v1343_v26  ;;  %v1391_v17 = vld [vmem:[%s7629_s8 + $0x1818] sm:$0xff] }
 0x3f8   : > { %3951 = vmatpush1.bf16.msra.mxu0 %v2686_v36  ;;  %v1342_v36 = vld [vmem:[%s7629_s8 + $0x1690] sm:$0xff] }
 0x3f9   : > { %3976 = vmatpush1.bf16.msra.mxu1 %v2750_v49  ;;  %3952 = vmatprep.subr.bf16.mxu0 %v2695_v51  ;;  %v2798_v49 = vunpack.c.l.s8.bf16 %v1310_v35  ;;  %v2862_v50 = vunpack.c.l.s8.bf16 %v1342_v36  ;;  %v2807_v51 = vunpack.c.h.s8.bf16 %v1311_v25 }
 0x3fa   : > { %3977 = vmatprep.subr.bf16.mxu1 %v2759_v52  ;;  %v2871_v52 = vunpack.c.h.s8.bf16 %v1343_v26 }
 0x3fc   : > { %3953 = vmatpush1.bf16.msra.mxu0 %v2694_v8  ;;  %v2806_v8 = vunpack.c.h.s8.bf16 %v1310_v35 }
 0x3fd   : > { %3978 = vmatpush1.bf16.msra.mxu1 %v2758_v15  ;;  %4004 = vmatprep.subr.bf16.mxu0 %v2831_v63  ;;  %v2870_v15 = vunpack.c.h.s8.bf16 %v1342_v36  ;;  %v2879_v63 = vunpack.c.l.s8.bf16 %v1351_v56 }
 0x3fe   : > { %3979 = vmatprep.subr.bf16.mxu1 %v2767_v55  ;;  %v2815_v55 = vunpack.c.l.s8.bf16 %v1319_v54 }
 0x3ff   : > { %3955 = vmatmul.mubr.bf16.vlgmr.msra.gmra.mrb[44].mxu0 %v7897_v60 }
 0x400   : > { %4005 = vmatpush1.bf16.msra.mxu0 %v2830_v7  ;;  %4036 = vmatprep.mubr.bf16.mxu0 %v7905_v6 }
 0x401   : > { %3980 = vmatpush1.bf16.msra.mxu1 %v2766_v2  ;;  %4006 = vmatprep.subr.bf16.mxu0 %v2839_v11 }
 0x402   : > { %3981 = vmatprep.subr.bf16.mxu1 %v2775_v3 }
 0x404   : > { %4007 = vmatpush1.bf16.msra.mxu0 %v2838_v18 }
 0x405   : > { %3982 = vmatpush1.bf16.msra.mxu1 %v2774_v10  ;;  %4008 = vmatprep.subr.bf16.mxu0 %v2847_v13  ;;  %v2878_v10 = vunpack.c.l.s8.bf16 %v1350_v0  ;;  %v2887_v13 = vunpack.c.h.s8.bf16 %v1351_v56 }
 0x406   : > { %3983 = vmatprep.subr.bf16.mxu1 %v2783_v12  ;;  %v2823_v12 = vunpack.c.h.s8.bf16 %v1319_v54 }
 0x408   : > { %4009 = vmatpush1.bf16.msra.mxu0 %v2846_v20  ;;  %v2959_v20 = vunpack.c.l.s8.bf16 %v1391_v17 }
 0x409   : > { %3984 = vmatpush1.bf16.msra.mxu1 %v2782_v19  ;;  %4010 = vmatprep.subr.bf16.mxu0 %v2855_v44  ;;  %v2895_v19 = vunpack.c.l.s8.bf16 %v1359_v16  ;;  %v1390_v44 = vld [vmem:[%s7629_s8 + $0x1810] sm:$0xff] }
 0x40a   : > { %3985 = vmatprep.subr.bf16.mxu1 %v2791_v43  ;;  %v1358_v43 = vld [vmem:[%s7629_s8 + $0x1710] sm:$0xff]  ;;  %v2958_v26 = vunpack.c.l.s8.bf16 %v1390_v44  ;;  %v2966_v36 = vunpack.c.h.s8.bf16 %v1390_v44 }
 0x40b   : > { %v2894_v25 = vunpack.c.l.s8.bf16 %v1358_v43  ;;  %v2902_v35 = vunpack.c.h.s8.bf16 %v1358_v43  ;;  %v1382_v43 = vld [vmem:[%s7629_s8 + $0x17d0] sm:$0xff] }
 0x40c   : > { %4011 = vmatpush1.bf16.msra.mxu0 %v2854_v53  ;;  %v2967_v53 = vunpack.c.h.s8.bf16 %v1391_v17  ;;  %v1415_v17 = vld [vmem:[%s7629_s8 + $0x18d8] sm:$0xff]  ;;  %v1414_v44 = vld [vmem:[%s7629_s8 + $0x18d0] sm:$0xff] }
 0x40d   : > { %3986 = vmatpush1.bf16.msra.mxu1 %v2790_v27  ;;  %4012 = vmatprep.subr.bf16.mxu0 %v2863_v61  ;;  %v2903_v27 = vunpack.c.h.s8.bf16 %v1359_v16  ;;  %v1399_v61 = vld [vmem:[%s7629_s8 + $0x1858] sm:$0xff] }
 0x40e   : > { %3987 = vmatprep.subr.bf16.mxu1 %v2799_v28  ;;  %v1367_v28 = vld [vmem:[%s7629_s8 + $0x1758] sm:$0xff] }
 0x40f   : > { %v1383_v16 = vld [vmem:[%s7629_s8 + $0x17d8] sm:$0xff] }
 0x410   : > { %4013 = vmatpush1.bf16.msra.mxu0 %v2862_v50  ;;  %v2975_v50 = vunpack.c.l.s8.bf16 %v1399_v61 }
 0x411   : > { %3988 = vmatpush1.bf16.msra.mxu1 %v2798_v49  ;;  %4014 = vmatprep.subr.bf16.mxu0 %v2871_v52  ;;  %v2911_v49 = vunpack.c.l.s8.bf16 %v1367_v28  ;;  %v1398_v52 = vld [vmem:[%s7629_s8 + $0x1850] sm:$0xff] }
 0x412   : > { %3989 = vmatprep.subr.bf16.mxu1 %v2807_v51  ;;  %v3710_v2 = vpop.f32.mrb[32].mxu0  ;;  %v1366_v51 = vld [vmem:[%s7629_s8 + $0x1750] sm:$0xff]  ;;  %v2974_v56 = vunpack.c.l.s8.bf16 %v1398_v52 }
 0x413   : > { %v8213_v7 = vadd.f32 %v3710_v2, %v8189_v31  ;;  %v3712_v3 = vpop.f32.mrb[33].mxu0  ;;  %v2822_v31 = vunpack.c.h.s8.bf16 %v1318_v62  ;;  %v2910_v54 = vunpack.c.l.s8.bf16 %v1366_v51  ;;  %v2918_v62 = vunpack.c.h.s8.bf16 %v1366_v51  ;;  %v625_v51 = vld [vmem:[%s7629_s8 + $0x28] sm:$0xff] }
 0x414   : > { %v8216_v11 = vadd.f32 %v3712_v3, %v8192_v32  ;;  %v3714_v4 = vpop.f32.mrb[34].mxu0  ;;  %4015 = vmatpush1.bf16.msra.mxu0 %v2870_v15  ;;  %v2886_v32 = vunpack.c.h.s8.bf16 %v1350_v0  ;;  %v2983_v15 = vunpack.c.h.s8.bf16 %v1399_v61  ;;  %v2982_v0 = vunpack.c.h.s8.bf16 %v1398_v52  ;;  %v689_v52 = vld [vmem:[%s7629_s8 + $0x228] sm:$0xff] }
 0x415   : > { %3990 = vmatpush1.bf16.msra.mxu1 %v2806_v8  ;;  %v3715_v18 = vpop.f32.mrb[35].mxu0  ;;  %4016 = vmatprep.subr.bf16.mxu0 %v2879_v63  ;;  %v2919_v8 = vunpack.c.h.s8.bf16 %v1367_v28  ;;  %v1407_v63 = vld [vmem:[%s7629_s8 + $0x1898] sm:$0xff]  ;;  %v1374_v4 = vld [vmem:[%s7629_s8 + $0x1790] sm:$0xff]  ;;  %v2942_v61 = vunpack.c.l.s8.bf16 %v1382_v43 }
 0x416   : > { %3991 = vmatprep.subr.bf16.mxu1 %v2815_v55  ;;  %v1375_v55 = vld [vmem:[%s7629_s8 + $0x1798] sm:$0xff]  ;;  %v2991_v3 = vunpack.c.l.s8.bf16 %v1407_v63 }
 0x417   : > { %v2927_v2 = vunpack.c.l.s8.bf16 %v1375_v55 }
 0x418   : > { %4017 = vmatpush1.bf16.msra.mxu0 %v2878_v10  ;;  %v2926_v10 = vunpack.c.l.s8.bf16 %v1374_v4 }
 0x419   : > { %3992 = vmatpush1.bf16.msra.mxu1 %v2814_v9  ;;  %4018 = vmatprep.subr.bf16.mxu0 %v2887_v13  ;;  %v1406_v9 = vld [vmem:[%s7629_s8 + $0x1890] sm:$0xff]  ;;  %v2999_v13 = vunpack.c.h.s8.bf16 %v1407_v63 }
 0x41a   : > { %3993 = vmatprep.subr.bf16.mxu1 %v2823_v12  ;;  %v2990_v18 = vunpack.c.l.s8.bf16 %v1406_v9  ;;  %v2935_v12 = vunpack.c.h.s8.bf16 %v1375_v55 }
 0x41c   : > { %4019 = vmatpush1.bf16.msra.mxu0 %v2886_v32  ;;  %v2998_v32 = vunpack.c.h.s8.bf16 %v1406_v9 }
 0x41d   : > { %3994 = vmatpush1.bf16.msra.mxu1 %v2822_v31  ;;  %4020 = vmatprep.subr.bf16.mxu0 %v2895_v19  ;;  %v2934_v31 = vunpack.c.h.s8.bf16 %v1374_v4  ;;  %v2943_v19 = vunpack.c.l.s8.bf16 %v1383_v16 }
 0x41e   : > { %4045 = vmatprep.subr.bf16.mxu1 %v2959_v20  ;;  %v3007_v20 = vunpack.c.l.s8.bf16 %v1415_v17 }
 0x420   : > { %3996 = vmatmul.mubr.bf16.vlgmr.msra.gmra.mrb[44].mxu1 %v7949_v45  ;;  %4021 = vmatpush1.bf16.msra.mxu0 %v2894_v25 }
 0x421   : > { %4046 = vmatpush1.bf16.msra.mxu1 %v2958_v26  ;;  %4022 = vmatprep.subr.bf16.mxu0 %v2903_v27 }
 0x422   : > { %4047 = vmatprep.subr.bf16.mxu1 %v2967_v53  ;;  %4077 = vmatprep.mubr.bf16.mxu1 %v7251_v1 }
 0x424   : > { %4023 = vmatpush1.bf16.msra.mxu0 %v2902_v35  ;;  %v3006_v35 = vunpack.c.l.s8.bf16 %v1414_v44 }
 0x425   : > { %4048 = vmatpush1.bf16.msra.mxu1 %v2966_v36  ;;  %4024 = vmatprep.subr.bf16.mxu0 %v2911_v49  ;;  %v2951_v49 = vunpack.c.h.s8.bf16 %v1383_v16 }
 0x426   : > { %4049 = vmatprep.subr.bf16.mxu1 %v2975_v50  ;;  %v3015_v50 = vunpack.c.h.s8.bf16 %v1415_v17 }
 0x428   : > { %4025 = vmatpush1.bf16.msra.mxu0 %v2910_v54  ;;  %v1425_v54 = vunpack.c.l.s8.bf16 %v625_v51 }
 0x429   : > { %4050 = vmatpush1.bf16.msra.mxu1 %v2974_v56  ;;  %4026 = vmatprep.subr.bf16.mxu0 %v2919_v8  ;;  %v1553_v56 = vunpack.c.l.s8.bf16 %v689_v52  ;;  %v624_v8 = vld [vmem:[%s7629_s8 + $0x20] sm:$0xff] }
 0x42a   : > { %4051 = vmatprep.subr.bf16.mxu1 %v2983_v15  ;;  %v688_v15 = vld [vmem:[%s7629_s8 + $0x220] sm:$0xff]  ;;  %v1424_v55 = vunpack.c.l.s8.bf16 %v624_v8  ;;  %v1432_v4 = vunpack.c.h.s8.bf16 %v624_v8 }
 0x42b   : > { %v1552_v63 = vunpack.c.l.s8.bf16 %v688_v15  ;;  %v1560_v9 = vunpack.c.h.s8.bf16 %v688_v15  ;;  %v648_v8 = vld [vmem:[%s7629_s8 + $0xe0] sm:$0xff] }
 0x42c   : > { %4027 = vmatpush1.bf16.msra.mxu0 %v2918_v62  ;;  %v1433_v62 = vunpack.c.h.s8.bf16 %v625_v51  ;;  %v649_v51 = vld [vmem:[%s7629_s8 + $0xe8] sm:$0xff]  ;;  %v712_v15 = vld [vmem:[%s7629_s8 + $0x2e0] sm:$0xff] }
 0x42d   : > { %4052 = vmatpush1.bf16.msra.mxu1 %v2982_v0  ;;  %4028 = vmatprep.subr.bf16.mxu0 %v2927_v2  ;;  %v1561_v0 = vunpack.c.h.s8.bf16 %v689_v52  ;;  %v633_v2 = vld [vmem:[%s7629_s8 + $0x68] sm:$0xff] }
 0x42e   : > { %4053 = vmatprep.subr.bf16.mxu1 %v2991_v3  ;;  %v697_v3 = vld [vmem:[%s7629_s8 + $0x268] sm:$0xff] }
 0x42f   : > { %v713_v52 = vld [vmem:[%s7629_s8 + $0x2e8] sm:$0xff] }
 0x430   : > { %4029 = vmatpush1.bf16.msra.mxu0 %v2926_v10  ;;  %v1441_v10 = vunpack.c.l.s8.bf16 %v633_v2 }
 0x431   : > { %4054 = vmatpush1.bf16.msra.mxu1 %v2990_v18  ;;  %4030 = vmatprep.subr.bf16.mxu0 %v2935_v12  ;;  %v1569_v18 = vunpack.c.l.s8.bf16 %v697_v3  ;;  %v632_v12 = vld [vmem:[%s7629_s8 + $0x60] sm:$0xff] }
 0x432   : > { %4055 = vmatprep.subr.bf16.mxu1 %v2999_v13  ;;  %v696_v13 = vld [vmem:[%s7629_s8 + $0x260] sm:$0xff]  ;;  %v1440_v16 = vunpack.c.l.s8.bf16 %v632_v12 }
 0x433   : > { %v3751_v25 = vpop.f32.mrb[32].mxu1  ;;  %v1568_v17 = vunpack.c.l.s8.bf16 %v696_v13 }
 0x434   : > { %v8237_v26 = vadd.f32 %v3751_v25, %v8213_v7  ;;  %v3753_v27 = vpop.f32.mrb[33].mxu1  ;;  %4031 = vmatpush1.bf16.msra.mxu0 %v2934_v31  ;;  %v2950_v7 = vunpack.c.h.s8.bf16 %v1382_v43  ;;  %v1449_v31 = vunpack.c.h.s8.bf16 %v633_v2  ;;  %v1448_v43 = vunpack.c.h.s8.bf16 %v632_v12  ;;  %v657_v12 = vld [vmem:[%s7629_s8 + $0x128] sm:$0xff] }
 0x435   : > { %v8240_v53 = vadd.f32 %v3753_v27, %v8216_v11  ;;  %v3755_v28 = vpop.f32.mrb[34].mxu1  ;;  %4056 = vmatpush1.bf16.msra.mxu1 %v2998_v32  ;;  %4032 = vmatprep.subr.bf16.mxu0 %v2943_v19  ;;  %v3014_v11 = vunpack.c.h.s8.bf16 %v1414_v44  ;;  %v1577_v32 = vunpack.c.h.s8.bf16 %v697_v3  ;;  %v641_v19 = vld [vmem:[%s7629_s8 + $0xa8] sm:$0xff]  ;;  %v1576_v44 = vunpack.c.h.s8.bf16 %v696_v13 }
 0x436   : > { %v3756_v36 = vpop.f32.mrb[35].mxu1  ;;  %4057 = vmatprep.subr.bf16.mxu1 %v3007_v20  ;;  %v705_v20 = vld [vmem:[%s7629_s8 + $0x2a8] sm:$0xff]  ;;  %v1457_v25 = vunpack.c.l.s8.bf16 %v641_v19  ;;  %v640_v28 = vld [vmem:[%s7629_s8 + $0xa0] sm:$0xff]  ;;  %v1472_v3 = vunpack.c.l.s8.bf16 %v648_v8 }
 0x437   : > { %v1585_v27 = vunpack.c.l.s8.bf16 %v705_v20  ;;  %v721_v13 = vld [vmem:[%s7629_s8 + $0x328] sm:$0xff] }
 0x438   : > { %4033 = vmatpush1.bf16.msra.mxu0 %v2942_v61  ;;  %v704_v61 = vld [vmem:[%s7629_s8 + $0x2a0] sm:$0xff] }
 0x439   : > { %4058 = vmatpush1.bf16.msra.mxu1 %v3006_v35  ;;  %4034 = vmatprep.subr.bf16.mxu0 %v2951_v49  ;;  %v1456_v35 = vunpack.c.l.s8.bf16 %v640_v28  ;;  %v1584_v36 = vunpack.c.l.s8.bf16 %v704_v61  ;;  %v1465_v49 = vunpack.c.h.s8.bf16 %v641_v19 }
 0x43a   : > { %4059 = vmatprep.subr.bf16.mxu1 %v3015_v50  ;;  %v1593_v50 = vunpack.c.h.s8.bf16 %v705_v20 }
 0x43c   : > { %4035 = vmatpush1.bf16.msra.mxu0 %v2950_v7  ;;  %v1464_v7 = vunpack.c.h.s8.bf16 %v640_v28 }
 0x43d   : > { %4060 = vmatpush1.bf16.msra.mxu1 %v3014_v11  ;;  %4086 = vmatprep.subr.bf16.mxu0 %v1425_v54  ;;  %v1592_v11 = vunpack.c.h.s8.bf16 %v704_v61  ;;  %v1473_v54 = vunpack.c.l.s8.bf16 %v649_v51 }
 0x43e   : > { %4127 = vmatprep.subr.bf16.mxu1 %v1553_v56  ;;  %v1601_v56 = vunpack.c.l.s8.bf16 %v713_v52 }
 0x43f   : > { %4037 = vmatmul.mubr.bf16.vlgmr.msra.gmra.mrb[48].mxu0 %v7951_v46 }
 0x440   : > { %4078 = vmatmul.mubr.bf16.vlgmr.msra.gmra.mrb[48].mxu1 %v7980_v14  ;;  %4087 = vmatpush1.bf16.msra.mxu0 %v1424_v55 }
 0x441   : > { %4128 = vmatpush1.bf16.msra.mxu1 %v1552_v63  ;;  %4088 = vmatprep.subr.bf16.mxu0 %v1433_v62 }
 0x442   : > { %4129 = vmatprep.subr.bf16.mxu1 %v1561_v0  ;;  %4118 = vmatprep.mubr.bf16.mxu0 %v7667_v37 }
 0x443   : > { %4159 = vmatprep.mubr.bf16.mxu1 %v7669_v38 }
 0x444   : > { %4089 = vmatpush1.bf16.msra.mxu0 %v1432_v4  ;;  %v1600_v4 = vunpack.c.l.s8.bf16 %v712_v15 }
 0x445   : > { %4130 = vmatpush1.bf16.msra.mxu1 %v1560_v9  ;;  %4090 = vmatprep.subr.bf16.mxu0 %v1441_v10  ;;  %v1481_v10 = vunpack.c.h.s8.bf16 %v649_v51 }
 0x446   : > { %4131 = vmatprep.subr.bf16.mxu1 %v1569_v18  ;;  %v1609_v18 = vunpack.c.h.s8.bf16 %v713_v52 }
 0x448   : > { %4091 = vmatpush1.bf16.msra.mxu0 %v1440_v16  ;;  %v1489_v16 = vunpack.c.l.s8.bf16 %v657_v12 }
 0x449   : > { %4132 = vmatpush1.bf16.msra.mxu1 %v1568_v17  ;;  %4092 = vmatprep.subr.bf16.mxu0 %v1449_v31  ;;  %v1617_v17 = vunpack.c.l.s8.bf16 %v721_v13  ;;  %v656_v31 = vld [vmem:[%s7629_s8 + $0x120] sm:$0xff] }
 0x44a   : > { %4133 = vmatprep.subr.bf16.mxu1 %v1577_v32  ;;  %v720_v32 = vld [vmem:[%s7629_s8 + $0x320] sm:$0xff]  ;;  %v1488_v19 = vunpack.c.l.s8.bf16 %v656_v31  ;;  %v1496_v28 = vunpack.c.h.s8.bf16 %v656_v31 }
 0x44b   : > { %v1616_v20 = vunpack.c.l.s8.bf16 %v720_v32  ;;  %v1624_v61 = vunpack.c.h.s8.bf16 %v720_v32  ;;  %v680_v31 = vld [vmem:[%s7629_s8 + $0x1e0] sm:$0xff] }
 0x44c   : > { %4093 = vmatpush1.bf16.msra.mxu0 %v1448_v43  ;;  %v1497_v43 = vunpack.c.h.s8.bf16 %v657_v12  ;;  %v681_v12 = vld [vmem:[%s7629_s8 + $0x1e8] sm:$0xff]  ;;  %v744_v32 = vld [vmem:[%s7629_s8 + $0x3e0] sm:$0xff] }
 0x44d   : > { %4134 = vmatpush1.bf16.msra.mxu1 %v1576_v44  ;;  %4094 = vmatprep.subr.bf16.mxu0 %v1457_v25  ;;  %v1625_v44 = vunpack.c.h.s8.bf16 %v721_v13  ;;  %v665_v25 = vld [vmem:[%s7629_s8 + $0x168] sm:$0xff] }
 0x44e   : > { %4135 = vmatprep.subr.bf16.mxu1 %v1585_v27  ;;  %v729_v27 = vld [vmem:[%s7629_s8 + $0x368] sm:$0xff] }
 0x44f   : > { %v745_v13 = vld [vmem:[%s7629_s8 + $0x3e8] sm:$0xff] }
 0x450   : > { %4095 = vmatpush1.bf16.msra.mxu0 %v1456_v35  ;;  %v1505_v35 = vunpack.c.l.s8.bf16 %v665_v25 }
 0x451   : > { %4136 = vmatpush1.bf16.msra.mxu1 %v1584_v36  ;;  %4096 = vmatprep.subr.bf16.mxu0 %v1465_v49  ;;  %v1633_v36 = vunpack.c.l.s8.bf16 %v729_v27  ;;  %v664_v49 = vld [vmem:[%s7629_s8 + $0x160] sm:$0xff] }
 0x452   : > { %4137 = vmatprep.subr.bf16.mxu1 %v1593_v50  ;;  %v3792_v55 = vpop.f32.mrb[36].mxu0  ;;  %v728_v50 = vld [vmem:[%s7629_s8 + $0x360] sm:$0xff]  ;;  %v1504_v51 = vunpack.c.l.s8.bf16 %v664_v49 }
 0x453   : > { %v8263_v63 = vadd.f32 %v3792_v55, %v8237_v26  ;;  %v3794_v62 = vpop.f32.mrb[37].mxu0  ;;  %v1480_v26 = vunpack.c.h.s8.bf16 %v648_v8  ;;  %v1632_v52 = vunpack.c.l.s8.bf16 %v728_v50  ;;  %v1512_v8 = vunpack.c.h.s8.bf16 %v664_v49  ;;  %v753_v49 = vld [vmem:[%s7629_s8 + $0x428] sm:$0xff] }
 0x454   : > { %v8266_v0 = vadd.f32 %v3794_v62, %v8240_v53  ;;  %v3796_v2 = vpop.f32.mrb[38].mxu0  ;;  %4097 = vmatpush1.bf16.msra.mxu0 %v1464_v7  ;;  %v1608_v53 = vunpack.c.h.s8.bf16 %v712_v15  ;;  %v1513_v7 = vunpack.c.h.s8.bf16 %v665_v25  ;;  %v1640_v15 = vunpack.c.h.s8.bf16 %v728_v50  ;;  %v817_v50 = vld [vmem:[%s7629_s8 + $0x628] sm:$0xff] }
 0x455   : > { %4138 = vmatpush1.bf16.msra.mxu1 %v1592_v11  ;;  %v3797_v9 = vpop.f32.mrb[39].mxu0  ;;  %4098 = vmatprep.subr.bf16.mxu0 %v1473_v54  ;;  %v1641_v11 = vunpack.c.h.s8.bf16 %v729_v27  ;;  %v673_v54 = vld [vmem:[%s7629_s8 + $0x1a8] sm:$0xff]  ;;  %v672_v2 = vld [vmem:[%s7629_s8 + $0x1a0] sm:$0xff]  ;;  %v1536_v27 = vunpack.c.l.s8.bf16 %v680_v31 }
 0x456   : > { %4139 = vmatprep.subr.bf16.mxu1 %v1601_v56  ;;  %v737_v56 = vld [vmem:[%s7629_s8 + $0x3a8] sm:$0xff]  ;;  %v1521_v55 = vunpack.c.l.s8.bf16 %v673_v54 }
 0x457   : > { %v1649_v62 = vunpack.c.l.s8.bf16 %v737_v56 }
 0x458   : > { %4099 = vmatpush1.bf16.msra.mxu0 %v1472_v3  ;;  %v736_v3 = vld [vmem:[%s7629_s8 + $0x3a0] sm:$0xff] }
 0x459   : > { %4140 = vmatpush1.bf16.msra.mxu1 %v1600_v4  ;;  %4100 = vmatprep.subr.bf16.mxu0 %v1481_v10  ;;  %v1520_v4 = vunpack.c.l.s8.bf16 %v672_v2  ;;  %v1648_v9 = vunpack.c.l.s8.bf16 %v736_v3  ;;  %v1529_v10 = vunpack.c.h.s8.bf16 %v673_v54 }
 0x45a   : > { %4141 = vmatprep.subr.bf16.mxu1 %v1609_v18  ;;  %v1657_v18 = vunpack.c.h.s8.bf16 %v737_v56 }
 0x45c   : > { %4101 = vmatpush1.bf16.msra.mxu0 %v1480_v26  ;;  %v1528_v26 = vunpack.c.h.s8.bf16 %v672_v2 }
 0x45d   : > { %4142 = vmatpush1.bf16.msra.mxu1 %v1608_v53  ;;  %4102 = vmatprep.subr.bf16.mxu0 %v1489_v16  ;;  %v1656_v53 = vunpack.c.h.s8.bf16 %v736_v3  ;;  %v1537_v16 = vunpack.c.l.s8.bf16 %v681_v12 }
 0x45e   : > { %4143 = vmatprep.subr.bf16.mxu1 %v1617_v17  ;;  %v1665_v17 = vunpack.c.l.s8.bf16 %v745_v13 }
 0x460   : > { %4103 = vmatpush1.bf16.msra.mxu0 %v1488_v19 }
 0x461   : > { %4144 = vmatpush1.bf16.msra.mxu1 %v1616_v20  ;;  %4104 = vmatprep.subr.bf16.mxu0 %v1497_v43 }
 0x462   : > { %4145 = vmatprep.subr.bf16.mxu1 %v1625_v44 }
 0x464   : > { %4105 = vmatpush1.bf16.msra.mxu0 %v1496_v28  ;;  %v1664_v28 = vunpack.c.l.s8.bf16 %v744_v32 }
 0x465   : > { %4146 = vmatpush1.bf16.msra.mxu1 %v1624_v61  ;;  %4106 = vmatprep.subr.bf16.mxu0 %v1505_v35  ;;  %v1545_v35 = vunpack.c.h.s8.bf16 %v681_v12 }
 0x466   : > { %4147 = vmatprep.subr.bf16.mxu1 %v1633_v36  ;;  %v1673_v36 = vunpack.c.h.s8.bf16 %v745_v13 }
 0x468   : > { %4107 = vmatpush1.bf16.msra.mxu0 %v1504_v51  ;;  %v1681_v51 = vunpack.c.l.s8.bf16 %v753_v49 }
 0x469   : > { %4148 = vmatpush1.bf16.msra.mxu1 %v1632_v52  ;;  %4108 = vmatprep.subr.bf16.mxu0 %v1513_v7  ;;  %v1809_v52 = vunpack.c.l.s8.bf16 %v817_v50  ;;  %v752_v7 = vld [vmem:[%s7629_s8 + $0x420] sm:$0xff] }
 0x46a   : > { %4149 = vmatprep.subr.bf16.mxu1 %v1641_v11  ;;  %v816_v11 = vld [vmem:[%s7629_s8 + $0x620] sm:$0xff]  ;;  %v1680_v54 = vunpack.c.l.s8.bf16 %v752_v7  ;;  %v1688_v2 = vunpack.c.h.s8.bf16 %v752_v7 }
 0x46b   : > { %v1808_v56 = vunpack.c.l.s8.bf16 %v816_v11  ;;  %v1816_v3 = vunpack.c.h.s8.bf16 %v816_v11  ;;  %v776_v7 = vld [vmem:[%s7629_s8 + $0x4e0] sm:$0xff] }
 0x46c   : > { %4109 = vmatpush1.bf16.msra.mxu0 %v1512_v8  ;;  %v1689_v8 = vunpack.c.h.s8.bf16 %v753_v49  ;;  %v777_v49 = vld [vmem:[%s7629_s8 + $0x4e8] sm:$0xff]  ;;  %v840_v11 = vld [vmem:[%s7629_s8 + $0x6e0] sm:$0xff] }
 0x46d   : > { %4150 = vmatpush1.bf16.msra.mxu1 %v1640_v15  ;;  %4110 = vmatprep.subr.bf16.mxu0 %v1521_v55  ;;  %v1817_v15 = vunpack.c.h.s8.bf16 %v817_v50  ;;  %v761_v55 = vld [vmem:[%s7629_s8 + $0x468] sm:$0xff] }
 0x46e   : > { %4151 = vmatprep.subr.bf16.mxu1 %v1649_v62  ;;  %v825_v62 = vld [vmem:[%s7629_s8 + $0x668] sm:$0xff] }
 0x46f   : > { %v841_v50 = vld [vmem:[%s7629_s8 + $0x6e8] sm:$0xff] }
 0x470   : > { %4111 = vmatpush1.bf16.msra.mxu0 %v1520_v4  ;;  %v1697_v4 = vunpack.c.l.s8.bf16 %v761_v55 }
 0x471   : > { %4152 = vmatpush1.bf16.msra.mxu1 %v1648_v9  ;;  %4112 = vmatprep.subr.bf16.mxu0 %v1529_v10  ;;  %v1825_v9 = vunpack.c.l.s8.bf16 %v825_v62  ;;  %v760_v10 = vld [vmem:[%s7629_s8 + $0x460] sm:$0xff] }
 0x472   : > { %4153 = vmatprep.subr.bf16.mxu1 %v1657_v18  ;;  %v824_v18 = vld [vmem:[%s7629_s8 + $0x660] sm:$0xff]  ;;  %v1696_v12 = vunpack.c.l.s8.bf16 %v760_v10 }
 0x473   : > { %v3833_v19 = vpop.f32.mrb[36].mxu1  ;;  %v1824_v13 = vunpack.c.l.s8.bf16 %v824_v18 }
 0x474   : > { %v8285_v20 = vadd.f32 %v3833_v19, %v8263_v63  ;;  %v3835_v43 = vpop.f32.mrb[37].mxu1  ;;  %4113 = vmatpush1.bf16.msra.mxu0 %v1528_v26  ;;  %v1544_v63 = vunpack.c.h.s8.bf16 %v680_v31  ;;  %v1705_v26 = vunpack.c.h.s8.bf16 %v761_v55  ;;  %v1704_v31 = vunpack.c.h.s8.bf16 %v760_v10  ;;  %v785_v10 = vld [vmem:[%s7629_s8 + $0x528] sm:$0xff] }
 0x475   : > { %v8288_v44 = vadd.f32 %v3835_v43, %v8266_v0  ;;  %v3837_v25 = vpop.f32.mrb[38].mxu1  ;;  %4154 = vmatpush1.bf16.msra.mxu1 %v1656_v53  ;;  %4114 = vmatprep.subr.bf16.mxu0 %v1537_v16  ;;  %v1672_v0 = vunpack.c.h.s8.bf16 %v744_v32  ;;  %v1833_v53 = vunpack.c.h.s8.bf16 %v825_v62  ;;  %v769_v16 = vld [vmem:[%s7629_s8 + $0x4a8] sm:$0xff]  ;;  %v1832_v32 = vunpack.c.h.s8.bf16 %v824_v18 }
 0x476   : > { %v3838_v61 = vpop.f32.mrb[39].mxu1  ;;  %4155 = vmatprep.subr.bf16.mxu1 %v1665_v17  ;;  %v833_v17 = vld [vmem:[%s7629_s8 + $0x6a8] sm:$0xff]  ;;  %v1713_v19 = vunpack.c.l.s8.bf16 %v769_v16  ;;  %v768_v25 = vld [vmem:[%s7629_s8 + $0x4a0] sm:$0xff]  ;;  %v1728_v62 = vunpack.c.l.s8.bf16 %v776_v7 }
 0x477   : > { %v1841_v43 = vunpack.c.l.s8.bf16 %v833_v17  ;;  %v849_v18 = vld [vmem:[%s7629_s8 + $0x728] sm:$0xff] }
 0x478   : > { %4115 = vmatpush1.bf16.msra.mxu0 %v1536_v27  ;;  %v832_v27 = vld [vmem:[%s7629_s8 + $0x6a0] sm:$0xff] }
 0x479   : > { %4156 = vmatpush1.bf16.msra.mxu1 %v1664_v28  ;;  %4116 = vmatprep.subr.bf16.mxu0 %v1545_v35  ;;  %v1712_v28 = vunpack.c.l.s8.bf16 %v768_v25  ;;  %v1840_v61 = vunpack.c.l.s8.bf16 %v832_v27  ;;  %v1721_v35 = vunpack.c.h.s8.bf16 %v769_v16 }
 0x47a   : > { %4157 = vmatprep.subr.bf16.mxu1 %v1673_v36  ;;  %v1849_v36 = vunpack.c.h.s8.bf16 %v833_v17 }
 0x47c   : > { %4117 = vmatpush1.bf16.msra.mxu0 %v1544_v63  ;;  %v1720_v63 = vunpack.c.h.s8.bf16 %v768_v25 }
 0x47d   : > { %4158 = vmatpush1.bf16.msra.mxu1 %v1672_v0  ;;  %4168 = vmatprep.subr.bf16.mxu0 %v1681_v51  ;;  %v1848_v0 = vunpack.c.h.s8.bf16 %v832_v27  ;;  %v1729_v51 = vunpack.c.l.s8.bf16 %v777_v49 }
 0x47e   : > { %4209 = vmatprep.subr.bf16.mxu1 %v1809_v52  ;;  %v1857_v52 = vunpack.c.l.s8.bf16 %v841_v50 }
 0x47f   : > { %4119 = vmatmul.mubr.bf16.vlgmr.msra.gmra.mrb[52].mxu0 %v7699_v47 }
 0x480   : > { %4160 = vmatmul.mubr.bf16.vlgmr.msra.gmra.mrb[52].mxu1 %v7701_v48  ;;  %4169 = vmatpush1.bf16.msra.mxu0 %v1680_v54 }
 0x481   : > { %4210 = vmatpush1.bf16.msra.mxu1 %v1808_v56  ;;  %4170 = vmatprep.subr.bf16.mxu0 %v1689_v8 }
 0x482   : > { %4211 = vmatprep.subr.bf16.mxu1 %v1817_v15  ;;  %4200 = vmatprep.mubr.bf16.mxu0 %v7707_v57 }
 0x483   : > { %4241 = vmatprep.mubr.bf16.mxu1 %v7709_v58 }
 0x484   : > { %4171 = vmatpush1.bf16.msra.mxu0 %v1688_v2  ;;  %v1856_v2 = vunpack.c.l.s8.bf16 %v840_v11 }
 0x485   : > { %4212 = vmatpush1.bf16.msra.mxu1 %v1816_v3  ;;  %4172 = vmatprep.subr.bf16.mxu0 %v1697_v4  ;;  %v1737_v4 = vunpack.c.h.s8.bf16 %v777_v49 }
 0x486   : > { %4213 = vmatprep.subr.bf16.mxu1 %v1825_v9  ;;  %v1865_v9 = vunpack.c.h.s8.bf16 %v841_v50 }
 0x488   : > { %4173 = vmatpush1.bf16.msra.mxu0 %v1696_v12  ;;  %v1745_v12 = vunpack.c.l.s8.bf16 %v785_v10 }
 0x489   : > { %4214 = vmatpush1.bf16.msra.mxu1 %v1824_v13  ;;  %4174 = vmatprep.subr.bf16.mxu0 %v1705_v26  ;;  %v1873_v13 = vunpack.c.l.s8.bf16 %v849_v18  ;;  %v784_v26 = vld [vmem:[%s7629_s8 + $0x520] sm:$0xff] }
 0x48a   : > { %4215 = vmatprep.subr.bf16.mxu1 %v1833_v53  ;;  %v848_v53 = vld [vmem:[%s7629_s8 + $0x720] sm:$0xff]  ;;  %v1744_v16 = vunpack.c.l.s8.bf16 %v784_v26  ;;  %v1752_v25 = vunpack.c.h.s8.bf16 %v784_v26 }
 0x48b   : > { %v1872_v17 = vunpack.c.l.s8.bf16 %v848_v53  ;;  %v1880_v27 = vunpack.c.h.s8.bf16 %v848_v53  ;;  %v808_v26 = vld [vmem:[%s7629_s8 + $0x5e0] sm:$0xff] }
 0x48c   : > { %4175 = vmatpush1.bf16.msra.mxu0 %v1704_v31  ;;  %v1753_v31 = vunpack.c.h.s8.bf16 %v785_v10  ;;  %v809_v10 = vld [vmem:[%s7629_s8 + $0x5e8] sm:$0xff]  ;;  %v872_v53 = vld [vmem:[%s7629_s8 + $0x7e0] sm:$0xff] }
 0x48d   : > { %4216 = vmatpush1.bf16.msra.mxu1 %v1832_v32  ;;  %4176 = vmatprep.subr.bf16.mxu0 %v1713_v19  ;;  %v1881_v32 = vunpack.c.h.s8.bf16 %v849_v18  ;;  %v793_v19 = vld [vmem:[%s7629_s8 + $0x568] sm:$0xff] }
 0x48e   : > { %4217 = vmatprep.subr.bf16.mxu1 %v1841_v43  ;;  %v857_v43 = vld [vmem:[%s7629_s8 + $0x768] sm:$0xff] }
 0x48f   : > { %v873_v18 = vld [vmem:[%s7629_s8 + $0x7e8] sm:$0xff] }
 0x490   : > { %4177 = vmatpush1.bf16.msra.mxu0 %v1712_v28  ;;  %v1761_v28 = vunpack.c.l.s8.bf16 %v793_v19 }
 0x491   : > { %4218 = vmatpush1.bf16.msra.mxu1 %v1840_v61  ;;  %4178 = vmatprep.subr.bf16.mxu0 %v1721_v35  ;;  %v1889_v61 = vunpack.c.l.s8.bf16 %v857_v43  ;;  %v792_v35 = vld [vmem:[%s7629_s8 + $0x560] sm:$0xff] }
 0x492   : > { %4219 = vmatprep.subr.bf16.mxu1 %v1849_v36  ;;  %v3874_v54 = vpop.f32.mrb[40].mxu0  ;;  %v856_v36 = vld [vmem:[%s7629_s8 + $0x760] sm:$0xff]  ;;  %v1760_v49 = vunpack.c.l.s8.bf16 %v792_v35 }
 0x493   : > { %v8311_v56 = vadd.f32 %v3874_v54, %v8285_v20  ;;  %v3876_v8 = vpop.f32.mrb[41].mxu0  ;;  %v1736_v20 = vunpack.c.h.s8.bf16 %v776_v7  ;;  %v1888_v50 = vunpack.c.l.s8.bf16 %v856_v36  ;;  %v1768_v7 = vunpack.c.h.s8.bf16 %v792_v35  ;;  %v881_v35 = vld [vmem:[%s7629_s8 + $0x828] sm:$0xff] }
 0x494   : > { %v8314_v15 = vadd.f32 %v3876_v8, %v8288_v44  ;;  %v3878_v55 = vpop.f32.mrb[42].mxu0  ;;  %4179 = vmatpush1.bf16.msra.mxu0 %v1720_v63  ;;  %v1864_v44 = vunpack.c.h.s8.bf16 %v840_v11  ;;  %v1769_v63 = vunpack.c.h.s8.bf16 %v793_v19  ;;  %v1896_v11 = vunpack.c.h.s8.bf16 %v856_v36  ;;  %v945_v36 = vld [vmem:[%s7629_s8 + $0xa28] sm:$0xff] }
 0x495   : > { %4220 = vmatpush1.bf16.msra.mxu1 %v1848_v0  ;;  %v3879_v3 = vpop.f32.mrb[43].mxu0  ;;  %4180 = vmatprep.subr.bf16.mxu0 %v1729_v51  ;;  %v1897_v0 = vunpack.c.h.s8.bf16 %v857_v43  ;;  %v801_v51 = vld [vmem:[%s7629_s8 + $0x5a8] sm:$0xff]  ;;  %v800_v55 = vld [vmem:[%s7629_s8 + $0x5a0] sm:$0xff]  ;;  %v1792_v43 = vunpack.c.l.s8.bf16 %v808_v26 }
 0x496   : > { %4221 = vmatprep.subr.bf16.mxu1 %v1857_v52  ;;  %v865_v52 = vld [vmem:[%s7629_s8 + $0x7a8] sm:$0xff]  ;;  %v1777_v54 = vunpack.c.l.s8.bf16 %v801_v51 }
 0x497   : > { %v1905_v8 = vunpack.c.l.s8.bf16 %v865_v52 }
 0x498   : > { %4181 = vmatpush1.bf16.msra.mxu0 %v1728_v62  ;;  %v864_v62 = vld [vmem:[%s7629_s8 + $0x7a0] sm:$0xff] }
 0x499   : > { %4222 = vmatpush1.bf16.msra.mxu1 %v1856_v2  ;;  %4182 = vmatprep.subr.bf16.mxu0 %v1737_v4  ;;  %v1776_v2 = vunpack.c.l.s8.bf16 %v800_v55  ;;  %v1904_v3 = vunpack.c.l.s8.bf16 %v864_v62  ;;  %v1785_v4 = vunpack.c.h.s8.bf16 %v801_v51 }
 0x49a   : > { %4223 = vmatprep.subr.bf16.mxu1 %v1865_v9  ;;  %v1913_v9 = vunpack.c.h.s8.bf16 %v865_v52 }
 0x49c   : > { %4183 = vmatpush1.bf16.msra.mxu0 %v1736_v20  ;;  %v1784_v20 = vunpack.c.h.s8.bf16 %v800_v55 }
 0x49d   : > { %4224 = vmatpush1.bf16.msra.mxu1 %v1864_v44  ;;  %4184 = vmatprep.subr.bf16.mxu0 %v1745_v12  ;;  %v1912_v44 = vunpack.c.h.s8.bf16 %v864_v62  ;;  %v1793_v12 = vunpack.c.l.s8.bf16 %v809_v10 }
 0x49e   : > { %4225 = vmatprep.subr.bf16.mxu1 %v1873_v13  ;;  %v1921_v13 = vunpack.c.l.s8.bf16 %v873_v18 }
 0x4a0   : > { %4185 = vmatpush1.bf16.msra.mxu0 %v1744_v16 }
 0x4a1   : > { %4226 = vmatpush1.bf16.msra.mxu1 %v1872_v17  ;;  %4186 = vmatprep.subr.bf16.mxu0 %v1753_v31 }
 0x4a2   : > { %4227 = vmatprep.subr.bf16.mxu1 %v1881_v32 }
 0x4a4   : > { %4187 = vmatpush1.bf16.msra.mxu0 %v1752_v25  ;;  %v1920_v25 = vunpack.c.l.s8.bf16 %v872_v53 }
 0x4a5   : > { %4228 = vmatpush1.bf16.msra.mxu1 %v1880_v27  ;;  %4188 = vmatprep.subr.bf16.mxu0 %v1761_v28  ;;  %v1801_v28 = vunpack.c.h.s8.bf16 %v809_v10 }
 0x4a6   : > { %4229 = vmatprep.subr.bf16.mxu1 %v1889_v61  ;;  %v1929_v61 = vunpack.c.h.s8.bf16 %v873_v18 }
 0x4a8   : > { %4189 = vmatpush1.bf16.msra.mxu0 %v1760_v49  ;;  %v1937_v49 = vunpack.c.l.s8.bf16 %v881_v35 }
 0x4a9   : > { %4230 = vmatpush1.bf16.msra.mxu1 %v1888_v50  ;;  %4190 = vmatprep.subr.bf16.mxu0 %v1769_v63  ;;  %v2065_v50 = vunpack.c.l.s8.bf16 %v945_v36  ;;  %v880_v63 = vld [vmem:[%s7629_s8 + $0x820] sm:$0xff] }
 0x4aa   : > { %4231 = vmatprep.subr.bf16.mxu1 %v1897_v0  ;;  %v944_v0 = vld [vmem:[%s7629_s8 + $0xa20] sm:$0xff]  ;;  %v1936_v51 = vunpack.c.l.s8.bf16 %v880_v63  ;;  %v1944_v55 = vunpack.c.h.s8.bf16 %v880_v63 }
 0x4ab   : > { %v2064_v52 = vunpack.c.l.s8.bf16 %v944_v0  ;;  %v2072_v62 = vunpack.c.h.s8.bf16 %v944_v0  ;;  %v904_v63 = vld [vmem:[%s7629_s8 + $0x8e0] sm:$0xff] }
 0x4ac   : > { %4191 = vmatpush1.bf16.msra.mxu0 %v1768_v7  ;;  %v1945_v7 = vunpack.c.h.s8.bf16 %v881_v35  ;;  %v905_v35 = vld [vmem:[%s7629_s8 + $0x8e8] sm:$0xff]  ;;  %v968_v0 = vld [vmem:[%s7629_s8 + $0xae0] sm:$0xff] }
 0x4ad   : > { %4232 = vmatpush1.bf16.msra.mxu1 %v1896_v11  ;;  %4192 = vmatprep.subr.bf16.mxu0 %v1777_v54  ;;  %v2073_v11 = vunpack.c.h.s8.bf16 %v945_v36  ;;  %v889_v54 = vld [vmem:[%s7629_s8 + $0x868] sm:$0xff] }
 0x4ae   : > { %4233 = vmatprep.subr.bf16.mxu1 %v1905_v8  ;;  %v953_v8 = vld [vmem:[%s7629_s8 + $0xa68] sm:$0xff] }
 0x4af   : > { %v969_v36 = vld [vmem:[%s7629_s8 + $0xae8] sm:$0xff] }
 0x4b0   : > { %4193 = vmatpush1.bf16.msra.mxu0 %v1776_v2  ;;  %v1953_v2 = vunpack.c.l.s8.bf16 %v889_v54 }
 0x4b1   : > { %4234 = vmatpush1.bf16.msra.mxu1 %v1904_v3  ;;  %4194 = vmatprep.subr.bf16.mxu0 %v1785_v4  ;;  %v2081_v3 = vunpack.c.l.s8.bf16 %v953_v8  ;;  %v888_v4 = vld [vmem:[%s7629_s8 + $0x860] sm:$0xff] }
 0x4b2   : > { %4235 = vmatprep.subr.bf16.mxu1 %v1913_v9  ;;  %v952_v9 = vld [vmem:[%s7629_s8 + $0xa60] sm:$0xff]  ;;  %v1952_v10 = vunpack.c.l.s8.bf16 %v888_v4 }
 0x4b3   : > { %v3915_v16 = vpop.f32.mrb[40].mxu1  ;;  %v2080_v18 = vunpack.c.l.s8.bf16 %v952_v9 }
 0x4b4   : > { %v8333_v17 = vadd.f32 %v3915_v16, %v8311_v56  ;;  %v3917_v31 = vpop.f32.mrb[41].mxu1  ;;  %4195 = vmatpush1.bf16.msra.mxu0 %v1784_v20  ;;  %v1800_v56 = vunpack.c.h.s8.bf16 %v808_v26  ;;  %v1961_v20 = vunpack.c.h.s8.bf16 %v889_v54  ;;  %v1960_v26 = vunpack.c.h.s8.bf16 %v888_v4  ;;  %v913_v4 = vld [vmem:[%s7629_s8 + $0x928] sm:$0xff] }
 0x4b5   : > { %v8336_v32 = vadd.f32 %v3917_v31, %v8314_v15  ;;  %v3919_v19 = vpop.f32.mrb[42].mxu1  ;;  %4236 = vmatpush1.bf16.msra.mxu1 %v1912_v44  ;;  %4196 = vmatprep.subr.bf16.mxu0 %v1793_v12  ;;  %v1928_v15 = vunpack.c.h.s8.bf16 %v872_v53  ;;  %v2089_v44 = vunpack.c.h.s8.bf16 %v953_v8  ;;  %v897_v12 = vld [vmem:[%s7629_s8 + $0x8a8] sm:$0xff]  ;;  %v2088_v53 = vunpack.c.h.s8.bf16 %v952_v9 }
 0x4b6   : > { %v3920_v27 = vpop.f32.mrb[43].mxu1  ;;  %4237 = vmatprep.subr.bf16.mxu1 %v1921_v13  ;;  %v961_v13 = vld [vmem:[%s7629_s8 + $0xaa8] sm:$0xff]  ;;  %v1969_v16 = vunpack.c.l.s8.bf16 %v897_v12  ;;  %v896_v19 = vld [vmem:[%s7629_s8 + $0x8a0] sm:$0xff]  ;;  %v1984_v8 = vunpack.c.l.s8.bf16 %v904_v63 }
 0x4b7   : > { %v2097_v31 = vunpack.c.l.s8.bf16 %v961_v13  ;;  %v977_v9 = vld [vmem:[%s7629_s8 + $0xb28] sm:$0xff] }
 0x4b8   : > { %4197 = vmatpush1.bf16.msra.mxu0 %v1792_v43  ;;  %v960_v43 = vld [vmem:[%s7629_s8 + $0xaa0] sm:$0xff] }
 0x4b9   : > { %4238 = vmatpush1.bf16.msra.mxu1 %v1920_v25  ;;  %4198 = vmatprep.subr.bf16.mxu0 %v1801_v28  ;;  %v1968_v25 = vunpack.c.l.s8.bf16 %v896_v19  ;;  %v2096_v27 = vunpack.c.l.s8.bf16 %v960_v43  ;;  %v1977_v28 = vunpack.c.h.s8.bf16 %v897_v12 }
 0x4ba   : > { %4239 = vmatprep.subr.bf16.mxu1 %v1929_v61  ;;  %v2105_v61 = vunpack.c.h.s8.bf16 %v961_v13 }
 0x4bc   : > { %4199 = vmatpush1.bf16.msra.mxu0 %v1800_v56  ;;  %v1976_v56 = vunpack.c.h.s8.bf16 %v896_v19 }
 0x4bd   : > { %4240 = vmatpush1.bf16.msra.mxu1 %v1928_v15  ;;  %4250 = vmatprep.subr.bf16.mxu0 %v1937_v49  ;;  %v2104_v15 = vunpack.c.h.s8.bf16 %v960_v43  ;;  %v1985_v49 = vunpack.c.l.s8.bf16 %v905_v35 }
 0x4be   : > { %4291 = vmatprep.subr.bf16.mxu1 %v2065_v50  ;;  %v2113_v50 = vunpack.c.l.s8.bf16 %v969_v36 }
 0x4bf   : > { %4201 = vmatmul.mubr.bf16.vlgmr.msra.gmra.mrb[56].mxu0 %v7747_v29 }
 0x4c0   : > { %4242 = vmatmul.mubr.bf16.vlgmr.msra.gmra.mrb[56].mxu1 %v7749_v30  ;;  %4251 = vmatpush1.bf16.msra.mxu0 %v1936_v51 }
 0x4c1   : > { %4292 = vmatpush1.bf16.msra.mxu1 %v2064_v52  ;;  %4252 = vmatprep.subr.bf16.mxu0 %v1945_v7 }
 0x4c2   : > { %4293 = vmatprep.subr.bf16.mxu1 %v2073_v11  ;;  %4282 = vmatprep.mubr.bf16.mxu0 %v7755_v41 }
 0x4c3   : > { %4323 = vmatprep.mubr.bf16.mxu1 %v7757_v42 }
 0x4c4   : > { %4253 = vmatpush1.bf16.msra.mxu0 %v1944_v55  ;;  %v2112_v55 = vunpack.c.l.s8.bf16 %v968_v0 }
 0x4c5   : > { %4294 = vmatpush1.bf16.msra.mxu1 %v2072_v62  ;;  %4254 = vmatprep.subr.bf16.mxu0 %v1953_v2  ;;  %v1993_v2 = vunpack.c.h.s8.bf16 %v905_v35 }
 0x4c6   : > { %4295 = vmatprep.subr.bf16.mxu1 %v2081_v3  ;;  %v2121_v3 = vunpack.c.h.s8.bf16 %v969_v36 }
 0x4c8   : > { %4255 = vmatpush1.bf16.msra.mxu0 %v1952_v10  ;;  %v2001_v10 = vunpack.c.l.s8.bf16 %v913_v4 }
 0x4c9   : > { %4296 = vmatpush1.bf16.msra.mxu1 %v2080_v18  ;;  %4256 = vmatprep.subr.bf16.mxu0 %v1961_v20  ;;  %v2129_v18 = vunpack.c.l.s8.bf16 %v977_v9  ;;  %v912_v20 = vld [vmem:[%s7629_s8 + $0x920] sm:$0xff] }
 0x4ca   : > { %4297 = vmatprep.subr.bf16.mxu1 %v2089_v44  ;;  %v976_v44 = vld [vmem:[%s7629_s8 + $0xb20] sm:$0xff]  ;;  %v2000_v12 = vunpack.c.l.s8.bf16 %v912_v20  ;;  %v2008_v19 = vunpack.c.h.s8.bf16 %v912_v20 }
 0x4cb   : > { %v2128_v13 = vunpack.c.l.s8.bf16 %v976_v44  ;;  %v2136_v43 = vunpack.c.h.s8.bf16 %v976_v44  ;;  %v936_v20 = vld [vmem:[%s7629_s8 + $0x9e0] sm:$0xff] }
 0x4cc   : > { %4257 = vmatpush1.bf16.msra.mxu0 %v1960_v26  ;;  %v2009_v26 = vunpack.c.h.s8.bf16 %v913_v4  ;;  %v937_v4 = vld [vmem:[%s7629_s8 + $0x9e8] sm:$0xff]  ;;  %v1000_v44 = vld [vmem:[%s7629_s8 + $0xbe0] sm:$0xff] }
 0x4cd   : > { %4298 = vmatpush1.bf16.msra.mxu1 %v2088_v53  ;;  %4258 = vmatprep.subr.bf16.mxu0 %v1969_v16  ;;  %v2137_v53 = vunpack.c.h.s8.bf16 %v977_v9  ;;  %v921_v16 = vld [vmem:[%s7629_s8 + $0x968] sm:$0xff] }
 0x4ce   : > { %4299 = vmatprep.subr.bf16.mxu1 %v2097_v31  ;;  %v985_v31 = vld [vmem:[%s7629_s8 + $0xb68] sm:$0xff] }
 0x4cf   : > { %v1001_v9 = vld [vmem:[%s7629_s8 + $0xbe8] sm:$0xff] }
 0x4d0   : > { %4259 = vmatpush1.bf16.msra.mxu0 %v1968_v25  ;;  %v2017_v25 = vunpack.c.l.s8.bf16 %v921_v16 }
 0x4d1   : > { %4300 = vmatpush1.bf16.msra.mxu1 %v2096_v27  ;;  %4260 = vmatprep.subr.bf16.mxu0 %v1977_v28  ;;  %v2145_v27 = vunpack.c.l.s8.bf16 %v985_v31  ;;  %v920_v28 = vld [vmem:[%s7629_s8 + $0x960] sm:$0xff] }
 0x4d2   : > { %4301 = vmatprep.subr.bf16.mxu1 %v2105_v61  ;;  %v3956_v51 = vpop.f32.mrb[44].mxu0  ;;  %v984_v61 = vld [vmem:[%s7629_s8 + $0xb60] sm:$0xff]  ;;  %v2016_v35 = vunpack.c.l.s8.bf16 %v920_v28 }
 0x4d3   : > { %v8359_v52 = vadd.f32 %v3956_v51, %v8333_v17  ;;  %v3958_v7 = vpop.f32.mrb[45].mxu0  ;;  %v1992_v17 = vunpack.c.h.s8.bf16 %v904_v63  ;;  %v2144_v36 = vunpack.c.l.s8.bf16 %v984_v61  ;;  %v2024_v63 = vunpack.c.h.s8.bf16 %v920_v28  ;;  %v1009_v28 = vld [vmem:[%s7629_s8 + $0xc28] sm:$0xff] }
 0x4d4   : > { %v8362_v11 = vadd.f32 %v3958_v7, %v8336_v32  ;;  %v3960_v54 = vpop.f32.mrb[46].mxu0  ;;  %4261 = vmatpush1.bf16.msra.mxu0 %v1976_v56  ;;  %v2120_v32 = vunpack.c.h.s8.bf16 %v968_v0  ;;  %v2025_v56 = vunpack.c.h.s8.bf16 %v921_v16  ;;  %v2152_v0 = vunpack.c.h.s8.bf16 %v984_v61  ;;  %v1073_v61 = vld [vmem:[%s7629_s8 + $0xe28] sm:$0xff] }
 0x4d5   : > { %4302 = vmatpush1.bf16.msra.mxu1 %v2104_v15  ;;  %v3961_v62 = vpop.f32.mrb[47].mxu0  ;;  %4262 = vmatprep.subr.bf16.mxu0 %v1985_v49  ;;  %v2153_v15 = vunpack.c.h.s8.bf16 %v985_v31  ;;  %v929_v49 = vld [vmem:[%s7629_s8 + $0x9a8] sm:$0xff]  ;;  %v928_v54 = vld [vmem:[%s7629_s8 + $0x9a0] sm:$0xff]  ;;  %v2048_v31 = vunpack.c.l.s8.bf16 %v936_v20 }
 0x4d6   : > { %4303 = vmatprep.subr.bf16.mxu1 %v2113_v50  ;;  %v993_v50 = vld [vmem:[%s7629_s8 + $0xba8] sm:$0xff]  ;;  %v2033_v51 = vunpack.c.l.s8.bf16 %v929_v49 }
 0x4d7   : > { %v2161_v7 = vunpack.c.l.s8.bf16 %v993_v50 }
 0x4d8   : > { %4263 = vmatpush1.bf16.msra.mxu0 %v1984_v8  ;;  %v992_v8 = vld [vmem:[%s7629_s8 + $0xba0] sm:$0xff] }
 0x4d9   : > { %4304 = vmatpush1.bf16.msra.mxu1 %v2112_v55  ;;  %4264 = vmatprep.subr.bf16.mxu0 %v1993_v2  ;;  %v2032_v55 = vunpack.c.l.s8.bf16 %v928_v54  ;;  %v2160_v62 = vunpack.c.l.s8.bf16 %v992_v8  ;;  %v2041_v2 = vunpack.c.h.s8.bf16 %v929_v49 }
 0x4da   : > { %4305 = vmatprep.subr.bf16.mxu1 %v2121_v3  ;;  %v2169_v3 = vunpack.c.h.s8.bf16 %v993_v50 }
 0x4dc   : > { %4265 = vmatpush1.bf16.msra.mxu0 %v1992_v17  ;;  %v2040_v17 = vunpack.c.h.s8.bf16 %v928_v54 }
 0x4dd   : > { %4306 = vmatpush1.bf16.msra.mxu1 %v2120_v32  ;;  %4266 = vmatprep.subr.bf16.mxu0 %v2001_v10  ;;  %v2168_v32 = vunpack.c.h.s8.bf16 %v992_v8  ;;  %v2049_v10 = vunpack.c.l.s8.bf16 %v937_v4 }
 0x4de   : > { %4307 = vmatprep.subr.bf16.mxu1 %v2129_v18  ;;  %v2177_v18 = vunpack.c.l.s8.bf16 %v1001_v9 }
 0x4e0   : > { %4267 = vmatpush1.bf16.msra.mxu0 %v2000_v12 }
 0x4e1   : > { %4308 = vmatpush1.bf16.msra.mxu1 %v2128_v13  ;;  %4268 = vmatprep.subr.bf16.mxu0 %v2009_v26 }
 0x4e2   : > { %4309 = vmatprep.subr.bf16.mxu1 %v2137_v53 }
 0x4e4   : > { %4269 = vmatpush1.bf16.msra.mxu0 %v2008_v19  ;;  %v2176_v19 = vunpack.c.l.s8.bf16 %v1000_v44 }
 0x4e5   : > { %4310 = vmatpush1.bf16.msra.mxu1 %v2136_v43  ;;  %4270 = vmatprep.subr.bf16.mxu0 %v2017_v25  ;;  %v2057_v25 = vunpack.c.h.s8.bf16 %v937_v4 }
 0x4e6   : > { %4311 = vmatprep.subr.bf16.mxu1 %v2145_v27  ;;  %v2185_v27 = vunpack.c.h.s8.bf16 %v1001_v9 }
 0x4e8   : > { %4271 = vmatpush1.bf16.msra.mxu0 %v2016_v35  ;;  %v2193_v35 = vunpack.c.l.s8.bf16 %v1009_v28 }
 0x4e9   : > { %4312 = vmatpush1.bf16.msra.mxu1 %v2144_v36  ;;  %4272 = vmatprep.subr.bf16.mxu0 %v2025_v56  ;;  %v2321_v36 = vunpack.c.l.s8.bf16 %v1073_v61  ;;  %v1008_v56 = vld [vmem:[%s7629_s8 + $0xc20] sm:$0xff] }
 0x4ea   : > { %4313 = vmatprep.subr.bf16.mxu1 %v2153_v15  ;;  %v1072_v15 = vld [vmem:[%s7629_s8 + $0xe20] sm:$0xff]  ;;  %v2192_v49 = vunpack.c.l.s8.bf16 %v1008_v56  ;;  %v2200_v54 = vunpack.c.h.s8.bf16 %v1008_v56 }
 0x4eb   : > { %v2320_v50 = vunpack.c.l.s8.bf16 %v1072_v15  ;;  %v2328_v8 = vunpack.c.h.s8.bf16 %v1072_v15  ;;  %v1032_v56 = vld [vmem:[%s7629_s8 + $0xce0] sm:$0xff] }
 0x4ec   : > { %4273 = vmatpush1.bf16.msra.mxu0 %v2024_v63  ;;  %v2201_v63 = vunpack.c.h.s8.bf16 %v1009_v28  ;;  %v1033_v28 = vld [vmem:[%s7629_s8 + $0xce8] sm:$0xff]  ;;  %v1096_v15 = vld [vmem:[%s7629_s8 + $0xee0] sm:$0xff] }
 0x4ed   : > { %4314 = vmatpush1.bf16.msra.mxu1 %v2152_v0  ;;  %4274 = vmatprep.subr.bf16.mxu0 %v2033_v51  ;;  %v2329_v0 = vunpack.c.h.s8.bf16 %v1073_v61  ;;  %v1017_v51 = vld [vmem:[%s7629_s8 + $0xc68] sm:$0xff] }
 0x4ee   : > { %4315 = vmatprep.subr.bf16.mxu1 %v2161_v7  ;;  %v1081_v7 = vld [vmem:[%s7629_s8 + $0xe68] sm:$0xff] }
 0x4ef   : > { %v1097_v61 = vld [vmem:[%s7629_s8 + $0xee8] sm:$0xff] }
 0x4f0   : > { %4275 = vmatpush1.bf16.msra.mxu0 %v2032_v55  ;;  %v2209_v55 = vunpack.c.l.s8.bf16 %v1017_v51 }
 0x4f1   : > { %4316 = vmatpush1.bf16.msra.mxu1 %v2160_v62  ;;  %4276 = vmatprep.subr.bf16.mxu0 %v2041_v2  ;;  %v2337_v62 = vunpack.c.l.s8.bf16 %v1081_v7  ;;  %v1016_v2 = vld [vmem:[%s7629_s8 + $0xc60] sm:$0xff] }
 0x4f2   : > { %4317 = vmatprep.subr.bf16.mxu1 %v2169_v3  ;;  %v1080_v3 = vld [vmem:[%s7629_s8 + $0xe60] sm:$0xff]  ;;  %v2208_v4 = vunpack.c.l.s8.bf16 %v1016_v2 }
 0x4f3   : > { %v3997_v12 = vpop.f32.mrb[44].mxu1  ;;  %v2336_v9 = vunpack.c.l.s8.bf16 %v1080_v3 }
 0x4f4   : > { %v8381_v13 = vadd.f32 %v3997_v12, %v8359_v52  ;;  %v3999_v26 = vpop.f32.mrb[45].mxu1  ;;  %4277 = vmatpush1.bf16.msra.mxu0 %v2040_v17  ;;  %v2056_v52 = vunpack.c.h.s8.bf16 %v936_v20  ;;  %v2217_v17 = vunpack.c.h.s8.bf16 %v1017_v51  ;;  %v2216_v20 = vunpack.c.h.s8.bf16 %v1016_v2 }
 0x4f5   : > { %v8384_v53 = vadd.f32 %v3999_v26, %v8362_v11  ;;  %v4001_v16 = vpop.f32.mrb[46].mxu1  ;;  %4318 = vmatpush1.bf16.msra.mxu1 %v2168_v32  ;;  %4278 = vmatprep.subr.bf16.mxu0 %v2049_v10  ;;  %v2184_v11 = vunpack.c.h.s8.bf16 %v1000_v44  ;;  %v2345_v32 = vunpack.c.h.s8.bf16 %v1081_v7  ;;  %v1025_v10 = vld [vmem:[%s7629_s8 + $0xca8] sm:$0xff]  ;;  %v2344_v44 = vunpack.c.h.s8.bf16 %v1080_v3  ;;  %v564_v7 = vld [vmem:[#allocation2 + $0x10] sm:$0xff] }
 0x4f6   : > { %v4002_v43 = vpop.f32.mrb[47].mxu1  ;;  %4319 = vmatprep.subr.bf16.mxu1 %v2177_v18  ;;  %v1089_v18 = vld [vmem:[%s7629_s8 + $0xea8] sm:$0xff]  ;;  %v2225_v12 = vunpack.c.l.s8.bf16 %v1025_v10  ;;  %v1024_v16 = vld [vmem:[%s7629_s8 + $0xca0] sm:$0xff]  ;;  %v2368_v2 = vunpack.c.l.s8.bf16 %v1096_v15 }
 0x4f7   : > { %v2353_v26 = vunpack.c.l.s8.bf16 %v1089_v18 }
 0x4f8   : > { %4279 = vmatpush1.bf16.msra.mxu0 %v2048_v31  ;;  %v1088_v31 = vld [vmem:[%s7629_s8 + $0xea0] sm:$0xff] }
 0x4f9   : > { %4320 = vmatpush1.bf16.msra.mxu1 %v2176_v19  ;;  %4280 = vmatprep.subr.bf16.mxu0 %v2057_v25  ;;  %v2224_v19 = vunpack.c.l.s8.bf16 %v1024_v16  ;;  %v2352_v43 = vunpack.c.l.s8.bf16 %v1088_v31  ;;  %v2233_v25 = vunpack.c.h.s8.bf16 %v1025_v10 }
 0x4fa   : > { %4321 = vmatprep.subr.bf16.mxu1 %v2185_v27  ;;  %v2361_v27 = vunpack.c.h.s8.bf16 %v1089_v18  ;;  %v1105_v18 = vld [vmem:[%s7629_s8 + $0xf28] sm:$0xff] }
 0x4fc   : > { %4281 = vmatpush1.bf16.msra.mxu0 %v2056_v52  ;;  %v2232_v52 = vunpack.c.h.s8.bf16 %v1024_v16 }
 0x4fd   : > { %4322 = vmatpush1.bf16.msra.mxu1 %v2184_v11  ;;  %4332 = vmatprep.subr.bf16.mxu0 %v2193_v35  ;;  %v2360_v11 = vunpack.c.h.s8.bf16 %v1088_v31  ;;  %v2241_v35 = vunpack.c.l.s8.bf16 %v1033_v28  ;;  %v2385_v31 = vunpack.c.l.s8.bf16 %v1105_v18 }
 0x4fe   : > { %4373 = vmatprep.subr.bf16.mxu1 %v2321_v36  ;;  %v2369_v36 = vunpack.c.l.s8.bf16 %v1097_v61 }
 0x4ff   : > { %4283 = vmatmul.mubr.bf16.vlgmr.msra.gmra.mrb[60].mxu0 %v7795_v21 }
 0x500   : > { %4324 = vmatmul.mubr.bf16.vlgmr.msra.gmra.mrb[60].mxu1 %v7797_v22  ;;  %4333 = vmatpush1.bf16.msra.mxu0 %v2192_v49 }
 0x501   : > { %4374 = vmatpush1.bf16.msra.mxu1 %v2320_v50  ;;  %4334 = vmatprep.subr.bf16.mxu0 %v2201_v63 }
 0x502   : > { %4375 = vmatprep.subr.bf16.mxu1 %v2329_v0  ;;  %4364 = vmatprep.mubr.bf16.mxu0 %v7803_v33 }
 0x503   : > { %4405 = vmatprep.mubr.bf16.mxu1 %v7805_v34 }
 0x504   : > { %4335 = vmatpush1.bf16.msra.mxu0 %v2200_v54 }
 0x505   : > { %4376 = vmatpush1.bf16.msra.mxu1 %v2328_v8  ;;  %4336 = vmatprep.subr.bf16.mxu0 %v2209_v55 }
 0x506   : > { %4377 = vmatprep.subr.bf16.mxu1 %v2337_v62  ;;  %v2240_v62 = vunpack.c.l.s8.bf16 %v1032_v56 }
 0x508   : > { %4337 = vmatpush1.bf16.msra.mxu0 %v2208_v4  ;;  %v565_v4 = vld [vmem:[#allocation2 + $0x18] sm:$0xff] }
 0x509   : > { %4378 = vmatpush1.bf16.msra.mxu1 %v2336_v9  ;;  %4338 = vmatprep.subr.bf16.mxu0 %v2217_v17 }
 0x50a   : > { %4379 = vmatprep.subr.bf16.mxu1 %v2345_v32  ;;  %v2377_v32 = vunpack.c.h.s8.bf16 %v1097_v61  ;;  %v2393_v61 = vunpack.c.h.s8.bf16 %v1105_v18  ;;  %v1129_v18 = vld [vmem:[%s7629_s8 + $0xfe8] sm:$0xff] }
 0x50c   : > { %4339 = vmatpush1.bf16.msra.mxu0 %v2216_v20 }
 0x50d   : > { %4380 = vmatpush1.bf16.msra.mxu1 %v2344_v44  ;;  %4340 = vmatprep.subr.bf16.mxu0 %v2225_v12  ;;  %v2248_v12 = vunpack.c.h.s8.bf16 %v1032_v56 }
 0x50e   : > { %4381 = vmatprep.subr.bf16.mxu1 %v2353_v26  ;;  %v2376_v26 = vunpack.c.h.s8.bf16 %v1096_v15 }
 0x510   : > { %4341 = vmatpush1.bf16.msra.mxu0 %v2224_v19  ;;  %v1040_v19 = vld [vmem:[%s7629_s8 + $0xd20] sm:$0xff] }
 0x511   : > { %4382 = vmatpush1.bf16.msra.mxu1 %v2352_v43  ;;  %4342 = vmatprep.subr.bf16.mxu0 %v2233_v25  ;;  %v1104_v43 = vld [vmem:[%s7629_s8 + $0xf20] sm:$0xff]  ;;  %v2256_v25 = vunpack.c.l.s8.bf16 %v1040_v19 }
 0x512   : > { %4383 = vmatprep.subr.bf16.mxu1 %v2361_v27  ;;  %v4038_v49 = vpop.f32.mrb[48].mxu0  ;;  %v2384_v27 = vunpack.c.l.s8.bf16 %v1104_v43 }
 0x513   : > { %v4079_v50 = vpop.f32.mrb[48].mxu1  ;;  %v4039_v63 = vadd.f32 %v4038_v49, %v8381_v13  ;;  %v4040_v0 = vpop.f32.mrb[49].mxu0  ;;  %v2249_v13 = vunpack.c.h.s8.bf16 %v1033_v28  ;;  %v1048_v49 = vld [vmem:[%s7629_s8 + $0xd60] sm:$0xff] }
 0x514   : > { %v4081_v51 = vpop.f32.mrb[49].mxu1  ;;  %v4041_v54 = vadd.f32 %v4040_v0, %v8384_v53  ;;  %v4042_v8 = vpop.f32.mrb[50].mxu0  ;;  %4343 = vmatpush1.bf16.msra.mxu0 %v2232_v52  ;;  %v1041_v53 = vld [vmem:[%s7629_s8 + $0xd28] sm:$0xff] }
 0x515   : > { %v4083_v55 = vpop.f32.mrb[50].mxu1  ;;  %4384 = vmatpush1.bf16.msra.mxu1 %v2360_v11  ;;  %v4080_v3 = vadd.f32 %v4079_v50, %v4039_v63  ;;  %v4043_v9 = vpop.f32.mrb[51].mxu0  ;;  %4344 = vmatprep.subr.bf16.mxu0 %v2241_v35  ;;  %v2257_v16 = vunpack.c.l.s8.bf16 %v1041_v53  ;;  %v2265_v28 = vunpack.c.h.s8.bf16 %v1041_v53  ;;  %v1049_v52 = vld [vmem:[%s7629_s8 + $0xd68] sm:$0xff]  ;;  %v2264_v35 = vunpack.c.h.s8.bf16 %v1040_v19  ;;  %v1112_v50 = vld [vmem:[%s7629_s8 + $0xf60] sm:$0xff] }
 0x516   : > { %v4084_v17 = vpop.f32.mrb[51].mxu1  ;;  %4385 = vmatprep.subr.bf16.mxu1 %v2369_v36  ;;  %v4082_v10 = vadd.f32 %v4081_v51, %v4041_v54  ;;  %v1113_v11 = vld [vmem:[%s7629_s8 + $0xf68] sm:$0xff]  ;;  %v2392_v36 = vunpack.c.h.s8.bf16 %v1104_v43  ;;  %v2273_v56 = vunpack.c.l.s8.bf16 %v1049_v52  ;;  %v2272_v63 = vunpack.c.l.s8.bf16 %v1048_v49  ;;  %v1120_v9 = vld [vmem:[%s7629_s8 + $0xfa0] sm:$0xff] }
 0x517   : > { %v5154_v20 = vadd.f32 %v4080_v3, %v564_v7  ;;  %v2401_v15 = vunpack.c.l.s8.bf16 %v1113_v11  ;;  %v2400_v0 = vunpack.c.l.s8.bf16 %v1112_v50  ;;  %v2281_v51 = vunpack.c.h.s8.bf16 %v1049_v52  ;;  %v1057_v54 = vld [vmem:[%s7629_s8 + $0xda8] sm:$0xff] }
 0x518   : > { %v5155_v44 = vadd.f32 %v4082_v10, %v565_v4  ;;  %4345 = vmatpush1.bf16.msra.mxu0 %v2240_v62  ;;  %v2409_v7 = vunpack.c.h.s8.bf16 %v1113_v11  ;;  %v1121_v8 = vld [vmem:[%s7629_s8 + $0xfa8] sm:$0xff]  ;;  %v2280_v55 = vunpack.c.h.s8.bf16 %v1048_v49  ;;  %v2408_v62 = vunpack.c.h.s8.bf16 %v1112_v50  ;;  %v1056_v4 = vld [vmem:[%s7629_s8 + $0xda0] sm:$0xff] }
 0x519   : > { %4386 = vmatpush1.bf16.msra.mxu1 %v2368_v2  ;;  %5162 = vst [vmem:[#allocation2 + $0x10] sm:$0xff] %v5154_v20  ;;  %4346 = vmatprep.subr.bf16.mxu0 %v2249_v13  ;;  %v2289_v2 = vunpack.c.l.s8.bf16 %v1057_v54  ;;  %v2417_v3 = vunpack.c.l.s8.bf16 %v1121_v8  ;;  %v2288_v17 = vunpack.c.l.s8.bf16 %v1056_v4  ;;  %v2416_v13 = vunpack.c.l.s8.bf16 %v1120_v9  ;;  %v1065_v53 = vld [vmem:[%s7629_s8 + $0xde8] sm:$0xff] }
 0x51a   : > { %4387 = vmatprep.subr.bf16.mxu1 %v2377_v32  ;;  %5163 = vst [vmem:[#allocation2 + $0x18] sm:$0xff] %v5155_v44  ;;  %v2297_v32 = vunpack.c.h.s8.bf16 %v1057_v54  ;;  %v2425_v10 = vunpack.c.h.s8.bf16 %v1121_v8  ;;  %v2296_v20 = vunpack.c.h.s8.bf16 %v1056_v4  ;;  %v2424_v44 = vunpack.c.h.s8.bf16 %v1120_v9 }
 0x51c   : > { %4347 = vmatpush1.bf16.msra.mxu0 %v2248_v12  ;;  %v2305_v12 = vunpack.c.l.s8.bf16 %v1065_v53 }
 0x51d   : > { %4388 = vmatpush1.bf16.msra.mxu1 %v2376_v26  ;;  %4348 = vmatprep.subr.bf16.mxu0 %v2257_v16  ;;  %v2433_v26 = vunpack.c.l.s8.bf16 %v1129_v18  ;;  %v1064_v16 = vld [vmem:[%s7629_s8 + $0xde0] sm:$0xff] }
 0x51e   : > { %4389 = vmatprep.subr.bf16.mxu1 %v2385_v31  ;;  %v1128_v31 = vld [vmem:[%s7629_s8 + $0xfe0] sm:$0xff]  ;;  %v2304_v19 = vunpack.c.l.s8.bf16 %v1064_v16  ;;  %v2312_v52 = vunpack.c.h.s8.bf16 %v1064_v16 }
 0x51f   : > { %v2432_v43 = vunpack.c.l.s8.bf16 %v1128_v31  ;;  %v2440_v11 = vunpack.c.h.s8.bf16 %v1128_v31 }
 0x520   : > { %4349 = vmatpush1.bf16.msra.mxu0 %v2256_v25  ;;  %v2313_v25 = vunpack.c.h.s8.bf16 %v1065_v53 }
 0x521   : > { %4390 = vmatpush1.bf16.msra.mxu1 %v2384_v27  ;;  %4350 = vmatprep.subr.bf16.mxu0 %v2265_v28  ;;  %v2441_v27 = vunpack.c.h.s8.bf16 %v1129_v18  ;;  %v1137_v28 = vld [vmem:[%s7629_s8 + $0x1028] sm:$0xff] }
 0x522   : > { %4391 = vmatprep.subr.bf16.mxu1 %v2393_v61  ;;  %v1201_v61 = vld [vmem:[%s7629_s8 + $0x1228] sm:$0xff] }
 0x524   : > { %4351 = vmatpush1.bf16.msra.mxu0 %v2264_v35  ;;  %v2449_v35 = vunpack.c.l.s8.bf16 %v1137_v28 }
 0x525   : > { %4392 = vmatpush1.bf16.msra.mxu1 %v2392_v36  ;;  %4352 = vmatprep.subr.bf16.mxu0 %v2273_v56  ;;  %v2577_v36 = vunpack.c.l.s8.bf16 %v1201_v61  ;;  %v1136_v56 = vld [vmem:[%s7629_s8 + $0x1020] sm:$0xff] }
 0x526   : > { %4393 = vmatprep.subr.bf16.mxu1 %v2401_v15  ;;  %v1200_v15 = vld [vmem:[%s7629_s8 + $0x1220] sm:$0xff]  ;;  %v2448_v49 = vunpack.c.l.s8.bf16 %v1136_v56  ;;  %v2456_v54 = vunpack.c.h.s8.bf16 %v1136_v56 }
 0x527   : > { %v2576_v50 = vunpack.c.l.s8.bf16 %v1200_v15  ;;  %v2584_v8 = vunpack.c.h.s8.bf16 %v1200_v15 }
 0x528   : > { %4353 = vmatpush1.bf16.msra.mxu0 %v2272_v63  ;;  %v2457_v63 = vunpack.c.h.s8.bf16 %v1137_v28 }
 0x529   : > { %4394 = vmatpush1.bf16.msra.mxu1 %v2400_v0  ;;  %4354 = vmatprep.subr.bf16.mxu0 %v2281_v51  ;;  %v2585_v0 = vunpack.c.h.s8.bf16 %v1201_v61  ;;  %v1145_v51 = vld [vmem:[%s7629_s8 + $0x1068] sm:$0xff] }
 0x52a   : > { %4395 = vmatprep.subr.bf16.mxu1 %v2409_v7  ;;  %v1209_v7 = vld [vmem:[%s7629_s8 + $0x1268] sm:$0xff] }
 0x52c   : > { %4355 = vmatpush1.bf16.msra.mxu0 %v2280_v55  ;;  %v2465_v55 = vunpack.c.l.s8.bf16 %v1145_v51 }
 0x52d   : > { %4396 = vmatpush1.bf16.msra.mxu1 %v2408_v62  ;;  %4356 = vmatprep.subr.bf16.mxu0 %v2289_v2  ;;  %v2593_v62 = vunpack.c.l.s8.bf16 %v1209_v7  ;;  %v1144_v2 = vld [vmem:[%s7629_s8 + $0x1060] sm:$0xff] }
 0x52e   : > { %4397 = vmatprep.subr.bf16.mxu1 %v2417_v3  ;;  %v1208_v3 = vld [vmem:[%s7629_s8 + $0x1260] sm:$0xff]  ;;  %v2464_v4 = vunpack.c.l.s8.bf16 %v1144_v2  ;;  %v2472_v53 = vunpack.c.h.s8.bf16 %v1144_v2 }
 0x52f   : > { %v2592_v9 = vunpack.c.l.s8.bf16 %v1208_v3  ;;  %v2600_v18 = vunpack.c.h.s8.bf16 %v1208_v3 }
 0x530   : > { %4357 = vmatpush1.bf16.msra.mxu0 %v2288_v17  ;;  %v2473_v17 = vunpack.c.h.s8.bf16 %v1145_v51 }
 0x531   : > { %4398 = vmatpush1.bf16.msra.mxu1 %v2416_v13  ;;  %4358 = vmatprep.subr.bf16.mxu0 %v2297_v32  ;;  %v2601_v13 = vunpack.c.h.s8.bf16 %v1209_v7  ;;  %v1153_v32 = vld [vmem:[%s7629_s8 + $0x10a8] sm:$0xff] }
 0x532   : > { %4399 = vmatprep.subr.bf16.mxu1 %v2425_v10  ;;  %v1217_v10 = vld [vmem:[%s7629_s8 + $0x12a8] sm:$0xff] }
 0x534   : > { %4359 = vmatpush1.bf16.msra.mxu0 %v2296_v20  ;;  %v2481_v20 = vunpack.c.l.s8.bf16 %v1153_v32 }
 0x535   : > { %4400 = vmatpush1.bf16.msra.mxu1 %v2424_v44  ;;  %4360 = vmatprep.subr.bf16.mxu0 %v2305_v12  ;;  %v2609_v44 = vunpack.c.l.s8.bf16 %v1217_v10  ;;  %v1152_v12 = vld [vmem:[%s7629_s8 + $0x10a0] sm:$0xff] }
 0x536   : > { %4401 = vmatprep.subr.bf16.mxu1 %v2433_v26  ;;  %v1216_v26 = vld [vmem:[%s7629_s8 + $0x12a0] sm:$0xff]  ;;  %v2480_v16 = vunpack.c.l.s8.bf16 %v1152_v12  ;;  %v2488_v28 = vunpack.c.h.s8.bf16 %v1152_v12 }
 0x537   : > { %v2608_v31 = vunpack.c.l.s8.bf16 %v1216_v26  ;;  %v2616_v61 = vunpack.c.h.s8.bf16 %v1216_v26 }
 0x538   : > { %4361 = vmatpush1.bf16.msra.mxu0 %v2304_v19  ;;  %v2489_v19 = vunpack.c.h.s8.bf16 %v1153_v32 }
 0x539   : > { %4402 = vmatpush1.bf16.msra.mxu1 %v2432_v43  ;;  %4362 = vmatprep.subr.bf16.mxu0 %v2313_v25  ;;  %v2617_v43 = vunpack.c.h.s8.bf16 %v1217_v10  ;;  %v1161_v25 = vld [vmem:[%s7629_s8 + $0x10e8] sm:$0xff] }
 0x53a   : > { %4403 = vmatprep.subr.bf16.mxu1 %v2441_v27  ;;  %v1225_v27 = vld [vmem:[%s7629_s8 + $0x12e8] sm:$0xff]  ;;  %v2505_v2 = vunpack.c.h.s8.bf16 %v1161_v25 }
 0x53b   : > { %v2633_v3 = vunpack.c.h.s8.bf16 %v1225_v27 }
 0x53c   : > { %4363 = vmatpush1.bf16.msra.mxu0 %v2312_v52  ;;  %v2497_v52 = vunpack.c.l.s8.bf16 %v1161_v25 }
 0x53d   : > { %4404 = vmatpush1.bf16.msra.mxu1 %v2440_v11  ;;  %4414 = vmatprep.subr.bf16.mxu0 %v2449_v35  ;;  %v2625_v11 = vunpack.c.l.s8.bf16 %v1225_v27  ;;  %v1160_v35 = vld [vmem:[%s7629_s8 + $0x10e0] sm:$0xff] }
 0x53e   : > { %4455 = vmatprep.subr.bf16.mxu1 %v2577_v36  ;;  %v1224_v36 = vld [vmem:[%s7629_s8 + $0x12e0] sm:$0xff] }
 0x53f   : > { %4365 = vmatmul.mubr.bf16.vlgmr.msra.gmra.mrb[64].mxu0 %v7843_v23 }
 0x540   : > { %4406 = vmatmul.mubr.bf16.vlgmr.msra.gmra.mrb[64].mxu1 %v7845_v24  ;;  %4415 = vmatpush1.bf16.msra.mxu0 %v2448_v49 }
 0x541   : > { %4456 = vmatpush1.bf16.msra.mxu1 %v2576_v50  ;;  %4416 = vmatprep.subr.bf16.mxu0 %v2457_v63 }
 0x542   : > { %4457 = vmatprep.subr.bf16.mxu1 %v2585_v0  ;;  %4446 = vmatprep.mubr.bf16.mxu0 %v7851_v39 }
 0x543   : > { %4487 = vmatprep.mubr.bf16.mxu1 %v7853_v40 }
 0x544   : > { %4417 = vmatpush1.bf16.msra.mxu0 %v2456_v54  ;;  %v2496_v54 = vunpack.c.l.s8.bf16 %v1160_v35 }
 0x545   : > { %4458 = vmatpush1.bf16.msra.mxu1 %v2584_v8  ;;  %4418 = vmatprep.subr.bf16.mxu0 %v2465_v55  ;;  %v2624_v8 = vunpack.c.l.s8.bf16 %v1224_v36 }
 0x546   : > { %4459 = vmatprep.subr.bf16.mxu1 %v2593_v62 }
 0x548   : > { %4419 = vmatpush1.bf16.msra.mxu0 %v2464_v4  ;;  %v1169_v4 = vld [vmem:[%s7629_s8 + $0x1128] sm:$0xff] }
 0x549   : > { %4460 = vmatpush1.bf16.msra.mxu1 %v2592_v9  ;;  %4420 = vmatprep.subr.bf16.mxu0 %v2473_v17  ;;  %v1233_v9 = vld [vmem:[%s7629_s8 + $0x1328] sm:$0xff]  ;;  %v2504_v17 = vunpack.c.h.s8.bf16 %v1160_v35  ;;  %v2513_v32 = vunpack.c.l.s8.bf16 %v1169_v4  ;;  %v2521_v12 = vunpack.c.h.s8.bf16 %v1169_v4 }
 0x54a   : > { %4461 = vmatprep.subr.bf16.mxu1 %v2601_v13  ;;  %v2632_v13 = vunpack.c.h.s8.bf16 %v1224_v36  ;;  %v2641_v10 = vunpack.c.l.s8.bf16 %v1233_v9  ;;  %v2649_v26 = vunpack.c.h.s8.bf16 %v1233_v9  ;;  %v1193_v4 = vld [vmem:[%s7629_s8 + $0x11e8] sm:$0xff] }
 0x54b   : > { %v1257_v9 = vld [vmem:[%s7629_s8 + $0x13e8] sm:$0xff] }
 0x54c   : > { %4421 = vmatpush1.bf16.msra.mxu0 %v2472_v53  ;;  %v1168_v53 = vld [vmem:[%s7629_s8 + $0x1120] sm:$0xff] }
 0x54d   : > { %4462 = vmatpush1.bf16.msra.mxu1 %v2600_v18  ;;  %4422 = vmatprep.subr.bf16.mxu0 %v2481_v20  ;;  %v1232_v18 = vld [vmem:[%s7629_s8 + $0x1320] sm:$0xff]  ;;  %v2512_v20 = vunpack.c.l.s8.bf16 %v1168_v53 }
 0x54e   : > { %4463 = vmatprep.subr.bf16.mxu1 %v2609_v44  ;;  %v2640_v44 = vunpack.c.l.s8.bf16 %v1232_v18 }
 0x550   : > { %4423 = vmatpush1.bf16.msra.mxu0 %v2480_v16  ;;  %v1177_v16 = vld [vmem:[%s7629_s8 + $0x1168] sm:$0xff] }
 0x551   : > { %4464 = vmatpush1.bf16.msra.mxu1 %v2608_v31  ;;  %4424 = vmatprep.subr.bf16.mxu0 %v2489_v19  ;;  %v1241_v31 = vld [vmem:[%s7629_s8 + $0x1368] sm:$0xff]  ;;  %v2520_v19 = vunpack.c.h.s8.bf16 %v1168_v53  ;;  %v2529_v25 = vunpack.c.l.s8.bf16 %v1177_v16  ;;  %v2537_v35 = vunpack.c.h.s8.bf16 %v1177_v16  ;;  %v1192_v53 = vld [vmem:[%s7629_s8 + $0x11e0] sm:$0xff] }
 0x552   : > { %4465 = vmatprep.subr.bf16.mxu1 %v2617_v43  ;;  %v4120_v56 = vpop.f32.mrb[52].mxu0  ;;  %v2648_v43 = vunpack.c.h.s8.bf16 %v1232_v18  ;;  %v2657_v27 = vunpack.c.l.s8.bf16 %v1241_v31  ;;  %v2665_v36 = vunpack.c.h.s8.bf16 %v1241_v31  ;;  %v1256_v18 = vld [vmem:[%s7629_s8 + $0x13e0] sm:$0xff]  ;;  %v1265_v16 = vld [vmem:[%s7629_s8 + $0x1428] sm:$0xff] }
 0x553   : > { %v4161_v15 = vpop.f32.mrb[52].mxu1  ;;  %v4122_v50 = vpop.f32.mrb[53].mxu0  ;;  %v1329_v31 = vld [vmem:[%s7629_s8 + $0x1628] sm:$0xff] }
 0x554   : > { %v8444_v49 = vadd.f32 %v4161_v15, %v4120_v56  ;;  %v4163_v63 = vpop.f32.mrb[53].mxu1  ;;  %v4124_v51 = vpop.f32.mrb[54].mxu0  ;;  %4425 = vmatpush1.bf16.msra.mxu0 %v2488_v28  ;;  %v1176_v28 = vld [vmem:[%s7629_s8 + $0x1160] sm:$0xff]  ;;  %v1185_v56 = vld [vmem:[%s7629_s8 + $0x11a8] sm:$0xff] }
 0x555   : > { %v8446_v0 = vadd.f32 %v4163_v63, %v4122_v50  ;;  %v4165_v7 = vpop.f32.mrb[54].mxu1  ;;  %4466 = vmatpush1.bf16.msra.mxu1 %v2616_v61  ;;  %v4125_v55 = vpop.f32.mrb[55].mxu0  ;;  %4426 = vmatprep.subr.bf16.mxu0 %v2497_v52  ;;  %v1240_v61 = vld [vmem:[%s7629_s8 + $0x1360] sm:$0xff]  ;;  %v2528_v52 = vunpack.c.l.s8.bf16 %v1176_v28  ;;  %v1249_v15 = vld [vmem:[%s7629_s8 + $0x13a8] sm:$0xff]  ;;  %v2536_v50 = vunpack.c.h.s8.bf16 %v1176_v28  ;;  %v2545_v51 = vunpack.c.l.s8.bf16 %v1185_v56 }
 0x556   : > { %v4166_v62 = vpop.f32.mrb[55].mxu1  ;;  %4467 = vmatprep.subr.bf16.mxu1 %v2625_v11  ;;  %v2656_v11 = vunpack.c.l.s8.bf16 %v1240_v61  ;;  %v2664_v63 = vunpack.c.h.s8.bf16 %v1240_v61  ;;  %v2673_v7 = vunpack.c.l.s8.bf16 %v1249_v15  ;;  %v1264_v28 = vld [vmem:[%s7629_s8 + $0x1420] sm:$0xff] }
 0x557   : > { %v1328_v61 = vld [vmem:[%s7629_s8 + $0x1620] sm:$0xff] }
 0x558   : > { %4427 = vmatpush1.bf16.msra.mxu0 %v2496_v54  ;;  %v1184_v54 = vld [vmem:[%s7629_s8 + $0x11a0] sm:$0xff] }
 0x559   : > { %4468 = vmatpush1.bf16.msra.mxu1 %v2624_v8  ;;  %4428 = vmatprep.subr.bf16.mxu0 %v2505_v2  ;;  %v1248_v8 = vld [vmem:[%s7629_s8 + $0x13a0] sm:$0xff]  ;;  %v2544_v55 = vunpack.c.l.s8.bf16 %v1184_v54  ;;  %v2553_v2 = vunpack.c.h.s8.bf16 %v1185_v56  ;;  %v1273_v56 = vld [vmem:[%s7629_s8 + $0x1468] sm:$0xff] }
 0x55a   : > { %4469 = vmatprep.subr.bf16.mxu1 %v2633_v3  ;;  %v2672_v62 = vunpack.c.l.s8.bf16 %v1248_v8  ;;  %v2681_v3 = vunpack.c.h.s8.bf16 %v1249_v15  ;;  %v1337_v15 = vld [vmem:[%s7629_s8 + $0x1668] sm:$0xff] }
 0x55c   : > { %4429 = vmatpush1.bf16.msra.mxu0 %v2504_v17  ;;  %v2552_v17 = vunpack.c.h.s8.bf16 %v1184_v54  ;;  %v1272_v54 = vld [vmem:[%s7629_s8 + $0x1460] sm:$0xff] }
 0x55d   : > { %4470 = vmatpush1.bf16.msra.mxu1 %v2632_v13  ;;  %4430 = vmatprep.subr.bf16.mxu0 %v2513_v32  ;;  %v2680_v13 = vunpack.c.h.s8.bf16 %v1248_v8  ;;  %v2561_v32 = vunpack.c.l.s8.bf16 %v1193_v4  ;;  %v1336_v8 = vld [vmem:[%s7629_s8 + $0x1660] sm:$0xff] }
 0x55e   : > { %4471 = vmatprep.subr.bf16.mxu1 %v2641_v10  ;;  %v2689_v10 = vunpack.c.l.s8.bf16 %v1257_v9 }
 0x560   : > { %4431 = vmatpush1.bf16.msra.mxu0 %v2512_v20  ;;  %v2560_v20 = vunpack.c.l.s8.bf16 %v1192_v53 }
 0x561   : > { %4472 = vmatpush1.bf16.msra.mxu1 %v2640_v44  ;;  %4432 = vmatprep.subr.bf16.mxu0 %v2521_v12  ;;  %v2688_v44 = vunpack.c.l.s8.bf16 %v1256_v18  ;;  %v2569_v12 = vunpack.c.h.s8.bf16 %v1193_v4  ;;  %v1281_v4 = vld [vmem:[%s7629_s8 + $0x14a8] sm:$0xff] }
 0x562   : > { %4473 = vmatprep.subr.bf16.mxu1 %v2649_v26  ;;  %v2697_v26 = vunpack.c.h.s8.bf16 %v1257_v9  ;;  %v1345_v9 = vld [vmem:[%s7629_s8 + $0x16a8] sm:$0xff] }
 0x564   : > { %4433 = vmatpush1.bf16.msra.mxu0 %v2520_v19  ;;  %v2568_v19 = vunpack.c.h.s8.bf16 %v1192_v53  ;;  %v1280_v53 = vld [vmem:[%s7629_s8 + $0x14a0] sm:$0xff] }
 0x565   : > { %4474 = vmatpush1.bf16.msra.mxu1 %v2648_v43  ;;  %4434 = vmatprep.subr.bf16.mxu0 %v2529_v25  ;;  %v2696_v43 = vunpack.c.h.s8.bf16 %v1256_v18  ;;  %v2705_v25 = vunpack.c.l.s8.bf16 %v1265_v16  ;;  %v1344_v18 = vld [vmem:[%s7629_s8 + $0x16a0] sm:$0xff] }
 0x566   : > { %4475 = vmatprep.subr.bf16.mxu1 %v2657_v27  ;;  %v2833_v27 = vunpack.c.l.s8.bf16 %v1329_v31 }
 0x568   : > { %4435 = vmatpush1.bf16.msra.mxu0 %v2528_v52  ;;  %v2704_v52 = vunpack.c.l.s8.bf16 %v1264_v28 }
 0x569   : > { %4476 = vmatpush1.bf16.msra.mxu1 %v2656_v11  ;;  %4436 = vmatprep.subr.bf16.mxu0 %v2537_v35  ;;  %v2832_v11 = vunpack.c.l.s8.bf16 %v1328_v61  ;;  %v2713_v35 = vunpack.c.h.s8.bf16 %v1265_v16  ;;  %v1289_v16 = vld [vmem:[%s7629_s8 + $0x14e8] sm:$0xff] }
 0x56a   : > { %4477 = vmatprep.subr.bf16.mxu1 %v2665_v36  ;;  %v2841_v36 = vunpack.c.h.s8.bf16 %v1329_v31  ;;  %v1353_v31 = vld [vmem:[%s7629_s8 + $0x16e8] sm:$0xff] }
 0x56c   : > { %4437 = vmatpush1.bf16.msra.mxu0 %v2536_v50  ;;  %v2712_v50 = vunpack.c.h.s8.bf16 %v1264_v28  ;;  %v1288_v28 = vld [vmem:[%s7629_s8 + $0x14e0] sm:$0xff] }
 0x56d   : > { %4478 = vmatpush1.bf16.msra.mxu1 %v2664_v63  ;;  %4438 = vmatprep.subr.bf16.mxu0 %v2545_v51  ;;  %v2840_v63 = vunpack.c.h.s8.bf16 %v1328_v61  ;;  %v2721_v51 = vunpack.c.l.s8.bf16 %v1273_v56  ;;  %v1352_v61 = vld [vmem:[%s7629_s8 + $0x16e0] sm:$0xff] }
 0x56e   : > { %4479 = vmatprep.subr.bf16.mxu1 %v2673_v7  ;;  %v2849_v7 = vunpack.c.l.s8.bf16 %v1337_v15 }
 0x570   : > { %4439 = vmatpush1.bf16.msra.mxu0 %v2544_v55  ;;  %v2720_v55 = vunpack.c.l.s8.bf16 %v1272_v54 }
 0x571   : > { %4480 = vmatpush1.bf16.msra.mxu1 %v2672_v62  ;;  %4440 = vmatprep.subr.bf16.mxu0 %v2553_v2  ;;  %v2848_v62 = vunpack.c.l.s8.bf16 %v1336_v8  ;;  %v2729_v2 = vunpack.c.h.s8.bf16 %v1273_v56 }
 0x572   : > { %4481 = vmatprep.subr.bf16.mxu1 %v2681_v3  ;;  %v2857_v3 = vunpack.c.h.s8.bf16 %v1337_v15 }
 0x574   : > { %4441 = vmatpush1.bf16.msra.mxu0 %v2552_v17  ;;  %v2728_v17 = vunpack.c.h.s8.bf16 %v1272_v54 }
 0x575   : > { %4482 = vmatpush1.bf16.msra.mxu1 %v2680_v13  ;;  %4442 = vmatprep.subr.bf16.mxu0 %v2561_v32  ;;  %v2856_v13 = vunpack.c.h.s8.bf16 %v1336_v8  ;;  %v2737_v32 = vunpack.c.l.s8.bf16 %v1281_v4 }
 0x576   : > { %4483 = vmatprep.subr.bf16.mxu1 %v2689_v10  ;;  %v2865_v10 = vunpack.c.l.s8.bf16 %v1345_v9 }
 0x578   : > { %4443 = vmatpush1.bf16.msra.mxu0 %v2560_v20  ;;  %v2736_v20 = vunpack.c.l.s8.bf16 %v1280_v53 }
 0x579   : > { %4484 = vmatpush1.bf16.msra.mxu1 %v2688_v44  ;;  %4444 = vmatprep.subr.bf16.mxu0 %v2569_v12  ;;  %v2864_v44 = vunpack.c.l.s8.bf16 %v1344_v18  ;;  %v2745_v12 = vunpack.c.h.s8.bf16 %v1281_v4  ;;  %v2760_v4 = vunpack.c.h.s8.bf16 %v1288_v28 }
 0x57a   : > { %4485 = vmatprep.subr.bf16.mxu1 %v2697_v26  ;;  %v2873_v26 = vunpack.c.h.s8.bf16 %v1345_v9  ;;  %v2888_v9 = vunpack.c.h.s8.bf16 %v1352_v61 }
 0x57c   : > { %4445 = vmatpush1.bf16.msra.mxu0 %v2568_v19  ;;  %v2744_v19 = vunpack.c.h.s8.bf16 %v1280_v53 }
 0x57d   : > { %4486 = vmatpush1.bf16.msra.mxu1 %v2696_v43  ;;  %4496 = vmatprep.subr.bf16.mxu0 %v2705_v25  ;;  %v2872_v43 = vunpack.c.h.s8.bf16 %v1344_v18  ;;  %v2753_v25 = vunpack.c.l.s8.bf16 %v1289_v16 }
 0x57e   : > { %4537 = vmatprep.subr.bf16.mxu1 %v2833_v27  ;;  %v2881_v27 = vunpack.c.l.s8.bf16 %v1353_v31 }
 0x57f   : > { %4447 = vmatmul.mubr.bf16.vlgmr.msra.gmra.mrb[68].mxu0 %v7895_v59 }
 0x580   : > { %4488 = vmatmul.mubr.bf16.vlgmr.msra.gmra.mrb[68].mxu1 %v7897_v60  ;;  %4497 = vmatpush1.bf16.msra.mxu0 %v2704_v52 }
 0x581   : > { %4538 = vmatpush1.bf16.msra.mxu1 %v2832_v11  ;;  %4498 = vmatprep.subr.bf16.mxu0 %v2713_v35 }
 0x582   : > { %4539 = vmatprep.subr.bf16.mxu1 %v2841_v36  ;;  %4528 = vmatprep.mubr.bf16.mxu0 %v7903_v5 }
 0x583   : > { %4569 = vmatprep.mubr.bf16.mxu1 %v7905_v6 }
 0x584   : > { %4499 = vmatpush1.bf16.msra.mxu0 %v2712_v50 }
 0x585   : > { %4540 = vmatpush1.bf16.msra.mxu1 %v2840_v63  ;;  %4500 = vmatprep.subr.bf16.mxu0 %v2721_v51  ;;  %v2752_v51 = vunpack.c.l.s8.bf16 %v1288_v28 }
 0x586   : > { %4541 = vmatprep.subr.bf16.mxu1 %v2849_v7  ;;  %v2880_v7 = vunpack.c.l.s8.bf16 %v1352_v61 }
 0x588   : > { %4501 = vmatpush1.bf16.msra.mxu0 %v2720_v55 }
 0x589   : > { %4542 = vmatpush1.bf16.msra.mxu1 %v2848_v62  ;;  %4502 = vmatprep.subr.bf16.mxu0 %v2729_v2  ;;  %v2889_v62 = vunpack.c.h.s8.bf16 %v1353_v31 }
 0x58a   : > { %4543 = vmatprep.subr.bf16.mxu1 %v2857_v3  ;;  %v1361_v3 = vld [vmem:[%s7629_s8 + $0x1728] sm:$0xff] }
 0x58c   : > { %4503 = vmatpush1.bf16.msra.mxu0 %v2728_v17 }
 0x58d   : > { %4544 = vmatpush1.bf16.msra.mxu1 %v2856_v13  ;;  %4504 = vmatprep.subr.bf16.mxu0 %v2737_v32  ;;  %v2897_v13 = vunpack.c.l.s8.bf16 %v1361_v3  ;;  %v1296_v32 = vld [vmem:[%s7629_s8 + $0x1520] sm:$0xff] }
 0x58e   : > { %4545 = vmatprep.subr.bf16.mxu1 %v2865_v10  ;;  %v1360_v10 = vld [vmem:[%s7629_s8 + $0x1720] sm:$0xff]  ;;  %v2768_v53 = vunpack.c.l.s8.bf16 %v1296_v32 }
 0x58f   : > { %v2896_v18 = vunpack.c.l.s8.bf16 %v1360_v10  ;;  %v2904_v31 = vunpack.c.h.s8.bf16 %v1360_v10  ;;  %v1384_v10 = vld [vmem:[%s7629_s8 + $0x17e0] sm:$0xff] }
 0x590   : > { %4505 = vmatpush1.bf16.msra.mxu0 %v2736_v20 }
 0x591   : > { %4546 = vmatpush1.bf16.msra.mxu1 %v2864_v44  ;;  %4506 = vmatprep.subr.bf16.mxu0 %v2745_v12  ;;  %v2905_v44 = vunpack.c.h.s8.bf16 %v1361_v3  ;;  %v1305_v12 = vld [vmem:[%s7629_s8 + $0x1568] sm:$0xff] }
 0x592   : > { %4547 = vmatprep.subr.bf16.mxu1 %v2873_v26  ;;  %v4202_v52 = vpop.f32.mrb[56].mxu0  ;;  %v1369_v26 = vld [vmem:[%s7629_s8 + $0x1768] sm:$0xff] }
 0x593   : > { %v4243_v11 = vpop.f32.mrb[56].mxu1  ;;  %v4203_v35 = vadd.f32 %v4202_v52, %v8444_v49  ;;  %v4204_v36 = vpop.f32.mrb[57].mxu0  ;;  %v2761_v49 = vunpack.c.h.s8.bf16 %v1289_v16  ;;  %v2776_v16 = vunpack.c.h.s8.bf16 %v1296_v32  ;;  %v2793_v52 = vunpack.c.h.s8.bf16 %v1305_v12  ;;  %v1385_v3 = vld [vmem:[%s7629_s8 + $0x17e8] sm:$0xff]  ;;  %v1320_v32 = vld [vmem:[%s7629_s8 + $0x15e0] sm:$0xff] }
 0x594   : > { %v4245_v56 = vpop.f32.mrb[57].mxu1  ;;  %v4205_v15 = vadd.f32 %v4204_v36, %v8446_v0  ;;  %v4206_v50 = vpop.f32.mrb[58].mxu0  ;;  %4507 = vmatpush1.bf16.msra.mxu0 %v2744_v19  ;;  %v1297_v0 = vld [vmem:[%s7629_s8 + $0x1528] sm:$0xff]  ;;  %v2785_v19 = vunpack.c.l.s8.bf16 %v1305_v12 }
 0x595   : > { %v4247_v63 = vpop.f32.mrb[58].mxu1  ;;  %4548 = vmatpush1.bf16.msra.mxu1 %v2872_v43  ;;  %v8486_v54 = vadd.f32 %v4243_v11, %v4203_v35  ;;  %v4207_v8 = vpop.f32.mrb[59].mxu0  ;;  %4508 = vmatprep.subr.bf16.mxu0 %v2753_v25  ;;  %v2769_v17 = vunpack.c.l.s8.bf16 %v1297_v0  ;;  %v2777_v20 = vunpack.c.h.s8.bf16 %v1297_v0  ;;  %v2913_v43 = vunpack.c.l.s8.bf16 %v1369_v26  ;;  %v1304_v25 = vld [vmem:[%s7629_s8 + $0x1560] sm:$0xff]  ;;  %v1313_v35 = vld [vmem:[%s7629_s8 + $0x15a8] sm:$0xff] }
 0x596   : > { %v4248_v55 = vpop.f32.mrb[59].mxu1  ;;  %4549 = vmatprep.subr.bf16.mxu1 %v2881_v27  ;;  %v8488_v2 = vadd.f32 %v4245_v56, %v4205_v15  ;;  %v1368_v27 = vld [vmem:[%s7629_s8 + $0x1760] sm:$0xff]  ;;  %v2784_v28 = vunpack.c.l.s8.bf16 %v1304_v25  ;;  %v2921_v11 = vunpack.c.h.s8.bf16 %v1369_v26  ;;  %v1377_v36 = vld [vmem:[%s7629_s8 + $0x17a8] sm:$0xff]  ;;  %v2792_v56 = vunpack.c.h.s8.bf16 %v1304_v25  ;;  %v627_v26 = vld [vmem:[%s7629_s8 + $0x38] sm:$0xff] }
 0x597   : > { %v2912_v61 = vunpack.c.l.s8.bf16 %v1368_v27  ;;  %v2920_v15 = vunpack.c.h.s8.bf16 %v1368_v27  ;;  %v2801_v50 = vunpack.c.l.s8.bf16 %v1313_v35  ;;  %v2929_v63 = vunpack.c.l.s8.bf16 %v1377_v36  ;;  %v1321_v0 = vld [vmem:[%s7629_s8 + $0x15e8] sm:$0xff]  ;;  %v1392_v25 = vld [vmem:[%s7629_s8 + $0x1820] sm:$0xff]  ;;  %v626_v27 = vld [vmem:[%s7629_s8 + $0x30] sm:$0xff] }
 0x598   : > { %4509 = vmatpush1.bf16.msra.mxu0 %v2752_v51  ;;  %v1312_v51 = vld [vmem:[%s7629_s8 + $0x15a0] sm:$0xff]  ;;  %v1393_v12 = vld [vmem:[%s7629_s8 + $0x1828] sm:$0xff] }
 0x599   : > { %4550 = vmatpush1.bf16.msra.mxu1 %v2880_v7  ;;  %4510 = vmatprep.subr.bf16.mxu0 %v2761_v49  ;;  %v1376_v7 = vld [vmem:[%s7629_s8 + $0x17a0] sm:$0xff]  ;;  %v2800_v8 = vunpack.c.l.s8.bf16 %v1312_v51  ;;  %v2809_v49 = vunpack.c.h.s8.bf16 %v1313_v35  ;;  %v1401_v35 = vld [vmem:[%s7629_s8 + $0x1868] sm:$0xff] }
 0x59a   : > { %4551 = vmatprep.subr.bf16.mxu1 %v2889_v62  ;;  %v2928_v55 = vunpack.c.l.s8.bf16 %v1376_v7  ;;  %v2937_v62 = vunpack.c.h.s8.bf16 %v1377_v36  ;;  %v635_v36 = vld [vmem:[%s7629_s8 + $0x78] sm:$0xff] }
 0x59c   : > { %4511 = vmatpush1.bf16.msra.mxu0 %v2760_v4  ;;  %v2808_v4 = vunpack.c.h.s8.bf16 %v1312_v51  ;;  %v1400_v51 = vld [vmem:[%s7629_s8 + $0x1860] sm:$0xff] }
 0x59d   : > { %4552 = vmatpush1.bf16.msra.mxu1 %v2888_v9  ;;  %4512 = vmatprep.subr.bf16.mxu0 %v2769_v17  ;;  %v2936_v9 = vunpack.c.h.s8.bf16 %v1376_v7  ;;  %v2817_v17 = vunpack.c.l.s8.bf16 %v1321_v0  ;;  %v634_v7 = vld [vmem:[%s7629_s8 + $0x70] sm:$0xff] }
 0x59e   : > { %4553 = vmatprep.subr.bf16.mxu1 %v2897_v13  ;;  %v2945_v13 = vunpack.c.l.s8.bf16 %v1385_v3 }
 0x5a0   : > { %4513 = vmatpush1.bf16.msra.mxu0 %v2768_v53  ;;  %v2816_v53 = vunpack.c.l.s8.bf16 %v1320_v32 }
 0x5a1   : > { %4554 = vmatpush1.bf16.msra.mxu1 %v2896_v18  ;;  %4514 = vmatprep.subr.bf16.mxu0 %v2777_v20  ;;  %v2944_v18 = vunpack.c.l.s8.bf16 %v1384_v10  ;;  %v2825_v20 = vunpack.c.h.s8.bf16 %v1321_v0  ;;  %v1409_v0 = vld [vmem:[%s7629_s8 + $0x18a8] sm:$0xff] }
 0x5a2   : > { %4555 = vmatprep.subr.bf16.mxu1 %v2905_v44  ;;  %v2953_v44 = vunpack.c.h.s8.bf16 %v1385_v3  ;;  %v643_v3 = vld [vmem:[%s7629_s8 + $0xb8] sm:$0xff] }
 0x5a4   : > { %4515 = vmatpush1.bf16.msra.mxu0 %v2776_v16  ;;  %v2824_v16 = vunpack.c.h.s8.bf16 %v1320_v32  ;;  %v642_v32 = vld [vmem:[%s7629_s8 + $0xb0] sm:$0xff] }
 0x5a5   : > { %4556 = vmatpush1.bf16.msra.mxu1 %v2904_v31  ;;  %4516 = vmatprep.subr.bf16.mxu0 %v2785_v19  ;;  %v2952_v31 = vunpack.c.h.s8.bf16 %v1384_v10  ;;  %v2961_v19 = vunpack.c.l.s8.bf16 %v1393_v12 }
 0x5a6   : > { %4557 = vmatprep.subr.bf16.mxu1 %v2913_v43  ;;  %v1427_v43 = vunpack.c.l.s8.bf16 %v627_v26 }
 0x5a8   : > { %4517 = vmatpush1.bf16.msra.mxu0 %v2784_v28  ;;  %v2960_v28 = vunpack.c.l.s8.bf16 %v1392_v25 }
 0x5a9   : > { %4558 = vmatpush1.bf16.msra.mxu1 %v2912_v61  ;;  %4518 = vmatprep.subr.bf16.mxu0 %v2793_v52  ;;  %v1426_v61 = vunpack.c.l.s8.bf16 %v626_v27  ;;  %v2969_v52 = vunpack.c.h.s8.bf16 %v1393_v12  ;;  %v651_v12 = vld [vmem:[%s7629_s8 + $0xf8] sm:$0xff] }
 0x5aa   : > { %4559 = vmatprep.subr.bf16.mxu1 %v2921_v11  ;;  %v1435_v11 = vunpack.c.h.s8.bf16 %v627_v26 }
 0x5ac   : > { %4519 = vmatpush1.bf16.msra.mxu0 %v2792_v56  ;;  %v2968_v56 = vunpack.c.h.s8.bf16 %v1392_v25  ;;  %v650_v25 = vld [vmem:[%s7629_s8 + $0xf0] sm:$0xff] }
 0x5ad   : > { %4560 = vmatpush1.bf16.msra.mxu1 %v2920_v15  ;;  %4520 = vmatprep.subr.bf16.mxu0 %v2801_v50  ;;  %v1434_v15 = vunpack.c.h.s8.bf16 %v626_v27  ;;  %v2977_v50 = vunpack.c.l.s8.bf16 %v1401_v35 }
 0x5ae   : > { %4561 = vmatprep.subr.bf16.mxu1 %v2929_v63  ;;  %v1443_v63 = vunpack.c.l.s8.bf16 %v635_v36 }
 0x5b0   : > { %4521 = vmatpush1.bf16.msra.mxu0 %v2800_v8  ;;  %v2976_v8 = vunpack.c.l.s8.bf16 %v1400_v51 }
 0x5b1   : > { %4562 = vmatpush1.bf16.msra.mxu1 %v2928_v55  ;;  %4522 = vmatprep.subr.bf16.mxu0 %v2809_v49  ;;  %v1442_v55 = vunpack.c.l.s8.bf16 %v634_v7  ;;  %v2985_v49 = vunpack.c.h.s8.bf16 %v1401_v35 }
 0x5b2   : > { %4563 = vmatprep.subr.bf16.mxu1 %v2937_v62  ;;  %v1451_v62 = vunpack.c.h.s8.bf16 %v635_v36 }
 0x5b4   : > { %4523 = vmatpush1.bf16.msra.mxu0 %v2808_v4  ;;  %v2984_v4 = vunpack.c.h.s8.bf16 %v1400_v51 }
 0x5b5   : > { %4564 = vmatpush1.bf16.msra.mxu1 %v2936_v9  ;;  %4524 = vmatprep.subr.bf16.mxu0 %v2817_v17  ;;  %v1450_v9 = vunpack.c.h.s8.bf16 %v634_v7  ;;  %v1459_v17 = vunpack.c.l.s8.bf16 %v643_v3 }
 0x5b6   : > { %4565 = vmatprep.subr.bf16.mxu1 %v2945_v13  ;;  %v1408_v13 = vld [vmem:[%s7629_s8 + $0x18a0] sm:$0xff] }
 0x5b7   : > { %v2992_v10 = vunpack.c.l.s8.bf16 %v1408_v13  ;;  %v3000_v26 = vunpack.c.h.s8.bf16 %v1408_v13 }
 0x5b8   : > { %4525 = vmatpush1.bf16.msra.mxu0 %v2816_v53  ;;  %v1458_v53 = vunpack.c.l.s8.bf16 %v642_v32 }
 0x5b9   : > { %4566 = vmatpush1.bf16.msra.mxu1 %v2944_v18  ;;  %4526 = vmatprep.subr.bf16.mxu0 %v2825_v20  ;;  %v3001_v18 = vunpack.c.h.s8.bf16 %v1409_v0  ;;  %v1467_v20 = vunpack.c.h.s8.bf16 %v643_v3 }
 0x5ba   : > { %4567 = vmatprep.subr.bf16.mxu1 %v2953_v44  ;;  %v1417_v44 = vld [vmem:[%s7629_s8 + $0x18e8] sm:$0xff] }
 0x5bc   : > { %4527 = vmatpush1.bf16.msra.mxu0 %v2824_v16  ;;  %v1466_v16 = vunpack.c.h.s8.bf16 %v642_v32 }
 0x5bd   : > { %4568 = vmatpush1.bf16.msra.mxu1 %v2952_v31  ;;  %4578 = vmatprep.subr.bf16.mxu0 %v2961_v19  ;;  %v3009_v31 = vunpack.c.l.s8.bf16 %v1417_v44  ;;  %v1475_v19 = vunpack.c.l.s8.bf16 %v651_v12 }
 0x5be   : > { %4619 = vmatprep.subr.bf16.mxu1 %v1427_v43  ;;  %v1416_v43 = vld [vmem:[%s7629_s8 + $0x18e0] sm:$0xff] }
 0x5bf   : > { %4529 = vmatmul.mubr.bf16.vlgmr.msra.gmra.mrb[72].mxu0 %v7949_v45 }
 0x5c0   : > { %4570 = vmatmul.mubr.bf16.vlgmr.msra.gmra.mrb[72].mxu1 %v7951_v46  ;;  %4579 = vmatpush1.bf16.msra.mxu0 %v2960_v28 }
 0x5c1   : > { %4620 = vmatpush1.bf16.msra.mxu1 %v1426_v61  ;;  %4580 = vmatprep.subr.bf16.mxu0 %v2969_v52 }
 0x5c2   : > { %4621 = vmatprep.subr.bf16.mxu1 %v1435_v11  ;;  %4610 = vmatprep.mubr.bf16.mxu0 %v7251_v1 }
 0x5c3   : > { %4651 = vmatprep.mubr.bf16.mxu1 %v7667_v37  ;;  %v2993_v37 = vunpack.c.l.s8.bf16 %v1409_v0  ;;  %v1482_v0 = vunpack.c.h.s8.bf16 %v650_v25 }
 0x5c4   : > { %4581 = vmatpush1.bf16.msra.mxu0 %v2968_v56 }
 0x5c5   : > { %4622 = vmatpush1.bf16.msra.mxu1 %v1434_v15  ;;  %4582 = vmatprep.subr.bf16.mxu0 %v2977_v50  ;;  %v3008_v15 = vunpack.c.l.s8.bf16 %v1416_v43  ;;  %v1474_v50 = vunpack.c.l.s8.bf16 %v650_v25 }
 0x5c6   : > { %4623 = vmatprep.subr.bf16.mxu1 %v1443_v63 }
 0x5c8   : > { %4583 = vmatpush1.bf16.msra.mxu0 %v2976_v8  ;;  %v1483_v8 = vunpack.c.h.s8.bf16 %v651_v12 }
 0x5c9   : > { %4624 = vmatpush1.bf16.msra.mxu1 %v1442_v55  ;;  %4584 = vmatprep.subr.bf16.mxu0 %v2985_v49  ;;  %v691_v49 = vld [vmem:[%s7629_s8 + $0x238] sm:$0xff] }
 0x5ca   : > { %4625 = vmatprep.subr.bf16.mxu1 %v1451_v62  ;;  %v3016_v62 = vunpack.c.h.s8.bf16 %v1416_v43 }
 0x5cc   : > { %4585 = vmatpush1.bf16.msra.mxu0 %v2984_v4  ;;  %v1555_v4 = vunpack.c.l.s8.bf16 %v691_v49 }
 0x5cd   : > { %4626 = vmatpush1.bf16.msra.mxu1 %v1450_v9  ;;  %4586 = vmatprep.subr.bf16.mxu0 %v2993_v37  ;;  %v658_v9 = vld [vmem:[%s7629_s8 + $0x130] sm:$0xff] }
 0x5ce   : > { %4627 = vmatprep.subr.bf16.mxu1 %v1459_v17  ;;  %v690_v37 = vld [vmem:[%s7629_s8 + $0x230] sm:$0xff]  ;;  %v1490_v17 = vunpack.c.l.s8.bf16 %v658_v9 }
 0x5cf   : > { %v1554_v13 = vunpack.c.l.s8.bf16 %v690_v37 }
 0x5d0   : > { %4587 = vmatpush1.bf16.msra.mxu0 %v2992_v10  ;;  %v1563_v10 = vunpack.c.h.s8.bf16 %v691_v49 }
 0x5d1   : > { %4628 = vmatpush1.bf16.msra.mxu1 %v1458_v53  ;;  %4588 = vmatprep.subr.bf16.mxu0 %v3001_v18  ;;  %v667_v53 = vld [vmem:[%s7629_s8 + $0x178] sm:$0xff] }
 0x5d2   : > { %4629 = vmatprep.subr.bf16.mxu1 %v1467_v20  ;;  %v4284_v27 = vpop.f32.mrb[60].mxu0  ;;  %v699_v18 = vld [vmem:[%s7629_s8 + $0x278] sm:$0xff]  ;;  %v1498_v20 = vunpack.c.h.s8.bf16 %v658_v9  ;;  %v1507_v12 = vunpack.c.l.s8.bf16 %v667_v53  ;;  %v1515_v25 = vunpack.c.h.s8.bf16 %v667_v53 }
 0x5d3   : > { %v4325_v28 = vpop.f32.mrb[60].mxu1  ;;  %v4285_v61 = vadd.f32 %v4284_v27, %v8486_v54  ;;  %v4286_v52 = vpop.f32.mrb[61].mxu0  ;;  %v3017_v54 = vunpack.c.h.s8.bf16 %v1417_v44  ;;  %v1562_v44 = vunpack.c.h.s8.bf16 %v690_v37  ;;  %v1579_v27 = vunpack.c.h.s8.bf16 %v699_v18 }
 0x5d4   : > { %v4327_v11 = vpop.f32.mrb[61].mxu1  ;;  %v4287_v35 = vadd.f32 %v4286_v52, %v8488_v2  ;;  %v4288_v36 = vpop.f32.mrb[62].mxu0  ;;  %4589 = vmatpush1.bf16.msra.mxu0 %v3000_v26  ;;  %v659_v2 = vld [vmem:[%s7629_s8 + $0x138] sm:$0xff]  ;;  %v1571_v26 = vunpack.c.l.s8.bf16 %v699_v18 }
 0x5d5   : > { %v4329_v56 = vpop.f32.mrb[62].mxu1  ;;  %4630 = vmatpush1.bf16.msra.mxu1 %v1466_v16  ;;  %v8528_v63 = vadd.f32 %v4325_v28, %v4285_v61  ;;  %v4289_v51 = vpop.f32.mrb[63].mxu0  ;;  %4590 = vmatprep.subr.bf16.mxu0 %v3009_v31  ;;  %v1491_v3 = vunpack.c.l.s8.bf16 %v659_v2  ;;  %v1499_v32 = vunpack.c.h.s8.bf16 %v659_v2  ;;  %v666_v16 = vld [vmem:[%s7629_s8 + $0x170] sm:$0xff]  ;;  %v675_v28 = vld [vmem:[%s7629_s8 + $0x1b8] sm:$0xff] }
 0x5d6   : > { %v4330_v7 = vpop.f32.mrb[63].mxu1  ;;  %4631 = vmatprep.subr.bf16.mxu1 %v1475_v19  ;;  %v8530_v55 = vadd.f32 %v4327_v11, %v4287_v35  ;;  %v698_v31 = vld [vmem:[%s7629_s8 + $0x270] sm:$0xff]  ;;  %v1506_v19 = vunpack.c.l.s8.bf16 %v666_v16  ;;  %v707_v61 = vld [vmem:[%s7629_s8 + $0x2b8] sm:$0xff]  ;;  %v1514_v52 = vunpack.c.h.s8.bf16 %v666_v16  ;;  %v1531_v51 = vunpack.c.h.s8.bf16 %v675_v28 }
 0x5d7   : > { %v1570_v43 = vunpack.c.l.s8.bf16 %v698_v31  ;;  %v1578_v11 = vunpack.c.h.s8.bf16 %v698_v31  ;;  %v1587_v35 = vunpack.c.l.s8.bf16 %v707_v61  ;;  %v674_v36 = vld [vmem:[%s7629_s8 + $0x1b0] sm:$0xff]  ;;  %v1595_v7 = vunpack.c.h.s8.bf16 %v707_v61 }
 0x5d8   : > { %4591 = vmatpush1.bf16.msra.mxu0 %v3008_v15  ;;  %v706_v56 = vld [vmem:[%s7629_s8 + $0x2b0] sm:$0xff]  ;;  %v1522_v15 = vunpack.c.l.s8.bf16 %v674_v36  ;;  %v1530_v2 = vunpack.c.h.s8.bf16 %v674_v36 }
 0x5d9   : > { %4632 = vmatpush1.bf16.msra.mxu1 %v1474_v50  ;;  %4592 = vmatprep.subr.bf16.mxu0 %v3017_v54  ;;  %v1586_v50 = vunpack.c.l.s8.bf16 %v706_v56  ;;  %v683_v54 = vld [vmem:[%s7629_s8 + $0x1f8] sm:$0xff]  ;;  %v1594_v49 = vunpack.c.h.s8.bf16 %v706_v56 }
 0x5da   : > { %4633 = vmatprep.subr.bf16.mxu1 %v1483_v8  ;;  %v715_v8 = vld [vmem:[%s7629_s8 + $0x2f8] sm:$0xff] }
 0x5dc   : > { %4593 = vmatpush1.bf16.msra.mxu0 %v3016_v62  ;;  %v1539_v62 = vunpack.c.l.s8.bf16 %v683_v54 }
 0x5dd   : > { %4634 = vmatpush1.bf16.msra.mxu1 %v1482_v0  ;;  %4660 = vmatprep.subr.bf16.mxu0 %v1555_v4  ;;  %v1603_v0 = vunpack.c.l.s8.bf16 %v715_v8  ;;  %v714_v4 = vld [vmem:[%s7629_s8 + $0x2f0] sm:$0xff] }
 0x5de   : > { %4635 = vmatprep.subr.bf16.mxu1 %v1491_v3  ;;  %v682_v3 = vld [vmem:[%s7629_s8 + $0x1f0] sm:$0xff]  ;;  %v1602_v37 = vunpack.c.l.s8.bf16 %v714_v4  ;;  %v1610_v18 = vunpack.c.h.s8.bf16 %v714_v4 }
 0x5df   : > { %4611 = vmatmul.mubr.bf16.vlgmr.msra.gmra.mrb[76].mxu0 %v7980_v14  ;;  %v1538_v9 = vunpack.c.l.s8.bf16 %v682_v3  ;;  %v1546_v53 = vunpack.c.h.s8.bf16 %v682_v3 }
 0x5e0   : > { %4661 = vmatpush1.bf16.msra.mxu0 %v1554_v13  ;;  %4692 = vmatprep.mubr.bf16.mxu0 %v7669_v38  ;;  %v1523_v38 = vunpack.c.l.s8.bf16 %v675_v28  ;;  %v1611_v13 = vunpack.c.h.s8.bf16 %v715_v8 }
 0x5e1   : > { %4636 = vmatpush1.bf16.msra.mxu1 %v1490_v17  ;;  %4662 = vmatprep.subr.bf16.mxu0 %v1563_v10  ;;  %v1547_v17 = vunpack.c.h.s8.bf16 %v683_v54  ;;  %v755_v10 = vld [vmem:[%s7629_s8 + $0x438] sm:$0xff] }
 0x5e2   : > { %4637 = vmatprep.subr.bf16.mxu1 %v1499_v32  ;;  %v723_v32 = vld [vmem:[%s7629_s8 + $0x338] sm:$0xff] }
 0x5e4   : > { %4663 = vmatpush1.bf16.msra.mxu0 %v1562_v44  ;;  %v1683_v44 = vunpack.c.l.s8.bf16 %v755_v10 }
 0x5e5   : > { %4638 = vmatpush1.bf16.msra.mxu1 %v1498_v20  ;;  %4664 = vmatprep.subr.bf16.mxu0 %v1571_v26  ;;  %v1619_v20 = vunpack.c.l.s8.bf16 %v723_v32  ;;  %v754_v26 = vld [vmem:[%s7629_s8 + $0x430] sm:$0xff] }
 0x5e6   : > { %4639 = vmatprep.subr.bf16.mxu1 %v1507_v12  ;;  %v722_v12 = vld [vmem:[%s7629_s8 + $0x330] sm:$0xff]  ;;  %v1682_v31 = vunpack.c.l.s8.bf16 %v754_v26  ;;  %v1690_v61 = vunpack.c.h.s8.bf16 %v754_v26 }
 0x5e7   : > { %v1618_v16 = vunpack.c.l.s8.bf16 %v722_v12  ;;  %v1626_v28 = vunpack.c.h.s8.bf16 %v722_v12 }
 0x5e8   : > { %4665 = vmatpush1.bf16.msra.mxu0 %v1570_v43  ;;  %v1691_v43 = vunpack.c.h.s8.bf16 %v755_v10 }
 0x5e9   : > { %4640 = vmatpush1.bf16.msra.mxu1 %v1506_v19  ;;  %4666 = vmatprep.subr.bf16.mxu0 %v1579_v27  ;;  %v1627_v19 = vunpack.c.h.s8.bf16 %v723_v32  ;;  %v763_v27 = vld [vmem:[%s7629_s8 + $0x478] sm:$0xff] }
 0x5ea   : > { %4641 = vmatprep.subr.bf16.mxu1 %v1515_v25  ;;  %v731_v25 = vld [vmem:[%s7629_s8 + $0x378] sm:$0xff] }
 0x5ec   : > { %4667 = vmatpush1.bf16.msra.mxu0 %v1578_v11  ;;  %v1699_v11 = vunpack.c.l.s8.bf16 %v763_v27 }
 0x5ed   : > { %4642 = vmatpush1.bf16.msra.mxu1 %v1514_v52  ;;  %4668 = vmatprep.subr.bf16.mxu0 %v1587_v35  ;;  %v1635_v52 = vunpack.c.l.s8.bf16 %v731_v25  ;;  %v762_v35 = vld [vmem:[%s7629_s8 + $0x470] sm:$0xff] }
 0x5ee   : > { %4643 = vmatprep.subr.bf16.mxu1 %v1523_v38  ;;  %v730_v38 = vld [vmem:[%s7629_s8 + $0x370] sm:$0xff]  ;;  %v1698_v56 = vunpack.c.l.s8.bf16 %v762_v35  ;;  %v1706_v54 = vunpack.c.h.s8.bf16 %v762_v35  ;;  %v819_v35 = vld [vmem:[%s7629_s8 + $0x638] sm:$0xff] }
 0x5ef   : > { %v1634_v36 = vunpack.c.l.s8.bf16 %v730_v38 }
 0x5f0   : > { %4669 = vmatpush1.bf16.msra.mxu0 %v1586_v50  ;;  %v739_v50 = vld [vmem:[%s7629_s8 + $0x3b8] sm:$0xff] }
 0x5f1   : > { %4644 = vmatpush1.bf16.msra.mxu1 %v1522_v15  ;;  %4670 = vmatprep.subr.bf16.mxu0 %v1595_v7  ;;  %v1707_v15 = vunpack.c.h.s8.bf16 %v763_v27  ;;  %v1642_v7 = vunpack.c.h.s8.bf16 %v730_v38  ;;  %v1659_v3 = vunpack.c.h.s8.bf16 %v739_v50 }
 0x5f2   : > { %4645 = vmatprep.subr.bf16.mxu1 %v1531_v51  ;;  %v771_v51 = vld [vmem:[%s7629_s8 + $0x4b8] sm:$0xff] }
 0x5f3   : > { %v1715_v8 = vunpack.c.l.s8.bf16 %v771_v51  ;;  %v1723_v4 = vunpack.c.h.s8.bf16 %v771_v51  ;;  %v818_v51 = vld [vmem:[%s7629_s8 + $0x630] sm:$0xff] }
 0x5f4   : > { %4671 = vmatpush1.bf16.msra.mxu0 %v1594_v49  ;;  %v770_v49 = vld [vmem:[%s7629_s8 + $0x4b0] sm:$0xff] }
 0x5f5   : > { %4646 = vmatpush1.bf16.msra.mxu1 %v1530_v2  ;;  %4672 = vmatprep.subr.bf16.mxu0 %v1603_v0  ;;  %v738_v2 = vld [vmem:[%s7629_s8 + $0x3b0] sm:$0xff]  ;;  %v1714_v0 = vunpack.c.l.s8.bf16 %v770_v49 }
 0x5f6   : > { %4647 = vmatprep.subr.bf16.mxu1 %v1539_v62  ;;  %v1650_v62 = vunpack.c.l.s8.bf16 %v738_v2 }
 0x5f8   : > { %4673 = vmatpush1.bf16.msra.mxu0 %v1602_v37  ;;  %v779_v37 = vld [vmem:[%s7629_s8 + $0x4f8] sm:$0xff] }
 0x5f9   : > { %4648 = vmatpush1.bf16.msra.mxu1 %v1538_v9  ;;  %4674 = vmatprep.subr.bf16.mxu0 %v1611_v13  ;;  %v747_v9 = vld [vmem:[%s7629_s8 + $0x3f8] sm:$0xff]  ;;  %v1722_v13 = vunpack.c.h.s8.bf16 %v770_v49  ;;  %v1731_v10 = vunpack.c.l.s8.bf16 %v779_v37 }
 0x5fa   : > { %4649 = vmatprep.subr.bf16.mxu1 %v1547_v17  ;;  %v1658_v17 = vunpack.c.h.s8.bf16 %v738_v2  ;;  %v1667_v32 = vunpack.c.l.s8.bf16 %v747_v9  ;;  %v795_v2 = vld [vmem:[%s7629_s8 + $0x578] sm:$0xff] }
 0x5fb   : > { %v827_v49 = vld [vmem:[%s7629_s8 + $0x678] sm:$0xff] }
 0x5fc   : > { %4675 = vmatpush1.bf16.msra.mxu0 %v1610_v18  ;;  %v778_v18 = vld [vmem:[%s7629_s8 + $0x4f0] sm:$0xff] }
 0x5fd   : > { %4650 = vmatpush1.bf16.msra.mxu1 %v1546_v53  ;;  %4676 = vmatprep.subr.bf16.mxu0 %v1619_v20  ;;  %v746_v53 = vld [vmem:[%s7629_s8 + $0x3f0] sm:$0xff]  ;;  %v1730_v27 = vunpack.c.l.s8.bf16 %v778_v18 }
 0x5fe   : > { %4701 = vmatprep.subr.bf16.mxu1 %v1683_v44 }
 0x600   : > { %4652 = vmatmul.mubr.bf16.vlgmr.msra.gmra.mrb[76].mxu1 %v7699_v47  ;;  %4677 = vmatpush1.bf16.msra.mxu0 %v1618_v16  ;;  %v1643_v47 = vunpack.c.h.s8.bf16 %v731_v25  ;;  %v1666_v25 = vunpack.c.l.s8.bf16 %v746_v53 }
 0x601   : > { %4702 = vmatpush1.bf16.msra.mxu1 %v1682_v31  ;;  %4678 = vmatprep.subr.bf16.mxu0 %v1627_v19 }
 0x602   : > { %4703 = vmatprep.subr.bf16.mxu1 %v1691_v43  ;;  %4733 = vmatprep.mubr.bf16.mxu1 %v7707_v57  ;;  %v1651_v57 = vunpack.c.l.s8.bf16 %v739_v50  ;;  %v786_v50 = vld [vmem:[%s7629_s8 + $0x530] sm:$0xff] }
 0x604   : > { %4679 = vmatpush1.bf16.msra.mxu0 %v1626_v28 }
 0x605   : > { %4704 = vmatpush1.bf16.msra.mxu1 %v1690_v61  ;;  %4680 = vmatprep.subr.bf16.mxu0 %v1635_v52 }
 0x606   : > { %4705 = vmatprep.subr.bf16.mxu1 %v1699_v11  ;;  %v1739_v11 = vunpack.c.h.s8.bf16 %v779_v37  ;;  %v826_v37 = vld [vmem:[%s7629_s8 + $0x670] sm:$0xff] }
 0x608   : > { %4681 = vmatpush1.bf16.msra.mxu0 %v1634_v36  ;;  %v1674_v36 = vunpack.c.h.s8.bf16 %v746_v53  ;;  %v835_v53 = vld [vmem:[%s7629_s8 + $0x6b8] sm:$0xff] }
 0x609   : > { %4706 = vmatpush1.bf16.msra.mxu1 %v1698_v56  ;;  %4682 = vmatprep.subr.bf16.mxu0 %v1643_v47  ;;  %v1738_v56 = vunpack.c.h.s8.bf16 %v778_v18 }
 0x60a   : > { %4707 = vmatprep.subr.bf16.mxu1 %v1707_v15  ;;  %v1811_v15 = vunpack.c.l.s8.bf16 %v819_v35 }
 0x60c   : > { %4683 = vmatpush1.bf16.msra.mxu0 %v1642_v7  ;;  %v1746_v7 = vunpack.c.l.s8.bf16 %v786_v50 }
 0x60d   : > { %4708 = vmatpush1.bf16.msra.mxu1 %v1706_v54  ;;  %4684 = vmatprep.subr.bf16.mxu0 %v1651_v57  ;;  %v1810_v54 = vunpack.c.l.s8.bf16 %v818_v51 }
 0x60e   : > { %4709 = vmatprep.subr.bf16.mxu1 %v1715_v8  ;;  %v1819_v8 = vunpack.c.h.s8.bf16 %v819_v35  ;;  %v842_v35 = vld [vmem:[%s7629_s8 + $0x6f0] sm:$0xff] }
 0x610   : > { %4685 = vmatpush1.bf16.msra.mxu0 %v1650_v62  ;;  %v1754_v62 = vunpack.c.h.s8.bf16 %v786_v50  ;;  %v851_v50 = vld [vmem:[%s7629_s8 + $0x738] sm:$0xff] }
 0x611   : > { %4710 = vmatpush1.bf16.msra.mxu1 %v1714_v0  ;;  %4686 = vmatprep.subr.bf16.mxu0 %v1659_v3  ;;  %v1818_v0 = vunpack.c.h.s8.bf16 %v818_v51  ;;  %v1763_v3 = vunpack.c.l.s8.bf16 %v795_v2  ;;  %v883_v51 = vld [vmem:[%s7629_s8 + $0x838] sm:$0xff] }
 0x612   : > { %4711 = vmatprep.subr.bf16.mxu1 %v1723_v4  ;;  %v4366_v20 = vpop.f32.mrb[64].mxu0  ;;  %v1827_v4 = vunpack.c.l.s8.bf16 %v827_v49 }
 0x613   : > { %v4407_v44 = vpop.f32.mrb[64].mxu1  ;;  %v4367_v12 = vadd.f32 %v4366_v20, %v8528_v63  ;;  %v4368_v26 = vpop.f32.mrb[65].mxu0  ;;  %v1675_v63 = vunpack.c.h.s8.bf16 %v747_v9  ;;  %v794_v9 = vld [vmem:[%s7629_s8 + $0x570] sm:$0xff]  ;;  %v1834_v20 = vunpack.c.h.s8.bf16 %v826_v37 }
 0x614   : > { %v4409_v16 = vpop.f32.mrb[65].mxu1  ;;  %v4369_v31 = vadd.f32 %v4368_v26, %v8530_v55  ;;  %v4370_v19 = vpop.f32.mrb[66].mxu0  ;;  %4687 = vmatpush1.bf16.msra.mxu0 %v1658_v17  ;;  %v787_v55 = vld [vmem:[%s7629_s8 + $0x538] sm:$0xff]  ;;  %v1762_v17 = vunpack.c.l.s8.bf16 %v794_v9  ;;  %v1770_v18 = vunpack.c.h.s8.bf16 %v794_v9  ;;  %v834_v26 = vld [vmem:[%s7629_s8 + $0x6b0] sm:$0xff] }
 0x615   : > { %v4411_v43 = vpop.f32.mrb[66].mxu1  ;;  %4712 = vmatpush1.bf16.msra.mxu1 %v1722_v13  ;;  %v8570_v28 = vadd.f32 %v4407_v44, %v4367_v12  ;;  %v4371_v61 = vpop.f32.mrb[67].mxu0  ;;  %4688 = vmatprep.subr.bf16.mxu0 %v1667_v32  ;;  %v1747_v47 = vunpack.c.l.s8.bf16 %v787_v55  ;;  %v1755_v57 = vunpack.c.h.s8.bf16 %v787_v55  ;;  %v1826_v13 = vunpack.c.l.s8.bf16 %v826_v37  ;;  %v802_v12 = vld [vmem:[%s7629_s8 + $0x5b0] sm:$0xff]  ;;  %v859_v9 = vld [vmem:[%s7629_s8 + $0x778] sm:$0xff] }
 0x616   : > { %v4412_v52 = vpop.f32.mrb[67].mxu1  ;;  %4713 = vmatprep.subr.bf16.mxu1 %v1731_v10  ;;  %v8572_v38 = vadd.f32 %v4409_v16, %v4369_v31  ;;  %v1835_v32 = vunpack.c.h.s8.bf16 %v827_v49  ;;  %v803_v10 = vld [vmem:[%s7629_s8 + $0x5b8] sm:$0xff]  ;;  %v1843_v44 = vunpack.c.l.s8.bf16 %v835_v53  ;;  %v1778_v16 = vunpack.c.l.s8.bf16 %v802_v12  ;;  %v810_v55 = vld [vmem:[%s7629_s8 + $0x5f0] sm:$0xff] }
 0x617   : > { %v1842_v31 = vunpack.c.l.s8.bf16 %v834_v26  ;;  %v1787_v19 = vunpack.c.h.s8.bf16 %v803_v10  ;;  %v1851_v43 = vunpack.c.h.s8.bf16 %v835_v53  ;;  %v1786_v61 = vunpack.c.h.s8.bf16 %v802_v12  ;;  %v882_v49 = vld [vmem:[%s7629_s8 + $0x830] sm:$0xff]  ;;  %v891_v37 = vld [vmem:[%s7629_s8 + $0x878] sm:$0xff] }
 0x618   : > { %4689 = vmatpush1.bf16.msra.mxu0 %v1666_v25  ;;  %v811_v25 = vld [vmem:[%s7629_s8 + $0x5f8] sm:$0xff]  ;;  %v1850_v52 = vunpack.c.h.s8.bf16 %v834_v26  ;;  %v890_v53 = vld [vmem:[%s7629_s8 + $0x870] sm:$0xff] }
 0x619   : > { %4714 = vmatpush1.bf16.msra.mxu1 %v1730_v27  ;;  %4690 = vmatprep.subr.bf16.mxu0 %v1675_v63  ;;  %v843_v27 = vld [vmem:[%s7629_s8 + $0x6f8] sm:$0xff]  ;;  %v1795_v63 = vunpack.c.l.s8.bf16 %v811_v25 }
 0x61a   : > { %4715 = vmatprep.subr.bf16.mxu1 %v1739_v11  ;;  %v1859_v11 = vunpack.c.l.s8.bf16 %v843_v27  ;;  %v899_v12 = vld [vmem:[%s7629_s8 + $0x8b8] sm:$0xff] }
 0x61c   : > { %4691 = vmatpush1.bf16.msra.mxu0 %v1674_v36  ;;  %v1794_v36 = vunpack.c.l.s8.bf16 %v810_v55 }
 0x61d   : > { %4716 = vmatpush1.bf16.msra.mxu1 %v1738_v56  ;;  %4742 = vmatprep.subr.bf16.mxu0 %v1811_v15  ;;  %v1858_v56 = vunpack.c.l.s8.bf16 %v842_v35  ;;  %v1867_v15 = vunpack.c.h.s8.bf16 %v843_v27 }
 0x61e   : > { %4717 = vmatprep.subr.bf16.mxu1 %v1747_v47  ;;  %v1803_v47 = vunpack.c.h.s8.bf16 %v811_v25 }
 0x61f   : > { %4693 = vmatmul.mubr.bf16.vlgmr.msra.gmra.mrb[80].mxu0 %v7701_v48  ;;  %v1771_v48 = vunpack.c.h.s8.bf16 %v795_v2  ;;  %v850_v2 = vld [vmem:[%s7629_s8 + $0x730] sm:$0xff] }
 0x620   : > { %4743 = vmatpush1.bf16.msra.mxu0 %v1810_v54  ;;  %4774 = vmatprep.mubr.bf16.mxu0 %v7709_v58  ;;  %v1779_v58 = vunpack.c.l.s8.bf16 %v803_v10  ;;  %v1866_v54 = vunpack.c.h.s8.bf16 %v842_v35  ;;  %v858_v10 = vld [vmem:[%s7629_s8 + $0x770] sm:$0xff] }
 0x621   : > { %4718 = vmatpush1.bf16.msra.mxu1 %v1746_v7  ;;  %4744 = vmatprep.subr.bf16.mxu0 %v1819_v8  ;;  %v1802_v7 = vunpack.c.h.s8.bf16 %v810_v55  ;;  %v1939_v8 = vunpack.c.l.s8.bf16 %v883_v51  ;;  %v1898_v26 = vunpack.c.h.s8.bf16 %v858_v10 }
 0x622   : > { %4719 = vmatprep.subr.bf16.mxu1 %v1755_v57  ;;  %v1875_v57 = vunpack.c.l.s8.bf16 %v851_v50 }
 0x624   : > { %4745 = vmatpush1.bf16.msra.mxu0 %v1818_v0  ;;  %v1938_v0 = vunpack.c.l.s8.bf16 %v882_v49 }
 0x625   : > { %4720 = vmatpush1.bf16.msra.mxu1 %v1754_v62  ;;  %4746 = vmatprep.subr.bf16.mxu0 %v1827_v4  ;;  %v1874_v62 = vunpack.c.l.s8.bf16 %v850_v2  ;;  %v1947_v4 = vunpack.c.h.s8.bf16 %v883_v51 }
 0x626   : > { %4721 = vmatprep.subr.bf16.mxu1 %v1763_v3  ;;  %v1883_v3 = vunpack.c.h.s8.bf16 %v851_v50 }
 0x628   : > { %4747 = vmatpush1.bf16.msra.mxu0 %v1826_v13  ;;  %v1946_v13 = vunpack.c.h.s8.bf16 %v882_v49 }
 0x629   : > { %4722 = vmatpush1.bf16.msra.mxu1 %v1762_v17  ;;  %4748 = vmatprep.subr.bf16.mxu0 %v1835_v32  ;;  %v1882_v17 = vunpack.c.h.s8.bf16 %v850_v2  ;;  %v1955_v32 = vunpack.c.l.s8.bf16 %v891_v37 }
 0x62a   : > { %4723 = vmatprep.subr.bf16.mxu1 %v1771_v48  ;;  %v1891_v48 = vunpack.c.l.s8.bf16 %v859_v9 }
 0x62c   : > { %4749 = vmatpush1.bf16.msra.mxu0 %v1834_v20  ;;  %v1954_v20 = vunpack.c.l.s8.bf16 %v890_v53 }
 0x62d   : > { %4724 = vmatpush1.bf16.msra.mxu1 %v1770_v18  ;;  %4750 = vmatprep.subr.bf16.mxu0 %v1843_v44  ;;  %v1890_v18 = vunpack.c.l.s8.bf16 %v858_v10  ;;  %v867_v44 = vld [vmem:[%s7629_s8 + $0x7b8] sm:$0xff] }
 0x62e   : > { %4725 = vmatprep.subr.bf16.mxu1 %v1779_v58  ;;  %v1963_v58 = vunpack.c.h.s8.bf16 %v891_v37 }
 0x630   : > { %4751 = vmatpush1.bf16.msra.mxu0 %v1842_v31  ;;  %v1971_v31 = vunpack.c.l.s8.bf16 %v899_v12 }
 0x631   : > { %4726 = vmatpush1.bf16.msra.mxu1 %v1778_v16  ;;  %4752 = vmatprep.subr.bf16.mxu0 %v1851_v43  ;;  %v1962_v16 = vunpack.c.h.s8.bf16 %v890_v53  ;;  %v898_v43 = vld [vmem:[%s7629_s8 + $0x8b0] sm:$0xff] }
 0x632   : > { %4727 = vmatprep.subr.bf16.mxu1 %v1787_v19  ;;  %v866_v19 = vld [vmem:[%s7629_s8 + $0x7b0] sm:$0xff]  ;;  %v1970_v27 = vunpack.c.l.s8.bf16 %v898_v43  ;;  %v1978_v35 = vunpack.c.h.s8.bf16 %v898_v43 }
 0x633   : > { %v1906_v25 = vunpack.c.l.s8.bf16 %v866_v19  ;;  %v1914_v55 = vunpack.c.h.s8.bf16 %v866_v19 }
 0x634   : > { %4753 = vmatpush1.bf16.msra.mxu0 %v1850_v52  ;;  %v1979_v52 = vunpack.c.h.s8.bf16 %v899_v12 }
 0x635   : > { %4728 = vmatpush1.bf16.msra.mxu1 %v1786_v61  ;;  %4754 = vmatprep.subr.bf16.mxu0 %v1859_v11  ;;  %v1915_v61 = vunpack.c.h.s8.bf16 %v867_v44  ;;  %v907_v11 = vld [vmem:[%s7629_s8 + $0x8f8] sm:$0xff] }
 0x636   : > { %4729 = vmatprep.subr.bf16.mxu1 %v1795_v63  ;;  %v875_v63 = vld [vmem:[%s7629_s8 + $0x7f8] sm:$0xff]  ;;  %v1995_v37 = vunpack.c.h.s8.bf16 %v907_v11 }
 0x638   : > { %4755 = vmatpush1.bf16.msra.mxu0 %v1858_v56  ;;  %v1987_v56 = vunpack.c.l.s8.bf16 %v907_v11  ;;  %v931_v11 = vld [vmem:[%s7629_s8 + $0x9b8] sm:$0xff] }
 0x639   : > { %4730 = vmatpush1.bf16.msra.mxu1 %v1794_v36  ;;  %4756 = vmatprep.subr.bf16.mxu0 %v1867_v15  ;;  %v1923_v36 = vunpack.c.l.s8.bf16 %v875_v63  ;;  %v906_v15 = vld [vmem:[%s7629_s8 + $0x8f0] sm:$0xff] }
 0x63a   : > { %4731 = vmatprep.subr.bf16.mxu1 %v1803_v47  ;;  %v874_v47 = vld [vmem:[%s7629_s8 + $0x7f0] sm:$0xff] }
 0x63c   : > { %4757 = vmatpush1.bf16.msra.mxu0 %v1866_v54 }
 0x63d   : > { %4732 = vmatpush1.bf16.msra.mxu1 %v1802_v7  ;;  %4758 = vmatprep.subr.bf16.mxu0 %v1875_v57 }
 0x63e   : > { %4783 = vmatprep.subr.bf16.mxu1 %v1939_v8 }
 0x640   : > { %4734 = vmatmul.mubr.bf16.vlgmr.msra.gmra.mrb[80].mxu1 %v7747_v29  ;;  %4759 = vmatpush1.bf16.msra.mxu0 %v1874_v62  ;;  %v1899_v29 = vunpack.c.h.s8.bf16 %v859_v9  ;;  %v1922_v62 = vunpack.c.l.s8.bf16 %v874_v47 }
 0x641   : > { %4784 = vmatpush1.bf16.msra.mxu1 %v1938_v0  ;;  %4760 = vmatprep.subr.bf16.mxu0 %v1883_v3  ;;  %v1986_v0 = vunpack.c.l.s8.bf16 %v906_v15 }
 0x642   : > { %4785 = vmatprep.subr.bf16.mxu1 %v1947_v4  ;;  %4815 = vmatprep.mubr.bf16.mxu1 %v7755_v41  ;;  %v1907_v41 = vunpack.c.l.s8.bf16 %v867_v44 }
 0x644   : > { %4761 = vmatpush1.bf16.msra.mxu0 %v1882_v17 }
 0x645   : > { %4786 = vmatpush1.bf16.msra.mxu1 %v1946_v13  ;;  %4762 = vmatprep.subr.bf16.mxu0 %v1891_v48  ;;  %v947_v13 = vld [vmem:[%s7629_s8 + $0xa38] sm:$0xff]  ;;  %v1930_v48 = vunpack.c.h.s8.bf16 %v874_v47  ;;  %v930_v47 = vld [vmem:[%s7629_s8 + $0x9b0] sm:$0xff] }
 0x646   : > { %4787 = vmatprep.subr.bf16.mxu1 %v1955_v32  ;;  %v1994_v32 = vunpack.c.h.s8.bf16 %v906_v15  ;;  %v2067_v53 = vunpack.c.l.s8.bf16 %v947_v13  ;;  %v2075_v12 = vunpack.c.h.s8.bf16 %v947_v13  ;;  %v962_v15 = vld [vmem:[%s7629_s8 + $0xab0] sm:$0xff] }
 0x648   : > { %4763 = vmatpush1.bf16.msra.mxu0 %v1890_v18  ;;  %v914_v18 = vld [vmem:[%s7629_s8 + $0x930] sm:$0xff] }
 0x649   : > { %4788 = vmatpush1.bf16.msra.mxu1 %v1954_v20  ;;  %4764 = vmatprep.subr.bf16.mxu0 %v1899_v29  ;;  %v946_v20 = vld [vmem:[%s7629_s8 + $0xa30] sm:$0xff]  ;;  %v2002_v29 = vunpack.c.l.s8.bf16 %v914_v18 }
 0x64a   : > { %4789 = vmatprep.subr.bf16.mxu1 %v1963_v58  ;;  %v2066_v58 = vunpack.c.l.s8.bf16 %v946_v20 }
 0x64c   : > { %4765 = vmatpush1.bf16.msra.mxu0 %v1898_v26  ;;  %v923_v26 = vld [vmem:[%s7629_s8 + $0x978] sm:$0xff] }
 0x64d   : > { %4790 = vmatpush1.bf16.msra.mxu1 %v1962_v16  ;;  %4766 = vmatprep.subr.bf16.mxu0 %v1907_v41  ;;  %v955_v16 = vld [vmem:[%s7629_s8 + $0xa78] sm:$0xff]  ;;  %v2010_v41 = vunpack.c.h.s8.bf16 %v914_v18  ;;  %v2019_v19 = vunpack.c.l.s8.bf16 %v923_v26 }
 0x64e   : > { %4791 = vmatprep.subr.bf16.mxu1 %v1971_v31  ;;  %v2074_v31 = vunpack.c.h.s8.bf16 %v946_v20  ;;  %v2083_v43 = vunpack.c.l.s8.bf16 %v955_v16 }
 0x650   : > { %4767 = vmatpush1.bf16.msra.mxu0 %v1906_v25  ;;  %v922_v25 = vld [vmem:[%s7629_s8 + $0x970] sm:$0xff] }
 0x651   : > { %4792 = vmatpush1.bf16.msra.mxu1 %v1970_v27  ;;  %4768 = vmatprep.subr.bf16.mxu0 %v1915_v61  ;;  %v954_v27 = vld [vmem:[%s7629_s8 + $0xa70] sm:$0xff]  ;;  %v2018_v61 = vunpack.c.l.s8.bf16 %v922_v25 }
 0x652   : > { %4793 = vmatprep.subr.bf16.mxu1 %v1979_v52  ;;  %v4448_v50 = vpop.f32.mrb[68].mxu0  ;;  %v2082_v52 = vunpack.c.l.s8.bf16 %v954_v27 }
 0x653   : > { %v4489_v51 = vpop.f32.mrb[68].mxu1  ;;  %v4449_v7 = vadd.f32 %v4448_v50, %v8570_v28  ;;  %v4450_v54 = vpop.f32.mrb[69].mxu0  ;;  %v1931_v28 = vunpack.c.h.s8.bf16 %v875_v63  ;;  %v2091_v63 = vunpack.c.h.s8.bf16 %v955_v16  ;;  %v2034_v50 = vunpack.c.l.s8.bf16 %v930_v47 }
 0x654   : > { %v4491_v57 = vpop.f32.mrb[69].mxu1  ;;  %v4451_v8 = vadd.f32 %v4450_v54, %v8572_v38  ;;  %v4452_v2 = vpop.f32.mrb[70].mxu0  ;;  %4769 = vmatpush1.bf16.msra.mxu0 %v1914_v55  ;;  %v915_v38 = vld [vmem:[%s7629_s8 + $0x938] sm:$0xff] }
 0x655   : > { %v4493_v49 = vpop.f32.mrb[70].mxu1  ;;  %4794 = vmatpush1.bf16.msra.mxu1 %v1978_v35  ;;  %v8612_v3 = vadd.f32 %v4489_v51, %v4449_v7  ;;  %v4453_v4 = vpop.f32.mrb[71].mxu0  ;;  %4770 = vmatprep.subr.bf16.mxu0 %v1923_v36  ;;  %v2003_v10 = vunpack.c.l.s8.bf16 %v915_v38  ;;  %v2011_v44 = vunpack.c.h.s8.bf16 %v915_v38  ;;  %v963_v55 = vld [vmem:[%s7629_s8 + $0xab8] sm:$0xff]  ;;  %v2026_v35 = vunpack.c.h.s8.bf16 %v922_v25 }
 0x656   : > { %v4494_v9 = vpop.f32.mrb[71].mxu1  ;;  %4795 = vmatprep.subr.bf16.mxu1 %v1987_v56  ;;  %v8614_v17 = vadd.f32 %v4491_v57, %v4451_v8  ;;  %v2090_v36 = vunpack.c.h.s8.bf16 %v954_v27  ;;  %v2099_v56 = vunpack.c.l.s8.bf16 %v963_v55  ;;  %v2098_v51 = vunpack.c.l.s8.bf16 %v962_v15  ;;  %v939_v57 = vld [vmem:[%s7629_s8 + $0x9f8] sm:$0xff]  ;;  %v938_v4 = vld [vmem:[%s7629_s8 + $0x9f0] sm:$0xff] }
 0x657   : > { %v2043_v7 = vunpack.c.h.s8.bf16 %v931_v11  ;;  %v2107_v54 = vunpack.c.h.s8.bf16 %v963_v55  ;;  %v971_v8 = vld [vmem:[%s7629_s8 + $0xaf8] sm:$0xff]  ;;  %v2042_v2 = vunpack.c.h.s8.bf16 %v930_v47  ;;  %v2106_v49 = vunpack.c.h.s8.bf16 %v962_v15  ;;  %v970_v9 = vld [vmem:[%s7629_s8 + $0xaf0] sm:$0xff] }
 0x658   : > { %4771 = vmatpush1.bf16.msra.mxu0 %v1922_v62  ;;  %v2051_v62 = vunpack.c.l.s8.bf16 %v939_v57  ;;  %v2059_v38 = vunpack.c.h.s8.bf16 %v939_v57  ;;  %v2123_v13 = vunpack.c.h.s8.bf16 %v971_v8  ;;  %v995_v55 = vld [vmem:[%s7629_s8 + $0xbb8] sm:$0xff]  ;;  %v994_v47 = vld [vmem:[%s7629_s8 + $0xbb0] sm:$0xff] }
 0x659   : > { %4796 = vmatpush1.bf16.msra.mxu1 %v1986_v0  ;;  %4772 = vmatprep.subr.bf16.mxu0 %v1931_v28  ;;  %v2115_v0 = vunpack.c.l.s8.bf16 %v971_v8  ;;  %v2050_v28 = vunpack.c.l.s8.bf16 %v938_v4  ;;  %v1026_v15 = vld [vmem:[%s7629_s8 + $0xcb0] sm:$0xff]  ;;  %v1003_v57 = vld [vmem:[%s7629_s8 + $0xbf8] sm:$0xff] }
 0x65a   : > { %4797 = vmatprep.subr.bf16.mxu1 %v1995_v37  ;;  %v2114_v37 = vunpack.c.l.s8.bf16 %v970_v9  ;;  %v1035_v8 = vld [vmem:[%s7629_s8 + $0xcf8] sm:$0xff] }
 0x65c   : > { %4773 = vmatpush1.bf16.msra.mxu0 %v1930_v48  ;;  %v979_v48 = vld [vmem:[%s7629_s8 + $0xb38] sm:$0xff] }
 0x65d   : > { %4798 = vmatpush1.bf16.msra.mxu1 %v1994_v32  ;;  %4824 = vmatprep.subr.bf16.mxu0 %v2067_v53  ;;  %v1011_v32 = vld [vmem:[%s7629_s8 + $0xc38] sm:$0xff]  ;;  %v2122_v53 = vunpack.c.h.s8.bf16 %v970_v9  ;;  %v2131_v18 = vunpack.c.l.s8.bf16 %v979_v48  ;;  %v1034_v9 = vld [vmem:[%s7629_s8 + $0xcf0] sm:$0xff] }
 0x65e   : > { %4799 = vmatprep.subr.bf16.mxu1 %v2003_v10  ;;  %v2058_v10 = vunpack.c.h.s8.bf16 %v938_v4  ;;  %v2195_v20 = vunpack.c.l.s8.bf16 %v1011_v32  ;;  %v2203_v16 = vunpack.c.h.s8.bf16 %v1011_v32  ;;  %v1002_v4 = vld [vmem:[%s7629_s8 + $0xbf0] sm:$0xff] }
 0x65f   : > { %4775 = vmatmul.mubr.bf16.vlgmr.msra.gmra.mrb[84].mxu0 %v7749_v30  ;;  %v2027_v30 = vunpack.c.h.s8.bf16 %v923_v26  ;;  %v2139_v26 = vunpack.c.h.s8.bf16 %v979_v48 }
 0x660   : > { %4825 = vmatpush1.bf16.msra.mxu0 %v2066_v58  ;;  %4856 = vmatprep.mubr.bf16.mxu0 %v7757_v42  ;;  %v2035_v42 = vunpack.c.l.s8.bf16 %v931_v11  ;;  %v1010_v58 = vld [vmem:[%s7629_s8 + $0xc30] sm:$0xff] }
 0x661   : > { %4800 = vmatpush1.bf16.msra.mxu1 %v2002_v29  ;;  %4826 = vmatprep.subr.bf16.mxu0 %v2075_v12  ;;  %v978_v29 = vld [vmem:[%s7629_s8 + $0xb30] sm:$0xff]  ;;  %v2194_v12 = vunpack.c.l.s8.bf16 %v1010_v58 }
 0x662   : > { %4801 = vmatprep.subr.bf16.mxu1 %v2011_v44  ;;  %v2130_v44 = vunpack.c.l.s8.bf16 %v978_v29 }
 0x664   : > { %4827 = vmatpush1.bf16.msra.mxu0 %v2074_v31  ;;  %v1019_v31 = vld [vmem:[%s7629_s8 + $0xc78] sm:$0xff] }
 0x665   : > { %4802 = vmatpush1.bf16.msra.mxu1 %v2010_v41  ;;  %4828 = vmatprep.subr.bf16.mxu0 %v2083_v43  ;;  %v987_v41 = vld [vmem:[%s7629_s8 + $0xb78] sm:$0xff]  ;;  %v2202_v43 = vunpack.c.h.s8.bf16 %v1010_v58  ;;  %v2211_v27 = vunpack.c.l.s8.bf16 %v1019_v31  ;;  %v2219_v11 = vunpack.c.h.s8.bf16 %v1019_v31  ;;  %v2250_v31 = vunpack.c.h.s8.bf16 %v1034_v9 }
 0x666   : > { %4803 = vmatprep.subr.bf16.mxu1 %v2019_v19  ;;  %v2138_v19 = vunpack.c.h.s8.bf16 %v978_v29  ;;  %v2147_v25 = vunpack.c.l.s8.bf16 %v987_v41 }
 0x668   : > { %4829 = vmatpush1.bf16.msra.mxu0 %v2082_v52  ;;  %v1018_v52 = vld [vmem:[%s7629_s8 + $0xc70] sm:$0xff] }
 0x669   : > { %4804 = vmatpush1.bf16.msra.mxu1 %v2018_v61  ;;  %4830 = vmatprep.subr.bf16.mxu0 %v2091_v63  ;;  %v986_v61 = vld [vmem:[%s7629_s8 + $0xb70] sm:$0xff]  ;;  %v2210_v63 = vunpack.c.l.s8.bf16 %v1018_v52 }
 0x66a   : > { %4805 = vmatprep.subr.bf16.mxu1 %v2027_v30  ;;  %v2146_v30 = vunpack.c.l.s8.bf16 %v986_v61 }
 0x66c   : > { %4831 = vmatpush1.bf16.msra.mxu0 %v2090_v36  ;;  %v2154_v36 = vunpack.c.h.s8.bf16 %v986_v61 }
 0x66d   : > { %4806 = vmatpush1.bf16.msra.mxu1 %v2026_v35  ;;  %4832 = vmatprep.subr.bf16.mxu0 %v2099_v56  ;;  %v1027_v35 = vld [vmem:[%s7629_s8 + $0xcb8] sm:$0xff] }
 0x66e   : > { %4807 = vmatprep.subr.bf16.mxu1 %v2035_v42  ;;  %v2218_v42 = vunpack.c.h.s8.bf16 %v1018_v52  ;;  %v2227_v56 = vunpack.c.l.s8.bf16 %v1027_v35 }
 0x670   : > { %4833 = vmatpush1.bf16.msra.mxu0 %v2098_v51  ;;  %v2226_v51 = vunpack.c.l.s8.bf16 %v1026_v15 }
 0x671   : > { %4808 = vmatpush1.bf16.msra.mxu1 %v2034_v50  ;;  %4834 = vmatprep.subr.bf16.mxu0 %v2107_v54  ;;  %v2162_v50 = vunpack.c.l.s8.bf16 %v994_v47  ;;  %v2235_v54 = vunpack.c.h.s8.bf16 %v1027_v35 }
 0x672   : > { %4809 = vmatprep.subr.bf16.mxu1 %v2043_v7  ;;  %v2171_v7 = vunpack.c.h.s8.bf16 %v995_v55 }
 0x674   : > { %4835 = vmatpush1.bf16.msra.mxu0 %v2106_v49  ;;  %v2234_v49 = vunpack.c.h.s8.bf16 %v1026_v15 }
 0x675   : > { %4810 = vmatpush1.bf16.msra.mxu1 %v2042_v2  ;;  %4836 = vmatprep.subr.bf16.mxu0 %v2115_v0  ;;  %v2170_v2 = vunpack.c.h.s8.bf16 %v994_v47  ;;  %v2243_v0 = vunpack.c.l.s8.bf16 %v1035_v8 }
 0x676   : > { %4811 = vmatprep.subr.bf16.mxu1 %v2051_v62  ;;  %v2179_v62 = vunpack.c.l.s8.bf16 %v1003_v57 }
 0x678   : > { %4837 = vmatpush1.bf16.msra.mxu0 %v2114_v37 }
 0x679   : > { %4812 = vmatpush1.bf16.msra.mxu1 %v2050_v28  ;;  %4838 = vmatprep.subr.bf16.mxu0 %v2123_v13 }
 0x67a   : > { %4813 = vmatprep.subr.bf16.mxu1 %v2059_v38 }
 0x67c   : > { %4839 = vmatpush1.bf16.msra.mxu0 %v2122_v53 }
 0x67d   : > { %4814 = vmatpush1.bf16.msra.mxu1 %v2058_v10  ;;  %4840 = vmatprep.subr.bf16.mxu0 %v2131_v18  ;;  %v2178_v18 = vunpack.c.l.s8.bf16 %v1002_v4 }
 0x67e   : > { %4865 = vmatprep.subr.bf16.mxu1 %v2195_v20  ;;  %v2242_v20 = vunpack.c.l.s8.bf16 %v1034_v9 }
 0x680   : > { %4816 = vmatmul.mubr.bf16.vlgmr.msra.gmra.mrb[84].mxu1 %v7795_v21  ;;  %4841 = vmatpush1.bf16.msra.mxu0 %v2130_v44  ;;  %v2155_v21 = vunpack.c.h.s8.bf16 %v987_v41  ;;  %v2186_v41 = vunpack.c.h.s8.bf16 %v1002_v4 }
 0x681   : > { %4866 = vmatpush1.bf16.msra.mxu1 %v2194_v12  ;;  %4842 = vmatprep.subr.bf16.mxu0 %v2139_v26  ;;  %v2251_v12 = vunpack.c.h.s8.bf16 %v1035_v8 }
 0x682   : > { %4867 = vmatprep.subr.bf16.mxu1 %v2203_v16  ;;  %4897 = vmatprep.mubr.bf16.mxu1 %v7803_v33  ;;  %v2163_v33 = vunpack.c.l.s8.bf16 %v995_v55  ;;  %v1075_v16 = vld [vmem:[%s7629_s8 + $0xe38] sm:$0xff] }
 0x684   : > { %4843 = vmatpush1.bf16.msra.mxu0 %v2138_v19 }
 0x685   : > { %4868 = vmatpush1.bf16.msra.mxu1 %v2202_v43  ;;  %4844 = vmatprep.subr.bf16.mxu0 %v2147_v25  ;;  %v2323_v43 = vunpack.c.l.s8.bf16 %v1075_v16  ;;  %v1042_v25 = vld [vmem:[%s7629_s8 + $0xd30] sm:$0xff] }
 0x686   : > { %4869 = vmatprep.subr.bf16.mxu1 %v2211_v27  ;;  %v1074_v27 = vld [vmem:[%s7629_s8 + $0xe30] sm:$0xff]  ;;  %v2258_v61 = vunpack.c.l.s8.bf16 %v1042_v25  ;;  %v2266_v55 = vunpack.c.h.s8.bf16 %v1042_v25 }
 0x687   : > { %v2322_v52 = vunpack.c.l.s8.bf16 %v1074_v27  ;;  %v2330_v35 = vunpack.c.h.s8.bf16 %v1074_v27  ;;  %v1107_v27 = vld [vmem:[%s7629_s8 + $0xf38] sm:$0xff] }
 0x688   : > { %4845 = vmatpush1.bf16.msra.mxu0 %v2146_v30 }
 0x689   : > { %4870 = vmatpush1.bf16.msra.mxu1 %v2210_v63  ;;  %4846 = vmatprep.subr.bf16.mxu0 %v2155_v21  ;;  %v2331_v63 = vunpack.c.h.s8.bf16 %v1075_v16  ;;  %v1051_v21 = vld [vmem:[%s7629_s8 + $0xd78] sm:$0xff] }
 0x68a   : > { %4871 = vmatprep.subr.bf16.mxu1 %v2219_v11  ;;  %v1083_v11 = vld [vmem:[%s7629_s8 + $0xe78] sm:$0xff] }
 0x68c   : > { %4847 = vmatpush1.bf16.msra.mxu0 %v2154_v36  ;;  %v2275_v36 = vunpack.c.l.s8.bf16 %v1051_v21 }
 0x68d   : > { %4872 = vmatpush1.bf16.msra.mxu1 %v2218_v42  ;;  %4848 = vmatprep.subr.bf16.mxu0 %v2163_v33  ;;  %v2339_v42 = vunpack.c.l.s8.bf16 %v1083_v11  ;;  %v1050_v33 = vld [vmem:[%s7629_s8 + $0xd70] sm:$0xff] }
 0x68e   : > { %4873 = vmatprep.subr.bf16.mxu1 %v2227_v56  ;;  %v1082_v56 = vld [vmem:[%s7629_s8 + $0xe70] sm:$0xff]  ;;  %v2274_v47 = vunpack.c.l.s8.bf16 %v1050_v33 }
 0x68f   : > { %v2338_v15 = vunpack.c.l.s8.bf16 %v1082_v56 }
 0x690   : > { %4849 = vmatpush1.bf16.msra.mxu0 %v2162_v50  ;;  %v2347_v50 = vunpack.c.h.s8.bf16 %v1083_v11  ;;  %v1138_v11 = vld [vmem:[%s7629_s8 + $0x1030] sm:$0xff] }
 0x691   : > { %4874 = vmatpush1.bf16.msra.mxu1 %v2226_v51  ;;  %4850 = vmatprep.subr.bf16.mxu0 %v2171_v7  ;;  %v1059_v51 = vld [vmem:[%s7629_s8 + $0xdb8] sm:$0xff] }
 0x692   : > { %4875 = vmatprep.subr.bf16.mxu1 %v2235_v54  ;;  %v4530_v28 = vpop.f32.mrb[72].mxu0  ;;  %v1091_v7 = vld [vmem:[%s7629_s8 + $0xeb8] sm:$0xff]  ;;  %v2282_v54 = vunpack.c.h.s8.bf16 %v1050_v33  ;;  %v2299_v4 = vunpack.c.h.s8.bf16 %v1059_v51 }
 0x693   : > { %v4571_v37 = vpop.f32.mrb[72].mxu1  ;;  %v4531_v38 = vadd.f32 %v4530_v28, %v8612_v3  ;;  %v4532_v13 = vpop.f32.mrb[73].mxu0  ;;  %v2187_v3 = vunpack.c.h.s8.bf16 %v1003_v57  ;;  %v2346_v57 = vunpack.c.h.s8.bf16 %v1082_v56  ;;  %v2355_v8 = vunpack.c.l.s8.bf16 %v1091_v7  ;;  %v1067_v28 = vld [vmem:[%s7629_s8 + $0xdf8] sm:$0xff] }
 0x694   : > { %v4573_v48 = vpop.f32.mrb[73].mxu1  ;;  %v4533_v32 = vadd.f32 %v4532_v13, %v8614_v17  ;;  %v4534_v10 = vpop.f32.mrb[74].mxu0  ;;  %4851 = vmatpush1.bf16.msra.mxu0 %v2170_v2  ;;  %v1043_v17 = vld [vmem:[%s7629_s8 + $0xd38] sm:$0xff]  ;;  %v1058_v2 = vld [vmem:[%s7629_s8 + $0xdb0] sm:$0xff]  ;;  %v2363_v9 = vunpack.c.h.s8.bf16 %v1091_v7 }
 0x695   : > { %v4575_v53 = vpop.f32.mrb[74].mxu1  ;;  %4876 = vmatpush1.bf16.msra.mxu1 %v2234_v49  ;;  %v8654_v29 = vadd.f32 %v4571_v37, %v4531_v38  ;;  %v4535_v58 = vpop.f32.mrb[75].mxu0  ;;  %4852 = vmatprep.subr.bf16.mxu0 %v2179_v62  ;;  %v2259_v19 = vunpack.c.l.s8.bf16 %v1043_v17  ;;  %v2267_v30 = vunpack.c.h.s8.bf16 %v1043_v17  ;;  %v1090_v49 = vld [vmem:[%s7629_s8 + $0xeb0] sm:$0xff]  ;;  %v2290_v62 = vunpack.c.l.s8.bf16 %v1058_v2  ;;  %v1099_v37 = vld [vmem:[%s7629_s8 + $0xef8] sm:$0xff] }
 0x696   : > { %v4576_v44 = vpop.f32.mrb[75].mxu1  ;;  %4877 = vmatprep.subr.bf16.mxu1 %v2243_v0  ;;  %v8656_v26 = vadd.f32 %v4573_v48, %v4533_v32  ;;  %v2354_v0 = vunpack.c.l.s8.bf16 %v1090_v49  ;;  %v2298_v38 = vunpack.c.h.s8.bf16 %v1058_v2  ;;  %v2362_v13 = vunpack.c.h.s8.bf16 %v1090_v49  ;;  %v1066_v10 = vld [vmem:[%s7629_s8 + $0xdf0] sm:$0xff]  ;;  %v1115_v33 = vld [vmem:[%s7629_s8 + $0xf78] sm:$0xff] }
 0x697   : > { %v2307_v48 = vunpack.c.l.s8.bf16 %v1067_v28  ;;  %v2371_v32 = vunpack.c.l.s8.bf16 %v1099_v37  ;;  %v1098_v53 = vld [vmem:[%s7629_s8 + $0xef0] sm:$0xff]  ;;  %v567_v44 = vld [vmem:[#allocation2 + $0x28] sm:$0xff]  ;;  %v2306_v16 = vunpack.c.l.s8.bf16 %v1066_v10  ;;  %v2379_v25 = vunpack.c.h.s8.bf16 %v1099_v37 }
 0x698   : > { %4853 = vmatpush1.bf16.msra.mxu0 %v2178_v18  ;;  %v566_v18 = vld [vmem:[#allocation2 + $0x20] sm:$0xff]  ;;  %v1147_v56 = vld [vmem:[%s7629_s8 + $0x1078] sm:$0xff] }
 0x699   : > { %4878 = vmatpush1.bf16.msra.mxu1 %v2242_v20  ;;  %4854 = vmatprep.subr.bf16.mxu0 %v2187_v3  ;;  %v1146_v7 = vld [vmem:[%s7629_s8 + $0x1070] sm:$0xff]  ;;  %v1155_v2 = vld [vmem:[%s7629_s8 + $0x10b8] sm:$0xff] }
 0x69a   : > { %4879 = vmatprep.subr.bf16.mxu1 %v2251_v12 }
 0x69c   : > { %4855 = vmatpush1.bf16.msra.mxu0 %v2186_v41  ;;  %v2370_v41 = vunpack.c.l.s8.bf16 %v1098_v53 }
 0x69d   : > { %4880 = vmatpush1.bf16.msra.mxu1 %v2250_v31  ;;  %4906 = vmatprep.subr.bf16.mxu0 %v2323_v43  ;;  %v2315_v43 = vunpack.c.h.s8.bf16 %v1067_v28 }
 0x69e   : > { %4881 = vmatprep.subr.bf16.mxu1 %v2259_v19 }
 0x69f   : > { %4857 = vmatmul.mubr.bf16.vlgmr.msra.gmra.mrb[88].mxu0 %v7797_v22  ;;  %v2283_v22 = vunpack.c.h.s8.bf16 %v1051_v21  ;;  %v1106_v21 = vld [vmem:[%s7629_s8 + $0xf30] sm:$0xff] }
 0x6a0   : > { %4907 = vmatpush1.bf16.msra.mxu0 %v2322_v52  ;;  %4938 = vmatprep.mubr.bf16.mxu0 %v7805_v34  ;;  %v2291_v34 = vunpack.c.l.s8.bf16 %v1059_v51  ;;  %v2378_v52 = vunpack.c.h.s8.bf16 %v1098_v53  ;;  %v1114_v51 = vld [vmem:[%s7629_s8 + $0xf70] sm:$0xff] }
 0x6a1   : > { %4882 = vmatpush1.bf16.msra.mxu1 %v2258_v61  ;;  %4908 = vmatprep.subr.bf16.mxu0 %v2331_v63  ;;  %v1139_v61 = vld [vmem:[%s7629_s8 + $0x1038] sm:$0xff]  ;;  %v2410_v49 = vunpack.c.h.s8.bf16 %v1114_v51 }
 0x6a2   : > { %4883 = vmatprep.subr.bf16.mxu1 %v2267_v30  ;;  %v2387_v30 = vunpack.c.l.s8.bf16 %v1107_v27  ;;  %v2451_v63 = vunpack.c.l.s8.bf16 %v1139_v61 }
 0x6a4   : > { %4909 = vmatpush1.bf16.msra.mxu0 %v2330_v35  ;;  %v2450_v35 = vunpack.c.l.s8.bf16 %v1138_v11 }
 0x6a5   : > { %4884 = vmatpush1.bf16.msra.mxu1 %v2266_v55  ;;  %4910 = vmatprep.subr.bf16.mxu0 %v2339_v42  ;;  %v2386_v55 = vunpack.c.l.s8.bf16 %v1106_v21  ;;  %v2459_v42 = vunpack.c.h.s8.bf16 %v1139_v61 }
 0x6a6   : > { %4885 = vmatprep.subr.bf16.mxu1 %v2275_v36  ;;  %v2395_v36 = vunpack.c.h.s8.bf16 %v1107_v27 }
 0x6a8   : > { %4911 = vmatpush1.bf16.msra.mxu0 %v2338_v15  ;;  %v2458_v15 = vunpack.c.h.s8.bf16 %v1138_v11 }
 0x6a9   : > { %4886 = vmatpush1.bf16.msra.mxu1 %v2274_v47  ;;  %4912 = vmatprep.subr.bf16.mxu0 %v2347_v50  ;;  %v2394_v47 = vunpack.c.h.s8.bf16 %v1106_v21  ;;  %v2467_v50 = vunpack.c.l.s8.bf16 %v1147_v56 }
 0x6aa   : > { %4887 = vmatprep.subr.bf16.mxu1 %v2283_v22  ;;  %v2403_v22 = vunpack.c.l.s8.bf16 %v1115_v33 }
 0x6ac   : > { %4913 = vmatpush1.bf16.msra.mxu0 %v2346_v57  ;;  %v2466_v57 = vunpack.c.l.s8.bf16 %v1146_v7 }
 0x6ad   : > { %4888 = vmatpush1.bf16.msra.mxu1 %v2282_v54  ;;  %4914 = vmatprep.subr.bf16.mxu0 %v2355_v8  ;;  %v2402_v54 = vunpack.c.l.s8.bf16 %v1114_v51  ;;  %v1123_v8 = vld [vmem:[%s7629_s8 + $0xfb8] sm:$0xff] }
 0x6ae   : > { %4889 = vmatprep.subr.bf16.mxu1 %v2291_v34  ;;  %v2475_v34 = vunpack.c.h.s8.bf16 %v1147_v56 }
 0x6b0   : > { %4915 = vmatpush1.bf16.msra.mxu0 %v2354_v0  ;;  %v2483_v0 = vunpack.c.l.s8.bf16 %v1155_v2 }
 0x6b1   : > { %4890 = vmatpush1.bf16.msra.mxu1 %v2290_v62  ;;  %4916 = vmatprep.subr.bf16.mxu0 %v2363_v9  ;;  %v2474_v62 = vunpack.c.h.s8.bf16 %v1146_v7  ;;  %v1154_v9 = vld [vmem:[%s7629_s8 + $0x10b0] sm:$0xff] }
 0x6b2   : > { %4891 = vmatprep.subr.bf16.mxu1 %v2299_v4  ;;  %v4612_v20 = vpop.f32.mrb[76].mxu0  ;;  %v1122_v4 = vld [vmem:[%s7629_s8 + $0xfb0] sm:$0xff]  ;;  %v2482_v37 = vunpack.c.l.s8.bf16 %v1154_v9  ;;  %v2490_v53 = vunpack.c.h.s8.bf16 %v1154_v9 }
 0x6b3   : > { %v4613_v58 = vadd.f32 %v4612_v20, %v8654_v29  ;;  %v4614_v3 = vpop.f32.mrb[77].mxu0  ;;  %v2418_v28 = vunpack.c.l.s8.bf16 %v1122_v4 }
 0x6b4   : > { %v4615_v12 = vadd.f32 %v4614_v3, %v8656_v26  ;;  %v4616_v17 = vpop.f32.mrb[78].mxu0  ;;  %4917 = vmatpush1.bf16.msra.mxu0 %v2362_v13  ;;  %v2314_v26 = vunpack.c.h.s8.bf16 %v1066_v10  ;;  %v2491_v13 = vunpack.c.h.s8.bf16 %v1155_v2  ;;  %v2426_v10 = vunpack.c.h.s8.bf16 %v1122_v4 }
 0x6b5   : > { %4892 = vmatpush1.bf16.msra.mxu1 %v2298_v38  ;;  %v5156_v31 = vadd.f32 %v4613_v58, %v566_v18  ;;  %v4617_v19 = vpop.f32.mrb[79].mxu0  ;;  %4918 = vmatprep.subr.bf16.mxu0 %v2371_v32  ;;  %v2427_v38 = vunpack.c.h.s8.bf16 %v1123_v8  ;;  %v1163_v32 = vld [vmem:[%s7629_s8 + $0x10f8] sm:$0xff]  ;;  %v1130_v58 = vld [vmem:[%s7629_s8 + $0xff0] sm:$0xff] }
 0x6b6   : > { %4893 = vmatprep.subr.bf16.mxu1 %v2307_v48  ;;  %v5157_v29 = vadd.f32 %v4615_v12, %v567_v44  ;;  %v1131_v48 = vld [vmem:[%s7629_s8 + $0xff8] sm:$0xff]  ;;  %v2499_v20 = vunpack.c.l.s8.bf16 %v1163_v32  ;;  %v1162_v44 = vld [vmem:[%s7629_s8 + $0x10f0] sm:$0xff]  ;;  %v2442_v27 = vunpack.c.h.s8.bf16 %v1130_v58 }
 0x6b7   : > { %5164 = vst [vmem:[#allocation2 + $0x20] sm:$0xff] %v5156_v31  ;;  %v2435_v18 = vunpack.c.l.s8.bf16 %v1131_v48  ;;  %v2443_v19 = vunpack.c.h.s8.bf16 %v1131_v48  ;;  %v2506_v61 = vunpack.c.h.s8.bf16 %v1162_v44 }
 0x6b8   : > { %5165 = vst [vmem:[#allocation2 + $0x28] sm:$0xff] %v5157_v29  ;;  %4919 = vmatpush1.bf16.msra.mxu0 %v2370_v41  ;;  %v2498_v41 = vunpack.c.l.s8.bf16 %v1162_v44  ;;  %v1203_v29 = vld [vmem:[%s7629_s8 + $0x1238] sm:$0xff] }
 0x6b9   : > { %4894 = vmatpush1.bf16.msra.mxu1 %v2306_v16  ;;  %4920 = vmatprep.subr.bf16.mxu0 %v2379_v25  ;;  %v2434_v16 = vunpack.c.l.s8.bf16 %v1130_v58  ;;  %v1171_v25 = vld [vmem:[%s7629_s8 + $0x1138] sm:$0xff] }
 0x6ba   : > { %4895 = vmatprep.subr.bf16.mxu1 %v2315_v43  ;;  %v2507_v43 = vunpack.c.h.s8.bf16 %v1163_v32 }
 0x6bc   : > { %4921 = vmatpush1.bf16.msra.mxu0 %v2378_v52  ;;  %v2579_v52 = vunpack.c.l.s8.bf16 %v1203_v29 }
 0x6bd   : > { %4896 = vmatpush1.bf16.msra.mxu1 %v2314_v26  ;;  %4922 = vmatprep.subr.bf16.mxu0 %v2387_v30  ;;  %v2515_v26 = vunpack.c.l.s8.bf16 %v1171_v25  ;;  %v1170_v30 = vld [vmem:[%s7629_s8 + $0x1130] sm:$0xff] }
 0x6be   : > { %4947 = vmatprep.subr.bf16.mxu1 %v2451_v63  ;;  %v1202_v63 = vld [vmem:[%s7629_s8 + $0x1230] sm:$0xff]  ;;  %v2514_v21 = vunpack.c.l.s8.bf16 %v1170_v30 }
 0x6bf   : > { %v2578_v11 = vunpack.c.l.s8.bf16 %v1202_v63  ;;  %v2586_v56 = vunpack.c.h.s8.bf16 %v1202_v63 }
 0x6c0   : > { %4898 = vmatmul.mubr.bf16.vlgmr.msra.gmra.mrb[88].mxu1 %v7843_v23  ;;  %4923 = vmatpush1.bf16.msra.mxu0 %v2386_v55  ;;  %v2411_v23 = vunpack.c.h.s8.bf16 %v1115_v33  ;;  %v2523_v55 = vunpack.c.h.s8.bf16 %v1171_v25  ;;  %v2522_v33 = vunpack.c.h.s8.bf16 %v1170_v30  ;;  %v1235_v25 = vld [vmem:[%s7629_s8 + $0x1338] sm:$0xff] }
 0x6c1   : > { %4948 = vmatpush1.bf16.msra.mxu1 %v2450_v35  ;;  %4924 = vmatprep.subr.bf16.mxu0 %v2395_v36  ;;  %v2587_v35 = vunpack.c.h.s8.bf16 %v1203_v29  ;;  %v1179_v36 = vld [vmem:[%s7629_s8 + $0x1178] sm:$0xff] }
 0x6c2   : > { %4949 = vmatprep.subr.bf16.mxu1 %v2459_v42  ;;  %4979 = vmatprep.mubr.bf16.mxu1 %v7851_v39  ;;  %v2419_v39 = vunpack.c.l.s8.bf16 %v1123_v8  ;;  %v1211_v42 = vld [vmem:[%s7629_s8 + $0x1278] sm:$0xff] }
 0x6c3   : > { %v1267_v29 = vld [vmem:[%s7629_s8 + $0x1438] sm:$0xff] }
 0x6c4   : > { %4925 = vmatpush1.bf16.msra.mxu0 %v2394_v47  ;;  %v2531_v47 = vunpack.c.l.s8.bf16 %v1179_v36 }
 0x6c5   : > { %4950 = vmatpush1.bf16.msra.mxu1 %v2458_v15  ;;  %4926 = vmatprep.subr.bf16.mxu0 %v2403_v22  ;;  %v2595_v15 = vunpack.c.l.s8.bf16 %v1211_v42  ;;  %v1178_v22 = vld [vmem:[%s7629_s8 + $0x1170] sm:$0xff] }
 0x6c6   : > { %4951 = vmatprep.subr.bf16.mxu1 %v2467_v50  ;;  %v1210_v50 = vld [vmem:[%s7629_s8 + $0x1270] sm:$0xff]  ;;  %v2530_v51 = vunpack.c.l.s8.bf16 %v1178_v22 }
 0x6c7   : > { %v2594_v7 = vunpack.c.l.s8.bf16 %v1210_v50  ;;  %v2602_v8 = vunpack.c.h.s8.bf16 %v1210_v50 }
 0x6c8   : > { %4927 = vmatpush1.bf16.msra.mxu0 %v2402_v54  ;;  %v2603_v54 = vunpack.c.h.s8.bf16 %v1211_v42 }
 0x6c9   : > { %4952 = vmatpush1.bf16.msra.mxu1 %v2466_v57  ;;  %4928 = vmatprep.subr.bf16.mxu0 %v2411_v23  ;;  %v1187_v57 = vld [vmem:[%s7629_s8 + $0x11b8] sm:$0xff] }
 0x6ca   : > { %4953 = vmatprep.subr.bf16.mxu1 %v2475_v34  ;;  %v1219_v23 = vld [vmem:[%s7629_s8 + $0x12b8] sm:$0xff]  ;;  %v2538_v34 = vunpack.c.h.s8.bf16 %v1178_v22  ;;  %v2555_v4 = vunpack.c.h.s8.bf16 %v1187_v57 }
 0x6cb   : > { %v2611_v2 = vunpack.c.l.s8.bf16 %v1219_v23  ;;  %v2619_v9 = vunpack.c.h.s8.bf16 %v1219_v23 }
 0x6cc   : > { %4929 = vmatpush1.bf16.msra.mxu0 %v2410_v49  ;;  %v1186_v49 = vld [vmem:[%s7629_s8 + $0x11b0] sm:$0xff] }
 0x6cd   : > { %4954 = vmatpush1.bf16.msra.mxu1 %v2474_v62  ;;  %4930 = vmatprep.subr.bf16.mxu0 %v2419_v39  ;;  %v1218_v62 = vld [vmem:[%s7629_s8 + $0x12b0] sm:$0xff]  ;;  %v2546_v39 = vunpack.c.l.s8.bf16 %v1186_v49 }
 0x6ce   : > { %4955 = vmatprep.subr.bf16.mxu1 %v2483_v0  ;;  %v2610_v0 = vunpack.c.l.s8.bf16 %v1218_v62 }
 0x6d0   : > { %4931 = vmatpush1.bf16.msra.mxu0 %v2418_v28  ;;  %v1195_v28 = vld [vmem:[%s7629_s8 + $0x11f8] sm:$0xff] }
 0x6d1   : > { %4956 = vmatpush1.bf16.msra.mxu1 %v2482_v37  ;;  %4932 = vmatprep.subr.bf16.mxu0 %v2427_v38  ;;  %v1227_v37 = vld [vmem:[%s7629_s8 + $0x12f8] sm:$0xff]  ;;  %v2554_v38 = vunpack.c.h.s8.bf16 %v1186_v49  ;;  %v2563_v48 = vunpack.c.l.s8.bf16 %v1195_v28 }
 0x6d2   : > { %4957 = vmatprep.subr.bf16.mxu1 %v2491_v13  ;;  %v2618_v13 = vunpack.c.h.s8.bf16 %v1218_v62  ;;  %v2627_v32 = vunpack.c.l.s8.bf16 %v1227_v37 }
 0x6d3   : > { %v8696_v3 = vpop.f32.mrb[76].mxu1 }
 0x6d4   : > { %v8698_v12 = vpop.f32.mrb[77].mxu1  ;;  %4933 = vmatpush1.bf16.msra.mxu0 %v2426_v10  ;;  %v1194_v10 = vld [vmem:[%s7629_s8 + $0x11f0] sm:$0xff] }
 0x6d5   : > { %v4657_v17 = vpop.f32.mrb[78].mxu1  ;;  %4958 = vmatpush1.bf16.msra.mxu1 %v2490_v53  ;;  %4934 = vmatprep.subr.bf16.mxu0 %v2435_v18  ;;  %v1226_v53 = vld [vmem:[%s7629_s8 + $0x12f0] sm:$0xff] }
 0x6d6   : > { %v4658_v31 = vpop.f32.mrb[79].mxu1  ;;  %4959 = vmatprep.subr.bf16.mxu1 %v2499_v20 }
 0x6d8   : > { %4935 = vmatpush1.bf16.msra.mxu0 %v2434_v16  ;;  %v2562_v16 = vunpack.c.l.s8.bf16 %v1194_v10 }
 0x6d9   : > { %4960 = vmatpush1.bf16.msra.mxu1 %v2498_v41  ;;  %4936 = vmatprep.subr.bf16.mxu0 %v2443_v19  ;;  %v2626_v41 = vunpack.c.l.s8.bf16 %v1226_v53  ;;  %v2571_v19 = vunpack.c.h.s8.bf16 %v1195_v28 }
 0x6da   : > { %4961 = vmatprep.subr.bf16.mxu1 %v2507_v43  ;;  %v2635_v43 = vunpack.c.h.s8.bf16 %v1227_v37 }
 0x6dc   : > { %4937 = vmatpush1.bf16.msra.mxu0 %v2442_v27  ;;  %v2643_v27 = vunpack.c.l.s8.bf16 %v1235_v25 }
 0x6dd   : > { %4962 = vmatpush1.bf16.msra.mxu1 %v2506_v61  ;;  %4988 = vmatprep.subr.bf16.mxu0 %v2579_v52  ;;  %v2707_v61 = vunpack.c.l.s8.bf16 %v1267_v29  ;;  %v1266_v52 = vld [vmem:[%s7629_s8 + $0x1430] sm:$0xff] }
 0x6de   : > { %4963 = vmatprep.subr.bf16.mxu1 %v2515_v26  ;;  %v1234_v26 = vld [vmem:[%s7629_s8 + $0x1330] sm:$0xff]  ;;  %v2706_v63 = vunpack.c.l.s8.bf16 %v1266_v52  ;;  %v2714_v42 = vunpack.c.h.s8.bf16 %v1266_v52 }
 0x6df   : > { %4939 = vmatmul.mubr.bf16.vlgmr.msra.gmra.mrb[92].mxu0 %v7845_v24  ;;  %v2539_v24 = vunpack.c.h.s8.bf16 %v1179_v36  ;;  %v2642_v30 = vunpack.c.l.s8.bf16 %v1234_v26  ;;  %v2650_v36 = vunpack.c.h.s8.bf16 %v1234_v26 }
 0x6e0   : > { %4989 = vmatpush1.bf16.msra.mxu0 %v2578_v11  ;;  %5020 = vmatprep.mubr.bf16.mxu0 %v7853_v40  ;;  %v2547_v40 = vunpack.c.l.s8.bf16 %v1187_v57  ;;  %v2715_v11 = vunpack.c.h.s8.bf16 %v1267_v29 }
 0x6e1   : > { %4964 = vmatpush1.bf16.msra.mxu1 %v2514_v21  ;;  %4990 = vmatprep.subr.bf16.mxu0 %v2587_v35  ;;  %v2651_v21 = vunpack.c.h.s8.bf16 %v1235_v25  ;;  %v1275_v35 = vld [vmem:[%s7629_s8 + $0x1478] sm:$0xff] }
 0x6e2   : > { %4965 = vmatprep.subr.bf16.mxu1 %v2523_v55  ;;  %v1243_v55 = vld [vmem:[%s7629_s8 + $0x1378] sm:$0xff] }
 0x6e4   : > { %4991 = vmatpush1.bf16.msra.mxu0 %v2586_v56  ;;  %v2723_v56 = vunpack.c.l.s8.bf16 %v1275_v35 }
 0x6e5   : > { %4966 = vmatpush1.bf16.msra.mxu1 %v2522_v33  ;;  %4992 = vmatprep.subr.bf16.mxu0 %v2595_v15  ;;  %v2659_v33 = vunpack.c.l.s8.bf16 %v1243_v55  ;;  %v1274_v15 = vld [vmem:[%s7629_s8 + $0x1470] sm:$0xff] }
 0x6e6   : > { %4967 = vmatprep.subr.bf16.mxu1 %v2531_v47  ;;  %v1242_v47 = vld [vmem:[%s7629_s8 + $0x1370] sm:$0xff]  ;;  %v2722_v50 = vunpack.c.l.s8.bf16 %v1274_v15  ;;  %v2730_v57 = vunpack.c.h.s8.bf16 %v1274_v15  ;;  %v1315_v15 = vld [vmem:[%s7629_s8 + $0x15b8] sm:$0xff] }
 0x6e7   : > { %v2658_v22 = vunpack.c.l.s8.bf16 %v1242_v47 }
 0x6e8   : > { %4993 = vmatpush1.bf16.msra.mxu0 %v2594_v7  ;;  %v1251_v7 = vld [vmem:[%s7629_s8 + $0x13b8] sm:$0xff] }
 0x6e9   : > { %4968 = vmatpush1.bf16.msra.mxu1 %v2530_v51  ;;  %4994 = vmatprep.subr.bf16.mxu0 %v2603_v54  ;;  %v2731_v51 = vunpack.c.h.s8.bf16 %v1275_v35  ;;  %v2666_v54 = vunpack.c.h.s8.bf16 %v1242_v47  ;;  %v2683_v49 = vunpack.c.h.s8.bf16 %v1251_v7 }
 0x6ea   : > { %4969 = vmatprep.subr.bf16.mxu1 %v2539_v24  ;;  %v1283_v24 = vld [vmem:[%s7629_s8 + $0x14b8] sm:$0xff] }
 0x6eb   : > { %v2739_v23 = vunpack.c.l.s8.bf16 %v1283_v24  ;;  %v2747_v62 = vunpack.c.h.s8.bf16 %v1283_v24  ;;  %v1346_v24 = vld [vmem:[%s7629_s8 + $0x16b0] sm:$0xff] }
 0x6ec   : > { %4995 = vmatpush1.bf16.msra.mxu0 %v2602_v8  ;;  %v1282_v8 = vld [vmem:[%s7629_s8 + $0x14b0] sm:$0xff] }
 0x6ed   : > { %4970 = vmatpush1.bf16.msra.mxu1 %v2538_v34  ;;  %4996 = vmatprep.subr.bf16.mxu0 %v2611_v2  ;;  %v1250_v34 = vld [vmem:[%s7629_s8 + $0x13b0] sm:$0xff]  ;;  %v2738_v2 = vunpack.c.l.s8.bf16 %v1282_v8 }
 0x6ee   : > { %4971 = vmatprep.subr.bf16.mxu1 %v2547_v40  ;;  %v2674_v40 = vunpack.c.l.s8.bf16 %v1250_v34 }
 0x6f0   : > { %4997 = vmatpush1.bf16.msra.mxu0 %v2610_v0  ;;  %v1291_v0 = vld [vmem:[%s7629_s8 + $0x14f8] sm:$0xff] }
 0x6f1   : > { %4972 = vmatpush1.bf16.msra.mxu1 %v2546_v39  ;;  %4998 = vmatprep.subr.bf16.mxu0 %v2619_v9  ;;  %v1259_v39 = vld [vmem:[%s7629_s8 + $0x13f8] sm:$0xff]  ;;  %v2746_v9 = vunpack.c.h.s8.bf16 %v1282_v8  ;;  %v2755_v37 = vunpack.c.l.s8.bf16 %v1291_v0 }
 0x6f2   : > { %4973 = vmatprep.subr.bf16.mxu1 %v2555_v4  ;;  %v4694_v18 = vpop.f32.mrb[80].mxu0  ;;  %v2682_v4 = vunpack.c.h.s8.bf16 %v1250_v34  ;;  %v2691_v28 = vunpack.c.l.s8.bf16 %v1259_v39  ;;  %v1323_v34 = vld [vmem:[%s7629_s8 + $0x15f8] sm:$0xff] }
 0x6f3   : > { %v8719_v20 = vadd.f32 %v4694_v18, %v8696_v3  ;;  %v4696_v58 = vpop.f32.mrb[81].mxu0  ;;  %v2570_v3 = vunpack.c.h.s8.bf16 %v1194_v10  ;;  %v1355_v8 = vld [vmem:[%s7629_s8 + $0x16f8] sm:$0xff] }
 0x6f4   : > { %v8722_v44 = vadd.f32 %v4696_v58, %v8698_v12  ;;  %v4698_v17 = vpop.f32.mrb[82].mxu0  ;;  %4999 = vmatpush1.bf16.msra.mxu0 %v2618_v13  ;;  %v2634_v12 = vunpack.c.h.s8.bf16 %v1226_v53  ;;  %v1290_v13 = vld [vmem:[%s7629_s8 + $0x14f0] sm:$0xff] }
 0x6f5   : > { %4974 = vmatpush1.bf16.msra.mxu1 %v2554_v38  ;;  %v4699_v31 = vpop.f32.mrb[83].mxu0  ;;  %5000 = vmatprep.subr.bf16.mxu0 %v2627_v32  ;;  %v1258_v38 = vld [vmem:[%s7629_s8 + $0x13f0] sm:$0xff]  ;;  %v2754_v17 = vunpack.c.l.s8.bf16 %v1290_v13 }
 0x6f6   : > { %4975 = vmatprep.subr.bf16.mxu1 %v2563_v48  ;;  %v2690_v58 = vunpack.c.l.s8.bf16 %v1258_v38  ;;  %v2763_v31 = vunpack.c.h.s8.bf16 %v1291_v0  ;;  %v1354_v0 = vld [vmem:[%s7629_s8 + $0x16f0] sm:$0xff] }
 0x6f8   : > { %5001 = vmatpush1.bf16.msra.mxu0 %v2626_v41  ;;  %v2699_v41 = vunpack.c.h.s8.bf16 %v1259_v39  ;;  %v1322_v39 = vld [vmem:[%s7629_s8 + $0x15f0] sm:$0xff] }
 0x6f9   : > { %4976 = vmatpush1.bf16.msra.mxu1 %v2562_v16  ;;  %5002 = vmatprep.subr.bf16.mxu0 %v2635_v43  ;;  %v1331_v43 = vld [vmem:[%s7629_s8 + $0x1638] sm:$0xff] }
 0x6fa   : > { %4977 = vmatprep.subr.bf16.mxu1 %v2571_v19  ;;  %v1299_v19 = vld [vmem:[%s7629_s8 + $0x1538] sm:$0xff]  ;;  %v2835_v29 = vunpack.c.l.s8.bf16 %v1331_v43  ;;  %v2843_v52 = vunpack.c.h.s8.bf16 %v1331_v43  ;;  %v1394_v43 = vld [vmem:[%s7629_s8 + $0x1830] sm:$0xff] }
 0x6fb   : > { %v2771_v25 = vunpack.c.l.s8.bf16 %v1299_v19  ;;  %v2779_v26 = vunpack.c.h.s8.bf16 %v1299_v19  ;;  %v1362_v19 = vld [vmem:[%s7629_s8 + $0x1730] sm:$0xff] }
 0x6fc   : > { %5003 = vmatpush1.bf16.msra.mxu0 %v2634_v12  ;;  %v1330_v12 = vld [vmem:[%s7629_s8 + $0x1630] sm:$0xff] }
 0x6fd   : > { %4978 = vmatpush1.bf16.msra.mxu1 %v2570_v3  ;;  %5004 = vmatprep.subr.bf16.mxu0 %v2643_v27  ;;  %v1298_v3 = vld [vmem:[%s7629_s8 + $0x1530] sm:$0xff] }
 0x6fe   : > { %5029 = vmatprep.subr.bf16.mxu1 %v2707_v61  ;;  %v2770_v27 = vunpack.c.l.s8.bf16 %v1298_v3  ;;  %v2834_v61 = vunpack.c.l.s8.bf16 %v1330_v12 }
 0x700   : > { %4980 = vmatmul.mubr.bf16.vlgmr.msra.gmra.mrb[92].mxu1 %v7895_v59  ;;  %5005 = vmatpush1.bf16.msra.mxu0 %v2642_v30  ;;  %v2667_v59 = vunpack.c.h.s8.bf16 %v1243_v55  ;;  %v1307_v30 = vld [vmem:[%s7629_s8 + $0x1578] sm:$0xff] }
 0x701   : > { %5030 = vmatpush1.bf16.msra.mxu1 %v2706_v63  ;;  %5006 = vmatprep.subr.bf16.mxu0 %v2651_v21  ;;  %v1339_v63 = vld [vmem:[%s7629_s8 + $0x1678] sm:$0xff]  ;;  %v2778_v21 = vunpack.c.h.s8.bf16 %v1298_v3  ;;  %v2787_v55 = vunpack.c.l.s8.bf16 %v1307_v30 }
 0x702   : > { %5031 = vmatprep.subr.bf16.mxu1 %v2715_v11  ;;  %5061 = vmatprep.mubr.bf16.mxu1 %v7903_v5  ;;  %v2675_v5 = vunpack.c.l.s8.bf16 %v1251_v7  ;;  %v2842_v11 = vunpack.c.h.s8.bf16 %v1330_v12  ;;  %v2851_v35 = vunpack.c.l.s8.bf16 %v1339_v63  ;;  %v2859_v47 = vunpack.c.h.s8.bf16 %v1339_v63  ;;  %v1314_v7 = vld [vmem:[%s7629_s8 + $0x15b0] sm:$0xff]  ;;  %v1371_v3 = vld [vmem:[%s7629_s8 + $0x1778] sm:$0xff] }
 0x703   : > { %v1403_v12 = vld [vmem:[%s7629_s8 + $0x1878] sm:$0xff]  ;;  %v1402_v63 = vld [vmem:[%s7629_s8 + $0x1870] sm:$0xff] }
 0x704   : > { %5007 = vmatpush1.bf16.msra.mxu0 %v2650_v36  ;;  %v1306_v36 = vld [vmem:[%s7629_s8 + $0x1570] sm:$0xff] }
 0x705   : > { %5032 = vmatpush1.bf16.msra.mxu1 %v2714_v42  ;;  %5008 = vmatprep.subr.bf16.mxu0 %v2659_v33  ;;  %v1338_v42 = vld [vmem:[%s7629_s8 + $0x1670] sm:$0xff]  ;;  %v2786_v33 = vunpack.c.l.s8.bf16 %v1306_v36 }
 0x706   : > { %5033 = vmatprep.subr.bf16.mxu1 %v2723_v56  ;;  %v2850_v56 = vunpack.c.l.s8.bf16 %v1338_v42 }
 0x708   : > { %5009 = vmatpush1.bf16.msra.mxu0 %v2658_v22  ;;  %v1347_v22 = vld [vmem:[%s7629_s8 + $0x16b8] sm:$0xff] }
 0x709   : > { %5034 = vmatpush1.bf16.msra.mxu1 %v2722_v50  ;;  %5010 = vmatprep.subr.bf16.mxu0 %v2667_v59  ;;  %v2794_v50 = vunpack.c.h.s8.bf16 %v1306_v36  ;;  %v2858_v59 = vunpack.c.h.s8.bf16 %v1338_v42  ;;  %v1411_v36 = vld [vmem:[%s7629_s8 + $0x18b8] sm:$0xff] }
 0x70a   : > { %5035 = vmatprep.subr.bf16.mxu1 %v2731_v51  ;;  %v2867_v51 = vunpack.c.l.s8.bf16 %v1347_v22 }
 0x70c   : > { %5011 = vmatpush1.bf16.msra.mxu0 %v2666_v54  ;;  %v2802_v54 = vunpack.c.l.s8.bf16 %v1314_v7 }
 0x70d   : > { %5036 = vmatpush1.bf16.msra.mxu1 %v2730_v57  ;;  %5012 = vmatprep.subr.bf16.mxu0 %v2675_v5  ;;  %v2866_v57 = vunpack.c.l.s8.bf16 %v1346_v24  ;;  %v2811_v5 = vunpack.c.h.s8.bf16 %v1315_v15 }
 0x70e   : > { %5037 = vmatprep.subr.bf16.mxu1 %v2739_v23  ;;  %v2875_v23 = vunpack.c.h.s8.bf16 %v1347_v22 }
 0x710   : > { %5013 = vmatpush1.bf16.msra.mxu0 %v2674_v40  ;;  %v2810_v40 = vunpack.c.h.s8.bf16 %v1314_v7 }
 0x711   : > { %5038 = vmatpush1.bf16.msra.mxu1 %v2738_v2  ;;  %5014 = vmatprep.subr.bf16.mxu0 %v2683_v49  ;;  %v2874_v2 = vunpack.c.h.s8.bf16 %v1346_v24  ;;  %v2819_v49 = vunpack.c.l.s8.bf16 %v1323_v34 }
 0x712   : > { %5039 = vmatprep.subr.bf16.mxu1 %v2747_v62  ;;  %v2883_v62 = vunpack.c.l.s8.bf16 %v1355_v8 }
 0x713   : > { %v4735_v48 = vpop.f32.mrb[80].mxu1 }
 0x714   : > { %v8743_v32 = vadd.f32 %v4735_v48, %v8719_v20  ;;  %v4737_v10 = vpop.f32.mrb[81].mxu1  ;;  %5015 = vmatpush1.bf16.msra.mxu0 %v2682_v4  ;;  %v2698_v20 = vunpack.c.h.s8.bf16 %v1258_v38  ;;  %v2882_v48 = vunpack.c.l.s8.bf16 %v1354_v0 }
 0x715   : > { %v8746_v53 = vadd.f32 %v4737_v10, %v8722_v44  ;;  %v4739_v18 = vpop.f32.mrb[82].mxu1  ;;  %5040 = vmatpush1.bf16.msra.mxu1 %v2746_v9  ;;  %5016 = vmatprep.subr.bf16.mxu0 %v2691_v28  ;;  %v2762_v44 = vunpack.c.h.s8.bf16 %v1290_v13  ;;  %v2818_v13 = vunpack.c.l.s8.bf16 %v1322_v39 }
 0x716   : > { %v4740_v16 = vpop.f32.mrb[83].mxu1  ;;  %5041 = vmatprep.subr.bf16.mxu1 %v2755_v37  ;;  %v2827_v18 = vunpack.c.h.s8.bf16 %v1323_v34 }
 0x717   : > { %v1395_v16 = vld [vmem:[%s7629_s8 + $0x1838] sm:$0xff] }
 0x718   : > { %5017 = vmatpush1.bf16.msra.mxu0 %v2690_v58  ;;  %v2891_v58 = vunpack.c.h.s8.bf16 %v1355_v8 }
 0x719   : > { %5042 = vmatpush1.bf16.msra.mxu1 %v2754_v17  ;;  %5018 = vmatprep.subr.bf16.mxu0 %v2699_v41  ;;  %v1363_v17 = vld [vmem:[%s7629_s8 + $0x1738] sm:$0xff] }
 0x71a   : > { %5043 = vmatprep.subr.bf16.mxu1 %v2763_v31  ;;  %v2899_v41 = vunpack.c.l.s8.bf16 %v1363_v17  ;;  %v2963_v31 = vunpack.c.l.s8.bf16 %v1395_v16 }
 0x71c   : > { %5019 = vmatpush1.bf16.msra.mxu0 %v2698_v20  ;;  %v2898_v20 = vunpack.c.l.s8.bf16 %v1362_v19 }
 0x71d   : > { %5044 = vmatpush1.bf16.msra.mxu1 %v2762_v44  ;;  %5070 = vmatprep.subr.bf16.mxu0 %v2835_v29  ;;  %v2962_v44 = vunpack.c.l.s8.bf16 %v1394_v43  ;;  %v2971_v29 = vunpack.c.h.s8.bf16 %v1395_v16 }
 0x71e   : > { %5045 = vmatprep.subr.bf16.mxu1 %v2771_v25  ;;  %v2907_v25 = vunpack.c.h.s8.bf16 %v1363_v17 }
 0x71f   : > { %5021 = vmatmul.mubr.bf16.vlgmr.msra.gmra.mrb[96].mxu0 %v7897_v60  ;;  %v2795_v60 = vunpack.c.h.s8.bf16 %v1307_v30  ;;  %v1370_v30 = vld [vmem:[%s7629_s8 + $0x1770] sm:$0xff] }
 0x720   : > { %5071 = vmatpush1.bf16.msra.mxu0 %v2834_v61  ;;  %5102 = vmatprep.mubr.bf16.mxu0 %v7905_v6  ;;  %v2803_v6 = vunpack.c.l.s8.bf16 %v1315_v15  ;;  %v2970_v61 = vunpack.c.h.s8.bf16 %v1394_v43  ;;  %v2922_v42 = vunpack.c.h.s8.bf16 %v1370_v30 }
 0x721   : > { %5046 = vmatpush1.bf16.msra.mxu1 %v2770_v27  ;;  %5072 = vmatprep.subr.bf16.mxu0 %v2843_v52  ;;  %v2906_v27 = vunpack.c.h.s8.bf16 %v1362_v19  ;;  %v2979_v52 = vunpack.c.l.s8.bf16 %v1403_v12 }
 0x722   : > { %5047 = vmatprep.subr.bf16.mxu1 %v2779_v26  ;;  %v2915_v26 = vunpack.c.l.s8.bf16 %v1371_v3 }
 0x724   : > { %5073 = vmatpush1.bf16.msra.mxu0 %v2842_v11  ;;  %v2978_v11 = vunpack.c.l.s8.bf16 %v1402_v63 }
 0x725   : > { %5048 = vmatpush1.bf16.msra.mxu1 %v2778_v21  ;;  %5074 = vmatprep.subr.bf16.mxu0 %v2851_v35  ;;  %v2914_v21 = vunpack.c.l.s8.bf16 %v1370_v30  ;;  %v1379_v35 = vld [vmem:[%s7629_s8 + $0x17b8] sm:$0xff] }
 0x726   : > { %5049 = vmatprep.subr.bf16.mxu1 %v2787_v55  ;;  %v2987_v55 = vunpack.c.h.s8.bf16 %v1403_v12 }
 0x728   : > { %5075 = vmatpush1.bf16.msra.mxu0 %v2850_v56  ;;  %v2995_v56 = vunpack.c.l.s8.bf16 %v1411_v36 }
 0x729   : > { %5050 = vmatpush1.bf16.msra.mxu1 %v2786_v33  ;;  %5076 = vmatprep.subr.bf16.mxu0 %v2859_v47  ;;  %v2986_v33 = vunpack.c.h.s8.bf16 %v1402_v63  ;;  %v1410_v47 = vld [vmem:[%s7629_s8 + $0x18b0] sm:$0xff] }
 0x72a   : > { %5051 = vmatprep.subr.bf16.mxu1 %v2795_v60  ;;  %v1378_v60 = vld [vmem:[%s7629_s8 + $0x17b0] sm:$0xff]  ;;  %v2994_v22 = vunpack.c.l.s8.bf16 %v1410_v47  ;;  %v3002_v24 = vunpack.c.h.s8.bf16 %v1410_v47 }
 0x72b   : > { %v2930_v15 = vunpack.c.l.s8.bf16 %v1378_v60  ;;  %v2938_v7 = vunpack.c.h.s8.bf16 %v1378_v60 }
 0x72c   : > { %5077 = vmatpush1.bf16.msra.mxu0 %v2858_v59  ;;  %v3003_v59 = vunpack.c.h.s8.bf16 %v1411_v36 }
 0x72d   : > { %5052 = vmatpush1.bf16.msra.mxu1 %v2794_v50  ;;  %5078 = vmatprep.subr.bf16.mxu0 %v2867_v51  ;;  %v2939_v50 = vunpack.c.h.s8.bf16 %v1379_v35  ;;  %v1419_v51 = vld [vmem:[%s7629_s8 + $0x18f8] sm:$0xff] }
 0x72e   : > { %5053 = vmatprep.subr.bf16.mxu1 %v2803_v6  ;;  %v1387_v6 = vld [vmem:[%s7629_s8 + $0x17f8] sm:$0xff] }
 0x730   : > { %5079 = vmatpush1.bf16.msra.mxu0 %v2866_v57  ;;  %v3011_v57 = vunpack.c.l.s8.bf16 %v1419_v51 }
 0x731   : > { %5054 = vmatpush1.bf16.msra.mxu1 %v2802_v54  ;;  %5080 = vmatprep.subr.bf16.mxu0 %v2875_v23  ;;  %v2947_v54 = vunpack.c.l.s8.bf16 %v1387_v6  ;;  %v1418_v23 = vld [vmem:[%s7629_s8 + $0x18f0] sm:$0xff] }
 0x732   : > { %5055 = vmatprep.subr.bf16.mxu1 %v2811_v5  ;;  %v4776_v4 = vpop.f32.mrb[84].mxu0  ;;  %v1386_v5 = vld [vmem:[%s7629_s8 + $0x17f0] sm:$0xff] }
 0x733   : > { %v8767_v9 = vadd.f32 %v4776_v4, %v8743_v32  ;;  %v4778_v28 = vpop.f32.mrb[85].mxu0  ;;  %v2826_v32 = vunpack.c.h.s8.bf16 %v1322_v39  ;;  %v3010_v39 = vunpack.c.l.s8.bf16 %v1418_v23  ;;  %v2955_v4 = vunpack.c.h.s8.bf16 %v1387_v6 }
 0x734   : > { %v8770_v37 = vadd.f32 %v4778_v28, %v8746_v53  ;;  %v4780_v38 = vpop.f32.mrb[86].mxu0  ;;  %5081 = vmatpush1.bf16.msra.mxu0 %v2874_v2  ;;  %v2890_v53 = vunpack.c.h.s8.bf16 %v1354_v0  ;;  %v3019_v28 = vunpack.c.h.s8.bf16 %v1419_v51 }
 0x735   : > { %5056 = vmatpush1.bf16.msra.mxu1 %v2810_v40  ;;  %v4781_v10 = vpop.f32.mrb[87].mxu0  ;;  %5082 = vmatprep.subr.bf16.mxu0 %v2883_v62  ;;  %v2946_v62 = vunpack.c.l.s8.bf16 %v1386_v5  ;;  %v2954_v38 = vunpack.c.h.s8.bf16 %v1386_v5 }
 0x736   : > { %5057 = vmatprep.subr.bf16.mxu1 %v2819_v49 }
 0x738   : > { %5083 = vmatpush1.bf16.msra.mxu0 %v2882_v48 }
 0x739   : > { %5058 = vmatpush1.bf16.msra.mxu1 %v2818_v13  ;;  %5084 = vmatprep.subr.bf16.mxu0 %v2891_v58  ;;  %v3018_v13 = vunpack.c.h.s8.bf16 %v1418_v23 }
 0x73a   : > { %5059 = vmatprep.subr.bf16.mxu1 %v2827_v18 }
 0x73c   : > { %5085 = vmatpush1.bf16.msra.mxu0 %v2890_v53 }
 0x73d   : > { %5060 = vmatpush1.bf16.msra.mxu1 %v2826_v32  ;;  %5086 = vmatprep.subr.bf16.mxu0 %v2899_v41 }
 0x73e   : > { %5111 = vmatprep.subr.bf16.mxu1 %v2963_v31 }
 0x740   : > { %5062 = vmatmul.mubr.bf16.vlgmr.msra.gmra.mrb[96].mxu1 %v7949_v45  ;;  %5087 = vmatpush1.bf16.msra.mxu0 %v2898_v20  ;;  %v2923_v45 = vunpack.c.h.s8.bf16 %v1371_v3 }
 0x741   : > { %5112 = vmatpush1.bf16.msra.mxu1 %v2962_v44  ;;  %5088 = vmatprep.subr.bf16.mxu0 %v2907_v25 }
 0x742   : > { %5113 = vmatprep.subr.bf16.mxu1 %v2971_v29  ;;  %5143 = vmatprep.mubr.bf16.mxu1 %v7251_v1  ;;  %v2931_v1 = vunpack.c.l.s8.bf16 %v1379_v35 }
 0x744   : > { %5089 = vmatpush1.bf16.msra.mxu0 %v2906_v27 }
 0x745   : > { %5114 = vmatpush1.bf16.msra.mxu1 %v2970_v61  ;;  %5090 = vmatprep.subr.bf16.mxu0 %v2915_v26 }
 0x746   : > { %5115 = vmatprep.subr.bf16.mxu1 %v2979_v52 }
 0x748   : > { %5091 = vmatpush1.bf16.msra.mxu0 %v2914_v21 }
 0x749   : > { %5116 = vmatpush1.bf16.msra.mxu1 %v2978_v11  ;;  %5092 = vmatprep.subr.bf16.mxu0 %v2923_v45 }
 0x74a   : > { %5117 = vmatprep.subr.bf16.mxu1 %v2987_v55 }
 0x74c   : > { %5093 = vmatpush1.bf16.msra.mxu0 %v2922_v42 }
 0x74d   : > { %5118 = vmatpush1.bf16.msra.mxu1 %v2986_v33  ;;  %5094 = vmatprep.subr.bf16.mxu0 %v2931_v1 }
 0x74e   : > { %5119 = vmatprep.subr.bf16.mxu1 %v2995_v56 }
 0x750   : > { %5095 = vmatpush1.bf16.msra.mxu0 %v2930_v15 }
 0x751   : > { %5120 = vmatpush1.bf16.msra.mxu1 %v2994_v22  ;;  %5096 = vmatprep.subr.bf16.mxu0 %v2939_v50  ;;  %v568_v22 = vld [vmem:[#allocation2 + $0x30] sm:$0xff] }
 0x752   : > { %5121 = vmatprep.subr.bf16.mxu1 %v3003_v59 }
 0x753   : > { %v4817_v34 = vpop.f32.mrb[84].mxu1 }
 0x754   : > { %v4818_v8 = vadd.f32 %v4817_v34, %v8767_v9  ;;  %v4819_v40 = vpop.f32.mrb[85].mxu1  ;;  %5097 = vmatpush1.bf16.msra.mxu0 %v2938_v7  ;;  %v569_v7 = vld [vmem:[#allocation2 + $0x38] sm:$0xff]  ;;  %v6809_v34 = vld [vmem:[#allocation10 + $0x40] sm:$0xff] (!%p6442_p0)  }
 0x755   : > { %v4820_v2 = vadd.f32 %v4819_v40, %v8770_v37  ;;  %v4821_v49 = vpop.f32.mrb[86].mxu1  ;;  %5122 = vmatpush1.bf16.msra.mxu1 %v3002_v24  ;;  %5098 = vmatprep.subr.bf16.mxu0 %v2947_v54  ;;  %v6811_v40 = vld [vmem:[#allocation10] sm:$0xff] (!%p6442_p0)  }
 0x756   : > { %v4822_v0 = vpop.f32.mrb[87].mxu1  ;;  %5123 = vmatprep.subr.bf16.mxu1 %v3011_v57  ;;  %v6813_v49 = vld [vmem:[#allocation10 + $0x48] sm:$0xff] (!%p6442_p0)  }
 0x757   : > { %v6816_v0 = vld [vmem:[#allocation10 + $0x88] sm:$0xff] (!%p6442_p0)  }
 0x758   : > { %5099 = vmatpush1.bf16.msra.mxu0 %v2946_v62  ;;  %v6814_v62 = vld [vmem:[#allocation10 + $0xc8] sm:$0xff] (!%p6442_p0)  }
 0x759   : > { %5124 = vmatpush1.bf16.msra.mxu1 %v3010_v39  ;;  %5100 = vmatprep.subr.bf16.mxu0 %v2955_v4  ;;  %v6815_v39 = vld [vmem:[#allocation10 + $0x8] sm:$0xff] (!%p6442_p0)   ;;  %v6817_v4 = vld [vmem:[#allocation10 + $0x50] sm:$0xff] (!%p6442_p0)  }
 0x75a   : > { %5125 = vmatprep.subr.bf16.mxu1 %v3019_v28  ;;  %v6818_v28 = vld [vmem:[#allocation10 + $0xd0] sm:$0xff] (!%p6442_p0)  }
 0x75c   : > { %5101 = vmatpush1.bf16.msra.mxu0 %v2954_v38  ;;  %v6819_v38 = vld [vmem:[#allocation10 + $0x10] sm:$0xff] (!%p6442_p0)  }
 0x75d   : > { %5126 = vmatpush1.bf16.msra.mxu1 %v3018_v13  ;;  %6541 = vmatprep.subr.bf16.mxu0 (!%p6442_p0), %v6809_v34  ;;  %v6820_v13 = vld [vmem:[#allocation10 + $0x90] sm:$0xff] (!%p6442_p0)  }
 0x75f   : > { %5103 = vmatmul.mubr.bf16.vlgmr.msra.gmra.mrb[100].mxu0 %v7951_v46 }
 0x760   : > { %5144 = vmatmul.mubr.bf16.vlgmr.msra.gmra.mrb[100].mxu1 %v7980_v14  ;;  %6542 = vmatpush3.bf16.msra.mxu0 (!%p6442_p0), %v6811_v40 }
 0x761   : > { %6543 = vmatprep.subr.bf16.mxu0 (!%p6442_p0), %v6813_v49 }
 0x764   : > { %6544 = vmatpush3.bf16.msra.mxu0 (!%p6442_p0), %v6815_v39 }
 0x765   : > { %6545 = vmatprep.subr.bf16.mxu0 (!%p6442_p0), %v6817_v4 }
 0x768   : > { %6546 = vmatpush3.bf16.msra.mxu0 (!%p6442_p0), %v6819_v38 }
 0x772   : > { %v4858_v9 = vpop.f32.mrb[88].mxu0 }
 0x773   : > { %v4859_v37 = vadd.f32 %v4858_v9, %v4818_v8  ;;  %v4860_v48 = vpop.f32.mrb[89].mxu0  ;;  %v6810_v8 = vld [vmem:[#allocation10 + $0xc0] sm:$0xff] (!%p6442_p0)   ;;  %v6821_v9 = vld [vmem:[#allocation10 + $0x58] sm:$0xff] (!%p6442_p0)  }
 0x774   : > { %v4861_v10 = vadd.f32 %v4860_v48, %v4820_v2  ;;  %v4862_v18 = vpop.f32.mrb[90].mxu0  ;;  %6563 = vmatprep.subr.bf16.mxu1 (!%p6442_p0), %v6810_v8  ;;  %v6812_v2 = vld [vmem:[#allocation10 + $0x80] sm:$0xff] (!%p6442_p0)   ;;  %6547 = vmatprep.subr.bf16.mxu0 (!%p6442_p0), %v6821_v9  ;;  %v6823_v48 = vld [vmem:[#allocation10 + $0x18] sm:$0xff] (!%p6442_p0)  }
 0x775   : > { %v4863_v58 = vpop.f32.mrb[91].mxu0  ;;  %6564 = vmatpush3.bf16.msra.mxu1 (!%p6442_p0), %v6812_v2  ;;  %6548 = vmatpush3.bf16.msra.mxu0 (!%p6442_p0), %v6823_v48  ;;  %v6825_v18 = vld [vmem:[#allocation10 + $0x60] sm:$0xff] (!%p6442_p0)  }
 0x776   : > { %6565 = vmatprep.subr.bf16.mxu1 (!%p6442_p0), %v6814_v62  ;;  %v6826_v58 = vld [vmem:[#allocation10 + $0xe0] sm:$0xff] (!%p6442_p0)   ;;  %6549 = vmatprep.subr.bf16.mxu0 (!%p6442_p0), %v6825_v18 }
 0x779   : > { %6566 = vmatpush3.bf16.msra.mxu1 (!%p6442_p0), %v6816_v0 }
 0x77a   : > { %6567 = vmatprep.subr.bf16.mxu1 (!%p6442_p0), %v6818_v28 }
 0x77d   : > { %6568 = vmatpush3.bf16.msra.mxu1 (!%p6442_p0), %v6820_v13 }
 0x793   : > { %v4899_v17 = vpop.f32.mrb[88].mxu1 }
 0x794   : > { %v4900_v16 = vadd.f32 %v4899_v17, %v4859_v37  ;;  %v4901_v32 = vpop.f32.mrb[89].mxu1  ;;  %v6822_v37 = vld [vmem:[#allocation10 + $0xd8] sm:$0xff] (!%p6442_p0)   ;;  %v6827_v17 = vld [vmem:[#allocation10 + $0x20] sm:$0xff] (!%p6442_p0)  }
 0x795   : > { %v4902_v53 = vadd.f32 %v4901_v32, %v4861_v10  ;;  %v4903_v41 = vpop.f32.mrb[90].mxu1  ;;  %6569 = vmatprep.subr.bf16.mxu1 (!%p6442_p0), %v6822_v37  ;;  %v6824_v10 = vld [vmem:[#allocation10 + $0x98] sm:$0xff] (!%p6442_p0)   ;;  %v5182_v32 = vlaneseq (!%p6442_p0)  ;;  %6550 = vmatpush3.bf16.msra.mxu0 (!%p6442_p0), %v6827_v17 }
 0x796   : > { %v4904_v31 = vpop.f32.mrb[91].mxu1  ;;  %6570 = vmatpush3.bf16.msra.mxu1 (!%p6442_p0), %v6824_v10  ;;  %v6830_v41 = vld [vmem:[#allocation10 + $0xe8] sm:$0xff] (!%p6442_p0)   ;;  %v6843_v10 = vld [vmem:[#allocation10 + $0x100] sm:$0xff] (!%p6442_p0)  }
 0x797   : > { %6571 = vmatprep.subr.bf16.mxu1 (!%p6442_p0), %v6826_v58  ;;  %v6831_v31 = vld [vmem:[#allocation10 + $0x28] sm:$0xff] (!%p6442_p0)  }
 0x7b2   : > { %v4940_v19 = vpop.f32.mrb[92].mxu0 }
 0x7b3   : > { %v4941_v43 = vadd.f32 %v4940_v19, %v4900_v16  ;;  %v4942_v20 = vpop.f32.mrb[93].mxu0  ;;  %v6828_v16 = vld [vmem:[#allocation10 + $0xa0] sm:$0xff] (!%p6442_p0)   ;;  %v6832_v19 = vld [vmem:[#allocation10 + $0xa8] sm:$0xff] (!%p6442_p0)  }
 0x7b4   : > { %v4943_v44 = vadd.f32 %v4942_v20, %v4902_v53  ;;  %v4944_v25 = vpop.f32.mrb[94].mxu0  ;;  %v6829_v53 = vld [vmem:[#allocation10 + $0x68] sm:$0xff] (!%p6442_p0)   ;;  %6572 = vmatpush3.bf16.msra.mxu1 (!%p6442_p0), %v6828_v16  ;;  %v6833_v20 = vld [vmem:[#allocation10 + $0x70] sm:$0xff] (!%p6442_p0)  }
 0x7b5   : > { %v4945_v46 = vpop.f32.mrb[95].mxu0  ;;  %6551 = vmatprep.subr.bf16.mxu0 (!%p6442_p0), %v6829_v53  ;;  %6573 = vmatprep.subr.bf16.mxu1 (!%p6442_p0), %v6830_v41  ;;  %v6835_v25 = vld [vmem:[#allocation10 + $0x30] sm:$0xff] (!%p6442_p0)  }
 0x7b6   : > { %6552 = vmatpush3.bf16.msra.mxu0 (!%p6442_p0), %v6831_v31  ;;  %v6836_v46 = vld [vmem:[#allocation10 + $0xb0] sm:$0xff] (!%p6442_p0)  }
 0x7b7   : > { %6553 = vmatprep.subr.bf16.mxu0 (!%p6442_p0), %v6833_v20  ;;  %v6845_v20 = vld [vmem:[#allocation10 + $0x148] sm:$0xff] (!%p6442_p0)  }
 0x7b8   : > { %6574 = vmatpush3.bf16.msra.mxu1 (!%p6442_p0), %v6832_v19 }
 0x7ba   : > { %6554 = vmatpush3.bf16.msra.mxu0 (!%p6442_p0), %v6835_v25 }
 0x7d3   : > { %v4981_v29 = vpop.f32.mrb[92].mxu1 }
 0x7d4   : > { %v4982_v14 = vadd.f32 %v4981_v29, %v4941_v43  ;;  %v4983_v3 = vpop.f32.mrb[93].mxu1  ;;  %v8795_v43 = vshrl.u32 (!%p6442_p0), %v5182_v32, 7  ;;  %v6844_v32 = vld [vmem:[#allocation10 + $0x180] sm:$0xff] (!%p6442_p0)  }
 0x7d5   : > { %v4984_v12 = vadd.f32 %v4983_v3, %v4943_v44  ;;  %v4985_v27 = vpop.f32.mrb[94].mxu1  ;;  %v6834_v44 = vld [vmem:[#allocation10 + $0xf0] sm:$0xff] (!%p6442_p0)  }
 0x7d6   : > { %v4986_v61 = vpop.f32.mrb[95].mxu1  ;;  %6575 = vmatprep.subr.bf16.mxu1 (!%p6442_p0), %v6834_v44  ;;  %v5188_v29 = vsub.s32 (!%p6442_p0), 1, %v8795_v43  ;;  %v5196_v3 = vsub.s32 (!%p6442_p0), 3, %v8795_v43  ;;  %v5184_v27 = vsub.s32 (!%p6442_p0), 0, %v8795_v43  ;;  %v5204_v38 = vsub.s32 (!%p6442_p0), 5, %v8795_v43 }
 0x7d7   : > { %6576 = vmatpush3.bf16.msra.mxu1 (!%p6442_p0), %v6836_v46  ;;  %v6839_v61 = vld [vmem:[#allocation10 + $0x38] sm:$0xff] (!%p6442_p0)   ;;  %v5212_v13 = vsub.s32 (!%p6442_p0), 7, %v8795_v43  ;;  %v5200_v9 = vsub.s32 (!%p6442_p0), 4, %v8795_v43  ;;  %v5208_v37 = vsub.s32 (!%p6442_p0), 6, %v8795_v43 }
 0x7f2   : > { %v5022_v26 = vpop.f32.mrb[96].mxu0 }
 0x7f3   : > { %v5023_v52 = vadd.f32 %v5022_v26, %v4982_v14  ;;  %v5024_v30 = vpop.f32.mrb[97].mxu0  ;;  %v6837_v14 = vld [vmem:[#allocation10 + $0x78] sm:$0xff] (!%p6442_p0)   ;;  %v5192_v26 = vsub.s32 (!%p6442_p0), 2, %v8795_v43  ;;  %v6846_v43 = vld [vmem:[#allocation10 + $0x1c8] sm:$0xff] (!%p6442_p0)  }
 0x7f4   : > { %v5025_v63 = vadd.f32 %v5024_v30, %v4984_v12  ;;  %v5026_v21 = vpop.f32.mrb[98].mxu0  ;;  %v6838_v12 = vld [vmem:[#allocation10 + $0xf8] sm:$0xff] (!%p6442_p0)   ;;  %6555 = vmatprep.subr.bf16.mxu0 (!%p6442_p0), %v6837_v14  ;;  %v5173_v30 = vld [vmem:[#allocation2 + $0x8] sm:$0xff] (!%p6442_p0) }
 0x7f5   : > { %v5027_v11 = vpop.f32.mrb[99].mxu0  ;;  %6577 = vmatprep.subr.bf16.mxu1 (!%p6442_p0), %v6838_v12  ;;  %6556 = vmatpush3.bf16.msra.mxu0 (!%p6442_p0), %v6839_v61  ;;  %v8801_v21 = vld [vmem:[#allocation8] sm:$0xff] (!%p6442_p0)  ;;  %v5177_v14 = vld [vmem:[#allocation2 + $0x28] sm:$0xff] (!%p6442_p0) }
 0x7f6   : > { %v5255_v44 = vrot.slane (!%p6442_p0), %v8801_v21, %v5204_v38  ;;  %v5263_v25 = vrot.slane (!%p6442_p0), %v8801_v21, %v5212_v13  ;;  %v5251_v12 = vrot.slane (!%p6442_p0), %v8801_v21, %v5200_v9 }
 0x813   : > { %v5063_v45 = vpop.f32.mrb[96].mxu1 }
 0x814   : > { %v5064_v55 = vadd.f32 %v5063_v45, %v5023_v52  ;;  %v5065_v35 = vpop.f32.mrb[97].mxu1  ;;  %v6840_v52 = vld [vmem:[#allocation10 + $0xb8] sm:$0xff] (!%p6442_p0)   ;;  %v5239_v45 = vrot.slane (!%p6442_p0), %v8801_v21, %v5188_v29 }
 0x815   : > { %v5066_v36 = vadd.f32 %v5065_v35, %v5025_v63  ;;  %v5067_v42 = vpop.f32.mrb[98].mxu1  ;;  %v5180_v63 = vld [vmem:[#allocation7] sm:$0xff] (!%p6442_p0)  ;;  %6578 = vmatpush3.bf16.msra.mxu1 (!%p6442_p0), %v6840_v52 }
 0x816   : > { %v5068_v33 = vpop.f32.mrb[99].mxu1  ;;  %v5189_v11 = vrot.slane (!%p6442_p0), %v5180_v63, %v5188_v29  ;;  %v5197_v35 = vrot.slane (!%p6442_p0), %v5180_v63, %v5196_v3  ;;  %v6841_v42 = vld [vmem:[#allocation10 + $0x140] sm:$0xff] (!%p6442_p0)   ;;  %v5205_v18 = vrot.slane (!%p6442_p0), %v5180_v63, %v5204_v38  ;;  %v5213_v58 = vrot.slane (!%p6442_p0), %v5180_v63, %v5212_v13  ;;  %v6865_v38 = vld [vmem:[#allocation10 + $0x170] sm:$0xff] (!%p6442_p0)  }
 0x817   : > { %v5185_v33 = vrot.slane (!%p6442_p0), %v5180_v63, %v5184_v27  ;;  %6585 = vmatprep.subr.bf16.mxu0 (!%p6442_p0), %v6841_v42  ;;  %v5201_v53 = vrot.slane (!%p6442_p0), %v5180_v63, %v5200_v9  ;;  %v5209_v41 = vrot.slane (!%p6442_p0), %v5180_v63, %v5208_v37  ;;  %v6850_v42 = vld [vmem:[#allocation10 + $0x1d0] sm:$0xff] (!%p6442_p0)  }
 0x818   : > { %v5227_v52 = vmul.f32 (!%p6442_p0), %v5205_v18, %v5177_v14  ;;  %v6866_v9 = vld [vmem:[#allocation10 + $0x1f0] sm:$0xff] (!%p6442_p0)   ;;  %v6869_v18 = vld [vmem:[#allocation10 + $0x178] sm:$0xff] (!%p6442_p0)  }
 0x819   : > { %v6875_v14 = vld [vmem:[%s8898_s6 + $0x10] sm:$0xff] (!%p6442_p0)  }
 0x832   : > { %v5104_v1 = vpop.f32.mrb[100].mxu0 }
 0x833   : > { %v5145_v56 = vpop.f32.mrb[100].mxu1  ;;  %v5105_v60 = vadd.f32 %v5104_v1, %v5064_v55  ;;  %v5106_v47 = vpop.f32.mrb[101].mxu0  ;;  %v5175_v55 = vld [vmem:[#allocation2 + $0x18] sm:$0xff] (!%p6442_p0)  ;;  %v5235_v1 = vrot.slane (!%p6442_p0), %v8801_v21, %v5184_v27  ;;  %v5259_v27 = vrot.slane (!%p6442_p0), %v8801_v21, %v5208_v37 }
 0x834   : > { %v5147_v15 = vpop.f32.mrb[101].mxu1  ;;  %v5107_v50 = vadd.f32 %v5106_v47, %v5066_v36  ;;  %v5108_v59 = vpop.f32.mrb[102].mxu0  ;;  %5171 = sbr.rel (%p6442_p0) target bundleno = 3380 (0xd34), region = 112  ;;  %v5247_v36 = vrot.slane (!%p6442_p0), %v8801_v21, %v5196_v3  ;;  %v5223_v47 = vmul.f32 (!%p6442_p0), %v5189_v11, %v5173_v30 }
 0x835   : > { %v5149_v6 = vpop.f32.mrb[102].mxu1  ;;  %v5146_v51 = vadd.f32 %v5145_v56, %v5105_v60  ;;  %v5109_v24 = vpop.f32.mrb[103].mxu0  ;;  %v5193_v56 = vrot.slane (!%p6442_p0), %v5180_v63, %v5192_v26  ;;  %v5243_v60 = vrot.slane (!%p6442_p0), %v8801_v21, %v5192_v26  ;;  %v5174_v59 = vld [vmem:[#allocation2 + $0x10] sm:$0xff] (!%p6442_p0)  ;;  %v6847_v26 = vld [vmem:[#allocation10 + $0x108] sm:$0xff] (!%p6442_p0)   ;;  %v5176_v63 = vld [vmem:[#allocation2 + $0x20] sm:$0xff] (!%p6442_p0) }
 0x836   : > { %v5150_v54 = vpop.f32.mrb[103].mxu1  ;;  %v5148_v57 = vadd.f32 %v5147_v15, %v5107_v50  ;;  %v5225_v15 = vmul.f32 (!%p6442_p0), %v5197_v35, %v5175_v55  ;;  %v5172_v50 = vld [vmem:[#allocation2] sm:$0xff] (!%p6442_p0)  ;;  %v6849_v55 = vld [vmem:[#allocation10 + $0x150] sm:$0xff] (!%p6442_p0)   ;;  %v5226_v35 = vmul.f32 (!%p6442_p0), %v5201_v53, %v5176_v63 }
 0x837   : > { %v5158_v5 = vadd.f32 %v5146_v51, %v568_v22  ;;  %v6842_v22 = vld [vmem:[#allocation10 + $0x1c0] sm:$0xff] (!%p6442_p0)   ;;  %v5222_v6 = vmul.f32 (!%p6442_p0), %v5185_v33, %v5172_v50  ;;  %v5224_v51 = vmul.f32 (!%p6442_p0), %v5193_v56, %v5174_v59  ;;  %v5277_v33 = vadd.f32 (!%p6442_p0), %v5255_v44, %v5227_v52  ;;  %v6853_v50 = vld [vmem:[#allocation10 + $0x158] sm:$0xff] (!%p6442_p0)  }
 0x838   : > { %v5159_v23 = vadd.f32 %v5148_v57, %v569_v7  ;;  %v5273_v7 = vadd.f32 (!%p6442_p0), %v5239_v45, %v5223_v47  ;;  %v5275_v24 = vadd.f32 (!%p6442_p0), %v5247_v36, %v5225_v15  ;;  %6607 = vmatprep.subr.bf16.mxu1 (!%p6442_p0), %v6842_v22  ;;  %v6848_v45 = vld [vmem:[#allocation10 + $0x188] sm:$0xff] (!%p6442_p0)   ;;  %v5276_v21 = vadd.f32 (!%p6442_p0), %v5251_v12, %v5226_v35  ;;  %v6852_v22 = vld [vmem:[#allocation10 + $0x190] sm:$0xff] (!%p6442_p0)   ;;  %v6877_v12 = vld [vmem:[%s8898_s6 + $0x20] sm:$0xff] (!%p6442_p0)  }
 0x839   : > { %5166 = vst [vmem:[#allocation2 + $0x30] sm:$0xff] %v5158_v5  ;;  %v5272_v54 = vadd.f32 (!%p6442_p0), %v5235_v1, %v5222_v6  ;;  %v5274_v57 = vadd.f32 (!%p6442_p0), %v5243_v60, %v5224_v51  ;;  %v6851_v60 = vld [vmem:[#allocation10 + $0x110] sm:$0xff] (!%p6442_p0)   ;;  %v6448_v47 = vmul.f32 (!%p6442_p0), -1.442695, %v5277_v33  ;;  %v6854_v51 = vld [vmem:[#allocation10 + $0x1d8] sm:$0xff] (!%p6442_p0)  }
 0x83a   : > { %5167 = vst [vmem:[#allocation2 + $0x38] sm:$0xff] %v5159_v23  ;;  %v6444_v5 = vmul.f32 (!%p6442_p0), -1.442695, %v5273_v7  ;;  %v6446_v23 = vmul.f32 (!%p6442_p0), -1.442695, %v5275_v24  ;;  %v6855_v7 = vld [vmem:[#allocation10 + $0x118] sm:$0xff] (!%p6442_p0)  }
 0x83b   : > { %v6443_v34 = vmul.f32 -1.442695, %v5272_v54  ;;  %v6445_v8 = vmul.f32 -1.442695, %v5274_v57  ;;  %v6447_v59 = vmul.f32 -1.442695, %v5276_v21 }
 0x83c   : > { %6886 = vpow2.f32 %v6444_v5  ;;  %v6856_v24 = vld [vmem:[#allocation10 + $0x198] sm:$0xff]   ;;  %v6857_v54 = vld [vmem:[#allocation10 + $0x160] sm:$0xff]  }
 0x83d   : > { %6888 = vpow2.f32 %v6446_v23  ;;  %v6858_v57 = vld [vmem:[#allocation10 + $0x1e0] sm:$0xff]  }
 0x83e   : > { %6890 = vpow2.f32 %v6443_v34  ;;  %v6859_v5 = vld [vmem:[#allocation10 + $0x120] sm:$0xff]   ;;  %v6861_v34 = vld [vmem:[#allocation10 + $0x168] sm:$0xff]  }
 0x83f   : > { %6892 = vpow2.f32 %v6445_v8  ;;  %v6860_v23 = vld [vmem:[#allocation10 + $0x1a0] sm:$0xff]  }
 0x840   : > { %v5178_v11 = vld [vmem:[#allocation2 + $0x30] sm:$0xff]  ;;  %v6451_v63 = vld [vmem:[#allocation11] ss:$0 sm:$0xff] }
 0x841   : > { %v5179_v3 = vld [vmem:[#allocation2 + $0x38] sm:$0xff]  ;;  %v5228_v36 = vmul.f32 %v5209_v41, %v5178_v11 }
 0x842   : > { %v5229_v30 = vmul.f32 %v5213_v58, %v5179_v3  ;;  %v6870_v58 = vld [vmem:[#allocation10 + $0x1f8] sm:$0xff]  }
 0x843   : > { %v5278_v56 = vadd.f32 %v5259_v27, %v5228_v36  ;;  %v6876_v3 = vld [vmem:[%s8898_s6 + $0x18] sm:$0xff]   ;;  %v6878_v27 = vld [vmem:[%s8898_s6 + $0x28] sm:$0xff]  }
 0x844   : > { %v5279_v1 = vadd.f32 %v5263_v25, %v5229_v30 }
 0x845   : > { %v6449_v6 = vmul.f32 -1.442695, %v5278_v56 }
 0x846   : > { %v6887_v40 = vpop.eup %6886  ;;  %v6450_v15 = vmul.f32 -1.442695, %v5279_v1 }
 0x847   : > { %v6889_v2 = vpop.eup %6888  ;;  %v5305_v49 = vadd.f32 1.0, %v6887_v40  ;;  %v6862_v40 = vld [vmem:[#allocation10 + $0x1e8] sm:$0xff]  }
 0x848   : > { %v6891_v62 = vpop.eup %6890  ;;  %v5307_v39 = vadd.f32 1.0, %v6889_v2 }
 0x849   : > { %v6893_v0 = vpop.eup %6892  ;;  %6894 = vrcp.f32 %v5305_v49  ;;  %v5304_v4 = vadd.f32 1.0, %v6891_v62 }
 0x84a   : > { %6896 = vrcp.f32 %v5307_v39  ;;  %v5306_v28 = vadd.f32 1.0, %v6893_v0  ;;  %v6863_v39 = vld [vmem:[#allocation10 + $0x128] sm:$0xff]  }
 0x84b   : > { %6898 = vrcp.f32 %v5304_v4 }
 0x84c   : > { %6900 = vrcp.f32 %v5306_v28  ;;  %v6864_v28 = vld [vmem:[#allocation10 + $0x1a8] sm:$0xff]  }
 0x84d   : > { %6902 = vpow2.f32 %v6448_v47 }
 0x84e   : > { %6904 = vpow2.f32 %v6450_v15 }
 0x84f   : > { %6906 = vpow2.f32 %v6447_v59 }
 0x850   : > { %6908 = vpow2.f32 %v6449_v6 }
 0x853   : > { %v6895_v48 = vpop.eup %6894 }
 0x854   : > { %v6897_v17 = vpop.eup %6896  ;;  %v5329_v16 = vpack.c.bf16 %v6895_v48, %v6895_v48  ;;  %v6867_v48 = vld [vmem:[#allocation10 + $0x130] sm:$0xff]  }
 0x855   : > { %v6899_v31 = vpop.eup %6898  ;;  %v5331_v19 = vpack.c.bf16 %v6897_v17, %v6897_v17  ;;  %v6871_v17 = vld [vmem:[#allocation10 + $0x138] sm:$0xff]  }
 0x856   : > { %v6901_v46 = vpop.eup %6900  ;;  %5887 = vmatprep.mubr.bf16.mxu0 %v5329_v16  ;;  %v5328_v29 = vpack.c.bf16 %v6899_v31, %v6899_v31  ;;  %v6872_v16 = vld [vmem:[#allocation10 + $0x1b8] sm:$0xff]  }
 0x857   : > { %5927 = vmatprep.mubr.bf16.mxu1 %v5331_v19  ;;  %v5330_v61 = vpack.c.bf16 %v6901_v46, %v6901_v46  ;;  %v6903_v8 = vpop.eup %6902  ;;  %v6873_v46 = vld [vmem:[%s8898_s6] sm:$0xff]  }
 0x858   : > { %5888 = vmatmul.mubr.bf16.vlgmr.msra.gmra.mrb[0].mxu0 %v5328_v29  ;;  %v6905_v2 = vpop.eup %6904  ;;  %v5309_v49 = vadd.f32 1.0, %v6903_v8  ;;  %v7252_v29 = vmov 0.0   ;;  %v6882_v8 = vld [vmem:[%s8933_s17 + $0x8] sm:$0xff]  }
 0x859   : > { %5928 = vmatmul.mubr.bf16.vlgmr.msra.gmra.mrb[0].mxu1 %v5330_v61  ;;  %6586 = vmatpush3.bf16.msra.mxu0 %v6843_v10  ;;  %v6907_v62 = vpop.eup %6906  ;;  %v5311_v0 = vadd.f32 1.0, %v6905_v2  ;;  %v6868_v10 = vld [vmem:[#allocation10 + $0x1b0] sm:$0xff]   ;;  %v6884_v2 = vld [vmem:[%s8933_s17 + $0x18] sm:$0xff]  }
 0x85a   : > { %6608 = vmatpush3.bf16.msra.mxu1 %v6844_v32  ;;  %6587 = vmatprep.subr.bf16.mxu0 %v6845_v20  ;;  %v6909_v4 = vpop.eup %6908  ;;  %6910 = vrcp.f32 %v5309_v49  ;;  %v5308_v13 = vadd.f32 1.0, %v6907_v62  ;;  %v6879_v61 = vld [vmem:[%s8898_s6 + $0x30] sm:$0xff]   ;;  %v6516_v49 = vld [vmem:[#allocation13] ss:$0 sm:$0xff] }
 0x85b   : > { %6609 = vmatprep.subr.bf16.mxu1 %v6846_v43  ;;  %6912 = vrcp.f32 %v5311_v0  ;;  %v5310_v37 = vadd.f32 1.0, %v6909_v4  ;;  %v6874_v43 = vld [vmem:[%s8898_s6 + $0x8] sm:$0xff]  }
 0x85c   : > { %6914 = vrcp.f32 %v5308_v13 }
 0x85d   : > { %6588 = vmatpush3.bf16.msra.mxu0 %v6847_v26  ;;  %6916 = vrcp.f32 %v5310_v37  ;;  %v6880_v26 = vld [vmem:[%s8898_s6 + $0x38] sm:$0xff]  }
 0x85e   : > { %6610 = vmatpush3.bf16.msra.mxu1 %v6848_v45  ;;  %6589 = vmatprep.subr.bf16.mxu0 %v6849_v55 }
 0x85f   : > { %6611 = vmatprep.subr.bf16.mxu1 %v6850_v42 }
 0x861   : > { %6590 = vmatpush3.bf16.msra.mxu0 %v6851_v60 }
 0x862   : > { %6612 = vmatpush3.bf16.msra.mxu1 %v6852_v22  ;;  %6591 = vmatprep.subr.bf16.mxu0 %v6853_v50 }
 0x863   : > { %6613 = vmatprep.subr.bf16.mxu1 %v6854_v51 }
 0x864   : > { %v6911_v32 = vpop.eup %6910 }
 0x865   : > { %6592 = vmatpush3.bf16.msra.mxu0 %v6855_v7  ;;  %v6913_v53 = vpop.eup %6912  ;;  %v5333_v41 = vpack.c.bf16 %v6911_v32, %v6911_v32 }
 0x866   : > { %6614 = vmatpush3.bf16.msra.mxu1 %v6856_v24  ;;  %6593 = vmatprep.subr.bf16.mxu0 %v6857_v54  ;;  %v6915_v31 = vpop.eup %6914  ;;  %v5335_v19 = vpack.c.bf16 %v6913_v53, %v6913_v53 }
 0x867   : > { %6615 = vmatprep.subr.bf16.mxu1 %v6858_v57  ;;  %v6917_v20 = vpop.eup %6916  ;;  %5967 = vmatprep.mubr.bf16.mxu0 %v5333_v41  ;;  %v5332_v44 = vpack.c.bf16 %v6915_v31, %v6915_v31 }
 0x868   : > { %6007 = vmatprep.mubr.bf16.mxu1 %v5335_v19  ;;  %v5334_v25 = vpack.c.bf16 %v6917_v20, %v6917_v20  ;;  %v6532_v19 = vld [vmem:[#allocation16] ss:$0 sm:$0xff] }
 0x869   : > { %6594 = vmatpush3.bf16.msra.mxu0 %v6859_v5 }
 0x86a   : > { %6616 = vmatpush3.bf16.msra.mxu1 %v6860_v23  ;;  %6595 = vmatprep.subr.bf16.mxu0 %v6861_v34  ;;  %v6881_v34 = vld [vmem:[%s8933_s17] sm:$0xff]  }
 0x86b   : > { %6617 = vmatprep.subr.bf16.mxu1 %v6862_v40  ;;  %v6883_v40 = vld [vmem:[%s8933_s17 + $0x10] sm:$0xff]  }
 0x86d   : > { %6596 = vmatpush3.bf16.msra.mxu0 %v6863_v39 }
 0x86e   : > { %6618 = vmatpush3.bf16.msra.mxu1 %v6864_v28  ;;  %6597 = vmatprep.subr.bf16.mxu0 %v6865_v38 }
 0x86f   : > { %6619 = vmatprep.subr.bf16.mxu1 %v6866_v9 }
 0x871   : > { %6598 = vmatpush3.bf16.msra.mxu0 %v6867_v48  ;;  %v6885_v48 = vld [vmem:[%s8934_s25] sm:$0xff]  }
 0x872   : > { %6620 = vmatpush3.bf16.msra.mxu1 %v6868_v10  ;;  %6599 = vmatprep.subr.bf16.mxu0 %v6869_v18  ;;  %v6526_v18 = vld [vmem:[#allocation14] ss:$0 sm:$0xff] }
 0x873   : > { %6621 = vmatprep.subr.bf16.mxu1 %v6870_v58 }
 0x875   : > { %6600 = vmatpush3.bf16.msra.mxu0 %v6871_v17 }
 0x876   : > { %6622 = vmatpush3.bf16.msra.mxu1 %v6872_v16  ;;  %6645 = vmatprep.subr.bf16.mxu0 %v7252_v29 }
 0x877   : > { %6665 = vmatprep.subr.bf16.mxu1 %v7252_v29 }
 0x878   : > { %5968 = vmatmul.mubr.bf16.vlgmr.msra.gmra.mrb[4].mxu0 %v5332_v44 }
 0x879   : > { %6008 = vmatmul.mubr.bf16.vlgmr.msra.gmra.mrb[4].mxu1 %v5334_v25  ;;  %6646 = vmatpush3.bf16.msra.mxu0 %v6873_v46 }
 0x87a   : > { %6647 = vmatprep.subr.bf16.mxu0 %v7252_v29  ;;  %6661 = vmatprep.mubr.msk.bf16.mxu0 %vm7253_vm0, %v7252_v29 }
 0x87b   : > { %6673 = vmatprep.mubr.msk.bf16.mxu1 %vm7253_vm0, %v7252_v29  ;;  %6666 = vmatpush3.bf16.msra.mxu1 %v6881_v34 }
 0x87c   : > { %6667 = vmatprep.subr.bf16.mxu1 %v7252_v29 }
 0x87d   : > { %6648 = vmatpush3.bf16.msra.mxu0 %v6874_v43 }
 0x87e   : > { %6649 = vmatprep.subr.bf16.mxu0 %v7252_v29 }
 0x87f   : > { %6668 = vmatpush3.bf16.msra.mxu1 %v6882_v8 }
 0x880   : > { %6669 = vmatprep.subr.bf16.mxu1 %v7252_v29 }
 0x881   : > { %6650 = vmatpush3.bf16.msra.mxu0 %v6875_v14 }
 0x882   : > { %6651 = vmatprep.subr.bf16.mxu0 %v7252_v29 }
 0x883   : > { %6670 = vmatpush3.bf16.msra.mxu1 %v6883_v40 }
 0x884   : > { %6671 = vmatprep.subr.bf16.mxu1 %v7252_v29 }
 0x885   : > { %6652 = vmatpush3.bf16.msra.mxu0 %v6876_v3 }
 0x886   : > { %6653 = vmatprep.subr.bf16.mxu0 %v7252_v29 }
 0x887   : > { %6672 = vmatpush3.bf16.msra.mxu1 %v6884_v2 }
 0x888   : > { %6677 = vmatprep.subr.bf16.mxu1 %v7252_v29 }
 0x889   : > { %6654 = vmatpush3.bf16.msra.mxu0 %v6877_v12 }
 0x88a   : > { %6655 = vmatprep.subr.bf16.mxu0 %v7252_v29 }
 0x88d   : > { %6656 = vmatpush3.bf16.msra.mxu0 %v6878_v27 }
 0x88e   : > { %6657 = vmatprep.subr.bf16.mxu0 %v7252_v29 }
 0x891   : > { %6658 = vmatpush3.bf16.msra.mxu0 %v6879_v61 }
 0x892   : > { %6659 = vmatprep.subr.bf16.mxu0 %v7252_v29 }
 0x895   : > { %6660 = vmatpush3.bf16.msra.mxu0 %v6880_v26 }
 0x92b   : > { %v6557_v52 = vpop.f32.mrb[0].mxu0 }
 0x92c   : > { %v6579_v30 = vpop.f32.mrb[0].mxu1  ;;  %v6558_v11 = vpop.f32.mrb[1].mxu0 }
 0x92d   : > { %v6559_v45 = vadd.f32 %v6558_v11, %v6557_v52  ;;  %v6580_v55 = vpop.f32.mrb[1].mxu1  ;;  %v6560_v35 = vpop.f32.mrb[2].mxu0 }
 0x92e   : > { %v6581_v36 = vadd.f32 %v6580_v55, %v6579_v30  ;;  %v6582_v42 = vpop.f32.mrb[2].mxu1  ;;  %v6561_v33 = vpop.f32.mrb[3].mxu0 }
 0x92f   : > { %v5890_v1 = vadd.f32 %v6559_v45, %v6451_v63  ;;  %v6583_v21 = vpop.f32.mrb[3].mxu1 }
 0x931   : > { %v5930_v56 = vadd.f32 %v6581_v36, %v5890_v1 }
 0x94b   : > { %v6601_v60 = vpop.f32.mrb[4].mxu0 }
 0x94c   : > { %v6623_v47 = vpop.f32.mrb[4].mxu1  ;;  %v6602_v15 = vpop.f32.mrb[5].mxu0 }
 0x94d   : > { %v6603_v22 = vadd.f32 %v6602_v15, %v6601_v60  ;;  %v6624_v50 = vpop.f32.mrb[5].mxu1  ;;  %v6604_v59 = vpop.f32.mrb[6].mxu0 }
 0x94e   : > { %v6625_v6 = vadd.f32 %v6624_v50, %v6623_v47  ;;  %v6626_v51 = vpop.f32.mrb[6].mxu1  ;;  %v6605_v7 = vpop.f32.mrb[7].mxu0 }
 0x94f   : > { %v5970_v24 = vadd.f32 %v6603_v22, %v5930_v56  ;;  %v6627_v54 = vpop.f32.mrb[7].mxu1 }
 0x951   : > { %v6010_v57 = vadd.f32 %v6625_v6, %v5970_v24 }
 0x953   : > { %v6015_v5 = vmax.f32 %v6010_v57, 0.0 }
 0x955   : > { %v6016_v23 = vpack.c.bf16 %v6015_v5, %v6015_v5 }
 0x957   : > { %6662 = vmatmul.mubr.bf16.vlgmr.msra.gmra.mrb[8].mxu0 %v6016_v23 }
 0xa2a   : > { %v6122_v62 = vpop.f32.mrb[8].mxu0 }
 0xa2b   : > { %v6123_v39 = vadd.f32 %v6516_v49, %v6122_v62  ;;  %v6663_v0 = vpop.f32.mrb[9].mxu0 }
 0xa2c   : > { %v6125_v4 = vpop.f32.mrb[10].mxu0 }
 0xa2d   : > { %v6525_v28 = vmul.f32 -1.442695, %v6123_v39  ;;  %v6664_v38 = vpop.f32.mrb[11].mxu0 }
 0xa2f   : > { %6918 = vpow2.f32 %v6525_v28 }
 0xa39   : > { %v6919_v13 = vpop.eup %6918 }
 0xa3a   : > { %v6131_v9 = vadd.f32 1.0, %v6919_v13 }
 0xa3c   : > { %6920 = vrcp.f32 %v6131_v9 }
 0xa46   : > { %v6921_v37 = vpop.eup %6920 }
 0xa47   : > { %v6134_v10 = vpack.c.bf16 %v6921_v37, %v6921_v37 }
 0xa49   : > { %6674 = vmatmul.mubr.msk.bf16.vlgmr.msra.gmra.mrb[8].mxu1 %vm6174_vm1, %v6134_v10 }
 0xa4a   : > { %6678 = vmatpush3.bf16.msra.mxu1 %v6885_v48  ;;  %6679 = vmatprep.mubr.msk.bf16.mxu1 %vm7253_vm0, %v7252_v29 }
 0xb1c   : > { %v6212_v58 = vpop.f32.mrb[8].mxu1 }
 0xb1d   : > { %v6213_v17 = vadd.f32 %v6526_v18, %v6212_v58  ;;  %v6675_v16 = vpop.f32.mrb[9].mxu1 }
 0xb1e   : > { %v6215_v32 = vpop.f32.mrb[10].mxu1 }
 0xb1f   : > { %v6218_v53 = vmax.f32 %v6213_v17, 0.0  ;;  %v6676_v41 = vpop.f32.mrb[11].mxu1 }
 0xb21   : > { %v6219_v31 = vpack.c.bf16 %v6218_v53, %v6218_v53 }
 0xb23   : > { %6680 = vmatmul.mubr.msk.bf16.vlgmr.msra.gmra.mrb[12].mxu1 %vm6235_vm2, %v6219_v31 }
 0xbf6   : > { %v6273_v20 = vpop.f32.mrb[12].mxu1 }
 0xbf7   : > { %v6274_v44 = vadd.f32 %v6532_v19, %v6273_v20  ;;  %v6681_v25 = vpop.f32.mrb[13].mxu1 }
 0xbf8   : > { %v6276_v46 = vpop.f32.mrb[14].mxu1 }
 0xbf9   : > { %v6682_v43 = vpop.f32.mrb[15].mxu1  ;;  %v6280_v14 = vsel %vm6279_vm3, %v6274_v44, -inf }
 0xbfa   : > { %6281 = vmax.xlane.f32.xlu0 %v6280_v14 }
 0xc87   : > { %v6282_v29 = vpop.xlane.xlu0 %6281 }
 0xc88   : > { %v6283_v3 = vsub.f32 %v6274_v44, %v6282_v29 }
 0xc8a   : > { %v6284_v12 = vmul.f32 1.442695, %v6283_v3 }
 0xc8c   : > { %6922 = vpow2.f32 %v6284_v12 }
 0xc96   : > { %v6923_v27 = vpop.eup %6922 }
 0xc97   : > { %v6286_v61 = vsel %vm6279_vm3, %v6923_v27, 0.0 }
 0xc98   : > { %6287 = vadd.xlane.f32.xlu0 %v6286_v61 }
 0xd25   : > { %v6288_v26 = vpop.xlane.xlu0 %6287 }
 0xd26   : > { %6924 = vrcp.f32 %v6288_v26 }
 0xd30   : > { %v6925_v52 = vpop.eup %6924 }
 0xd31   : > { %v6290_v30 = vmul.f32 %v6925_v52, %v6923_v27 }
 0xd33   : > { %6291 = vst.msk [vmem:[%s8935_s5] sm:$0xff] %vm6279_vm3, %v6290_v30 }
 0xd34 PF: > { %p28_p4 = scmp.ge.s32.totalorder %s7518_s13, 7   ;;  %s8936_s21 = smov %s7228_s22 }
 0xd35   : > { %s8937_s22 = smov %s7232_s23  ;;  %s8938_s23 = smov %s7529_s2 }
 0xd36   : > { %s8939_s24 = smov %s7518_s13  ;;  %30 = sbr.rel (!%p28_p4) target bundleno = 15 (0xf), region = 153 }
 0xd3d   :  { %6303 = vsyncpa [#allocation4], 1 }
 0xd3e   :  { %6305 = vsyncpa [#allocation4 + $0x1], 1 }
 0xd3f   :  { %6306 = vsyncpa [#allocation6], 1 }
 0xd40   :  { %6308 = vsyncpa [#allocation6 + $0x1], 1 }
 0xd41   :  { %6309 = vsyncpa [#allocation9], 1 }
 0xd42   :  { %6310 = vsyncpa [#allocation12], 1 }
 0xd43   :  { %6311 = vsyncpa [#allocation15], 1 }

</bundles_post_ra>
